<compile_context>
chip_gen: v6e
topology: v6e:2x2x1
jax: 0.10.0
libtpu: 0.0.40
codegen_flags: <defaults>
</compile_context>

<pallas_src>
import math
import numpy as np
import jax
import jax.numpy as jnp
from jax.experimental import pallas as pl
from jax.experimental.pallas import tpu as pltpu


def _round_up(x, m):
    return (x + m - 1) // m * m


def _pick_tn(np_):
    for c in (512, 256, 128):
        if np_ % c == 0:
            return c
    return np_


def _pick_tk(kp, tn, buf_bytes=4 * 1024 * 1024, min_steps=2):
    """Largest K tile that (a) keeps one bf16 B buffer <= buf_bytes and
    (b) leaves at least `min_steps` grid steps so the DMA of step k+1 can
    overlap the matmul of step k."""
    cap = max(128, buf_bytes // (tn * 2))
    for c in (4096, 2048, 1024, 512, 256, 128):
        if c <= cap and kp % c == 0 and kp // c >= min_steps:
            return c
    for c in (4096, 2048, 1024, 512, 256, 128):       # single-step fallback
        if c <= cap and kp % c == 0:
            return c
    return 128


# ---------------------------------------------------------------------------
# Pallas kernels
# ---------------------------------------------------------------------------

def _make_matmul_bias_act_kernel(act):
    """Tiled matmul, K-accumulated in f32 scratch; bias + activation fused on
    the last K step."""
    def kernel(a_ref, b_ref, bias_ref, o_ref, acc_ref):
        @pl.when(pl.program_id(2) == 0)
        def _():
            acc_ref[...] = jnp.zeros_like(acc_ref)

        acc_ref[...] += jnp.dot(a_ref[...], b_ref[...],
                                preferred_element_type=jnp.float32)

        @pl.when(pl.program_id(2) == pl.num_programs(2) - 1)
        def _():
            y = acc_ref[...] + bias_ref[...]
            if act == "lrelu":
                y = jnp.where(y > 0, y, 0.2 * y)
            elif act == "sigmoid":
                y = jax.nn.sigmoid(y)
            o_ref[...] = y.astype(o_ref.dtype)

    return kernel


def _make_conv_bn_lrelu_kernel(m_true, eps):
    """Conv-as-matmul over a (N-parallel, K-arbitrary) grid.  Each N tile
    accumulates its (Mp, tn) output over K in f32 scratch; the last-K epilogue
    computes per-column BatchNorm statistics (two-pass variance, padded rows
    masked), the affine transform and leaky_relu(0.2) in-register."""
    def kernel(a_ref, b_ref, bias_ref, gamma_ref, beta_ref, o_ref, acc_ref):
        @pl.when(pl.program_id(1) == 0)
        def _():
            acc_ref[...] = jnp.zeros_like(acc_ref)

        acc_ref[...] += jnp.dot(a_ref[...], b_ref[...],
                                preferred_element_type=jnp.float32)

        @pl.when(pl.program_id(1) == pl.num_programs(1) - 1)
        def _():
            y = acc_ref[...] + bias_ref[...]              # (Mp, tn) f32
            inv_m = 1.0 / float(m_true)
            if y.shape[0] != m_true:
                row = jax.lax.broadcasted_iota(jnp.int32, y.shape, 0)
                valid = row < m_true
                ym = jnp.where(valid, y, 0.0)
                mean = jnp.sum(ym, axis=0, keepdims=True) * inv_m
                diff = jnp.where(valid, y - mean, 0.0)
            else:
                mean = jnp.sum(y, axis=0, keepdims=True) * inv_m
                diff = y - mean
            var = jnp.sum(diff * diff, axis=0, keepdims=True) * inv_m
            scale = gamma_ref[...] * jax.lax.rsqrt(var + eps)
            shift = beta_ref[...] - mean * scale
            z = y * scale + shift
            z = jnp.where(z > 0, z, 0.2 * z)
            o_ref[...] = z.astype(o_ref.dtype)

    return kernel


# ---------------------------------------------------------------------------
# Pallas wrappers (weights arrive pre-padded / pre-cast from prep_params)
# ---------------------------------------------------------------------------

def matmul_bias_act(a, b_p, bias_p, n_true, act="none", out_dtype=jnp.bfloat16):
    """out = act(a @ B + bias); a:(M,K) (any float), b_p:(Kp,Np) bf16 padded,
    bias_p:(1,Np) f32 padded.  bf16 MXU, f32 accumulation."""
    M, K = a.shape
    Kp, Np = b_p.shape

    if M >= 256 and M % 256 == 0:
        tm = 256                       # fill the 256-wide MXU on v6e/v7x
    elif M >= 128 and M % 128 == 0:
        tm = 128
    elif M >= 128:
        tm = 128
    else:
        tm = _round_up(M, 8)
    Mp = _round_up(M, tm)
    tn = _pick_tn(Np)
    tk = _pick_tk(Kp, tn)

    a_p = jnp.pad(a, ((0, Mp - M), (0, Kp - K))).astype(jnp.bfloat16)

    out = pl.pallas_call(
        _make_matmul_bias_act_kernel(act),
        out_shape=jax.ShapeDtypeStruct((Mp, Np), out_dtype),
        grid_spec=pltpu.PrefetchScalarGridSpec(
            num_scalar_prefetch=0,
            grid=(Mp // tm, Np // tn, Kp // tk),
            in_specs=[
                pl.BlockSpec((tm, tk), lambda i, j, k: (i, k)),
                pl.BlockSpec((tk, tn), lambda i, j, k: (k, j)),
                pl.BlockSpec((1, tn), lambda i, j, k: (0, j)),
            ],
            out_specs=pl.BlockSpec((tm, tn), lambda i, j, k: (i, j)),
            scratch_shapes=[pltpu.VMEM((tm, tn), jnp.float32)],
        ),
        compiler_params=pltpu.CompilerParams(
            dimension_semantics=("parallel", "parallel", "arbitrary"),
            vmem_limit_bytes=32 * 1024 * 1024,
        ),
    )(a_p, b_p, bias_p)
    return out[:M, :n_true]


def conv_bn_lrelu_matmul(a, b_p, bias_p, gamma_p, beta_p, n_true,
                         eps=1e-5, out_dtype=jnp.bfloat16):
    """Fused conv(as matmul) + BatchNorm(batch stats) + leaky_relu(0.2).
    Grid is (Np//tn parallel, Kp//tk arbitrary): output channels are sharded
    across TensorCores, K is pipelined."""
    M, K = a.shape
    Kp, Np = b_p.shape
    Mp = _round_up(M, 8)

    if Np % 512 == 0:
        tn = 256                       # 2 parallel N blocks on cbn3
    elif Np % 128 == 0:
        tn = 128
    else:
        tn = Np
    tk = _pick_tk(Kp, tn)

    a_p = jnp.pad(a, ((0, Mp - M), (0, Kp - K))).astype(jnp.bfloat16)

    out = pl.pallas_call(
        _make_conv_bn_lrelu_kernel(M, eps),
        out_shape=jax.ShapeDtypeStruct((Mp, Np), out_dtype),
        grid_spec=pltpu.PrefetchScalarGridSpec(
            num_scalar_prefetch=0,
            grid=(Np // tn, Kp // tk),
            in_specs=[
                pl.BlockSpec((Mp, tk), lambda j, k: (0, k)),
                pl.BlockSpec((tk, tn), lambda j, k: (k, j)),
                pl.BlockSpec((1, tn), lambda j, k: (0, j)),
                pl.BlockSpec((1, tn), lambda j, k: (0, j)),
                pl.BlockSpec((1, tn), lambda j, k: (0, j)),
            ],
            out_specs=pl.BlockSpec((Mp, tn), lambda j, k: (0, j)),
            scratch_shapes=[pltpu.VMEM((Mp, tn), jnp.float32)],
        ),
        compiler_params=pltpu.CompilerParams(
            dimension_semantics=("parallel", "arbitrary"),
            vmem_limit_bytes=32 * 1024 * 1024,
        ),
    )(a_p, b_p, bias_p, gamma_p, beta_p)
    return out[:M, :n_true]


# ---------------------------------------------------------------------------
# JAX glue: channels-last im2col, one-time weight prep, forward wiring
# ---------------------------------------------------------------------------

def im2col_3d_cl(x, k, stride, pad):
    """x:(N,D,H,W,C) -> (N*Do*Ho*Wo, k^3*C), feature order = (kd, kh, kw, c)."""
    n, d, h, w, c = x.shape
    if pad:
        x = jnp.pad(x, ((0, 0), (pad, pad), (pad, pad), (pad, pad), (0, 0)))
    do = (d + 2 * pad - k) // stride + 1
    ho = (h + 2 * pad - k) // stride + 1
    wo = (w + 2 * pad - k) // stride + 1
    pieces = []
    for kd in range(k):
        for kh in range(k):
            for kw in range(k):
                pieces.append(
                    x[:, kd:kd + stride * do:stride,
                         kh:kh + stride * ho:stride,
                         kw:kw + stride * wo:stride, :]
                )
    pt = jnp.stack(pieces, axis=4)                    # (N, Do, Ho, Wo, k^3, C)
    return pt.reshape(n * do * ho * wo, k * k * k * c), (n, do, ho, wo)


def prep_conv_weight(w):
    """PyTorch (Cout, Cin, kd, kh, kw) -> (Kp, Np) bf16 matrix matching the
    channels-last im2col feature order, padded to lane/sublane multiples.
    Done once, outside jit.  Returns (matrix, true_cout)."""
    cout = w.shape[0]
    mat = jnp.transpose(w, (2, 3, 4, 1, 0)).reshape(-1, cout)
    K, N = mat.shape
    Kp, Np = _round_up(K, 128), _round_up(N, 128)
    mat = jnp.pad(mat, ((0, Kp - K), (0, Np - N))).astype(jnp.bfloat16)
    return mat, cout


def _prep_vec(v, np_):
    n = v.shape[0]
    return jnp.pad(v.astype(jnp.float32), (0, np_ - n)).reshape(1, np_)


def prep_params(raw):
    """Pad/transpose/cast every parameter ONCE (hoisted out of the jit path).
    Returns (array pytree, static-metadata dict of true channel counts)."""
    p, meta = {}, {}
    w1, n1 = prep_conv_weight(raw["w1"])
    p["w1"], p["b1"], meta["w1"] = w1, _prep_vec(raw["b1"], w1.shape[1]), n1
    w2, n2 = prep_conv_weight(raw["w2"])
    p["w2"], p["b2"], meta["w2"] = w2, _prep_vec(raw["b2"], w2.shape[1]), n2
    for name in ("cbn1", "cbn2", "cbn3"):
        w, b, g, be = raw[name]
        wm, n = prep_conv_weight(w)
        np_ = wm.shape[1]
        p[name] = (wm, _prep_vec(b, np_), _prep_vec(g, np_), _prep_vec(be, np_))
        meta[name] = n
    return p, meta


def make_dsc_forward(meta):
    """meta holds the (static) true output-channel counts per layer."""
    def fwd(x, p):
        # NCDHW -> channels-last, bf16 activations end-to-end
        x = jnp.transpose(x, (0, 2, 3, 4, 1)).astype(jnp.bfloat16)

        # conv(in,64,4,2,1) + leaky_relu(0.2)
        a, (n, do, ho, wo) = im2col_3d_cl(x, 4, 2, 1)
        y = matmul_bias_act(a, p["w1"], p["b1"], meta["w1"], act="lrelu")
        x = y.reshape(n, do, ho, wo, meta["w1"])

        # three ConvBN blocks: conv(4,2,1) + BN + leaky_relu, fused per block
        for name in ("cbn1", "cbn2", "cbn3"):
            w, b, gamma, beta = p[name]
            a, (n, do, ho, wo) = im2col_3d_cl(x, 4, 2, 1)
            y = conv_bn_lrelu_matmul(a, w, b, gamma, beta, meta[name])
            x = y.reshape(n, do, ho, wo, meta[name])

        # conv2(512,1,1,1) + sigmoid (f32 output)
        a, (n, do, ho, wo) = im2col_3d_cl(x, 1, 1, 0)
        y = matmul_bias_act(a, p["w2"], p["b2"], meta["w2"],
                            act="sigmoid", out_dtype=jnp.float32)
        out = y.reshape(n, do, ho, wo, meta["w2"])
        return jnp.transpose(out, (0, 4, 1, 2, 3))    # back to NCDHW

    return jax.jit(fwd)


# ---------------------------------------------------------------------------
# Pure-JAX reference (f32) for numerical verification
# ---------------------------------------------------------------------------

def _conv3d_ref(x, w, b, stride, pad):
    y = jax.lax.conv_general_dilated(
        x, w, window_strides=(stride,) * 3, padding=[(pad, pad)] * 3,
        dimension_numbers=("NCDHW", "OIDHW", "NCDHW"),
        precision=jax.lax.Precision.HIGHEST,
    )
    return y + b.reshape(1, -1, 1, 1, 1)


def _bn_lrelu_ref(x, gamma, beta, eps=1e-5):
    mean = jnp.mean(x, axis=(0, 2, 3, 4), keepdims=True)
    var = jnp.mean((x - mean) ** 2, axis=(0, 2, 3, 4), keepdims=True)
    y = (x - mean) / jnp.sqrt(var + eps)
    y = y * gamma.reshape(1, -1, 1, 1, 1) + beta.reshape(1, -1, 1, 1, 1)
    return jnp.where(y > 0, y, 0.2 * y)


def dsc_ref(x, params):
    y = _conv3d_ref(x, params["w1"], params["b1"], 2, 1)
    y = jnp.where(y > 0, y, 0.2 * y)
    for name in ("cbn1", "cbn2", "cbn3"):
        w, b, g, be = params[name]
        y = _conv3d_ref(y, w, b, 2, 1)
        y = _bn_lrelu_ref(y, g, be)
    y = _conv3d_ref(y, params["w2"], params["b2"], 1, 0)
    return jax.nn.sigmoid(y)


# ---------------------------------------------------------------------------
# Main
# ---------------------------------------------------------------------------

if __name__ == "__main__":
    key = jax.random.PRNGKey(0)
    ks = jax.random.split(key, 16)

    def conv_init(kw, kb, cin, cout, ksize):
        fan_in = cin * ksize ** 3
        bound = 1.0 / math.sqrt(fan_in)
        w = jax.random.uniform(kw, (cout, cin, ksize, ksize, ksize),
                               jnp.float32, -bound, bound)
        b = jax.random.uniform(kb, (cout,), jnp.float32, -bound, bound)
        return w, b

    params = {}
    params["w1"], params["b1"] = conv_init(ks[0], ks[1], 2, 64, 4)

    def cbn_init(k0, k1, k2, k3, cin, cout):
        w, b = conv_init(k0, k1, cin, cout, 4)
        gamma = jax.random.uniform(k2, (cout,), jnp.float32, 0.9, 1.1)
        beta = jax.random.uniform(k3, (cout,), jnp.float32, -0.1, 0.1)
        return (w, b, gamma, beta)

    params["cbn1"] = cbn_init(ks[2], ks[3], ks[4], ks[5], 64, 128)
    params["cbn2"] = cbn_init(ks[6], ks[7], ks[8], ks[9], 128, 256)
    params["cbn3"] = cbn_init(ks[10], ks[11], ks[12], ks[13], 256, 512)
    params["w2"], params["b2"] = conv_init(ks[14], ks[15], 512, 1, 1)

    # one-time padded/cast matmul-ready weights + static channel counts
    prepped, meta = prep_params(params)
    dsc_forward_jit = make_dsc_forward(meta)

    # Input: batch=2, in_channels=2, spatial 16^3  (16 -> 8 -> 4 -> 2 -> 1)
    x = jax.random.normal(jax.random.PRNGKey(1), (2, 2, 16, 16, 16), jnp.float32)

    out = jax.block_until_ready(dsc_forward_jit(x, prepped))
    ref = jax.block_until_ready(dsc_ref(x, params))

    assert out.shape == (2, 1, 1, 1, 1), out.shape
    np.testing.assert_allclose(np.asarray(out), np.asarray(ref),
                               rtol=2e-2, atol=2e-2)
    print("KERNEL_OK")
</pallas_src>

<mosaic_0001>
module attributes {stable_mosaic.version = 11 : i64} {
  func.func @kernel(%arg0: i32, %arg1: i32, %arg2: i32, %arg3: memref<256x128xbf16, #tpu.memory_space<vmem>>, %arg4: memref<128x128xbf16, #tpu.memory_space<vmem>>, %arg5: memref<1x128xf32, #tpu.memory_space<vmem>>, %arg6: memref<256x128xbf16, #tpu.memory_space<vmem>>, %arg7: memref<256x128xf32, #tpu.memory_space<vmem>>) attributes {dimension_semantics = [#tpu.dimension_semantics<parallel>, #tpu.dimension_semantics<parallel>, #tpu.dimension_semantics<arbitrary>], iteration_bounds = array<i64: 4, 1, 1>, scalar_prefetch = 0 : i64, scratch_operands = 1 : i64, tpu.core_type = #tpu.core_type<tc>, window_params = [{transform_indices = @transform_0, window_bounds = array<i64: 256, 128>}, {transform_indices = @transform_1, window_bounds = array<i64: 128, 128>}, {transform_indices = @transform_2, window_bounds = array<i64: 1, 128>}, {transform_indices = @transform_3, window_bounds = array<i64: 256, 128>}]} {
    %c0_i32 = arith.constant 0 : i32
    %0 = arith.cmpi eq, %arg2, %c0_i32 : i32
    %1 = arith.extui %0 : i1 to i32
    %c0_i32_0 = arith.constant 0 : i32
    %2 = arith.cmpi ne, %1, %c0_i32_0 : i32
    scf.if %2 {
      %cst_10 = arith.constant 0.000000e+00 : f32
      %12 = vector.broadcast %cst_10 : f32 to vector<256x128xf32>
      %c0_11 = arith.constant 0 : index
      %c0_12 = arith.constant 0 : index
      %13 = vector.load %arg7[%c0_11, %c0_12] : memref<256x128xf32, #tpu.memory_space<vmem>>, vector<256x128xf32>
      tpu.vector_store %arg7[%c0_11, %c0_12], %12 {strides = array<i32>} : memref<256x128xf32, #tpu.memory_space<vmem>>, vector<256x128xf32>,
    } else {
    }
    %c0 = arith.constant 0 : index
    %c0_1 = arith.constant 0 : index
    %3 = vector.load %arg7[%c0, %c0_1] : memref<256x128xf32, #tpu.memory_space<vmem>>, vector<256x128xf32>
    %c0_2 = arith.constant 0 : index
    %c0_3 = arith.constant 0 : index
    %4 = vector.load %arg3[%c0_2, %c0_3] : memref<256x128xbf16, #tpu.memory_space<vmem>>, vector<256x128xbf16>
    %c0_4 = arith.constant 0 : index
    %c0_5 = arith.constant 0 : index
    %5 = vector.load %arg4[%c0_4, %c0_5] : memref<128x128xbf16, #tpu.memory_space<vmem>>, vector<128x128xbf16>
    %cst = arith.constant dense<0.000000e+00> : vector<256x128xf32>
    %6 = tpu.matmul %4, %5, %cst {dimension_numbers = #tpu.dot_dimension_numbers<[1], [0], [0], [1], [0, 0, 1, 1], [], []>} : vector<256x128xbf16>, vector<128x128xbf16>, vector<256x128xf32> -> vector<256x128xf32>
    %7 = arith.addf %3, %6 : vector<256x128xf32>
    %c0_6 = arith.constant 0 : index
    %c0_7 = arith.constant 0 : index
    %8 = vector.load %arg7[%c0_6, %c0_7] : memref<256x128xf32, #tpu.memory_space<vmem>>, vector<256x128xf32>
    tpu.vector_store %arg7[%c0_6, %c0_7], %7 {strides = array<i32>} : memref<256x128xf32, #tpu.memory_space<vmem>>, vector<256x128xf32>,
    %c0_i32_8 = arith.constant 0 : i32
    %9 = arith.cmpi eq, %arg2, %c0_i32_8 : i32
    %10 = arith.extui %9 : i1 to i32
    %c0_i32_9 = arith.constant 0 : i32
    %11 = arith.cmpi ne, %10, %c0_i32_9 : i32
    scf.if %11 {
      %c0_10 = arith.constant 0 : index
      %c0_11 = arith.constant 0 : index
      %12 = vector.load %arg7[%c0_10, %c0_11] : memref<256x128xf32, #tpu.memory_space<vmem>>, vector<256x128xf32>
      %c0_12 = arith.constant 0 : index
      %c0_13 = arith.constant 0 : index
      %13 = vector.load %arg5[%c0_12, %c0_13] : memref<1x128xf32, #tpu.memory_space<vmem>>, vector<1x128xf32>
      %14 = vector.broadcast %13 : vector<1x128xf32> to vector<256x128xf32>
      %15 = arith.addf %12, %14 : vector<256x128xf32>
      %cst_14 = arith.constant 0.000000e+00 : f32
      %16 = vector.broadcast %cst_14 : f32 to vector<256x128xf32>
      %17 = arith.cmpf ogt, %15, %16 : vector<256x128xf32>
      %cst_15 = arith.constant 2.000000e-01 : f32
      %18 = vector.broadcast %cst_15 : f32 to vector<256x128xf32>
      %19 = arith.mulf %18, %15 : vector<256x128xf32>
      %20 = arith.select %17, %15, %19 : vector<256x128xi1>, vector<256x128xf32>
      %21 = arith.truncf %20 : vector<256x128xf32> to vector<256x128xbf16>
      %c0_16 = arith.constant 0 : index
      %c0_17 = arith.constant 0 : index
      %22 = vector.load %arg6[%c0_16, %c0_17] : memref<256x128xbf16, #tpu.memory_space<vmem>>, vector<256x128xbf16>
      tpu.vector_store %arg6[%c0_16, %c0_17], %21 {strides = array<i32>} : memref<256x128xbf16, #tpu.memory_space<vmem>>, vector<256x128xbf16>,
    } else {
    }
    return
  }
  func.func @transform_0(%arg0: i32, %arg1: i32, %arg2: i32) -> (i32, i32) {
    %c0_i32 = arith.constant 0 : i32
    return %arg0, %arg2 : i32, i32
  }
  func.func @transform_1(%arg0: i32, %arg1: i32, %arg2: i32) -> (i32, i32) {
    %c0_i32 = arith.constant 0 : i32
    return %arg2, %arg1 : i32, i32
  }
  func.func @transform_2(%arg0: i32, %arg1: i32, %arg2: i32) -> (i32, i32) {
    %c0_i32 = arith.constant 0 : i32
    %c0_i32_0 = arith.constant 0 : i32
    return %c0_i32, %arg1 : i32, i32
  }
  func.func @transform_3(%arg0: i32, %arg1: i32, %arg2: i32) -> (i32, i32) {
    %c0_i32 = arith.constant 0 : i32
    return %arg0, %arg1 : i32, i32
  }
}

module attributes {stable_mosaic.version = 11 : i64} {
  func.func @kernel(%arg0: i32, %arg1: i32, %arg2: memref<128x2048xbf16, #tpu.memory_space<vmem>>, %arg3: memref<2048x128xbf16, #tpu.memory_space<vmem>>, %arg4: memref<1x128xf32, #tpu.memory_space<vmem>>, %arg5: memref<1x128xf32, #tpu.memory_space<vmem>>, %arg6: memref<1x128xf32, #tpu.memory_space<vmem>>, %arg7: memref<128x128xbf16, #tpu.memory_space<vmem>>, %arg8: memref<128x128xf32, #tpu.memory_space<vmem>>) attributes {dimension_semantics = [#tpu.dimension_semantics<parallel>, #tpu.dimension_semantics<arbitrary>], iteration_bounds = array<i64: 1, 2>, scalar_prefetch = 0 : i64, scratch_operands = 1 : i64, tpu.core_type = #tpu.core_type<tc>, window_params = [{transform_indices = @transform_0, window_bounds = array<i64: 128, 2048>}, {transform_indices = @transform_1, window_bounds = array<i64: 2048, 128>}, {transform_indices = @transform_2, window_bounds = array<i64: 1, 128>}, {transform_indices = @transform_3, window_bounds = array<i64: 1, 128>}, {transform_indices = @transform_4, window_bounds = array<i64: 1, 128>}, {transform_indices = @transform_5, window_bounds = array<i64: 128, 128>}]} {
    %c0_i32 = arith.constant 0 : i32
    %0 = arith.cmpi eq, %arg1, %c0_i32 : i32
    %1 = arith.extui %0 : i1 to i32
    %c0_i32_0 = arith.constant 0 : i32
    %2 = arith.cmpi ne, %1, %c0_i32_0 : i32
    scf.if %2 {
      %cst_9 = arith.constant 0.000000e+00 : f32
      %12 = vector.broadcast %cst_9 : f32 to vector<128x128xf32>
      %c0_10 = arith.constant 0 : index
      %c0_11 = arith.constant 0 : index
      %13 = vector.load %arg8[%c0_10, %c0_11] : memref<128x128xf32, #tpu.memory_space<vmem>>, vector<128x128xf32>
      tpu.vector_store %arg8[%c0_10, %c0_11], %12 {strides = array<i32>} : memref<128x128xf32, #tpu.memory_space<vmem>>, vector<128x128xf32>,
    } else {
    }
    %c0 = arith.constant 0 : index
    %c0_1 = arith.constant 0 : index
    %3 = vector.load %arg8[%c0, %c0_1] : memref<128x128xf32, #tpu.memory_space<vmem>>, vector<128x128xf32>
    %c0_2 = arith.constant 0 : index
    %c0_3 = arith.constant 0 : index
    %4 = vector.load %arg2[%c0_2, %c0_3] : memref<128x2048xbf16, #tpu.memory_space<vmem>>, vector<128x2048xbf16>
    %c0_4 = arith.constant 0 : index
    %c0_5 = arith.constant 0 : index
    %5 = vector.load %arg3[%c0_4, %c0_5] : memref<2048x128xbf16, #tpu.memory_space<vmem>>, vector<2048x128xbf16>
    %cst = arith.constant dense<0.000000e+00> : vector<128x128xf32>
    %6 = tpu.matmul %4, %5, %cst {dimension_numbers = #tpu.dot_dimension_numbers<[1], [0], [0], [1], [0, 0, 1, 1], [], []>} : vector<128x2048xbf16>, vector<2048x128xbf16>, vector<128x128xf32> -> vector<128x128xf32>
    %7 = arith.addf %3, %6 : vector<128x128xf32>
    %c0_6 = arith.constant 0 : index
    %c0_7 = arith.constant 0 : index
    %8 = vector.load %arg8[%c0_6, %c0_7] : memref<128x128xf32, #tpu.memory_space<vmem>>, vector<128x128xf32>
    tpu.vector_store %arg8[%c0_6, %c0_7], %7 {strides = array<i32>} : memref<128x128xf32, #tpu.memory_space<vmem>>, vector<128x128xf32>,
    %c1_i32 = arith.constant 1 : i32
    %9 = arith.cmpi eq, %arg1, %c1_i32 : i32
    %10 = arith.extui %9 : i1 to i32
    %c0_i32_8 = arith.constant 0 : i32
    %11 = arith.cmpi ne, %10, %c0_i32_8 : i32
    scf.if %11 {
      %c0_9 = arith.constant 0 : index
      %c0_10 = arith.constant 0 : index
      %12 = vector.load %arg8[%c0_9, %c0_10] : memref<128x128xf32, #tpu.memory_space<vmem>>, vector<128x128xf32>
      %c0_11 = arith.constant 0 : index
      %c0_12 = arith.constant 0 : index
      %13 = vector.load %arg4[%c0_11, %c0_12] : memref<1x128xf32, #tpu.memory_space<vmem>>, vector<1x128xf32>
      %14 = vector.broadcast %13 : vector<1x128xf32> to vector<128x128xf32>
      %15 = arith.addf %12, %14 : vector<128x128xf32>
      %cst_13 = arith.constant dense<0.000000e+00> : vector<128xf32>
      %16 = vector.multi_reduction <add>, %15, %cst_13 [0] : vector<128x128xf32> to vector<128xf32>
      %17 = vector.shape_cast %16 : vector<128xf32> to vector<1x128xf32>
      %cst_14 = arith.constant 7.812500e-03 : f32
      %18 = vector.broadcast %cst_14 : f32 to vector<1x128xf32>
      %19 = arith.mulf %17, %18 : vector<1x128xf32>
      %20 = vector.broadcast %19 : vector<1x128xf32> to vector<128x128xf32>
      %21 = arith.subf %15, %20 : vector<128x128xf32>
      %22 = arith.mulf %21, %21 : vector<128x128xf32>
      %cst_15 = arith.constant dense<0.000000e+00> : vector<128xf32>
      %23 = vector.multi_reduction <add>, %22, %cst_15 [0] : vector<128x128xf32> to vector<128xf32>
      %24 = vector.shape_cast %23 : vector<128xf32> to vector<1x128xf32>
      %cst_16 = arith.constant 7.812500e-03 : f32
      %25 = vector.broadcast %cst_16 : f32 to vector<1x128xf32>
      %26 = arith.mulf %24, %25 : vector<1x128xf32>
      %c0_17 = arith.constant 0 : index
      %c0_18 = arith.constant 0 : index
      %27 = vector.load %arg5[%c0_17, %c0_18] : memref<1x128xf32, #tpu.memory_space<vmem>>, vector<1x128xf32>
      %cst_19 = arith.constant 9.99999974E-6 : f32
      %28 = vector.broadcast %cst_19 : f32 to vector<1x128xf32>
      %29 = arith.addf %26, %28 : vector<1x128xf32>
      %30 = math.rsqrt %29 : vector<1x128xf32>
      %31 = arith.mulf %27, %30 : vector<1x128xf32>
      %c0_20 = arith.constant 0 : index
      %c0_21 = arith.constant 0 : index
      %32 = vector.load %arg6[%c0_20, %c0_21] : memref<1x128xf32, #tpu.memory_space<vmem>>, vector<1x128xf32>
      %33 = arith.mulf %19, %31 : vector<1x128xf32>
      %34 = arith.subf %32, %33 : vector<1x128xf32>
      %35 = vector.broadcast %31 : vector<1x128xf32> to vector<128x128xf32>
      %36 = arith.mulf %15, %35 : vector<128x128xf32>
      %37 = vector.broadcast %34 : vector<1x128xf32> to vector<128x128xf32>
      %38 = arith.addf %36, %37 : vector<128x128xf32>
      %cst_22 = arith.constant 0.000000e+00 : f32
      %39 = vector.broadcast %cst_22 : f32 to vector<128x128xf32>
      %40 = arith.cmpf ogt, %38, %39 : vector<128x128xf32>
      %cst_23 = arith.constant 2.000000e-01 : f32
      %41 = vector.broadcast %cst_23 : f32 to vector<128x128xf32>
      %42 = arith.mulf %41, %38 : vector<128x128xf32>
      %43 = arith.select %40, %38, %42 : vector<128x128xi1>, vector<128x128xf32>
      %44 = arith.truncf %43 : vector<128x128xf32> to vector<128x128xbf16>
      %c0_24 = arith.constant 0 : index
      %c0_25 = arith.constant 0 : index
      %45 = vector.load %arg7[%c0_24, %c0_25] : memref<128x128xbf16, #tpu.memory_space<vmem>>, vector<128x128xbf16>
      tpu.vector_store %arg7[%c0_24, %c0_25], %44 {strides = array<i32>} : memref<128x128xbf16, #tpu.memory_space<vmem>>, vector<128x128xbf16>,
    } else {
    }
    return
  }
  func.func @transform_0(%arg0: i32, %arg1: i32) -> (i32, i32) {
    %c0_i32 = arith.constant 0 : i32
    %c0_i32_0 = arith.constant 0 : i32
    return %c0_i32, %arg1 : i32, i32
  }
  func.func @transform_1(%arg0: i32, %arg1: i32) -> (i32, i32) {
    %c0_i32 = arith.constant 0 : i32
    return %arg1, %arg0 : i32, i32
  }
  func.func @transform_2(%arg0: i32, %arg1: i32) -> (i32, i32) {
    %c0_i32 = arith.constant 0 : i32
    %c0_i32_0 = arith.constant 0 : i32
    return %c0_i32, %arg0 : i32, i32
  }
  func.func @transform_3(%arg0: i32, %arg1: i32) -> (i32, i32) {
    %c0_i32 = arith.constant 0 : i32
    %c0_i32_0 = arith.constant 0 : i32
    return %c0_i32, %arg0 : i32, i32
  }
  func.func @transform_4(%arg0: i32, %arg1: i32) -> (i32, i32) {
    %c0_i32 = arith.constant 0 : i32
    %c0_i32_0 = arith.constant 0 : i32
    return %c0_i32, %arg0 : i32, i32
  }
  func.func @transform_5(%arg0: i32, %arg1: i32) -> (i32, i32) {
    %c0_i32 = arith.constant 0 : i32
    %c0_i32_0 = arith.constant 0 : i32
    return %c0_i32, %arg0 : i32, i32
  }
}

module attributes {stable_mosaic.version = 11 : i64} {
  func.func @kernel(%arg0: i32, %arg1: i32, %arg2: memref<16x4096xbf16, #tpu.memory_space<vmem>>, %arg3: memref<4096x128xbf16, #tpu.memory_space<vmem>>, %arg4: memref<1x128xf32, #tpu.memory_space<vmem>>, %arg5: memref<1x128xf32, #tpu.memory_space<vmem>>, %arg6: memref<1x128xf32, #tpu.memory_space<vmem>>, %arg7: memref<16x128xbf16, #tpu.memory_space<vmem>>, %arg8: memref<16x128xf32, #tpu.memory_space<vmem>>) attributes {dimension_semantics = [#tpu.dimension_semantics<parallel>, #tpu.dimension_semantics<arbitrary>], iteration_bounds = array<i64: 2, 2>, scalar_prefetch = 0 : i64, scratch_operands = 1 : i64, tpu.core_type = #tpu.core_type<tc>, window_params = [{transform_indices = @transform_0, window_bounds = array<i64: 16, 4096>}, {transform_indices = @transform_1, window_bounds = array<i64: 4096, 128>}, {transform_indices = @transform_2, window_bounds = array<i64: 1, 128>}, {transform_indices = @transform_3, window_bounds = array<i64: 1, 128>}, {transform_indices = @transform_4, window_bounds = array<i64: 1, 128>}, {transform_indices = @transform_5, window_bounds = array<i64: 16, 128>}]} {
    %c0_i32 = arith.constant 0 : i32
    %0 = arith.cmpi eq, %arg1, %c0_i32 : i32
    %1 = arith.extui %0 : i1 to i32
    %c0_i32_0 = arith.constant 0 : i32
    %2 = arith.cmpi ne, %1, %c0_i32_0 : i32
    scf.if %2 {
      %cst_9 = arith.constant 0.000000e+00 : f32
      %12 = vector.broadcast %cst_9 : f32 to vector<16x128xf32>
      %c0_10 = arith.constant 0 : index
      %c0_11 = arith.constant 0 : index
      %13 = vector.load %arg8[%c0_10, %c0_11] : memref<16x128xf32, #tpu.memory_space<vmem>>, vector<16x128xf32>
      tpu.vector_store %arg8[%c0_10, %c0_11], %12 {strides = array<i32>} : memref<16x128xf32, #tpu.memory_space<vmem>>, vector<16x128xf32>,
    } else {
    }
    %c0 = arith.constant 0 : index
    %c0_1 = arith.constant 0 : index
    %3 = vector.load %arg8[%c0, %c0_1] : memref<16x128xf32, #tpu.memory_space<vmem>>, vector<16x128xf32>
    %c0_2 = arith.constant 0 : index
    %c0_3 = arith.constant 0 : index
    %4 = vector.load %arg2[%c0_2, %c0_3] : memref<16x4096xbf16, #tpu.memory_space<vmem>>, vector<16x4096xbf16>
    %c0_4 = arith.constant 0 : index
    %c0_5 = arith.constant 0 : index
    %5 = vector.load %arg3[%c0_4, %c0_5] : memref<4096x128xbf16, #tpu.memory_space<vmem>>, vector<4096x128xbf16>
    %cst = arith.constant dense<0.000000e+00> : vector<16x128xf32>
    %6 = tpu.matmul %4, %5, %cst {dimension_numbers = #tpu.dot_dimension_numbers<[1], [0], [0], [1], [0, 0, 1, 1], [], []>} : vector<16x4096xbf16>, vector<4096x128xbf16>, vector<16x128xf32> -> vector<16x128xf32>
    %7 = arith.addf %3, %6 : vector<16x128xf32>
    %c0_6 = arith.constant 0 : index
    %c0_7 = arith.constant 0 : index
    %8 = vector.load %arg8[%c0_6, %c0_7] : memref<16x128xf32, #tpu.memory_space<vmem>>, vector<16x128xf32>
    tpu.vector_store %arg8[%c0_6, %c0_7], %7 {strides = array<i32>} : memref<16x128xf32, #tpu.memory_space<vmem>>, vector<16x128xf32>,
    %c1_i32 = arith.constant 1 : i32
    %9 = arith.cmpi eq, %arg1, %c1_i32 : i32
    %10 = arith.extui %9 : i1 to i32
    %c0_i32_8 = arith.constant 0 : i32
    %11 = arith.cmpi ne, %10, %c0_i32_8 : i32
    scf.if %11 {
      %c0_9 = arith.constant 0 : index
      %c0_10 = arith.constant 0 : index
      %12 = vector.load %arg8[%c0_9, %c0_10] : memref<16x128xf32, #tpu.memory_space<vmem>>, vector<16x128xf32>
      %c0_11 = arith.constant 0 : index
      %c0_12 = arith.constant 0 : index
      %13 = vector.load %arg4[%c0_11, %c0_12] : memref<1x128xf32, #tpu.memory_space<vmem>>, vector<1x128xf32>
      %14 = vector.broadcast %13 : vector<1x128xf32> to vector<16x128xf32>
      %15 = arith.addf %12, %14 : vector<16x128xf32>
      %cst_13 = arith.constant dense<0.000000e+00> : vector<128xf32>
      %16 = vector.multi_reduction <add>, %15, %cst_13 [0] : vector<16x128xf32> to vector<128xf32>
      %17 = vector.shape_cast %16 : vector<128xf32> to vector<1x128xf32>
      %cst_14 = arith.constant 6.250000e-02 : f32
      %18 = vector.broadcast %cst_14 : f32 to vector<1x128xf32>
      %19 = arith.mulf %17, %18 : vector<1x128xf32>
      %20 = vector.broadcast %19 : vector<1x128xf32> to vector<16x128xf32>
      %21 = arith.subf %15, %20 : vector<16x128xf32>
      %22 = arith.mulf %21, %21 : vector<16x128xf32>
      %cst_15 = arith.constant dense<0.000000e+00> : vector<128xf32>
      %23 = vector.multi_reduction <add>, %22, %cst_15 [0] : vector<16x128xf32> to vector<128xf32>
      %24 = vector.shape_cast %23 : vector<128xf32> to vector<1x128xf32>
      %cst_16 = arith.constant 6.250000e-02 : f32
      %25 = vector.broadcast %cst_16 : f32 to vector<1x128xf32>
      %26 = arith.mulf %24, %25 : vector<1x128xf32>
      %c0_17 = arith.constant 0 : index
      %c0_18 = arith.constant 0 : index
      %27 = vector.load %arg5[%c0_17, %c0_18] : memref<1x128xf32, #tpu.memory_space<vmem>>, vector<1x128xf32>
      %cst_19 = arith.constant 9.99999974E-6 : f32
      %28 = vector.broadcast %cst_19 : f32 to vector<1x128xf32>
      %29 = arith.addf %26, %28 : vector<1x128xf32>
      %30 = math.rsqrt %29 : vector<1x128xf32>
      %31 = arith.mulf %27, %30 : vector<1x128xf32>
      %c0_20 = arith.constant 0 : index
      %c0_21 = arith.constant 0 : index
      %32 = vector.load %arg6[%c0_20, %c0_21] : memref<1x128xf32, #tpu.memory_space<vmem>>, vector<1x128xf32>
      %33 = arith.mulf %19, %31 : vector<1x128xf32>
      %34 = arith.subf %32, %33 : vector<1x128xf32>
      %35 = vector.broadcast %31 : vector<1x128xf32> to vector<16x128xf32>
      %36 = arith.mulf %15, %35 : vector<16x128xf32>
      %37 = vector.broadcast %34 : vector<1x128xf32> to vector<16x128xf32>
      %38 = arith.addf %36, %37 : vector<16x128xf32>
      %cst_22 = arith.constant 0.000000e+00 : f32
      %39 = vector.broadcast %cst_22 : f32 to vector<16x128xf32>
      %40 = arith.cmpf ogt, %38, %39 : vector<16x128xf32>
      %cst_23 = arith.constant 2.000000e-01 : f32
      %41 = vector.broadcast %cst_23 : f32 to vector<16x128xf32>
      %42 = arith.mulf %41, %38 : vector<16x128xf32>
      %43 = arith.select %40, %38, %42 : vector<16x128xi1>, vector<16x128xf32>
      %44 = arith.truncf %43 : vector<16x128xf32> to vector<16x128xbf16>
      %c0_24 = arith.constant 0 : index
      %c0_25 = arith.constant 0 : index
      %45 = vector.load %arg7[%c0_24, %c0_25] : memref<16x128xbf16, #tpu.memory_space<vmem>>, vector<16x128xbf16>
      tpu.vector_store %arg7[%c0_24, %c0_25], %44 {strides = array<i32>} : memref<16x128xbf16, #tpu.memory_space<vmem>>, vector<16x128xbf16>,
    } else {
    }
    return
  }
  func.func @transform_0(%arg0: i32, %arg1: i32) -> (i32, i32) {
    %c0_i32 = arith.constant 0 : i32
    %c0_i32_0 = arith.constant 0 : i32
    return %c0_i32, %arg1 : i32, i32
  }
  func.func @transform_1(%arg0: i32, %arg1: i32) -> (i32, i32) {
    %c0_i32 = arith.constant 0 : i32
    return %arg1, %arg0 : i32, i32
  }
  func.func @transform_2(%arg0: i32, %arg1: i32) -> (i32, i32) {
    %c0_i32 = arith.constant 0 : i32
    %c0_i32_0 = arith.constant 0 : i32
    return %c0_i32, %arg0 : i32, i32
  }
  func.func @transform_3(%arg0: i32, %arg1: i32) -> (i32, i32) {
    %c0_i32 = arith.constant 0 : i32
    %c0_i32_0 = arith.constant 0 : i32
    return %c0_i32, %arg0 : i32, i32
  }
  func.func @transform_4(%arg0: i32, %arg1: i32) -> (i32, i32) {
    %c0_i32 = arith.constant 0 : i32
    %c0_i32_0 = arith.constant 0 : i32
    return %c0_i32, %arg0 : i32, i32
  }
  func.func @transform_5(%arg0: i32, %arg1: i32) -> (i32, i32) {
    %c0_i32 = arith.constant 0 : i32
    %c0_i32_0 = arith.constant 0 : i32
    return %c0_i32, %arg0 : i32, i32
  }
}

module attributes {stable_mosaic.version = 11 : i64} {
  func.func @kernel(%arg0: i32, %arg1: i32, %arg2: memref<8x4096xbf16, #tpu.memory_space<vmem>>, %arg3: memref<4096x256xbf16, #tpu.memory_space<vmem>>, %arg4: memref<1x256xf32, #tpu.memory_space<vmem>>, %arg5: memref<1x256xf32, #tpu.memory_space<vmem>>, %arg6: memref<1x256xf32, #tpu.memory_space<vmem>>, %arg7: memref<8x256xbf16, #tpu.memory_space<vmem>>, %arg8: memref<8x256xf32, #tpu.memory_space<vmem>>) attributes {dimension_semantics = [#tpu.dimension_semantics<parallel>, #tpu.dimension_semantics<arbitrary>], iteration_bounds = array<i64: 2, 4>, scalar_prefetch = 0 : i64, scratch_operands = 1 : i64, tpu.core_type = #tpu.core_type<tc>, window_params = [{transform_indices = @transform_0, window_bounds = array<i64: 8, 4096>}, {transform_indices = @transform_1, window_bounds = array<i64: 4096, 256>}, {transform_indices = @transform_2, window_bounds = array<i64: 1, 256>}, {transform_indices = @transform_3, window_bounds = array<i64: 1, 256>}, {transform_indices = @transform_4, window_bounds = array<i64: 1, 256>}, {transform_indices = @transform_5, window_bounds = array<i64: 8, 256>}]} {
    %c0_i32 = arith.constant 0 : i32
    %0 = arith.cmpi eq, %arg1, %c0_i32 : i32
    %1 = arith.extui %0 : i1 to i32
    %c0_i32_0 = arith.constant 0 : i32
    %2 = arith.cmpi ne, %1, %c0_i32_0 : i32
    scf.if %2 {
      %cst_9 = arith.constant 0.000000e+00 : f32
      %12 = vector.broadcast %cst_9 : f32 to vector<8x256xf32>
      %c0_10 = arith.constant 0 : index
      %c0_11 = arith.constant 0 : index
      %13 = vector.load %arg8[%c0_10, %c0_11] : memref<8x256xf32, #tpu.memory_space<vmem>>, vector<8x256xf32>
      tpu.vector_store %arg8[%c0_10, %c0_11], %12 {strides = array<i32>} : memref<8x256xf32, #tpu.memory_space<vmem>>, vector<8x256xf32>,
    } else {
    }
    %c0 = arith.constant 0 : index
    %c0_1 = arith.constant 0 : index
    %3 = vector.load %arg8[%c0, %c0_1] : memref<8x256xf32, #tpu.memory_space<vmem>>, vector<8x256xf32>
    %c0_2 = arith.constant 0 : index
    %c0_3 = arith.constant 0 : index
    %4 = vector.load %arg2[%c0_2, %c0_3] : memref<8x4096xbf16, #tpu.memory_space<vmem>>, vector<8x4096xbf16>
    %c0_4 = arith.constant 0 : index
    %c0_5 = arith.constant 0 : index
    %5 = vector.load %arg3[%c0_4, %c0_5] : memref<4096x256xbf16, #tpu.memory_space<vmem>>, vector<4096x256xbf16>
    %cst = arith.constant dense<0.000000e+00> : vector<8x256xf32>
    %6 = tpu.matmul %4, %5, %cst {dimension_numbers = #tpu.dot_dimension_numbers<[1], [0], [0], [1], [0, 0, 1, 1], [], []>} : vector<8x4096xbf16>, vector<4096x256xbf16>, vector<8x256xf32> -> vector<8x256xf32>
    %7 = arith.addf %3, %6 : vector<8x256xf32>
    %c0_6 = arith.constant 0 : index
    %c0_7 = arith.constant 0 : index
    %8 = vector.load %arg8[%c0_6, %c0_7] : memref<8x256xf32, #tpu.memory_space<vmem>>, vector<8x256xf32>
    tpu.vector_store %arg8[%c0_6, %c0_7], %7 {strides = array<i32>} : memref<8x256xf32, #tpu.memory_space<vmem>>, vector<8x256xf32>,
    %c3_i32 = arith.constant 3 : i32
    %9 = arith.cmpi eq, %arg1, %c3_i32 : i32
    %10 = arith.extui %9 : i1 to i32
    %c0_i32_8 = arith.constant 0 : i32
    %11 = arith.cmpi ne, %10, %c0_i32_8 : i32
    scf.if %11 {
      %c0_9 = arith.constant 0 : index
      %c0_10 = arith.constant 0 : index
      %12 = vector.load %arg8[%c0_9, %c0_10] : memref<8x256xf32, #tpu.memory_space<vmem>>, vector<8x256xf32>
      %c0_11 = arith.constant 0 : index
      %c0_12 = arith.constant 0 : index
      %13 = vector.load %arg4[%c0_11, %c0_12] : memref<1x256xf32, #tpu.memory_space<vmem>>, vector<1x256xf32>
      %14 = vector.broadcast %13 : vector<1x256xf32> to vector<8x256xf32>
      %15 = arith.addf %12, %14 : vector<8x256xf32>
      %16 = tpu.iota {dimensions = array<i32: 0>} : vector<8x256xi32>
      %c2_i32 = arith.constant 2 : i32
      %17 = vector.broadcast %c2_i32 : i32 to vector<8x256xi32>
      %18 = arith.cmpi slt, %16, %17 : vector<8x256xi32>
      %cst_13 = arith.constant 0.000000e+00 : f32
      %19 = vector.broadcast %cst_13 : f32 to vector<8x256xf32>
      %20 = arith.select %18, %15, %19 : vector<8x256xi1>, vector<8x256xf32>
      %cst_14 = arith.constant dense<0.000000e+00> : vector<256xf32>
      %21 = vector.multi_reduction <add>, %20, %cst_14 [0] : vector<8x256xf32> to vector<256xf32>
      %22 = vector.shape_cast %21 : vector<256xf32> to vector<1x256xf32>
      %cst_15 = arith.constant 5.000000e-01 : f32
      %23 = vector.broadcast %cst_15 : f32 to vector<1x256xf32>
      %24 = arith.mulf %22, %23 : vector<1x256xf32>
      %25 = vector.broadcast %24 : vector<1x256xf32> to vector<8x256xf32>
      %26 = arith.subf %15, %25 : vector<8x256xf32>
      %cst_16 = arith.constant 0.000000e+00 : f32
      %27 = vector.broadcast %cst_16 : f32 to vector<8x256xf32>
      %28 = arith.select %18, %26, %27 : vector<8x256xi1>, vector<8x256xf32>
      %29 = arith.mulf %28, %28 : vector<8x256xf32>
      %cst_17 = arith.constant dense<0.000000e+00> : vector<256xf32>
      %30 = vector.multi_reduction <add>, %29, %cst_17 [0] : vector<8x256xf32> to vector<256xf32>
      %31 = vector.shape_cast %30 : vector<256xf32> to vector<1x256xf32>
      %cst_18 = arith.constant 5.000000e-01 : f32
      %32 = vector.broadcast %cst_18 : f32 to vector<1x256xf32>
      %33 = arith.mulf %31, %32 : vector<1x256xf32>
      %c0_19 = arith.constant 0 : index
      %c0_20 = arith.constant 0 : index
      %34 = vector.load %arg5[%c0_19, %c0_20] : memref<1x256xf32, #tpu.memory_space<vmem>>, vector<1x256xf32>
      %cst_21 = arith.constant 9.99999974E-6 : f32
      %35 = vector.broadcast %cst_21 : f32 to vector<1x256xf32>
      %36 = arith.addf %33, %35 : vector<1x256xf32>
      %37 = math.rsqrt %36 : vector<1x256xf32>
      %38 = arith.mulf %34, %37 : vector<1x256xf32>
      %c0_22 = arith.constant 0 : index
      %c0_23 = arith.constant 0 : index
      %39 = vector.load %arg6[%c0_22, %c0_23] : memref<1x256xf32, #tpu.memory_space<vmem>>, vector<1x256xf32>
      %40 = arith.mulf %24, %38 : vector<1x256xf32>
      %41 = arith.subf %39, %40 : vector<1x256xf32>
      %42 = vector.broadcast %38 : vector<1x256xf32> to vector<8x256xf32>
      %43 = arith.mulf %15, %42 : vector<8x256xf32>
      %44 = vector.broadcast %41 : vector<1x256xf32> to vector<8x256xf32>
      %45 = arith.addf %43, %44 : vector<8x256xf32>
      %cst_24 = arith.constant 0.000000e+00 : f32
      %46 = vector.broadcast %cst_24 : f32 to vector<8x256xf32>
      %47 = arith.cmpf ogt, %45, %46 : vector<8x256xf32>
      %cst_25 = arith.constant 2.000000e-01 : f32
      %48 = vector.broadcast %cst_25 : f32 to vector<8x256xf32>
      %49 = arith.mulf %48, %45 : vector<8x256xf32>
      %50 = arith.select %47, %45, %49 : vector<8x256xi1>, vector<8x256xf32>
      %51 = arith.truncf %50 : vector<8x256xf32> to vector<8x256xbf16>
      %c0_26 = arith.constant 0 : index
      %c0_27 = arith.constant 0 : index
      %52 = vector.load %arg7[%c0_26, %c0_27] : memref<8x256xbf16, #tpu.memory_space<vmem>>, vector<8x256xbf16>
      tpu.vector_store %arg7[%c0_26, %c0_27], %51 {strides = array<i32>} : memref<8x256xbf16, #tpu.memory_space<vmem>>, vector<8x256xbf16>,
    } else {
    }
    return
  }
  func.func @transform_0(%arg0: i32, %arg1: i32) -> (i32, i32) {
    %c0_i32 = arith.constant 0 : i32
    %c0_i32_0 = arith.constant 0 : i32
    return %c0_i32, %arg1 : i32, i32
  }
  func.func @transform_1(%arg0: i32, %arg1: i32) -> (i32, i32) {
    %c0_i32 = arith.constant 0 : i32
    return %arg1, %arg0 : i32, i32
  }
  func.func @transform_2(%arg0: i32, %arg1: i32) -> (i32, i32) {
    %c0_i32 = arith.constant 0 : i32
    %c0_i32_0 = arith.constant 0 : i32
    return %c0_i32, %arg0 : i32, i32
  }
  func.func @transform_3(%arg0: i32, %arg1: i32) -> (i32, i32) {
    %c0_i32 = arith.constant 0 : i32
    %c0_i32_0 = arith.constant 0 : i32
    return %c0_i32, %arg0 : i32, i32
  }
  func.func @transform_4(%arg0: i32, %arg1: i32) -> (i32, i32) {
    %c0_i32 = arith.constant 0 : i32
    %c0_i32_0 = arith.constant 0 : i32
    return %c0_i32, %arg0 : i32, i32
  }
  func.func @transform_5(%arg0: i32, %arg1: i32) -> (i32, i32) {
    %c0_i32 = arith.constant 0 : i32
    %c0_i32_0 = arith.constant 0 : i32
    return %c0_i32, %arg0 : i32, i32
  }
}

module attributes {stable_mosaic.version = 11 : i64} {
  func.func @kernel(%arg0: i32, %arg1: i32, %arg2: i32, %arg3: memref<8x256xbf16, #tpu.memory_space<vmem>>, %arg4: memref<256x128xbf16, #tpu.memory_space<vmem>>, %arg5: memref<1x128xf32, #tpu.memory_space<vmem>>, %arg6: memref<8x128xf32, #tpu.memory_space<vmem>>, %arg7: memref<8x128xf32, #tpu.memory_space<vmem>>) attributes {dimension_semantics = [#tpu.dimension_semantics<parallel>, #tpu.dimension_semantics<parallel>, #tpu.dimension_semantics<arbitrary>], iteration_bounds = array<i64: 1, 1, 2>, scalar_prefetch = 0 : i64, scratch_operands = 1 : i64, tpu.core_type = #tpu.core_type<tc>, window_params = [{transform_indices = @transform_0, window_bounds = array<i64: 8, 256>}, {transform_indices = @transform_1, window_bounds = array<i64: 256, 128>}, {transform_indices = @transform_2, window_bounds = array<i64: 1, 128>}, {transform_indices = @transform_3, window_bounds = array<i64: 8, 128>}]} {
    %c0_i32 = arith.constant 0 : i32
    %0 = arith.cmpi eq, %arg2, %c0_i32 : i32
    %1 = arith.extui %0 : i1 to i32
    %c0_i32_0 = arith.constant 0 : i32
    %2 = arith.cmpi ne, %1, %c0_i32_0 : i32
    scf.if %2 {
      %cst_9 = arith.constant 0.000000e+00 : f32
      %12 = vector.broadcast %cst_9 : f32 to vector<8x128xf32>
      %c0_10 = arith.constant 0 : index
      %c0_11 = arith.constant 0 : index
      %13 = vector.load %arg7[%c0_10, %c0_11] : memref<8x128xf32, #tpu.memory_space<vmem>>, vector<8x128xf32>
      tpu.vector_store %arg7[%c0_10, %c0_11], %12 {strides = array<i32>} : memref<8x128xf32, #tpu.memory_space<vmem>>, vector<8x128xf32>,
    } else {
    }
    %c0 = arith.constant 0 : index
    %c0_1 = arith.constant 0 : index
    %3 = vector.load %arg7[%c0, %c0_1] : memref<8x128xf32, #tpu.memory_space<vmem>>, vector<8x128xf32>
    %c0_2 = arith.constant 0 : index
    %c0_3 = arith.constant 0 : index
    %4 = vector.load %arg3[%c0_2, %c0_3] : memref<8x256xbf16, #tpu.memory_space<vmem>>, vector<8x256xbf16>
    %c0_4 = arith.constant 0 : index
    %c0_5 = arith.constant 0 : index
    %5 = vector.load %arg4[%c0_4, %c0_5] : memref<256x128xbf16, #tpu.memory_space<vmem>>, vector<256x128xbf16>
    %cst = arith.constant dense<0.000000e+00> : vector<8x128xf32>
    %6 = tpu.matmul %4, %5, %cst {dimension_numbers = #tpu.dot_dimension_numbers<[1], [0], [0], [1], [0, 0, 1, 1], [], []>} : vector<8x256xbf16>, vector<256x128xbf16>, vector<8x128xf32> -> vector<8x128xf32>
    %7 = arith.addf %3, %6 : vector<8x128xf32>
    %c0_6 = arith.constant 0 : index
    %c0_7 = arith.constant 0 : index
    %8 = vector.load %arg7[%c0_6, %c0_7] : memref<8x128xf32, #tpu.memory_space<vmem>>, vector<8x128xf32>
    tpu.vector_store %arg7[%c0_6, %c0_7], %7 {strides = array<i32>} : memref<8x128xf32, #tpu.memory_space<vmem>>, vector<8x128xf32>,
    %c1_i32 = arith.constant 1 : i32
    %9 = arith.cmpi eq, %arg2, %c1_i32 : i32
    %10 = arith.extui %9 : i1 to i32
    %c0_i32_8 = arith.constant 0 : i32
    %11 = arith.cmpi ne, %10, %c0_i32_8 : i32
    scf.if %11 {
      %c0_9 = arith.constant 0 : index
      %c0_10 = arith.constant 0 : index
      %12 = vector.load %arg7[%c0_9, %c0_10] : memref<8x128xf32, #tpu.memory_space<vmem>>, vector<8x128xf32>
      %c0_11 = arith.constant 0 : index
      %c0_12 = arith.constant 0 : index
      %13 = vector.load %arg5[%c0_11, %c0_12] : memref<1x128xf32, #tpu.memory_space<vmem>>, vector<1x128xf32>
      %14 = vector.broadcast %13 : vector<1x128xf32> to vector<8x128xf32>
      %15 = arith.addf %12, %14 : vector<8x128xf32>
      %16 = arith.negf %15 : vector<8x128xf32>
      %17 = math.exp %16 : vector<8x128xf32>
      %cst_13 = arith.constant 1.000000e+00 : f32
      %18 = vector.broadcast %cst_13 : f32 to vector<8x128xf32>
      %19 = arith.addf %18, %17 : vector<8x128xf32>
      %20 = arith.divf %18, %19 : vector<8x128xf32>
      %c0_14 = arith.constant 0 : index
      %c0_15 = arith.constant 0 : index
      %21 = vector.load %arg6[%c0_14, %c0_15] : memref<8x128xf32, #tpu.memory_space<vmem>>, vector<8x128xf32>
      tpu.vector_store %arg6[%c0_14, %c0_15], %20 {strides = array<i32>} : memref<8x128xf32, #tpu.memory_space<vmem>>, vector<8x128xf32>,
    } else {
    }
    return
  }
  func.func @transform_0(%arg0: i32, %arg1: i32, %arg2: i32) -> (i32, i32) {
    %c0_i32 = arith.constant 0 : i32
    return %arg0, %arg2 : i32, i32
  }
  func.func @transform_1(%arg0: i32, %arg1: i32, %arg2: i32) -> (i32, i32) {
    %c0_i32 = arith.constant 0 : i32
    return %arg2, %arg1 : i32, i32
  }
  func.func @transform_2(%arg0: i32, %arg1: i32, %arg2: i32) -> (i32, i32) {
    %c0_i32 = arith.constant 0 : i32
    %c0_i32_0 = arith.constant 0 : i32
    return %c0_i32, %arg1 : i32, i32
  }
  func.func @transform_3(%arg0: i32, %arg1: i32, %arg2: i32) -> (i32, i32) {
    %c0_i32 = arith.constant 0 : i32
    return %arg0, %arg1 : i32, i32
  }
}

</mosaic_0001>

<bundles_post_ra>
// kernel: fwd.5
= control target key start
LH: loop header
LB: loop body
LE: loop exit
PB: predicated region body
PF: predicated region fallthrough
CT: control target
= control target key end

     0   :  { %s1563_s12 = smov 0   ;;  %s1565_s13 = smov 0   ;;  %s1704_s0 = inlined_call_operand.vmem [shape: bf16[1024,128], index: 0, kind: input, shape index: {}]   ;;  %s1705_s1 = inlined_call_operand.vmem [shape: bf16[128,128], index: 1, kind: input, shape index: {}]   ;;  %s1706_s2 = inlined_call_operand.vmem [shape: f32[1,128], index: 2, kind: input, shape index: {}]   ;;  %s1707_s3 = inlined_call_operand.vmem [shape: bf16[1024,128], index: 3, kind: output, shape index: {}]  }
   0x1   :  { %s1567_s14 = smov 0  }
   0x2 LB: > { %s32_s15 = sadd.s32 1, %s1537_s13  ;;  %p1192_p0 = scmp.ge.s32.totalorder %s1541_s14, 1  ;;  %s1541_s14 = sphi %s1567_s14, %s13_s14   ;;  %s1537_s13 = sphi %s1565_s13, %s1709_s13   ;;  %s1533_s12 = sphi %s1563_s12, %s1708_s12  }
   0x3   : > { %p34_p1 = scmp.ge.s32.totalorder %s32_s15, 4  ;;  %p188_p2 = scmp.lt.s32.totalorder %s1541_s14, 5 }
   0x5   : > { %s1711_s15 = smov (%p34_p1, %s32_s15), 0  ;;  %p189_p3 = pnand %p1192_p0, %p188_p2 }
   0x6   : > { %s1193_s18 = sshll.u32 (!%p189_p3), %s1533_s12, 5 }
   0x7   : > { %192 = sbr.rel (%p189_p3) target bundleno = 280 (0x118), region = 32  ;;  %p230_p4 = scmp.lt.s32.totalorder (!%p189_p3), %s1193_s18, 127 }
   0xc   : > { %v1495_v0 = vld [vmem:[%s1705_s1 + $0x38] sm:$0xff]   ;;  %v1496_v1 = vld [vmem:[%s1705_s1 + $0x30] sm:$0xff]   ;;  %s1713_s18 = smov (!%p230_p4, %s1193_s18), 127  ;;  %v1497_v2 = vld [vmem:[%s1705_s1 + $0x28] sm:$0xff]  }
   0xd   : > { %1407 = vmatprep.subr.bf16.mxu0 %v1495_v0  ;;  %1455 = vmatprep.subr.bf16.mxu1 %v1495_v0  ;;  %s1194_s23 = sshll.u32 %s1713_s18, 2  ;;  %v1498_v3 = vld [vmem:[%s1705_s1 + $0x20] sm:$0xff]   ;;  %v1499_v6 = vld [vmem:[%s1705_s1 + $0x18] sm:$0xff]   ;;  %v1500_v7 = vld [vmem:[%s1705_s1 + $0x10] sm:$0xff]  }
   0xe   : > { %1408 = vmatpush3.bf16.msra.mxu0 %v1495_v0  ;;  %1463 = vmatpush3.bf16.msra.mxu1 %v1495_v0  ;;  %s1598_s26 = scalar_lea.vmem %s1704_s0, %s1194_s23  ;;  %v1501_v8 = vld [vmem:[%s1705_s1 + $0x8] sm:$0xff]   ;;  %v1502_v9 = vld [vmem:[%s1705_s1] sm:$0xff]   ;;  %s1649_s17 = scalar_lea.vmem %s1707_s3, %s1194_s23 }
   0xf   : > { %1409 = vmatprep.subr.bf16.mxu0 %v1496_v1  ;;  %1456 = vmatprep.subr.bf16.mxu1 %v1496_v1  ;;  %v1503_v4 = vld [vmem:[%s1598_s26] sm:$0xff]   ;;  %v1505_v10 = vld [vmem:[%s1598_s26 + $0x8] sm:$0xff]   ;;  %v1507_v12 = vld [vmem:[%s1598_s26 + $0x10] sm:$0xff]  }
  0x10   : > { %v1504_v5 = vld [vmem:[%s1598_s26 + $0x40] sm:$0xff]   ;;  %1423 = vmatprep.mubr.bf16.mxu0 %v1503_v4  ;;  %v1506_v11 = vld [vmem:[%s1598_s26 + $0x48] sm:$0xff]   ;;  %v1508_v13 = vld [vmem:[%s1598_s26 + $0x50] sm:$0xff]  }
  0x11   : > { %1439 = vmatprep.mubr.bf16.mxu1 %v1504_v5  ;;  %v1509_v14 = vld [vmem:[%s1598_s26 + $0x18] sm:$0xff]   ;;  %v1511_v16 = vld [vmem:[%s1598_s26 + $0x20] sm:$0xff]   ;;  %v1513_v18 = vld [vmem:[%s1598_s26 + $0x28] sm:$0xff]  }
  0x12   : > { %1410 = vmatpush3.bf16.msra.mxu0 %v1496_v1  ;;  %1464 = vmatpush3.bf16.msra.mxu1 %v1496_v1  ;;  %v1510_v15 = vld [vmem:[%s1598_s26 + $0x58] sm:$0xff]   ;;  %v1512_v17 = vld [vmem:[%s1598_s26 + $0x60] sm:$0xff]   ;;  %v1514_v19 = vld [vmem:[%s1598_s26 + $0x68] sm:$0xff]  }
  0x13   : > { %1411 = vmatprep.subr.bf16.mxu0 %v1497_v2  ;;  %1457 = vmatprep.subr.bf16.mxu1 %v1497_v2  ;;  %v1515_v20 = vld [vmem:[%s1598_s26 + $0x30] sm:$0xff]   ;;  %v1517_v22 = vld [vmem:[%s1598_s26 + $0x38] sm:$0xff]   ;;  %v1634_v24 = vld [vmem:[%s1706_s2] ss:$0 sm:$0xff] }
  0x14   : > { %v1516_v21 = vld [vmem:[%s1598_s26 + $0x70] sm:$0xff]   ;;  %v1518_v23 = vld [vmem:[%s1598_s26 + $0x78] sm:$0xff]  }
  0x16   : > { %1412 = vmatpush3.bf16.msra.mxu0 %v1497_v2  ;;  %1465 = vmatpush3.bf16.msra.mxu1 %v1497_v2 }
  0x17   : > { %1413 = vmatprep.subr.bf16.mxu0 %v1498_v3  ;;  %1458 = vmatprep.subr.bf16.mxu1 %v1498_v3 }
  0x1a   : > { %1414 = vmatpush3.bf16.msra.mxu0 %v1498_v3  ;;  %1466 = vmatpush3.bf16.msra.mxu1 %v1498_v3 }
  0x1b   : > { %1415 = vmatprep.subr.bf16.mxu0 %v1499_v6  ;;  %1459 = vmatprep.subr.bf16.mxu1 %v1499_v6 }
  0x1e   : > { %1416 = vmatpush3.bf16.msra.mxu0 %v1499_v6  ;;  %1467 = vmatpush3.bf16.msra.mxu1 %v1499_v6 }
  0x1f   : > { %1417 = vmatprep.subr.bf16.mxu0 %v1500_v7  ;;  %1460 = vmatprep.subr.bf16.mxu1 %v1500_v7 }
  0x22   : > { %1418 = vmatpush3.bf16.msra.mxu0 %v1500_v7  ;;  %1468 = vmatpush3.bf16.msra.mxu1 %v1500_v7 }
  0x23   : > { %1419 = vmatprep.subr.bf16.mxu0 %v1501_v8  ;;  %1461 = vmatprep.subr.bf16.mxu1 %v1501_v8 }
  0x26   : > { %1420 = vmatpush3.bf16.msra.mxu0 %v1501_v8  ;;  %1469 = vmatpush3.bf16.msra.mxu1 %v1501_v8 }
  0x27   : > { %1421 = vmatprep.subr.bf16.mxu0 %v1502_v9  ;;  %1462 = vmatprep.subr.bf16.mxu1 %v1502_v9 }
  0x2a   : > { %1422 = vmatpush3.bf16.msra.mxu0 %v1502_v9  ;;  %1470 = vmatpush3.bf16.msra.mxu1 %v1502_v9 }
  0x2d   : > { %1424 = vmatmul.mubr.bf16.vlgmr.msra.gmra.mxu0 %v1505_v10  ;;  %1440 = vmatmul.mubr.bf16.vlgmr.msra.gmra.mxu1 %v1506_v11 }
  0x2e   : > { %1427 = vmatprep.mubr.bf16.mxu0 %v1507_v12  ;;  %1443 = vmatprep.mubr.bf16.mxu1 %v1508_v13 }
  0x35   : > { %1428 = vmatmul.mubr.bf16.gmra.mxu0 %v1509_v14  ;;  %1444 = vmatmul.mubr.bf16.gmra.mxu1 %v1510_v15 }
  0x36   : > { %1431 = vmatprep.mubr.bf16.mxu0 %v1511_v16  ;;  %1447 = vmatprep.mubr.bf16.mxu1 %v1512_v17 }
  0x3d   : > { %1432 = vmatmul.mubr.bf16.gmra.mxu0 %v1513_v18  ;;  %1448 = vmatmul.mubr.bf16.gmra.mxu1 %v1514_v19 }
  0x3e   : > { %1435 = vmatprep.mubr.bf16.mxu0 %v1515_v20  ;;  %1451 = vmatprep.mubr.bf16.mxu1 %v1516_v21 }
  0x45   : > { %1436 = vmatmul.mubr.bf16.gmra.mxu0 %v1517_v22  ;;  %1452 = vmatmul.mubr.bf16.gmra.mxu1 %v1518_v23 }
  0xed   : > { %v1425_v25 = vpop.f32.mrf.mxu0  ;;  %v1441_v26 = vpop.f32.mrf.mxu1 }
  0xee   : > { %v789_v27 = vadd.f32 %v1425_v25, %v1634_v24  ;;  %v805_v28 = vadd.f32 %v1441_v26, %v1634_v24 }
  0xef   : > { %v554_v29 = vpop.f32.mrf.mxu0  ;;  %v618_v30 = vpop.f32.mrf.mxu1 }
  0xf0   : > { %vm821_vm0 = vcmp.gt.f32.partialorder %v789_v27, 0.0  ;;  %v853_v31 = vmul.f32 0.2, %v789_v27  ;;  %vm837_vm1 = vcmp.gt.f32.partialorder %v805_v28, 0.0  ;;  %v869_v32 = vmul.f32 0.2, %v805_v28 }
  0xf1   : > { %v787_v33 = vadd.f32 %v1634_v24, %v554_v29  ;;  %v803_v34 = vadd.f32 %v1634_v24, %v618_v30  ;;  %v1426_v35 = vpop.f32.mrf.mxu0  ;;  %v1442_v36 = vpop.f32.mrf.mxu1 }
  0xf2   : > { %v885_v37 = vsel %vm821_vm0, %v789_v27, %v853_v31  ;;  %v790_v38 = vadd.f32 %v1426_v35, %v1634_v24  ;;  %v806_v39 = vadd.f32 %v1442_v36, %v1634_v24  ;;  %v901_v40 = vsel %vm837_vm1, %v805_v28, %v869_v32 }
  0xf3   : > { %vm819_vm2 = vcmp.gt.f32.partialorder %v787_v33, 0.0  ;;  %v851_v41 = vmul.f32 0.2, %v787_v33  ;;  %vm835_vm3 = vcmp.gt.f32.partialorder %v803_v34, 0.0  ;;  %v557_v42 = vpop.f32.mrf.mxu0  ;;  %v621_v43 = vpop.f32.mrf.mxu1  ;;  %v867_v47 = vmul.f32 0.2, %v803_v34 }
  0xf4   : > { %vm822_vm4 = vcmp.gt.f32.partialorder %v790_v38, 0.0  ;;  %v854_v44 = vmul.f32 0.2, %v790_v38  ;;  %vm838_vm5 = vcmp.gt.f32.partialorder %v806_v39, 0.0  ;;  %v870_v45 = vmul.f32 0.2, %v806_v39 }
  0xf5   : > { %v883_v46 = vsel %vm819_vm2, %v787_v33, %v851_v41  ;;  %v788_v48 = vadd.f32 %v1634_v24, %v557_v42  ;;  %v804_v49 = vadd.f32 %v1634_v24, %v621_v43  ;;  %v1429_v50 = vpop.f32.mrf.mxu0  ;;  %v1445_v51 = vpop.f32.mrf.mxu1  ;;  %v899_v63 = vsel %vm835_vm3, %v803_v34, %v867_v47 }
  0xf6   : > { %v886_v52 = vsel %vm822_vm4, %v790_v38, %v854_v44  ;;  %v902_v53 = vsel %vm838_vm5, %v806_v39, %v870_v45  ;;  %v793_v54 = vadd.f32 %v1429_v50, %v1634_v24  ;;  %v809_v55 = vadd.f32 %v1445_v51, %v1634_v24 }
  0xf7   : > { %v1296_v56 = vpack.c.bf16 %v886_v52, %v885_v37  ;;  %v1336_v57 = vpack.c.bf16 %v902_v53, %v901_v40  ;;  %vm820_vm6 = vcmp.gt.f32.partialorder %v788_v48, 0.0  ;;  %v852_v58 = vmul.f32 0.2, %v788_v48  ;;  %v570_v59 = vpop.f32.mrf.mxu0  ;;  %v634_v60 = vpop.f32.mrf.mxu1 }
  0xf8   : > { %vm836_vm7 = vcmp.gt.f32.partialorder %v804_v49, 0.0  ;;  %v868_v61 = vmul.f32 0.2, %v804_v49  ;;  %vm825_vm8 = vcmp.gt.f32.partialorder %v793_v54, 0.0  ;;  %v857_v62 = vmul.f32 0.2, %v793_v54 }
  0xf9   : > { %1368 = vst [vmem:[%s1649_s17 + $0x8] sm:$0xff] %v1296_v56   ;;  %1376 = vst [vmem:[%s1649_s17 + $0x48] sm:$0xff] %v1336_v57   ;;  %v884_v0 = vsel %vm820_vm6, %v788_v48, %v852_v58  ;;  %v873_v1 = vmul.f32 0.2, %v809_v55  ;;  %v791_v2 = vadd.f32 %v1634_v24, %v570_v59  ;;  %v1430_v3 = vpop.f32.mrf.mxu0  ;;  %v1446_v4 = vpop.f32.mrf.mxu1  ;;  %vm841_vm9 = vcmp.gt.f32.partialorder %v809_v55, 0.0 }
  0xfa   : > { %v1291_v5 = vpack.c.bf16 %v884_v0, %v883_v46  ;;  %v900_v6 = vsel %vm836_vm7, %v804_v49, %v868_v61  ;;  %v807_v7 = vadd.f32 %v1634_v24, %v634_v60  ;;  %v889_v9 = vsel %vm825_vm8, %v793_v54, %v857_v62 }
  0xfb   : > { %v1331_v8 = vpack.c.bf16 %v900_v6, %v899_v63  ;;  %vm823_vm10 = vcmp.gt.f32.partialorder %v791_v2, 0.0  ;;  %v855_v10 = vmul.f32 0.2, %v791_v2  ;;  %v573_v11 = vpop.f32.mrf.mxu0  ;;  %v637_v12 = vpop.f32.mrf.mxu1  ;;  %v794_v14 = vadd.f32 %v1430_v3, %v1634_v24 }
  0xfc   : > { %1292 = vst [vmem:[%s1649_s17] sm:$0xff] %v1291_v5   ;;  %vm839_vm11 = vcmp.gt.f32.partialorder %v807_v7, 0.0  ;;  %v871_v13 = vmul.f32 0.2, %v807_v7  ;;  %v810_v15 = vadd.f32 %v1446_v4, %v1634_v24  ;;  %v905_v16 = vsel %vm841_vm9, %v809_v55, %v873_v1 }
  0xfd   : > { %1375 = vst [vmem:[%s1649_s17 + $0x40] sm:$0xff] %v1331_v8   ;;  %v887_v17 = vsel %vm823_vm10, %v791_v2, %v855_v10  ;;  %v792_v18 = vadd.f32 %v1634_v24, %v573_v11  ;;  %v808_v19 = vadd.f32 %v1634_v24, %v637_v12  ;;  %v1433_v20 = vpop.f32.mrf.mxu0  ;;  %v1449_v21 = vpop.f32.mrf.mxu1  ;;  %vm826_vm12 = vcmp.gt.f32.partialorder %v794_v14, 0.0 }
  0xfe   : > { %v903_v22 = vsel %vm839_vm11, %v807_v7, %v871_v13  ;;  %v858_v23 = vmul.f32 0.2, %v794_v14  ;;  %vm842_vm13 = vcmp.gt.f32.partialorder %v810_v15, 0.0  ;;  %v874_v25 = vmul.f32 0.2, %v810_v15 }
  0xff   : > { %vm824_vm14 = vcmp.gt.f32.partialorder %v792_v18, 0.0  ;;  %v856_v26 = vmul.f32 0.2, %v792_v18  ;;  %vm840_vm15 = vcmp.gt.f32.partialorder %v808_v19, 0.0  ;;  %v586_v27 = vpop.f32.mrf.mxu0  ;;  %v650_v28 = vpop.f32.mrf.mxu1  ;;  %v872_v30 = vmul.f32 0.2, %v808_v19 }
 0x100   : > { %v890_v29 = vsel %vm826_vm12, %v794_v14, %v858_v23  ;;  %v797_v31 = vadd.f32 %v1433_v20, %v1634_v24  ;;  %v813_v32 = vadd.f32 %v1449_v21, %v1634_v24  ;;  %v906_v34 = vsel %vm842_vm13, %v810_v15, %v874_v25 }
 0x101   : > { %v1306_v33 = vpack.c.bf16 %v890_v29, %v889_v9  ;;  %v888_v35 = vsel %vm824_vm14, %v792_v18, %v856_v26  ;;  %v795_v36 = vadd.f32 %v1634_v24, %v586_v27  ;;  %v1434_v37 = vpop.f32.mrf.mxu0  ;;  %v1450_v38 = vpop.f32.mrf.mxu1  ;;  %v1346_v39 = vpack.c.bf16 %v906_v34, %v905_v16 }
 0x102   : > { %v1301_v40 = vpack.c.bf16 %v888_v35, %v887_v17  ;;  %v904_v41 = vsel %vm840_vm15, %v808_v19, %v872_v30  ;;  %vm829_vm0 = vcmp.gt.f32.partialorder %v797_v31, 0.0  ;;  %v861_v43 = vmul.f32 0.2, %v797_v31 }
 0x103   : > { %1370 = vst [vmem:[%s1649_s17 + $0x18] sm:$0xff] %v1306_v33   ;;  %v1341_v42 = vpack.c.bf16 %v904_v41, %v903_v22  ;;  %vm845_vm1 = vcmp.gt.f32.partialorder %v813_v32, 0.0  ;;  %v877_v44 = vmul.f32 0.2, %v813_v32  ;;  %v589_v45 = vpop.f32.mrf.mxu0  ;;  %v653_v46 = vpop.f32.mrf.mxu1  ;;  %1378 = vst [vmem:[%s1649_s17 + $0x58] sm:$0xff] %v1346_v39   ;;  %vm827_vm2 = vcmp.gt.f32.partialorder %v795_v36, 0.0 }
 0x104   : > { %1369 = vst [vmem:[%s1649_s17 + $0x10] sm:$0xff] %v1301_v40   ;;  %v859_v47 = vmul.f32 0.2, %v795_v36  ;;  %v811_v48 = vadd.f32 %v1634_v24, %v650_v28  ;;  %v798_v49 = vadd.f32 %v1434_v37, %v1634_v24  ;;  %v893_v50 = vsel %vm829_vm0, %v797_v31, %v861_v43 }
 0x105   : > { %1377 = vst [vmem:[%s1649_s17 + $0x50] sm:$0xff] %v1341_v42   ;;  %v814_v51 = vadd.f32 %v1450_v38, %v1634_v24  ;;  %v796_v52 = vadd.f32 %v1634_v24, %v589_v45  ;;  %v1437_v53 = vpop.f32.mrf.mxu0  ;;  %v1453_v54 = vpop.f32.mrf.mxu1  ;;  %v909_v55 = vsel %vm845_vm1, %v813_v32, %v877_v44  ;;  %v812_v63 = vadd.f32 %v1634_v24, %v653_v46 }
 0x106   : > { %v891_v56 = vsel %vm827_vm2, %v795_v36, %v859_v47  ;;  %vm843_vm3 = vcmp.gt.f32.partialorder %v811_v48, 0.0  ;;  %vm830_vm4 = vcmp.gt.f32.partialorder %v798_v49, 0.0  ;;  %v862_v57 = vmul.f32 0.2, %v798_v49 }
 0x107   : > { %vm846_vm5 = vcmp.gt.f32.partialorder %v814_v51, 0.0  ;;  %v878_v58 = vmul.f32 0.2, %v814_v51  ;;  %vm828_vm6 = vcmp.gt.f32.partialorder %v796_v52, 0.0  ;;  %v602_v59 = vpop.f32.mrf.mxu0  ;;  %v666_v60 = vpop.f32.mrf.mxu1  ;;  %v875_v61 = vmul.f32 0.2, %v811_v48 }
 0x108   : > { %v860_v62 = vmul.f32 0.2, %v796_v52  ;;  %v801_v0 = vadd.f32 %v1437_v53, %v1634_v24  ;;  %v894_v1 = vsel %vm830_vm4, %v798_v49, %v862_v57  ;;  %v817_v3 = vadd.f32 %v1453_v54, %v1634_v24 }
 0x109   : > { %v910_v2 = vsel %vm846_vm5, %v814_v51, %v878_v58  ;;  %v799_v4 = vadd.f32 %v1634_v24, %v602_v59  ;;  %v1438_v5 = vpop.f32.mrf.mxu0  ;;  %v1454_v6 = vpop.f32.mrf.mxu1  ;;  %v1316_v7 = vpack.c.bf16 %v894_v1, %v893_v50  ;;  %vm844_vm7 = vcmp.gt.f32.partialorder %v812_v63, 0.0 }
 0x10a   : > { %v1356_v8 = vpack.c.bf16 %v910_v2, %v909_v55  ;;  %v892_v9 = vsel %vm828_vm6, %v796_v52, %v860_v62  ;;  %v876_v11 = vmul.f32 0.2, %v812_v63  ;;  %v865_v12 = vmul.f32 0.2, %v801_v0 }
 0x10b   : > { %v1311_v10 = vpack.c.bf16 %v892_v9, %v891_v56  ;;  %v907_v13 = vsel %vm843_vm3, %v811_v48, %v875_v61  ;;  %1372 = vst [vmem:[%s1649_s17 + $0x28] sm:$0xff] %v1316_v7   ;;  %vm833_vm8 = vcmp.gt.f32.partialorder %v801_v0, 0.0  ;;  %v881_v15 = vmul.f32 0.2, %v817_v3  ;;  %v605_v18 = vpop.f32.mrf.mxu0  ;;  %v669_v19 = vpop.f32.mrf.mxu1 }
 0x10c   : > { %1380 = vst [vmem:[%s1649_s17 + $0x68] sm:$0xff] %v1356_v8   ;;  %v908_v14 = vsel %vm844_vm7, %v812_v63, %v876_v11  ;;  %v815_v16 = vadd.f32 %v1634_v24, %v666_v60  ;;  %v802_v17 = vadd.f32 %v1438_v5, %v1634_v24  ;;  %vm849_vm9 = vcmp.gt.f32.partialorder %v817_v3, 0.0 }
 0x10d   : > { %1371 = vst [vmem:[%s1649_s17 + $0x20] sm:$0xff] %v1311_v10   ;;  %v1351_v20 = vpack.c.bf16 %v908_v14, %v907_v13  ;;  %vm831_vm10 = vcmp.gt.f32.partialorder %v799_v4, 0.0  ;;  %v818_v21 = vadd.f32 %v1454_v6, %v1634_v24  ;;  %v897_v22 = vsel %vm833_vm8, %v801_v0, %v865_v12 }
 0x10e   : > { %v863_v23 = vmul.f32 0.2, %v799_v4  ;;  %vm834_vm11 = vcmp.gt.f32.partialorder %v802_v17, 0.0  ;;  %v866_v25 = vmul.f32 0.2, %v802_v17  ;;  %v800_v27 = vadd.f32 %v1634_v24, %v605_v18 }
 0x10f   : > { %1379 = vst [vmem:[%s1649_s17 + $0x60] sm:$0xff] %v1351_v20   ;;  %vm850_vm12 = vcmp.gt.f32.partialorder %v818_v21, 0.0  ;;  %v882_v26 = vmul.f32 0.2, %v818_v21  ;;  %v816_v28 = vadd.f32 %v1634_v24, %v669_v19  ;;  %v913_v29 = vsel %vm849_vm9, %v817_v3, %v881_v15 }
 0x110   : > { %vm847_vm13 = vcmp.gt.f32.partialorder %v815_v16, 0.0  ;;  %v879_v30 = vmul.f32 0.2, %v815_v16  ;;  %v898_v31 = vsel %vm834_vm11, %v802_v17, %v866_v25  ;;  %vm832_vm14 = vcmp.gt.f32.partialorder %v800_v27, 0.0 }
 0x111   : > { %v1326_v32 = vpack.c.bf16 %v898_v31, %v897_v22  ;;  %v914_v33 = vsel %vm850_vm12, %v818_v21, %v882_v26  ;;  %v864_v34 = vmul.f32 0.2, %v800_v27  ;;  %vm848_vm15 = vcmp.gt.f32.partialorder %v816_v28, 0.0 }
 0x112   : > { %v1366_v35 = vpack.c.bf16 %v914_v33, %v913_v29  ;;  %v880_v36 = vmul.f32 0.2, %v816_v28  ;;  %v895_v37 = vsel %vm831_vm10, %v799_v4, %v863_v23  ;;  %v911_v39 = vsel %vm847_vm13, %v815_v16, %v879_v30 }
 0x113   : > { %1374 = vst [vmem:[%s1649_s17 + $0x38] sm:$0xff] %v1326_v32   ;;  %v896_v38 = vsel %vm832_vm14, %v800_v27, %v864_v34 }
 0x114   : > { %1382 = vst [vmem:[%s1649_s17 + $0x78] sm:$0xff] %v1366_v35   ;;  %v1321_v24 = vpack.c.bf16 %v896_v38, %v895_v37  ;;  %v912_v40 = vsel %vm848_vm15, %v816_v28, %v880_v36 }
 0x115   : > { %v1361_v41 = vpack.c.bf16 %v912_v40, %v911_v39 }
 0x116   : > { %1373 = vst [vmem:[%s1649_s17 + $0x30] sm:$0xff] %v1321_v24  }
 0x117   : > { %1381 = vst [vmem:[%s1649_s17 + $0x70] sm:$0xff] %v1361_v41  }
 0x118 PF: > { %s13_s14 = sadd.s32 1, %s1541_s14   ;;  %s1708_s12 = smov %s1537_s13 }
 0x119   : > { %p10_p5 = scmp.ge.s32.totalorder %s13_s14, 6   ;;  %s1709_s13 = smov %s1711_s15 }
 0x11b   :  { %12 = sbr.rel (!%p10_p5) target bundleno = 2 (0x2), region = 76 }

// kernel: fwd.6
= control target key start
LH: loop header
LB: loop body
LE: loop exit
PB: predicated region body
PF: predicated region fallthrough
CT: control target
= control target key end

     0   :  { %s4745_s18 = smov 0   ;;  %s4747_s19 = smov 0   ;;  %s5776_s0 = inlined_call_operand.vmem [shape: bf16[128,4096], index: 0, kind: input, shape index: {}]   ;;  %s5777_s1 = inlined_call_operand.vmem [shape: bf16[4096,128], index: 1, kind: input, shape index: {}]   ;;  %s5778_s2 = inlined_call_operand.vmem [shape: f32[1,128], index: 2, kind: input, shape index: {}]   ;;  %s5779_s3 = inlined_call_operand.vmem [shape: f32[1,128], index: 3, kind: input, shape index: {}]   ;;  %s5780_s4 = inlined_call_operand.vmem [shape: f32[1,128], index: 4, kind: input, shape index: {}]   ;;  %s5781_s5 = inlined_call_operand.vmem [shape: bf16[128,128], index: 5, kind: output, shape index: {}]  }
   0x1   :  { %s4749_s20 = smov 0   ;;  %s4751_s21 = smov 0  }
   0x2   :  { %s4753_s22 = smov 0  }
   0x3 LB: > { %s24_s23 = sadd.s32 1, %s4708_s21  ;;  %p41_p1 = scmp.ne.s32.totalorder %s4700_s19, %s4696_s18  ;;  %s4712_s22 = sphi %s4753_s22, %s15_s22   ;;  %s4708_s21 = sphi %s4751_s21, %s5843_s21   ;;  %s4704_s20 = sphi %s4749_s20, %s5842_s20   ;;  %s4700_s19 = sphi %s4747_s19, %s5841_s19   ;;  %s4696_s18 = sphi %s4745_s18, %s5840_s18  }
   0x4   : > { %p25_p0 = scmp.ge.s32.totalorder %s24_s23, 2  ;;  %p42_p2 = scmp.eq.s32.totalorder %s4712_s22, 0 }
   0x5   : > { %s34_s25 = sadd.s32 1, %s4700_s19  ;;  %p3641_p5 = scmp.ge.s32.totalorder %s4712_s22, 2 }
   0x6   : > { %s5845_s23 = smov (%p25_p0, %s24_s23), 0  ;;  %p43_p3 = por %p42_p2, %p41_p1 }
   0x7   : > { %s31_s24 = ssub.s32 %s4708_s21, %s5845_s23  ;;  %217 = sbr.rel (%p3641_p5) target bundleno = 80 (0x50), region = 28 }
   0x8   : > { %p32_p4 = scmp.eq.s32.totalorder %s31_s24, 0 }
   0xa   : > { %s4780_s26 = scalar_select %p32_p4, %s4700_s19, %s34_s25  }
   0xc   : > { %220 = sbr.rel (!%p43_p3) target bundleno = 80 (0x50), region = 32  ;;  %s222_s27 = sand.u32 (%p43_p3), 1, %s4700_s19  }
   0xd   : > { %s3927_s28 = sshll.u32 (%p43_p3), %s4708_s21, 6  ;;  %s3642_s29 = sshll.u32 (%p43_p3), %s222_s27, 10 }
   0xe   : > { %s4788_s7 = scalar_lea.vmem (%p43_p3), %s5776_s0, %s3927_s28  ;;  %s4793_s8 = scalar_lea.vmem (%p43_p3), [#allocation3], %s3642_s29 }
   0xf   : > { %v240_v0 = vld [vmem:[%s4788_s7] sm:$0xff] (%p43_p3)  ;;  %v242_v1 = vld [vmem:[%s4788_s7 + $0x8] sm:$0xff] (%p43_p3)  ;;  %v244_v2 = vld [vmem:[%s4788_s7 + $0x10] sm:$0xff] (%p43_p3) }
  0x10   : > { %241 = vst [vmem:[%s4793_s8] sm:$0xff] (%p43_p3), %v240_v0  ;;  %243 = vst [vmem:[%s4793_s8 + $0x8] sm:$0xff] (%p43_p3), %v242_v1  ;;  %v246_v3 = vld [vmem:[%s4788_s7 + $0x18] sm:$0xff] (%p43_p3)  ;;  %v248_v4 = vld [vmem:[%s4788_s7 + $0x20] sm:$0xff] (%p43_p3) }
  0x11   : > { %245 = vst [vmem:[%s4793_s8 + $0x10] sm:$0xff] %v244_v2  ;;  %v250_v5 = vld [vmem:[%s4788_s7 + $0x28] sm:$0xff]  ;;  %247 = vst [vmem:[%s4793_s8 + $0x18] sm:$0xff] %v246_v3  ;;  %v252_v6 = vld [vmem:[%s4788_s7 + $0x30] sm:$0xff] }
  0x12   : > { %249 = vst [vmem:[%s4793_s8 + $0x20] sm:$0xff] %v248_v4  ;;  %251 = vst [vmem:[%s4793_s8 + $0x28] sm:$0xff] %v250_v5  ;;  %v254_v7 = vld [vmem:[%s4788_s7 + $0x38] sm:$0xff]  ;;  %v256_v8 = vld [vmem:[%s4788_s7 + $0x80] sm:$0xff] }
  0x13   : > { %253 = vst [vmem:[%s4793_s8 + $0x30] sm:$0xff] %v252_v6  ;;  %255 = vst [vmem:[%s4793_s8 + $0x38] sm:$0xff] %v254_v7  ;;  %v258_v9 = vld [vmem:[%s4788_s7 + $0x88] sm:$0xff]  ;;  %v260_v10 = vld [vmem:[%s4788_s7 + $0x90] sm:$0xff] }
  0x14   : > { %257 = vst [vmem:[%s4793_s8 + $0x40] sm:$0xff] %v256_v8  ;;  %v262_v11 = vld [vmem:[%s4788_s7 + $0x98] sm:$0xff]  ;;  %259 = vst [vmem:[%s4793_s8 + $0x48] sm:$0xff] %v258_v9  ;;  %v264_v12 = vld [vmem:[%s4788_s7 + $0xa0] sm:$0xff] }
  0x15   : > { %261 = vst [vmem:[%s4793_s8 + $0x50] sm:$0xff] %v260_v10  ;;  %263 = vst [vmem:[%s4793_s8 + $0x58] sm:$0xff] %v262_v11  ;;  %v266_v13 = vld [vmem:[%s4788_s7 + $0xa8] sm:$0xff]  ;;  %v268_v14 = vld [vmem:[%s4788_s7 + $0xb0] sm:$0xff] }
  0x16   : > { %265 = vst [vmem:[%s4793_s8 + $0x60] sm:$0xff] %v264_v12  ;;  %267 = vst [vmem:[%s4793_s8 + $0x68] sm:$0xff] %v266_v13  ;;  %v270_v15 = vld [vmem:[%s4788_s7 + $0xb8] sm:$0xff]  ;;  %v272_v16 = vld [vmem:[%s4788_s7 + $0x100] sm:$0xff] }
  0x17   : > { %269 = vst [vmem:[%s4793_s8 + $0x70] sm:$0xff] %v268_v14  ;;  %v274_v17 = vld [vmem:[%s4788_s7 + $0x108] sm:$0xff]  ;;  %271 = vst [vmem:[%s4793_s8 + $0x78] sm:$0xff] %v270_v15  ;;  %v276_v18 = vld [vmem:[%s4788_s7 + $0x110] sm:$0xff] }
  0x18   : > { %273 = vst [vmem:[%s4793_s8 + $0x80] sm:$0xff] %v272_v16  ;;  %275 = vst [vmem:[%s4793_s8 + $0x88] sm:$0xff] %v274_v17  ;;  %v278_v19 = vld [vmem:[%s4788_s7 + $0x118] sm:$0xff]  ;;  %v280_v20 = vld [vmem:[%s4788_s7 + $0x120] sm:$0xff] }
  0x19   : > { %277 = vst [vmem:[%s4793_s8 + $0x90] sm:$0xff] %v276_v18  ;;  %279 = vst [vmem:[%s4793_s8 + $0x98] sm:$0xff] %v278_v19  ;;  %v282_v21 = vld [vmem:[%s4788_s7 + $0x128] sm:$0xff]  ;;  %v284_v22 = vld [vmem:[%s4788_s7 + $0x130] sm:$0xff] }
  0x1a   : > { %281 = vst [vmem:[%s4793_s8 + $0xa0] sm:$0xff] %v280_v20  ;;  %v286_v23 = vld [vmem:[%s4788_s7 + $0x138] sm:$0xff]  ;;  %283 = vst [vmem:[%s4793_s8 + $0xa8] sm:$0xff] %v282_v21  ;;  %v288_v24 = vld [vmem:[%s4788_s7 + $0x180] sm:$0xff] }
  0x1b   : > { %285 = vst [vmem:[%s4793_s8 + $0xb0] sm:$0xff] %v284_v22  ;;  %287 = vst [vmem:[%s4793_s8 + $0xb8] sm:$0xff] %v286_v23  ;;  %v290_v25 = vld [vmem:[%s4788_s7 + $0x188] sm:$0xff]  ;;  %v292_v26 = vld [vmem:[%s4788_s7 + $0x190] sm:$0xff] }
  0x1c   : > { %289 = vst [vmem:[%s4793_s8 + $0xc0] sm:$0xff] %v288_v24  ;;  %291 = vst [vmem:[%s4793_s8 + $0xc8] sm:$0xff] %v290_v25  ;;  %v294_v27 = vld [vmem:[%s4788_s7 + $0x198] sm:$0xff]  ;;  %v296_v28 = vld [vmem:[%s4788_s7 + $0x1a0] sm:$0xff] }
  0x1d   : > { %293 = vst [vmem:[%s4793_s8 + $0xd0] sm:$0xff] %v292_v26  ;;  %v298_v29 = vld [vmem:[%s4788_s7 + $0x1a8] sm:$0xff]  ;;  %295 = vst [vmem:[%s4793_s8 + $0xd8] sm:$0xff] %v294_v27  ;;  %v300_v30 = vld [vmem:[%s4788_s7 + $0x1b0] sm:$0xff] }
  0x1e   : > { %297 = vst [vmem:[%s4793_s8 + $0xe0] sm:$0xff] %v296_v28  ;;  %299 = vst [vmem:[%s4793_s8 + $0xe8] sm:$0xff] %v298_v29  ;;  %v302_v31 = vld [vmem:[%s4788_s7 + $0x1b8] sm:$0xff]  ;;  %v304_v32 = vld [vmem:[%s4788_s7 + $0x200] sm:$0xff] }
  0x1f   : > { %301 = vst [vmem:[%s4793_s8 + $0xf0] sm:$0xff] %v300_v30  ;;  %303 = vst [vmem:[%s4793_s8 + $0xf8] sm:$0xff] %v302_v31  ;;  %v306_v33 = vld [vmem:[%s4788_s7 + $0x208] sm:$0xff]  ;;  %v308_v34 = vld [vmem:[%s4788_s7 + $0x210] sm:$0xff] }
  0x20   : > { %305 = vst [vmem:[%s4793_s8 + $0x100] sm:$0xff] %v304_v32  ;;  %v310_v35 = vld [vmem:[%s4788_s7 + $0x218] sm:$0xff]  ;;  %307 = vst [vmem:[%s4793_s8 + $0x108] sm:$0xff] %v306_v33  ;;  %v312_v36 = vld [vmem:[%s4788_s7 + $0x220] sm:$0xff] }
  0x21   : > { %309 = vst [vmem:[%s4793_s8 + $0x110] sm:$0xff] %v308_v34  ;;  %311 = vst [vmem:[%s4793_s8 + $0x118] sm:$0xff] %v310_v35  ;;  %v314_v37 = vld [vmem:[%s4788_s7 + $0x228] sm:$0xff]  ;;  %v316_v38 = vld [vmem:[%s4788_s7 + $0x230] sm:$0xff] }
  0x22   : > { %313 = vst [vmem:[%s4793_s8 + $0x120] sm:$0xff] %v312_v36  ;;  %315 = vst [vmem:[%s4793_s8 + $0x128] sm:$0xff] %v314_v37  ;;  %v318_v39 = vld [vmem:[%s4788_s7 + $0x238] sm:$0xff]  ;;  %v320_v40 = vld [vmem:[%s4788_s7 + $0x280] sm:$0xff] }
  0x23   : > { %317 = vst [vmem:[%s4793_s8 + $0x130] sm:$0xff] %v316_v38  ;;  %v322_v41 = vld [vmem:[%s4788_s7 + $0x288] sm:$0xff]  ;;  %319 = vst [vmem:[%s4793_s8 + $0x138] sm:$0xff] %v318_v39  ;;  %v324_v42 = vld [vmem:[%s4788_s7 + $0x290] sm:$0xff] }
  0x24   : > { %321 = vst [vmem:[%s4793_s8 + $0x140] sm:$0xff] %v320_v40  ;;  %323 = vst [vmem:[%s4793_s8 + $0x148] sm:$0xff] %v322_v41  ;;  %v326_v43 = vld [vmem:[%s4788_s7 + $0x298] sm:$0xff]  ;;  %v328_v44 = vld [vmem:[%s4788_s7 + $0x2a0] sm:$0xff] }
  0x25   : > { %325 = vst [vmem:[%s4793_s8 + $0x150] sm:$0xff] %v324_v42  ;;  %327 = vst [vmem:[%s4793_s8 + $0x158] sm:$0xff] %v326_v43  ;;  %v330_v45 = vld [vmem:[%s4788_s7 + $0x2a8] sm:$0xff]  ;;  %v332_v46 = vld [vmem:[%s4788_s7 + $0x2b0] sm:$0xff] }
  0x26   : > { %329 = vst [vmem:[%s4793_s8 + $0x160] sm:$0xff] %v328_v44  ;;  %v334_v47 = vld [vmem:[%s4788_s7 + $0x2b8] sm:$0xff]  ;;  %331 = vst [vmem:[%s4793_s8 + $0x168] sm:$0xff] %v330_v45  ;;  %v336_v48 = vld [vmem:[%s4788_s7 + $0x300] sm:$0xff] }
  0x27   : > { %333 = vst [vmem:[%s4793_s8 + $0x170] sm:$0xff] %v332_v46  ;;  %335 = vst [vmem:[%s4793_s8 + $0x178] sm:$0xff] %v334_v47  ;;  %v338_v49 = vld [vmem:[%s4788_s7 + $0x308] sm:$0xff]  ;;  %v340_v50 = vld [vmem:[%s4788_s7 + $0x310] sm:$0xff] }
  0x28   : > { %337 = vst [vmem:[%s4793_s8 + $0x180] sm:$0xff] %v336_v48  ;;  %339 = vst [vmem:[%s4793_s8 + $0x188] sm:$0xff] %v338_v49  ;;  %v342_v51 = vld [vmem:[%s4788_s7 + $0x318] sm:$0xff]  ;;  %v344_v52 = vld [vmem:[%s4788_s7 + $0x320] sm:$0xff] }
  0x29   : > { %341 = vst [vmem:[%s4793_s8 + $0x190] sm:$0xff] %v340_v50  ;;  %v346_v53 = vld [vmem:[%s4788_s7 + $0x328] sm:$0xff]  ;;  %343 = vst [vmem:[%s4793_s8 + $0x198] sm:$0xff] %v342_v51  ;;  %v348_v54 = vld [vmem:[%s4788_s7 + $0x330] sm:$0xff] }
  0x2a   : > { %345 = vst [vmem:[%s4793_s8 + $0x1a0] sm:$0xff] %v344_v52  ;;  %347 = vst [vmem:[%s4793_s8 + $0x1a8] sm:$0xff] %v346_v53  ;;  %v350_v55 = vld [vmem:[%s4788_s7 + $0x338] sm:$0xff]  ;;  %v352_v56 = vld [vmem:[%s4788_s7 + $0x380] sm:$0xff] }
  0x2b   : > { %349 = vst [vmem:[%s4793_s8 + $0x1b0] sm:$0xff] %v348_v54  ;;  %351 = vst [vmem:[%s4793_s8 + $0x1b8] sm:$0xff] %v350_v55  ;;  %v354_v57 = vld [vmem:[%s4788_s7 + $0x388] sm:$0xff]  ;;  %v356_v58 = vld [vmem:[%s4788_s7 + $0x390] sm:$0xff] }
  0x2c   : > { %353 = vst [vmem:[%s4793_s8 + $0x1c0] sm:$0xff] %v352_v56  ;;  %v358_v59 = vld [vmem:[%s4788_s7 + $0x398] sm:$0xff]  ;;  %355 = vst [vmem:[%s4793_s8 + $0x1c8] sm:$0xff] %v354_v57  ;;  %v360_v60 = vld [vmem:[%s4788_s7 + $0x3a0] sm:$0xff] }
  0x2d   : > { %357 = vst [vmem:[%s4793_s8 + $0x1d0] sm:$0xff] %v356_v58  ;;  %359 = vst [vmem:[%s4793_s8 + $0x1d8] sm:$0xff] %v358_v59  ;;  %v362_v61 = vld [vmem:[%s4788_s7 + $0x3a8] sm:$0xff]  ;;  %v364_v62 = vld [vmem:[%s4788_s7 + $0x3b0] sm:$0xff] }
  0x2e   : > { %361 = vst [vmem:[%s4793_s8 + $0x1e0] sm:$0xff] %v360_v60  ;;  %363 = vst [vmem:[%s4793_s8 + $0x1e8] sm:$0xff] %v362_v61  ;;  %v366_v63 = vld [vmem:[%s4788_s7 + $0x3b8] sm:$0xff]  ;;  %v368_v0 = vld [vmem:[%s4788_s7 + $0x400] sm:$0xff] }
  0x2f   : > { %365 = vst [vmem:[%s4793_s8 + $0x1f0] sm:$0xff] %v364_v62  ;;  %v370_v1 = vld [vmem:[%s4788_s7 + $0x408] sm:$0xff]  ;;  %367 = vst [vmem:[%s4793_s8 + $0x1f8] sm:$0xff] %v366_v63  ;;  %v372_v2 = vld [vmem:[%s4788_s7 + $0x410] sm:$0xff] }
  0x30   : > { %369 = vst [vmem:[%s4793_s8 + $0x200] sm:$0xff] %v368_v0  ;;  %371 = vst [vmem:[%s4793_s8 + $0x208] sm:$0xff] %v370_v1  ;;  %v374_v3 = vld [vmem:[%s4788_s7 + $0x418] sm:$0xff]  ;;  %v376_v4 = vld [vmem:[%s4788_s7 + $0x420] sm:$0xff] }
  0x31   : > { %373 = vst [vmem:[%s4793_s8 + $0x210] sm:$0xff] %v372_v2  ;;  %375 = vst [vmem:[%s4793_s8 + $0x218] sm:$0xff] %v374_v3  ;;  %v378_v5 = vld [vmem:[%s4788_s7 + $0x428] sm:$0xff]  ;;  %v380_v6 = vld [vmem:[%s4788_s7 + $0x430] sm:$0xff] }
  0x32   : > { %377 = vst [vmem:[%s4793_s8 + $0x220] sm:$0xff] %v376_v4  ;;  %v382_v7 = vld [vmem:[%s4788_s7 + $0x438] sm:$0xff]  ;;  %379 = vst [vmem:[%s4793_s8 + $0x228] sm:$0xff] %v378_v5  ;;  %v384_v8 = vld [vmem:[%s4788_s7 + $0x480] sm:$0xff] }
  0x33   : > { %381 = vst [vmem:[%s4793_s8 + $0x230] sm:$0xff] %v380_v6  ;;  %383 = vst [vmem:[%s4793_s8 + $0x238] sm:$0xff] %v382_v7  ;;  %v386_v9 = vld [vmem:[%s4788_s7 + $0x488] sm:$0xff]  ;;  %v388_v10 = vld [vmem:[%s4788_s7 + $0x490] sm:$0xff] }
  0x34   : > { %385 = vst [vmem:[%s4793_s8 + $0x240] sm:$0xff] %v384_v8  ;;  %387 = vst [vmem:[%s4793_s8 + $0x248] sm:$0xff] %v386_v9  ;;  %v390_v11 = vld [vmem:[%s4788_s7 + $0x498] sm:$0xff]  ;;  %v392_v12 = vld [vmem:[%s4788_s7 + $0x4a0] sm:$0xff] }
  0x35   : > { %389 = vst [vmem:[%s4793_s8 + $0x250] sm:$0xff] %v388_v10  ;;  %v394_v13 = vld [vmem:[%s4788_s7 + $0x4a8] sm:$0xff]  ;;  %391 = vst [vmem:[%s4793_s8 + $0x258] sm:$0xff] %v390_v11  ;;  %v396_v14 = vld [vmem:[%s4788_s7 + $0x4b0] sm:$0xff] }
  0x36   : > { %393 = vst [vmem:[%s4793_s8 + $0x260] sm:$0xff] %v392_v12  ;;  %395 = vst [vmem:[%s4793_s8 + $0x268] sm:$0xff] %v394_v13  ;;  %v398_v15 = vld [vmem:[%s4788_s7 + $0x4b8] sm:$0xff]  ;;  %v400_v16 = vld [vmem:[%s4788_s7 + $0x500] sm:$0xff] }
  0x37   : > { %397 = vst [vmem:[%s4793_s8 + $0x270] sm:$0xff] %v396_v14  ;;  %399 = vst [vmem:[%s4793_s8 + $0x278] sm:$0xff] %v398_v15  ;;  %v402_v17 = vld [vmem:[%s4788_s7 + $0x508] sm:$0xff]  ;;  %v404_v18 = vld [vmem:[%s4788_s7 + $0x510] sm:$0xff] }
  0x38   : > { %401 = vst [vmem:[%s4793_s8 + $0x280] sm:$0xff] %v400_v16  ;;  %v406_v19 = vld [vmem:[%s4788_s7 + $0x518] sm:$0xff]  ;;  %403 = vst [vmem:[%s4793_s8 + $0x288] sm:$0xff] %v402_v17  ;;  %v408_v20 = vld [vmem:[%s4788_s7 + $0x520] sm:$0xff] }
  0x39   : > { %405 = vst [vmem:[%s4793_s8 + $0x290] sm:$0xff] %v404_v18  ;;  %407 = vst [vmem:[%s4793_s8 + $0x298] sm:$0xff] %v406_v19  ;;  %v410_v21 = vld [vmem:[%s4788_s7 + $0x528] sm:$0xff]  ;;  %v412_v22 = vld [vmem:[%s4788_s7 + $0x530] sm:$0xff] }
  0x3a   : > { %409 = vst [vmem:[%s4793_s8 + $0x2a0] sm:$0xff] %v408_v20  ;;  %411 = vst [vmem:[%s4793_s8 + $0x2a8] sm:$0xff] %v410_v21  ;;  %v414_v23 = vld [vmem:[%s4788_s7 + $0x538] sm:$0xff]  ;;  %v416_v24 = vld [vmem:[%s4788_s7 + $0x580] sm:$0xff] }
  0x3b   : > { %413 = vst [vmem:[%s4793_s8 + $0x2b0] sm:$0xff] %v412_v22  ;;  %v418_v25 = vld [vmem:[%s4788_s7 + $0x588] sm:$0xff]  ;;  %415 = vst [vmem:[%s4793_s8 + $0x2b8] sm:$0xff] %v414_v23  ;;  %v420_v26 = vld [vmem:[%s4788_s7 + $0x590] sm:$0xff] }
  0x3c   : > { %417 = vst [vmem:[%s4793_s8 + $0x2c0] sm:$0xff] %v416_v24  ;;  %419 = vst [vmem:[%s4793_s8 + $0x2c8] sm:$0xff] %v418_v25  ;;  %v422_v27 = vld [vmem:[%s4788_s7 + $0x598] sm:$0xff]  ;;  %v424_v28 = vld [vmem:[%s4788_s7 + $0x5a0] sm:$0xff] }
  0x3d   : > { %421 = vst [vmem:[%s4793_s8 + $0x2d0] sm:$0xff] %v420_v26  ;;  %423 = vst [vmem:[%s4793_s8 + $0x2d8] sm:$0xff] %v422_v27  ;;  %v426_v29 = vld [vmem:[%s4788_s7 + $0x5a8] sm:$0xff]  ;;  %v428_v30 = vld [vmem:[%s4788_s7 + $0x5b0] sm:$0xff] }
  0x3e   : > { %425 = vst [vmem:[%s4793_s8 + $0x2e0] sm:$0xff] %v424_v28  ;;  %v430_v31 = vld [vmem:[%s4788_s7 + $0x5b8] sm:$0xff]  ;;  %427 = vst [vmem:[%s4793_s8 + $0x2e8] sm:$0xff] %v426_v29  ;;  %v432_v32 = vld [vmem:[%s4788_s7 + $0x600] sm:$0xff] }
  0x3f   : > { %429 = vst [vmem:[%s4793_s8 + $0x2f0] sm:$0xff] %v428_v30  ;;  %431 = vst [vmem:[%s4793_s8 + $0x2f8] sm:$0xff] %v430_v31  ;;  %v434_v33 = vld [vmem:[%s4788_s7 + $0x608] sm:$0xff]  ;;  %v436_v34 = vld [vmem:[%s4788_s7 + $0x610] sm:$0xff] }
  0x40   : > { %433 = vst [vmem:[%s4793_s8 + $0x300] sm:$0xff] %v432_v32  ;;  %435 = vst [vmem:[%s4793_s8 + $0x308] sm:$0xff] %v434_v33  ;;  %v438_v35 = vld [vmem:[%s4788_s7 + $0x618] sm:$0xff]  ;;  %v440_v36 = vld [vmem:[%s4788_s7 + $0x620] sm:$0xff] }
  0x41   : > { %437 = vst [vmem:[%s4793_s8 + $0x310] sm:$0xff] %v436_v34  ;;  %v442_v37 = vld [vmem:[%s4788_s7 + $0x628] sm:$0xff]  ;;  %439 = vst [vmem:[%s4793_s8 + $0x318] sm:$0xff] %v438_v35  ;;  %v444_v38 = vld [vmem:[%s4788_s7 + $0x630] sm:$0xff] }
  0x42   : > { %441 = vst [vmem:[%s4793_s8 + $0x320] sm:$0xff] %v440_v36  ;;  %443 = vst [vmem:[%s4793_s8 + $0x328] sm:$0xff] %v442_v37  ;;  %v446_v39 = vld [vmem:[%s4788_s7 + $0x638] sm:$0xff]  ;;  %v448_v40 = vld [vmem:[%s4788_s7 + $0x680] sm:$0xff] }
  0x43   : > { %445 = vst [vmem:[%s4793_s8 + $0x330] sm:$0xff] %v444_v38  ;;  %447 = vst [vmem:[%s4793_s8 + $0x338] sm:$0xff] %v446_v39  ;;  %v450_v41 = vld [vmem:[%s4788_s7 + $0x688] sm:$0xff]  ;;  %v452_v42 = vld [vmem:[%s4788_s7 + $0x690] sm:$0xff] }
  0x44   : > { %449 = vst [vmem:[%s4793_s8 + $0x340] sm:$0xff] %v448_v40  ;;  %v454_v43 = vld [vmem:[%s4788_s7 + $0x698] sm:$0xff]  ;;  %451 = vst [vmem:[%s4793_s8 + $0x348] sm:$0xff] %v450_v41  ;;  %v456_v44 = vld [vmem:[%s4788_s7 + $0x6a0] sm:$0xff] }
  0x45   : > { %453 = vst [vmem:[%s4793_s8 + $0x350] sm:$0xff] %v452_v42  ;;  %455 = vst [vmem:[%s4793_s8 + $0x358] sm:$0xff] %v454_v43  ;;  %v458_v45 = vld [vmem:[%s4788_s7 + $0x6a8] sm:$0xff]  ;;  %v460_v46 = vld [vmem:[%s4788_s7 + $0x6b0] sm:$0xff] }
  0x46   : > { %457 = vst [vmem:[%s4793_s8 + $0x360] sm:$0xff] %v456_v44  ;;  %459 = vst [vmem:[%s4793_s8 + $0x368] sm:$0xff] %v458_v45  ;;  %v462_v47 = vld [vmem:[%s4788_s7 + $0x6b8] sm:$0xff]  ;;  %v464_v48 = vld [vmem:[%s4788_s7 + $0x700] sm:$0xff] }
  0x47   : > { %461 = vst [vmem:[%s4793_s8 + $0x370] sm:$0xff] %v460_v46  ;;  %v466_v49 = vld [vmem:[%s4788_s7 + $0x708] sm:$0xff]  ;;  %463 = vst [vmem:[%s4793_s8 + $0x378] sm:$0xff] %v462_v47  ;;  %v468_v50 = vld [vmem:[%s4788_s7 + $0x710] sm:$0xff] }
  0x48   : > { %465 = vst [vmem:[%s4793_s8 + $0x380] sm:$0xff] %v464_v48  ;;  %467 = vst [vmem:[%s4793_s8 + $0x388] sm:$0xff] %v466_v49  ;;  %v470_v51 = vld [vmem:[%s4788_s7 + $0x718] sm:$0xff]  ;;  %v472_v52 = vld [vmem:[%s4788_s7 + $0x720] sm:$0xff] }
  0x49   : > { %469 = vst [vmem:[%s4793_s8 + $0x390] sm:$0xff] %v468_v50  ;;  %471 = vst [vmem:[%s4793_s8 + $0x398] sm:$0xff] %v470_v51  ;;  %v474_v53 = vld [vmem:[%s4788_s7 + $0x728] sm:$0xff]  ;;  %v476_v54 = vld [vmem:[%s4788_s7 + $0x730] sm:$0xff] }
  0x4a   : > { %473 = vst [vmem:[%s4793_s8 + $0x3a0] sm:$0xff] %v472_v52  ;;  %v478_v55 = vld [vmem:[%s4788_s7 + $0x738] sm:$0xff]  ;;  %475 = vst [vmem:[%s4793_s8 + $0x3a8] sm:$0xff] %v474_v53  ;;  %v480_v56 = vld [vmem:[%s4788_s7 + $0x780] sm:$0xff] }
  0x4b   : > { %477 = vst [vmem:[%s4793_s8 + $0x3b0] sm:$0xff] %v476_v54  ;;  %479 = vst [vmem:[%s4793_s8 + $0x3b8] sm:$0xff] %v478_v55  ;;  %v482_v57 = vld [vmem:[%s4788_s7 + $0x788] sm:$0xff]  ;;  %v484_v58 = vld [vmem:[%s4788_s7 + $0x790] sm:$0xff] }
  0x4c   : > { %481 = vst [vmem:[%s4793_s8 + $0x3c0] sm:$0xff] %v480_v56  ;;  %483 = vst [vmem:[%s4793_s8 + $0x3c8] sm:$0xff] %v482_v57  ;;  %v486_v59 = vld [vmem:[%s4788_s7 + $0x798] sm:$0xff]  ;;  %v488_v60 = vld [vmem:[%s4788_s7 + $0x7a0] sm:$0xff] }
  0x4d   : > { %485 = vst [vmem:[%s4793_s8 + $0x3d0] sm:$0xff] %v484_v58  ;;  %v490_v61 = vld [vmem:[%s4788_s7 + $0x7a8] sm:$0xff]  ;;  %487 = vst [vmem:[%s4793_s8 + $0x3d8] sm:$0xff] %v486_v59  ;;  %v492_v62 = vld [vmem:[%s4788_s7 + $0x7b0] sm:$0xff] }
  0x4e   : > { %489 = vst [vmem:[%s4793_s8 + $0x3e0] sm:$0xff] %v488_v60  ;;  %491 = vst [vmem:[%s4793_s8 + $0x3e8] sm:$0xff] %v490_v61  ;;  %v494_v63 = vld [vmem:[%s4788_s7 + $0x7b8] sm:$0xff] }
  0x4f   : > { %493 = vst [vmem:[%s4793_s8 + $0x3f0] sm:$0xff] %v492_v62  ;;  %495 = vst [vmem:[%s4793_s8 + $0x3f8] sm:$0xff] %v494_v63 }
  0x50 PF: > { %p3645_p6 = scmp.ge.s32.totalorder %s4712_s22, 1  ;;  %p512_p7 = scmp.lt.s32.totalorder %s4712_s22, 3 }
  0x52   : > { %p513_p8 = pnand %p3645_p6, %p512_p7 }
  0x54   : > { %516 = sbr.rel (%p513_p8) target bundleno = 742 (0x2e6), region = 59 }
  0x59   : > { %s519_s9 = sand.u32 1, %s4696_s18   ;;  %s3647_s10 = sshll.u32 %s4704_s20, 8 }
  0x5a   : > { %s3646_s11 = sshll.u32 %s519_s9, 10  ;;  %p564_p9 = scmp.lt.s32.totalorder %s3647_s10, 511 }
  0x5b   : > { %s5057_s16 = scalar_lea.vmem [#allocation3], %s3646_s11  ;;  %p3649_p10 = scmp.ne.s32.totalorder %s4704_s20, 0 }
  0x5c   : > { %s5847_s10 = smov (!%p564_p9, %s3647_s10), 511 }
  0x5d   : > { %s3648_s12 = sshll.u32 %s5847_s10, 2  ;;  %589 = sbr.rel (%p3649_p10) target bundleno = 107 (0x6b), region = 67 }
  0x5e   : > { %s5055_s15 = scalar_lea.vmem %s5777_s1, %s3648_s12 }
  0x62   : > { %v4714_v0 = vmov 0.0  }
  0x63   : > { %590 = vst [vmem:[#allocation2 + $0x30] sm:$0xff] %v4714_v0  ;;  %591 = vst [vmem:[#allocation2] sm:$0xff] %v4714_v0 }
  0x64   : > { %592 = vst [vmem:[#allocation2 + $0x58] sm:$0xff] %v4714_v0  ;;  %593 = vst [vmem:[#allocation2 + $0x18] sm:$0xff] %v4714_v0 }
  0x65   : > { %594 = vst [vmem:[#allocation2 + $0x50] sm:$0xff] %v4714_v0  ;;  %595 = vst [vmem:[#allocation2 + $0x68] sm:$0xff] %v4714_v0 }
  0x66   : > { %596 = vst [vmem:[#allocation2 + $0x8] sm:$0xff] %v4714_v0  ;;  %597 = vst [vmem:[#allocation2 + $0x48] sm:$0xff] %v4714_v0 }
  0x67   : > { %598 = vst [vmem:[#allocation2 + $0x40] sm:$0xff] %v4714_v0  ;;  %599 = vst [vmem:[#allocation2 + $0x20] sm:$0xff] %v4714_v0 }
  0x68   : > { %600 = vst [vmem:[#allocation2 + $0x10] sm:$0xff] %v4714_v0  ;;  %601 = vst [vmem:[#allocation2 + $0x38] sm:$0xff] %v4714_v0 }
  0x69   : > { %602 = vst [vmem:[#allocation2 + $0x60] sm:$0xff] %v4714_v0  ;;  %603 = vst [vmem:[#allocation2 + $0x70] sm:$0xff] %v4714_v0 }
  0x6a   : > { %604 = vst [vmem:[#allocation2 + $0x78] sm:$0xff] %v4714_v0  ;;  %605 = vst [vmem:[#allocation2 + $0x28] sm:$0xff] %v4714_v0 }
  0x6b PF: > { %v4544_v1 = vld [vmem:[%s5055_s15 + $0x78] sm:$0xff]   ;;  %v4548_v5 = vld [vmem:[%s5055_s15 + $0x70] sm:$0xff]   ;;  %v4552_v9 = vld [vmem:[%s5055_s15 + $0x68] sm:$0xff]   ;;  %p3906_p11 = scmp.ne.s32.totalorder %s4704_s20, 1 }
  0x6c   : > { %v4545_v2 = vld [vmem:[%s5055_s15 + $0xf8] sm:$0xff]   ;;  %3991 = vmatprep.subr.bf16.mxu0 %v4544_v1  ;;  %v4549_v6 = vld [vmem:[%s5055_s15 + $0xf0] sm:$0xff]   ;;  %v4553_v10 = vld [vmem:[%s5055_s15 + $0xe8] sm:$0xff]  }
  0x6d   : > { %v4546_v3 = vld [vmem:[%s5055_s15 + $0x38] sm:$0xff]   ;;  %4055 = vmatprep.subr.bf16.mxu1 %v4545_v2  ;;  %v4550_v7 = vld [vmem:[%s5055_s15 + $0x30] sm:$0xff]   ;;  %v4554_v11 = vld [vmem:[%s5055_s15 + $0x28] sm:$0xff]  }
  0x6e   : > { %v4547_v4 = vld [vmem:[%s5055_s15 + $0xb8] sm:$0xff]   ;;  %3992 = vmatpush3.bf16.msra.mxu0 %v4546_v3  ;;  %v4551_v8 = vld [vmem:[%s5055_s15 + $0xb0] sm:$0xff]   ;;  %v4555_v12 = vld [vmem:[%s5055_s15 + $0xa8] sm:$0xff]  }
  0x6f   : > { %4056 = vmatpush3.bf16.msra.mxu1 %v4547_v4  ;;  %3993 = vmatprep.subr.bf16.mxu0 %v4548_v5  ;;  %v4556_v13 = vld [vmem:[%s5055_s15 + $0x60] sm:$0xff]   ;;  %v4560_v17 = vld [vmem:[%s5055_s15 + $0x58] sm:$0xff]   ;;  %v4564_v21 = vld [vmem:[%s5055_s15 + $0x50] sm:$0xff]  }
  0x70   : > { %4057 = vmatprep.subr.bf16.mxu1 %v4549_v6  ;;  %v4557_v14 = vld [vmem:[%s5055_s15 + $0xe0] sm:$0xff]   ;;  %v4561_v18 = vld [vmem:[%s5055_s15 + $0xd8] sm:$0xff]   ;;  %v4565_v22 = vld [vmem:[%s5055_s15 + $0xd0] sm:$0xff]  }
  0x71   : > { %v4558_v15 = vld [vmem:[%s5055_s15 + $0x20] sm:$0xff]   ;;  %v4562_v19 = vld [vmem:[%s5055_s15 + $0x18] sm:$0xff]   ;;  %v4566_v23 = vld [vmem:[%s5055_s15 + $0x10] sm:$0xff]  }
  0x72   : > { %3994 = vmatpush3.bf16.msra.mxu0 %v4550_v7  ;;  %v4559_v16 = vld [vmem:[%s5055_s15 + $0xa0] sm:$0xff]   ;;  %v4563_v20 = vld [vmem:[%s5055_s15 + $0x98] sm:$0xff]   ;;  %v4567_v24 = vld [vmem:[%s5055_s15 + $0x90] sm:$0xff]  }
  0x73   : > { %4058 = vmatpush3.bf16.msra.mxu1 %v4551_v8  ;;  %3995 = vmatprep.subr.bf16.mxu0 %v4552_v9  ;;  %v4568_v25 = vld [vmem:[%s5055_s15 + $0x48] sm:$0xff]   ;;  %v4572_v29 = vld [vmem:[%s5055_s15 + $0x40] sm:$0xff]   ;;  %v4576_v41 = vld [vmem:[%s5055_s15 + $0x178] sm:$0xff]  }
  0x74   : > { %4059 = vmatprep.subr.bf16.mxu1 %v4553_v10  ;;  %v4569_v26 = vld [vmem:[%s5055_s15 + $0xc8] sm:$0xff]   ;;  %v4573_v30 = vld [vmem:[%s5055_s15 + $0xc0] sm:$0xff]   ;;  %v4577_v42 = vld [vmem:[%s5055_s15 + $0x138] sm:$0xff]  }
  0x75   : > { %v4570_v27 = vld [vmem:[%s5055_s15 + $0x8] sm:$0xff]   ;;  %v4574_v31 = vld [vmem:[%s5055_s15] sm:$0xff]   ;;  %v4578_v43 = vld [vmem:[%s5055_s15 + $0x1f8] sm:$0xff]  }
  0x76   : > { %3996 = vmatpush3.bf16.msra.mxu0 %v4554_v11  ;;  %v4571_v28 = vld [vmem:[%s5055_s15 + $0x88] sm:$0xff]   ;;  %v4575_v32 = vld [vmem:[%s5055_s15 + $0x80] sm:$0xff]   ;;  %v4579_v44 = vld [vmem:[%s5055_s15 + $0x1b8] sm:$0xff]  }
  0x77   : > { %4060 = vmatpush3.bf16.msra.mxu1 %v4555_v12  ;;  %3997 = vmatprep.subr.bf16.mxu0 %v4556_v13  ;;  %v622_v33 = vld [vmem:[%s5057_s16] sm:$0xff]  ;;  %v623_v35 = vld [vmem:[%s5057_s16 + $0x8] sm:$0xff]  ;;  %v4580_v51 = vld [vmem:[%s5055_s15 + $0x170] sm:$0xff]  }
  0x78   : > { %4061 = vmatprep.subr.bf16.mxu1 %v4557_v14  ;;  %v630_v34 = vld [vmem:[%s5057_s16 + $0x40] sm:$0xff]  ;;  %v631_v38 = vld [vmem:[%s5057_s16 + $0x48] sm:$0xff]  ;;  %v4581_v53 = vld [vmem:[%s5055_s15 + $0x130] sm:$0xff]  }
  0x79   : > { %v3650_v36 = vcombine.low %v622_v33, %v630_v34  ;;  %v3651_v37 = vcombine.high %v622_v33, %v630_v34  ;;  %v3652_v39 = vcombine.low %v623_v35, %v631_v38  ;;  %v3653_v40 = vcombine.high %v623_v35, %v631_v38  ;;  %v638_v45 = vld [vmem:[%s5057_s16 + $0x80] sm:$0xff]  ;;  %v639_v48 = vld [vmem:[%s5057_s16 + $0x88] sm:$0xff]  ;;  %v4582_v55 = vld [vmem:[%s5055_s15 + $0x1f0] sm:$0xff]  }
  0x7a   : > { %3998 = vmatpush3.bf16.msra.mxu0 %v4558_v15  ;;  %v646_v46 = vld [vmem:[%s5057_s16 + $0xc0] sm:$0xff]  ;;  %v647_v49 = vld [vmem:[%s5057_s16 + $0xc8] sm:$0xff]  ;;  %v4583_v56 = vld [vmem:[%s5055_s15 + $0x1b0] sm:$0xff]  }
  0x7b   : > { %4062 = vmatpush3.bf16.msra.mxu1 %v4559_v16  ;;  %3999 = vmatprep.subr.bf16.mxu0 %v4560_v17  ;;  %v3667_v47 = vcombine.high %v638_v45, %v646_v46  ;;  %v3669_v50 = vcombine.high %v639_v48, %v647_v49  ;;  %v3666_v52 = vcombine.low %v638_v45, %v646_v46  ;;  %v654_v57 = vld [vmem:[%s5057_s16 + $0x100] sm:$0xff]  ;;  %v655_v59 = vld [vmem:[%s5057_s16 + $0x108] sm:$0xff]  ;;  %v4598_v33 = vld [vmem:[%s5055_s15 + $0x1d0] sm:$0xff]  }
  0x7c   : > { %4063 = vmatprep.subr.bf16.mxu1 %v4561_v18  ;;  %2446 = vmatprep.mubr.bf16.mxu0 %v3651_v37  ;;  %v3668_v54 = vcombine.low %v639_v48, %v647_v49  ;;  %v662_v58 = vld [vmem:[%s5057_s16 + $0x140] sm:$0xff]  ;;  %v663_v60 = vld [vmem:[%s5057_s16 + $0x148] sm:$0xff]  ;;  %v4599_v34 = vld [vmem:[%s5055_s15 + $0x190] sm:$0xff]  }
  0x7d   : > { %2543 = vmatprep.mubr.bf16.mxu1 %v3653_v40  ;;  %v3683_v61 = vcombine.high %v654_v57, %v662_v58  ;;  %v3685_v62 = vcombine.high %v655_v59, %v663_v60  ;;  %v4584_v63 = vld [vmem:[%s5055_s15 + $0x168] sm:$0xff]   ;;  %v3682_v3 = vcombine.low %v654_v57, %v662_v58  ;;  %v670_v4 = vld [vmem:[%s5057_s16 + $0x180] sm:$0xff]  ;;  %v3684_v7 = vcombine.low %v655_v59, %v663_v60  ;;  %v4608_v57 = vld [vmem:[%s5055_s15 + $0x278] sm:$0xff]  }
  0x7e   : > { %4000 = vmatpush3.bf16.msra.mxu0 %v4562_v19  ;;  %v4585_v0 = vld [vmem:[%s5055_s15 + $0x128] sm:$0xff]   ;;  %v678_v5 = vld [vmem:[%s5057_s16 + $0x1c0] sm:$0xff]  ;;  %v4592_v19 = vld [vmem:[%s5055_s15 + $0x158] sm:$0xff]  }
  0x7f   : > { %4064 = vmatpush3.bf16.msra.mxu1 %v4563_v20  ;;  %4001 = vmatprep.subr.bf16.mxu0 %v4564_v21  ;;  %v4586_v1 = vld [vmem:[%s5055_s15 + $0x1e8] sm:$0xff]   ;;  %v3699_v8 = vcombine.high %v670_v4, %v678_v5  ;;  %v4588_v11 = vld [vmem:[%s5055_s15 + $0x160] sm:$0xff]   ;;  %v3698_v20 = vcombine.low %v670_v4, %v678_v5  ;;  %v4593_v21 = vld [vmem:[%s5055_s15 + $0x118] sm:$0xff]  }
  0x80   : > { %4065 = vmatprep.subr.bf16.mxu1 %v4565_v22  ;;  %v4587_v2 = vld [vmem:[%s5055_s15 + $0x1a8] sm:$0xff]   ;;  %v4589_v12 = vld [vmem:[%s5055_s15 + $0x120] sm:$0xff]   ;;  %v4610_v59 = vld [vmem:[%s5055_s15 + $0x2f8] sm:$0xff]  }
  0x81   : > { %v671_v6 = vld [vmem:[%s5057_s16 + $0x188] sm:$0xff]  ;;  %v4590_v13 = vld [vmem:[%s5055_s15 + $0x1e0] sm:$0xff]   ;;  %v633_v4 = vld [vmem:[%s5057_s16 + $0x58] sm:$0xff] }
  0x82   : > { %4002 = vmatpush3.bf16.msra.mxu0 %v4566_v23  ;;  %v679_v9 = vld [vmem:[%s5057_s16 + $0x1c8] sm:$0xff]  ;;  %v4591_v14 = vld [vmem:[%s5055_s15 + $0x1a0] sm:$0xff]  }
  0x83   : > { %4066 = vmatpush3.bf16.msra.mxu1 %v4567_v24  ;;  %4003 = vmatprep.subr.bf16.mxu0 %v4568_v25  ;;  %v3701_v10 = vcombine.high %v671_v6, %v679_v9  ;;  %v686_v15 = vld [vmem:[%s5057_s16 + $0x200] sm:$0xff]  ;;  %v687_v17 = vld [vmem:[%s5057_s16 + $0x208] sm:$0xff]  ;;  %v3700_v22 = vcombine.low %v671_v6, %v679_v9  ;;  %v4594_v24 = vld [vmem:[%s5055_s15 + $0x1d8] sm:$0xff]  }
  0x84   : > { %4067 = vmatprep.subr.bf16.mxu1 %v4569_v26  ;;  %v694_v16 = vld [vmem:[%s5057_s16 + $0x240] sm:$0xff]  ;;  %v695_v18 = vld [vmem:[%s5057_s16 + $0x248] sm:$0xff]  ;;  %v4595_v26 = vld [vmem:[%s5055_s15 + $0x198] sm:$0xff]  }
  0x85   : > { %v3715_v23 = vcombine.high %v686_v15, %v694_v16  ;;  %v3717_v25 = vcombine.high %v687_v17, %v695_v18  ;;  %v3714_v35 = vcombine.low %v686_v15, %v694_v16  ;;  %v4601_v40 = vld [vmem:[%s5055_s15 + $0x108] sm:$0xff]   ;;  %v4605_v49 = vld [vmem:[%s5055_s15 + $0x100] sm:$0xff]   ;;  %v640_v9 = vld [vmem:[%s5057_s16 + $0x90] sm:$0xff] }
  0x86   : > { %4004 = vmatpush3.bf16.msra.mxu0 %v4570_v27  ;;  %v702_v27 = vld [vmem:[%s5057_s16 + $0x280] sm:$0xff]  ;;  %v719_v45 = vld [vmem:[%s5057_s16 + $0x308] sm:$0xff]  ;;  %v4611_v16 = vld [vmem:[%s5055_s15 + $0x2b8] sm:$0xff]  }
  0x87   : > { %4068 = vmatpush3.bf16.msra.mxu1 %v4571_v28  ;;  %4005 = vmatprep.subr.bf16.mxu0 %v4572_v29  ;;  %v710_v28 = vld [vmem:[%s5057_s16 + $0x2c0] sm:$0xff]  ;;  %v4596_v29 = vld [vmem:[%s5055_s15 + $0x150] sm:$0xff]   ;;  %v727_v46 = vld [vmem:[%s5057_s16 + $0x348] sm:$0xff] }
  0x88   : > { %4069 = vmatprep.subr.bf16.mxu1 %v4573_v30  ;;  %v703_v30 = vld [vmem:[%s5057_s16 + $0x288] sm:$0xff]  ;;  %v3731_v37 = vcombine.high %v702_v27, %v710_v28  ;;  %v3730_v48 = vcombine.low %v702_v27, %v710_v28 }
  0x89   : > { %v735_v58 = vld [vmem:[%s5057_s16 + $0x388] sm:$0xff] }
  0x8a   : > { %4006 = vmatpush3.bf16.msra.mxu0 %v4574_v31  ;;  %v711_v31 = vld [vmem:[%s5057_s16 + $0x2c8] sm:$0xff] }
  0x8b   : > { %4070 = vmatpush3.bf16.msra.mxu1 %v4575_v32  ;;  %4119 = vmatprep.subr.bf16.mxu0 %v4576_v41  ;;  %v4597_v32 = vld [vmem:[%s5055_s15 + $0x110] sm:$0xff]   ;;  %v3733_v38 = vcombine.high %v703_v30, %v711_v31  ;;  %v4602_v41 = vld [vmem:[%s5055_s15 + $0x1c8] sm:$0xff]  }
  0x8c   : > { %4183 = vmatprep.subr.bf16.mxu1 %v4578_v43  ;;  %v726_v43 = vld [vmem:[%s5057_s16 + $0x340] sm:$0xff]  ;;  %v743_v60 = vld [vmem:[%s5057_s16 + $0x3c8] sm:$0xff] }
  0x8d   : > { %2447 = vmatmul.mubr.bf16.vlgmr.msra.gmra.mxu0 %v3650_v36  ;;  %v3716_v36 = vcombine.low %v687_v17, %v695_v18  ;;  %v3764_v6 = vcombine.low %v735_v58, %v743_v60  ;;  %v4612_v18 = vld [vmem:[%s5055_s15 + $0x270] sm:$0xff]   ;;  %v4616_v27 = vld [vmem:[%s5055_s15 + $0x268] sm:$0xff]  }
  0x8e   : > { %2544 = vmatmul.mubr.bf16.vlgmr.msra.gmra.mxu1 %v3652_v39  ;;  %4120 = vmatpush3.bf16.msra.mxu0 %v4577_v42  ;;  %v4600_v39 = vld [vmem:[%s5055_s15 + $0x148] sm:$0xff]   ;;  %v718_v42 = vld [vmem:[%s5057_s16 + $0x300] sm:$0xff] }
  0x8f   : > { %4184 = vmatpush3.bf16.msra.mxu1 %v4579_v44  ;;  %2454 = vmatprep.mubr.bf16.mxu0 %v3667_v47  ;;  %v4603_v44 = vld [vmem:[%s5055_s15 + $0x188] sm:$0xff]   ;;  %v4604_v47 = vld [vmem:[%s5055_s15 + $0x140] sm:$0xff]  }
  0x90   : > { %2551 = vmatprep.mubr.bf16.mxu1 %v3669_v50  ;;  %4121 = vmatprep.subr.bf16.mxu0 %v4580_v51  ;;  %v3732_v50 = vcombine.low %v703_v30, %v711_v31  ;;  %v3747_v51 = vcombine.high %v718_v42, %v726_v43  ;;  %v4618_v28 = vld [vmem:[%s5055_s15 + $0x2e8] sm:$0xff]  }
  0x91   : > { %4185 = vmatprep.subr.bf16.mxu1 %v4582_v55  ;;  %v734_v55 = vld [vmem:[%s5057_s16 + $0x380] sm:$0xff] }
  0x92   : > { %4122 = vmatpush3.bf16.msra.mxu0 %v4581_v53  ;;  %v3749_v53 = vcombine.high %v719_v45, %v727_v46 }
  0x93   : > { %4186 = vmatpush3.bf16.msra.mxu1 %v4583_v56  ;;  %4123 = vmatprep.subr.bf16.mxu0 %v4584_v63  ;;  %v742_v56 = vld [vmem:[%s5057_s16 + $0x3c0] sm:$0xff] }
  0x94   : > { %4187 = vmatprep.subr.bf16.mxu1 %v4586_v1  ;;  %v3763_v63 = vcombine.high %v734_v55, %v742_v56  ;;  %v624_v1 = vld [vmem:[%s5057_s16 + $0x10] sm:$0xff]  ;;  %v3762_v5 = vcombine.low %v734_v55, %v742_v56  ;;  %v689_v55 = vld [vmem:[%s5057_s16 + $0x218] sm:$0xff] }
  0x95   : > { %2455 = vmatmul.mubr.bf16.gmra.mxu0 %v3666_v52  ;;  %v4606_v52 = vld [vmem:[%s5055_s15 + $0x1c0] sm:$0xff]   ;;  %v697_v56 = vld [vmem:[%s5057_s16 + $0x258] sm:$0xff] }
  0x96   : > { %2552 = vmatmul.mubr.bf16.gmra.mxu1 %v3668_v54  ;;  %2462 = vmatprep.mubr.bf16.mxu0 %v3683_v61  ;;  %v4607_v54 = vld [vmem:[%s5055_s15 + $0x180] sm:$0xff]   ;;  %v3746_v61 = vcombine.low %v718_v42, %v726_v43  ;;  %v4624_v43 = vld [vmem:[%s5055_s15 + $0x258] sm:$0xff]  }
  0x97   : > { %2559 = vmatprep.mubr.bf16.mxu1 %v3685_v62  ;;  %4124 = vmatpush3.bf16.msra.mxu0 %v4585_v0  ;;  %v3748_v62 = vcombine.low %v719_v45, %v727_v46  ;;  %v3765_v0 = vcombine.high %v735_v58, %v743_v60  ;;  %v4623_v42 = vld [vmem:[%s5055_s15 + $0x2a0] sm:$0xff]   ;;  %v4626_v45 = vld [vmem:[%s5055_s15 + $0x2d8] sm:$0xff]   ;;  %v4631_v58 = vld [vmem:[%s5055_s15 + $0x290] sm:$0xff]  }
  0x98   : > { %4188 = vmatpush3.bf16.msra.mxu1 %v4587_v2  ;;  %4125 = vmatprep.subr.bf16.mxu0 %v4588_v11  ;;  %v632_v2 = vld [vmem:[%s5057_s16 + $0x50] sm:$0xff] }
  0x99   : > { %4189 = vmatprep.subr.bf16.mxu1 %v4590_v13  ;;  %v3654_v11 = vcombine.low %v624_v1, %v632_v2  ;;  %v641_v13 = vld [vmem:[%s5057_s16 + $0x98] sm:$0xff] }
  0x9b   : > { %4126 = vmatpush3.bf16.msra.mxu0 %v4589_v12  ;;  %v4609_v12 = vld [vmem:[%s5055_s15 + $0x238] sm:$0xff]  }
  0x9c   : > { %4190 = vmatpush3.bf16.msra.mxu1 %v4591_v14  ;;  %4127 = vmatprep.subr.bf16.mxu0 %v4592_v19  ;;  %v649_v14 = vld [vmem:[%s5057_s16 + $0xd8] sm:$0xff] }
  0x9d   : > { %2463 = vmatmul.mubr.bf16.gmra.mxu0 %v3682_v3  ;;  %4191 = vmatprep.subr.bf16.mxu1 %v4594_v24  ;;  %v625_v3 = vld [vmem:[%s5057_s16 + $0x18] sm:$0xff]  ;;  %v3673_v19 = vcombine.high %v641_v13, %v649_v14  ;;  %v664_v24 = vld [vmem:[%s5057_s16 + $0x150] sm:$0xff]  ;;  %v3672_v30 = vcombine.low %v641_v13, %v649_v14  ;;  %v3720_v14 = vcombine.low %v689_v55, %v697_v56 }
  0x9e   : > { %2560 = vmatmul.mubr.bf16.gmra.mxu1 %v3684_v7  ;;  %2470 = vmatprep.mubr.bf16.mxu0 %v3699_v8  ;;  %v3655_v7 = vcombine.high %v624_v1, %v632_v2  ;;  %v3657_v8 = vcombine.high %v625_v3, %v633_v4  ;;  %v3656_v15 = vcombine.low %v625_v3, %v633_v4  ;;  %v4633_v1 = vld [vmem:[%s5055_s15 + $0x208] sm:$0xff]   ;;  %v4636_v3 = vld [vmem:[%s5055_s15 + $0x240] sm:$0xff]   ;;  %v704_v4 = vld [vmem:[%s5057_s16 + $0x290] sm:$0xff] }
  0x9f   : > { %2567 = vmatprep.mubr.bf16.mxu1 %v3701_v10  ;;  %4128 = vmatpush3.bf16.msra.mxu0 %v4593_v21  ;;  %v648_v10 = vld [vmem:[%s5057_s16 + $0xd0] sm:$0xff]  ;;  %v4635_v2 = vld [vmem:[%s5055_s15 + $0x288] sm:$0xff]   ;;  %v4642_v13 = vld [vmem:[%s5055_s15 + $0x3f8] sm:$0xff]  }
  0xa0   : > { %4192 = vmatpush3.bf16.msra.mxu1 %v4595_v26  ;;  %4129 = vmatprep.subr.bf16.mxu0 %v4596_v29  ;;  %v3671_v17 = vcombine.high %v640_v9, %v648_v10  ;;  %v4614_v21 = vld [vmem:[%s5055_s15 + $0x2f0] sm:$0xff]   ;;  %v665_v26 = vld [vmem:[%s5057_s16 + $0x158] sm:$0xff]  ;;  %v3670_v29 = vcombine.low %v640_v9, %v648_v10  ;;  %v4637_v9 = vld [vmem:[%s5055_s15 + $0x200] sm:$0xff]  }
  0xa1   : > { %4193 = vmatprep.subr.bf16.mxu1 %v4598_v33  ;;  %v4617_v33 = vld [vmem:[%s5055_s15 + $0x228] sm:$0xff]   ;;  %v4639_v10 = vld [vmem:[%s5055_s15 + $0x280] sm:$0xff]  }
  0xa3   : > { %4130 = vmatpush3.bf16.msra.mxu0 %v4597_v32 }
  0xa4   : > { %4194 = vmatpush3.bf16.msra.mxu1 %v4599_v34  ;;  %4131 = vmatprep.subr.bf16.mxu0 %v4600_v39  ;;  %v4619_v34 = vld [vmem:[%s5055_s15 + $0x2a8] sm:$0xff]   ;;  %v673_v39 = vld [vmem:[%s5057_s16 + $0x198] sm:$0xff] }
  0xa5   : > { %2471 = vmatmul.mubr.bf16.gmra.mxu0 %v3698_v20  ;;  %4195 = vmatprep.subr.bf16.mxu1 %v4602_v41  ;;  %v4613_v20 = vld [vmem:[%s5055_s15 + $0x230] sm:$0xff]   ;;  %v4621_v41 = vld [vmem:[%s5055_s15 + $0x220] sm:$0xff]  }
  0xa6   : > { %2568 = vmatmul.mubr.bf16.gmra.mxu1 %v3700_v22  ;;  %2478 = vmatprep.mubr.bf16.mxu0 %v3715_v23  ;;  %v4615_v22 = vld [vmem:[%s5055_s15 + $0x2b0] sm:$0xff]  }
  0xa7   : > { %2575 = vmatprep.mubr.bf16.mxu1 %v3717_v25  ;;  %4132 = vmatpush3.bf16.msra.mxu0 %v4601_v40  ;;  %v656_v23 = vld [vmem:[%s5057_s16 + $0x110] sm:$0xff]  ;;  %v657_v25 = vld [vmem:[%s5057_s16 + $0x118] sm:$0xff] }
  0xa8   : > { %4196 = vmatpush3.bf16.msra.mxu1 %v4603_v44  ;;  %4133 = vmatprep.subr.bf16.mxu0 %v4604_v47  ;;  %v3687_v31 = vcombine.high %v656_v23, %v664_v24  ;;  %v3689_v32 = vcombine.high %v657_v25, %v665_v26  ;;  %v681_v40 = vld [vmem:[%s5057_s16 + $0x1d8] sm:$0xff]  ;;  %v3686_v44 = vcombine.low %v656_v23, %v664_v24 }
  0xa9   : > { %4197 = vmatprep.subr.bf16.mxu1 %v4606_v52  ;;  %v3688_v46 = vcombine.low %v657_v25, %v665_v26  ;;  %v688_v52 = vld [vmem:[%s5057_s16 + $0x210] sm:$0xff] }
  0xaa   : > { %v736_v25 = vld [vmem:[%s5057_s16 + $0x390] sm:$0xff] }
  0xab   : > { %4134 = vmatpush3.bf16.msra.mxu0 %v4605_v49  ;;  %v3705_v49 = vcombine.high %v673_v39, %v681_v40  ;;  %v744_v26 = vld [vmem:[%s5057_s16 + $0x3d0] sm:$0xff] }
  0xac   : > { %4198 = vmatpush3.bf16.msra.mxu1 %v4607_v54  ;;  %4247 = vmatprep.subr.bf16.mxu0 %v4608_v57  ;;  %v696_v54 = vld [vmem:[%s5057_s16 + $0x250] sm:$0xff] }
  0xad   : > { %2479 = vmatmul.mubr.bf16.gmra.mxu0 %v3714_v35  ;;  %4311 = vmatprep.subr.bf16.mxu1 %v4610_v59  ;;  %v4620_v35 = vld [vmem:[%s5055_s15 + $0x260] sm:$0xff]   ;;  %v4629_v57 = vld [vmem:[%s5055_s15 + $0x210] sm:$0xff]   ;;  %v4632_v59 = vld [vmem:[%s5055_s15 + $0x248] sm:$0xff]  }
  0xae   : > { %2576 = vmatmul.mubr.bf16.gmra.mxu1 %v3716_v36  ;;  %2486 = vmatprep.mubr.bf16.mxu0 %v3731_v37  ;;  %v672_v36 = vld [vmem:[%s5057_s16 + $0x190] sm:$0xff] }
  0xaf   : > { %2583 = vmatprep.mubr.bf16.mxu1 %v3733_v38  ;;  %v680_v37 = vld [vmem:[%s5057_s16 + $0x1d0] sm:$0xff]  ;;  %v4622_v38 = vld [vmem:[%s5055_s15 + $0x2e0] sm:$0xff]  }
  0xb0   : > { %v3703_v47 = vcombine.high %v672_v36, %v680_v37  ;;  %v3702_v60 = vcombine.low %v672_v36, %v680_v37  ;;  %v635_v36 = vld [vmem:[%s5057_s16 + $0x68] sm:$0xff]  ;;  %v3766_v37 = vcombine.low %v736_v25, %v744_v26 }
  0xb5   : > { %2487 = vmatmul.mubr.bf16.gmra.mxu0 %v3730_v48  ;;  %v4625_v48 = vld [vmem:[%s5055_s15 + $0x218] sm:$0xff]  }
  0xb6   : > { %2584 = vmatmul.mubr.bf16.gmra.mxu1 %v3732_v50  ;;  %2494 = vmatprep.mubr.bf16.mxu0 %v3747_v51  ;;  %v4627_v50 = vld [vmem:[%s5055_s15 + $0x298] sm:$0xff]   ;;  %v4628_v51 = vld [vmem:[%s5055_s15 + $0x250] sm:$0xff]  }
  0xb7   : > { %2591 = vmatprep.mubr.bf16.mxu1 %v3749_v53  ;;  %v4630_v53 = vld [vmem:[%s5055_s15 + $0x2d0] sm:$0xff]  }
  0xbd   : > { %2495 = vmatmul.mubr.bf16.gmra.mxu0 %v3746_v61  ;;  %v4634_v61 = vld [vmem:[%s5055_s15 + $0x2c8] sm:$0xff]  }
  0xbe   : > { %2592 = vmatmul.mubr.bf16.gmra.mxu1 %v3748_v62  ;;  %2502 = vmatprep.mubr.bf16.mxu0 %v3763_v63  ;;  %v3704_v62 = vcombine.low %v673_v39, %v681_v40  ;;  %v3719_v63 = vcombine.high %v688_v52, %v696_v54 }
  0xbf   : > { %2599 = vmatprep.mubr.bf16.mxu1 %v3765_v0  ;;  %v3721_v0 = vcombine.high %v689_v55, %v697_v56  ;;  %v658_v55 = vld [vmem:[%s5057_s16 + $0x120] sm:$0xff] }
  0xc0   : > { %v666_v56 = vld [vmem:[%s5057_s16 + $0x160] sm:$0xff] }
  0xc5   : > { %2503 = vmatmul.mubr.bf16.gmra.mxu0 %v3762_v5  ;;  %v712_v5 = vld [vmem:[%s5057_s16 + $0x2d0] sm:$0xff] }
  0xc6   : > { %2600 = vmatmul.mubr.bf16.gmra.mxu1 %v3764_v6  ;;  %2640 = vmatprep.mubr.bf16.mxu0 %v3655_v7  ;;  %v4638_v6 = vld [vmem:[%s5055_s15 + $0x2c0] sm:$0xff]   ;;  %v705_v7 = vld [vmem:[%s5057_s16 + $0x298] sm:$0xff] }
  0xc7   : > { %2737 = vmatprep.mubr.bf16.mxu1 %v3657_v8  ;;  %v713_v8 = vld [vmem:[%s5057_s16 + $0x2d8] sm:$0xff] }
  0xcd   : > { %2641 = vmatmul.mubr.bf16.vlgmr.msra.gmra.mxu0 %v3654_v11  ;;  %v4640_v11 = vld [vmem:[%s5055_s15 + $0x378] sm:$0xff]  }
  0xce   : > { %2738 = vmatmul.mubr.bf16.vlgmr.msra.gmra.mxu1 %v3656_v15  ;;  %4248 = vmatpush3.bf16.msra.mxu0 %v4609_v12  ;;  %v3718_v12 = vcombine.low %v688_v52, %v696_v54  ;;  %v3735_v15 = vcombine.high %v704_v4, %v712_v5  ;;  %v4646_v52 = vld [vmem:[%s5055_s15 + $0x3f0] sm:$0xff]  }
  0xcf   : > { %4312 = vmatpush3.bf16.msra.mxu1 %v4611_v16  ;;  %2648 = vmatprep.mubr.bf16.mxu0 %v3671_v17  ;;  %v3737_v16 = vcombine.high %v705_v7, %v713_v8  ;;  %v720_v17 = vld [vmem:[%s5057_s16 + $0x310] sm:$0xff] }
  0xd0   : > { %2745 = vmatprep.mubr.bf16.mxu1 %v3673_v19  ;;  %4249 = vmatprep.subr.bf16.mxu0 %v4612_v18  ;;  %v728_v18 = vld [vmem:[%s5057_s16 + $0x350] sm:$0xff]  ;;  %v721_v19 = vld [vmem:[%s5057_s16 + $0x318] sm:$0xff] }
  0xd1   : > { %4313 = vmatprep.subr.bf16.mxu1 %v4614_v21  ;;  %v3734_v21 = vcombine.low %v704_v4, %v712_v5  ;;  %v3751_v23 = vcombine.high %v720_v17, %v728_v18  ;;  %v4647_v54 = vld [vmem:[%s5055_s15 + $0x3b0] sm:$0xff]   ;;  %v4654_v4 = vld [vmem:[%s5055_s15 + $0x3e0] sm:$0xff]  }
  0xd2   : > { %4250 = vmatpush3.bf16.msra.mxu0 %v4613_v20  ;;  %v729_v20 = vld [vmem:[%s5057_s16 + $0x358] sm:$0xff]  ;;  %v674_v5 = vld [vmem:[%s5057_s16 + $0x1a0] sm:$0xff] }
  0xd3   : > { %4314 = vmatpush3.bf16.msra.mxu1 %v4615_v22  ;;  %4251 = vmatprep.subr.bf16.mxu0 %v4616_v27  ;;  %v3736_v22 = vcombine.low %v705_v7, %v713_v8  ;;  %v3753_v24 = vcombine.high %v721_v19, %v729_v20  ;;  %v737_v27 = vld [vmem:[%s5057_s16 + $0x398] sm:$0xff]  ;;  %v675_v7 = vld [vmem:[%s5057_s16 + $0x1a8] sm:$0xff]  ;;  %v4653_v8 = vld [vmem:[%s5055_s15 + $0x320] sm:$0xff]  }
  0xd4   : > { %4315 = vmatprep.subr.bf16.mxu1 %v4618_v28  ;;  %v745_v28 = vld [vmem:[%s5057_s16 + $0x3d8] sm:$0xff] }
  0xd5   : > { %2649 = vmatmul.mubr.bf16.gmra.mxu0 %v3670_v29  ;;  %v3750_v29 = vcombine.low %v720_v17, %v728_v18  ;;  %v4657_v17 = vld [vmem:[%s5055_s15 + $0x318] sm:$0xff]  }
  0xd6   : > { %2746 = vmatmul.mubr.bf16.gmra.mxu1 %v3672_v30  ;;  %2656 = vmatprep.mubr.bf16.mxu0 %v3687_v31  ;;  %v3752_v30 = vcombine.low %v721_v19, %v729_v20  ;;  %v3767_v31 = vcombine.high %v736_v25, %v744_v26  ;;  %v4659_v18 = vld [vmem:[%s5055_s15 + $0x398] sm:$0xff]   ;;  %v4660_v19 = vld [vmem:[%s5055_s15 + $0x350] sm:$0xff]   ;;  %v699_v25 = vld [vmem:[%s5057_s16 + $0x268] sm:$0xff] }
  0xd7   : > { %2753 = vmatprep.mubr.bf16.mxu1 %v3689_v32  ;;  %4252 = vmatpush3.bf16.msra.mxu0 %v4617_v33  ;;  %v3769_v32 = vcombine.high %v737_v27, %v745_v28  ;;  %v626_v33 = vld [vmem:[%s5057_s16 + $0x20] sm:$0xff]  ;;  %v4662_v20 = vld [vmem:[%s5055_s15 + $0x3d0] sm:$0xff]  }
  0xd8   : > { %4316 = vmatpush3.bf16.msra.mxu1 %v4619_v34  ;;  %4253 = vmatprep.subr.bf16.mxu0 %v4620_v35  ;;  %v634_v34 = vld [vmem:[%s5057_s16 + $0x60] sm:$0xff]  ;;  %v627_v35 = vld [vmem:[%s5057_s16 + $0x28] sm:$0xff]  ;;  %v4663_v26 = vld [vmem:[%s5055_s15 + $0x390] sm:$0xff]  }
  0xd9   : > { %4317 = vmatprep.subr.bf16.mxu1 %v4622_v38  ;;  %v3768_v38 = vcombine.low %v737_v27, %v745_v28  ;;  %v3659_v39 = vcombine.high %v626_v33, %v634_v34  ;;  %v3661_v40 = vcombine.high %v627_v35, %v635_v36  ;;  %v4664_v27 = vld [vmem:[%s5055_s15 + $0x348] sm:$0xff]  }
  0xdb   : > { %4254 = vmatpush3.bf16.msra.mxu0 %v4621_v41  ;;  %v642_v41 = vld [vmem:[%s5057_s16 + $0xa0] sm:$0xff] }
  0xdc   : > { %4318 = vmatpush3.bf16.msra.mxu1 %v4623_v42  ;;  %4255 = vmatprep.subr.bf16.mxu0 %v4624_v43  ;;  %v650_v42 = vld [vmem:[%s5057_s16 + $0xe0] sm:$0xff]  ;;  %v3658_v43 = vcombine.low %v626_v33, %v634_v34  ;;  %v4665_v33 = vld [vmem:[%s5055_s15 + $0x308] sm:$0xff]  }
  0xdd   : > { %2657 = vmatmul.mubr.bf16.gmra.mxu0 %v3686_v44  ;;  %4319 = vmatprep.subr.bf16.mxu1 %v4626_v45  ;;  %v643_v44 = vld [vmem:[%s5057_s16 + $0xa8] sm:$0xff] }
  0xde   : > { %2754 = vmatmul.mubr.bf16.gmra.mxu1 %v3688_v46  ;;  %2664 = vmatprep.mubr.bf16.mxu0 %v3703_v47  ;;  %v651_v45 = vld [vmem:[%s5057_s16 + $0xe8] sm:$0xff]  ;;  %v3660_v46 = vcombine.low %v627_v35, %v635_v36  ;;  %v4641_v47 = vld [vmem:[%s5055_s15 + $0x338] sm:$0xff]   ;;  %v4668_v35 = vld [vmem:[%s5055_s15 + $0x340] sm:$0xff]  }
  0xdf   : > { %2761 = vmatprep.mubr.bf16.mxu1 %v3705_v49  ;;  %4256 = vmatpush3.bf16.msra.mxu0 %v4625_v48  ;;  %v4643_v48 = vld [vmem:[%s5055_s15 + $0x3b8] sm:$0xff]   ;;  %v3675_v49 = vcombine.high %v642_v41, %v650_v42  ;;  %v4667_v34 = vld [vmem:[%s5055_s15 + $0x388] sm:$0xff]   ;;  %v4670_v36 = vld [vmem:[%s5055_s15 + $0x3c0] sm:$0xff]  }
  0xe0   : > { %4320 = vmatpush3.bf16.msra.mxu1 %v4627_v50  ;;  %4257 = vmatprep.subr.bf16.mxu0 %v4628_v51  ;;  %v3677_v50 = vcombine.high %v643_v44, %v651_v45  ;;  %v4644_v51 = vld [vmem:[%s5055_s15 + $0x370] sm:$0xff]  }
  0xe1   : > { %4321 = vmatprep.subr.bf16.mxu1 %v4630_v53  ;;  %v4645_v53 = vld [vmem:[%s5055_s15 + $0x330] sm:$0xff]  }
  0xe3   : > { %4258 = vmatpush3.bf16.msra.mxu0 %v4629_v57  ;;  %v4648_v57 = vld [vmem:[%s5055_s15 + $0x368] sm:$0xff]  }
  0xe4   : > { %4322 = vmatpush3.bf16.msra.mxu1 %v4631_v58  ;;  %4259 = vmatprep.subr.bf16.mxu0 %v4632_v59  ;;  %v659_v58 = vld [vmem:[%s5057_s16 + $0x128] sm:$0xff] }
  0xe5   : > { %2665 = vmatmul.mubr.bf16.gmra.mxu0 %v3702_v60  ;;  %4323 = vmatprep.subr.bf16.mxu1 %v4634_v61  ;;  %v667_v59 = vld [vmem:[%s5057_s16 + $0x168] sm:$0xff]  ;;  %v3674_v61 = vcombine.low %v642_v41, %v650_v42  ;;  %v4671_v42 = vld [vmem:[%s5055_s15 + $0x380] sm:$0xff]  }
  0xe6   : > { %2762 = vmatmul.mubr.bf16.gmra.mxu1 %v3704_v62  ;;  %2672 = vmatprep.mubr.bf16.mxu0 %v3719_v63  ;;  %v4650_v60 = vld [vmem:[%s5055_s15 + $0x3e8] sm:$0xff]   ;;  %v3676_v62 = vcombine.low %v643_v44, %v651_v45  ;;  %v3691_v63 = vcombine.high %v658_v55, %v666_v56 }
  0xe7   : > { %2769 = vmatprep.mubr.bf16.mxu1 %v3721_v0  ;;  %4260 = vmatpush3.bf16.msra.mxu0 %v4633_v1  ;;  %v3693_v0 = vcombine.high %v659_v58, %v667_v59  ;;  %v4649_v1 = vld [vmem:[%s5055_s15 + $0x328] sm:$0xff]  }
  0xe8   : > { %4324 = vmatpush3.bf16.msra.mxu1 %v4635_v2  ;;  %4261 = vmatprep.subr.bf16.mxu0 %v4636_v3  ;;  %v4651_v2 = vld [vmem:[%s5055_s15 + $0x3a8] sm:$0xff]   ;;  %v4652_v3 = vld [vmem:[%s5055_s15 + $0x360] sm:$0xff]  }
  0xe9   : > { %4325 = vmatprep.subr.bf16.mxu1 %v4638_v6  ;;  %v682_v6 = vld [vmem:[%s5057_s16 + $0x1e0] sm:$0xff]  ;;  %v715_v41 = vld [vmem:[%s5057_s16 + $0x2e8] sm:$0xff] }
  0xea   : > { %v3706_v28 = vcombine.low %v674_v5, %v682_v6 }
  0xeb   : > { %4262 = vmatpush3.bf16.msra.mxu0 %v4637_v9  ;;  %v683_v9 = vld [vmem:[%s5057_s16 + $0x1e8] sm:$0xff] }
  0xec   : > { %4326 = vmatpush3.bf16.msra.mxu1 %v4639_v10  ;;  %4375 = vmatprep.subr.bf16.mxu0 %v4640_v11  ;;  %v4655_v10 = vld [vmem:[%s5055_s15 + $0x3a0] sm:$0xff]   ;;  %v4656_v11 = vld [vmem:[%s5055_s15 + $0x358] sm:$0xff]  }
  0xed   : > { %2673 = vmatmul.mubr.bf16.gmra.mxu0 %v3718_v12  ;;  %4439 = vmatprep.subr.bf16.mxu1 %v4642_v13  ;;  %v3690_v12 = vcombine.low %v658_v55, %v666_v56  ;;  %v4658_v13 = vld [vmem:[%s5055_s15 + $0x3d8] sm:$0xff]   ;;  %v738_v55 = vld [vmem:[%s5057_s16 + $0x3a0] sm:$0xff] }
  0xee   : > { %2770 = vmatmul.mubr.bf16.gmra.mxu1 %v3720_v14  ;;  %2680 = vmatprep.mubr.bf16.mxu0 %v3735_v15  ;;  %v3692_v14 = vcombine.low %v659_v58, %v667_v59  ;;  %v3707_v15 = vcombine.high %v674_v5, %v682_v6  ;;  %v746_v56 = vld [vmem:[%s5057_s16 + $0x3e0] sm:$0xff]  ;;  %v747_v58 = vld [vmem:[%s5057_s16 + $0x3e8] sm:$0xff] }
  0xef   : > { %2777 = vmatprep.mubr.bf16.mxu1 %v3737_v16  ;;  %v3709_v16 = vcombine.high %v675_v7, %v683_v9 }
  0xf5   : > { %2681 = vmatmul.mubr.bf16.gmra.mxu0 %v3734_v21  ;;  %v690_v21 = vld [vmem:[%s5057_s16 + $0x220] sm:$0xff] }
  0xf6   : > { %2778 = vmatmul.mubr.bf16.gmra.mxu1 %v3736_v22  ;;  %2688 = vmatprep.mubr.bf16.mxu0 %v3751_v23  ;;  %v698_v22 = vld [vmem:[%s5057_s16 + $0x260] sm:$0xff]  ;;  %v691_v23 = vld [vmem:[%s5057_s16 + $0x228] sm:$0xff] }
  0xf7   : > { %2785 = vmatprep.mubr.bf16.mxu1 %v3753_v24  ;;  %v4661_v24 = vld [vmem:[%s5055_s15 + $0x310] sm:$0xff]   ;;  %v3724_v44 = vcombine.low %v691_v23, %v699_v25 }
  0xfd   : > { %2689 = vmatmul.mubr.bf16.gmra.mxu0 %v3750_v29  ;;  %v4666_v29 = vld [vmem:[%s5055_s15 + $0x3c8] sm:$0xff]  }
  0xfe   : > { %2786 = vmatmul.mubr.bf16.gmra.mxu1 %v3752_v30  ;;  %2696 = vmatprep.mubr.bf16.mxu0 %v3767_v31  ;;  %v3708_v30 = vcombine.low %v675_v7, %v683_v9  ;;  %v3723_v31 = vcombine.high %v690_v21, %v698_v22  ;;  %v644_v7 = vld [vmem:[%s5057_s16 + $0xb0] sm:$0xff]  ;;  %v645_v9 = vld [vmem:[%s5057_s16 + $0xb8] sm:$0xff] }
  0xff   : > { %2793 = vmatprep.mubr.bf16.mxu1 %v3769_v32  ;;  %v3725_v32 = vcombine.high %v691_v23, %v699_v25  ;;  %v669_v23 = vld [vmem:[%s5057_s16 + $0x178] sm:$0xff] }
 0x105   : > { %2697 = vmatmul.mubr.bf16.gmra.mxu0 %v3766_v37  ;;  %v706_v37 = vld [vmem:[%s5057_s16 + $0x2a0] sm:$0xff] }
 0x106   : > { %2794 = vmatmul.mubr.bf16.gmra.mxu1 %v3768_v38  ;;  %2834 = vmatprep.mubr.bf16.mxu0 %v3659_v39  ;;  %v714_v38 = vld [vmem:[%s5057_s16 + $0x2e0] sm:$0xff] }
 0x107   : > { %2931 = vmatprep.mubr.bf16.mxu1 %v3661_v40  ;;  %v4669_v39 = vld [vmem:[%s5055_s15 + $0x300] sm:$0xff]   ;;  %v707_v40 = vld [vmem:[%s5057_s16 + $0x2a8] sm:$0xff]  ;;  %v3739_v45 = vcombine.high %v706_v37, %v714_v38 }
 0x10d   : > { %2835 = vmatmul.mubr.bf16.vlgmr.msra.gmra.mxu0 %v3658_v43  ;;  %v3722_v43 = vcombine.low %v690_v21, %v698_v22  ;;  %v661_v22 = vld [vmem:[%s5057_s16 + $0x138] sm:$0xff] }
 0x10e   : > { %2932 = vmatmul.mubr.bf16.vlgmr.msra.gmra.mxu1 %v3660_v46  ;;  %4376 = vmatpush3.bf16.msra.mxu0 %v4641_v47  ;;  %v3741_v46 = vcombine.high %v707_v40, %v715_v41  ;;  %v722_v47 = vld [vmem:[%s5057_s16 + $0x320] sm:$0xff] }
 0x10f   : > { %4440 = vmatpush3.bf16.msra.mxu1 %v4643_v48  ;;  %2842 = vmatprep.mubr.bf16.mxu0 %v3675_v49  ;;  %v730_v48 = vld [vmem:[%s5057_s16 + $0x360] sm:$0xff]  ;;  %v723_v49 = vld [vmem:[%s5057_s16 + $0x328] sm:$0xff] }
 0x110   : > { %2939 = vmatprep.mubr.bf16.mxu1 %v3677_v50  ;;  %4377 = vmatprep.subr.bf16.mxu0 %v4644_v51  ;;  %v731_v50 = vld [vmem:[%s5057_s16 + $0x368] sm:$0xff]  ;;  %v3738_v51 = vcombine.low %v706_v37, %v714_v38  ;;  %v3754_v59 = vcombine.low %v722_v47, %v730_v48 }
 0x111   : > { %4441 = vmatprep.subr.bf16.mxu1 %v4646_v52  ;;  %v3740_v52 = vcombine.low %v707_v40, %v715_v41  ;;  %v676_v40 = vld [vmem:[%s5057_s16 + $0x1b0] sm:$0xff] }
 0x112   : > { %4378 = vmatpush3.bf16.msra.mxu0 %v4645_v53  ;;  %v3755_v53 = vcombine.high %v722_v47, %v730_v48  ;;  %v684_v41 = vld [vmem:[%s5057_s16 + $0x1f0] sm:$0xff] }
 0x113   : > { %4442 = vmatpush3.bf16.msra.mxu1 %v4647_v54  ;;  %4379 = vmatprep.subr.bf16.mxu0 %v4648_v57  ;;  %v3757_v54 = vcombine.high %v723_v49, %v731_v50  ;;  %v739_v57 = vld [vmem:[%s5057_s16 + $0x3a8] sm:$0xff] }
 0x114   : > { %4443 = vmatprep.subr.bf16.mxu1 %v4650_v60  ;;  %v3756_v60 = vcombine.low %v723_v49, %v731_v50  ;;  %v3696_v50 = vcombine.low %v661_v22, %v669_v23 }
 0x115   : > { %2843 = vmatmul.mubr.bf16.gmra.mxu0 %v3674_v61  ;;  %v3771_v61 = vcombine.high %v738_v55, %v746_v56 }
 0x116   : > { %2940 = vmatmul.mubr.bf16.gmra.mxu1 %v3676_v62  ;;  %2850 = vmatprep.mubr.bf16.mxu0 %v3691_v63  ;;  %v3773_v62 = vcombine.high %v739_v57, %v747_v58  ;;  %v628_v63 = vld [vmem:[%s5057_s16 + $0x30] sm:$0xff] }
 0x117   : > { %2947 = vmatprep.mubr.bf16.mxu1 %v3693_v0  ;;  %4380 = vmatpush3.bf16.msra.mxu0 %v4649_v1  ;;  %v636_v0 = vld [vmem:[%s5057_s16 + $0x70] sm:$0xff]  ;;  %v629_v1 = vld [vmem:[%s5057_s16 + $0x38] sm:$0xff] }
 0x118   : > { %4444 = vmatpush3.bf16.msra.mxu1 %v4651_v2  ;;  %4381 = vmatprep.subr.bf16.mxu0 %v4652_v3  ;;  %v637_v2 = vld [vmem:[%s5057_s16 + $0x78] sm:$0xff]  ;;  %v3770_v3 = vcombine.low %v738_v55, %v746_v56  ;;  %v3663_v5 = vcombine.high %v628_v63, %v636_v0 }
 0x119   : > { %4445 = vmatprep.subr.bf16.mxu1 %v4654_v4  ;;  %v3772_v4 = vcombine.low %v739_v57, %v747_v58  ;;  %v3665_v6 = vcombine.high %v629_v1, %v637_v2 }
 0x11b   : > { %4382 = vmatpush3.bf16.msra.mxu0 %v4653_v8  ;;  %v652_v8 = vld [vmem:[%s5057_s16 + $0xf0] sm:$0xff] }
 0x11c   : > { %4446 = vmatpush3.bf16.msra.mxu1 %v4655_v10  ;;  %4383 = vmatprep.subr.bf16.mxu0 %v4656_v11  ;;  %v653_v10 = vld [vmem:[%s5057_s16 + $0xf8] sm:$0xff]  ;;  %v3662_v11 = vcombine.low %v628_v63, %v636_v0  ;;  %v700_v63 = vld [vmem:[%s5057_s16 + $0x270] sm:$0xff] }
 0x11d   : > { %2851 = vmatmul.mubr.bf16.gmra.mxu0 %v3690_v12  ;;  %4447 = vmatprep.subr.bf16.mxu1 %v4658_v13  ;;  %v3664_v12 = vcombine.low %v629_v1, %v637_v2  ;;  %v3679_v13 = vcombine.high %v644_v7, %v652_v8  ;;  %v693_v2 = vld [vmem:[%s5057_s16 + $0x238] sm:$0xff] }
 0x11e   : > { %2948 = vmatmul.mubr.bf16.gmra.mxu1 %v3692_v14  ;;  %2858 = vmatprep.mubr.bf16.mxu0 %v3707_v15  ;;  %v3681_v14 = vcombine.high %v645_v9, %v653_v10 }
 0x11f   : > { %2955 = vmatprep.mubr.bf16.mxu1 %v3709_v16  ;;  %4384 = vmatpush3.bf16.msra.mxu0 %v4657_v17 }
 0x120   : > { %4448 = vmatpush3.bf16.msra.mxu1 %v4659_v18  ;;  %4385 = vmatprep.subr.bf16.mxu0 %v4660_v19  ;;  %v660_v18 = vld [vmem:[%s5057_s16 + $0x130] sm:$0xff] }
 0x121   : > { %4449 = vmatprep.subr.bf16.mxu1 %v4662_v20  ;;  %v668_v19 = vld [vmem:[%s5057_s16 + $0x170] sm:$0xff] }
 0x122   : > { %v3694_v48 = vcombine.low %v660_v18, %v668_v19 }
 0x123   : > { %4386 = vmatpush3.bf16.msra.mxu0 %v4661_v24 }
 0x124   : > { %4450 = vmatpush3.bf16.msra.mxu1 %v4663_v26  ;;  %4387 = vmatprep.subr.bf16.mxu0 %v4664_v27  ;;  %v3678_v26 = vcombine.low %v644_v7, %v652_v8 }
 0x125   : > { %2859 = vmatmul.mubr.bf16.gmra.mxu0 %v3706_v28  ;;  %4451 = vmatprep.subr.bf16.mxu1 %v4666_v29  ;;  %v3680_v28 = vcombine.low %v645_v9, %v653_v10  ;;  %v3695_v29 = vcombine.high %v660_v18, %v668_v19 }
 0x126   : > { %2956 = vmatmul.mubr.bf16.gmra.mxu1 %v3708_v30  ;;  %2866 = vmatprep.mubr.bf16.mxu0 %v3723_v31 }
 0x127   : > { %2963 = vmatprep.mubr.bf16.mxu1 %v3725_v32  ;;  %4388 = vmatpush3.bf16.msra.mxu0 %v4665_v33  ;;  %v3697_v32 = vcombine.high %v661_v22, %v669_v23 }
 0x128   : > { %4452 = vmatpush3.bf16.msra.mxu1 %v4667_v34  ;;  %4389 = vmatprep.subr.bf16.mxu0 %v4668_v35 }
 0x129   : > { %4453 = vmatprep.subr.bf16.mxu1 %v4670_v36 }
 0x12b   : > { %4390 = vmatpush3.bf16.msra.mxu0 %v4669_v39 }
 0x12c   : > { %4454 = vmatpush3.bf16.msra.mxu1 %v4671_v42 }
 0x12d   : > { %2867 = vmatmul.mubr.bf16.gmra.mxu0 %v3722_v43 }
 0x12e   : > { %2964 = vmatmul.mubr.bf16.gmra.mxu1 %v3724_v44  ;;  %2874 = vmatprep.mubr.bf16.mxu0 %v3739_v45  ;;  %v677_v44 = vld [vmem:[%s5057_s16 + $0x1b8] sm:$0xff] }
 0x12f   : > { %2971 = vmatprep.mubr.bf16.mxu1 %v3741_v46  ;;  %v685_v45 = vld [vmem:[%s5057_s16 + $0x1f8] sm:$0xff] }
 0x130   : > { %v3712_v8 = vcombine.low %v677_v44, %v685_v45 }
 0x135   : > { %2875 = vmatmul.mubr.bf16.gmra.mxu0 %v3738_v51  ;;  %v3711_v51 = vcombine.high %v676_v40, %v684_v41 }
 0x136   : > { %2972 = vmatmul.mubr.bf16.gmra.mxu1 %v3740_v52  ;;  %2882 = vmatprep.mubr.bf16.mxu0 %v3755_v53 }
 0x137   : > { %2979 = vmatprep.mubr.bf16.mxu1 %v3757_v54  ;;  %v3713_v54 = vcombine.high %v677_v44, %v685_v45  ;;  %v724_v44 = vld [vmem:[%s5057_s16 + $0x330] sm:$0xff] }
 0x138   : > { %v732_v45 = vld [vmem:[%s5057_s16 + $0x370] sm:$0xff] }
 0x13d   : > { %2883 = vmatmul.mubr.bf16.gmra.mxu0 %v3754_v59 }
 0x13e   : > { %2980 = vmatmul.mubr.bf16.gmra.mxu1 %v3756_v60  ;;  %2890 = vmatprep.mubr.bf16.mxu0 %v3771_v61 }
 0x13f   : > { %2987 = vmatprep.mubr.bf16.mxu1 %v3773_v62  ;;  %v692_v62 = vld [vmem:[%s5057_s16 + $0x230] sm:$0xff] }
 0x140   : > { %v3727_v9 = vcombine.high %v692_v62, %v700_v63 }
 0x145   : > { %2891 = vmatmul.mubr.bf16.gmra.mxu0 %v3770_v3  ;;  %v701_v3 = vld [vmem:[%s5057_s16 + $0x278] sm:$0xff] }
 0x146   : > { %2988 = vmatmul.mubr.bf16.gmra.mxu1 %v3772_v4  ;;  %3028 = vmatprep.mubr.bf16.mxu0 %v3663_v5 }
 0x147   : > { %3125 = vmatprep.mubr.bf16.mxu1 %v3665_v6  ;;  %v3710_v6 = vcombine.low %v676_v40, %v684_v41 }
 0x14d   : > { %v4007_v15 = vpop.f32.mrf.mxu0  ;;  %3029 = vmatmul.mubr.bf16.vlgmr.msra.gmra.mxu0 %v3662_v11 }
 0x14e   : > { %v4071_v16 = vpop.f32.mrf.mxu1  ;;  %3126 = vmatmul.mubr.bf16.vlgmr.msra.gmra.mxu1 %v3664_v12  ;;  %3036 = vmatprep.mubr.bf16.mxu0 %v3679_v13  ;;  %v3729_v12 = vcombine.high %v693_v2, %v701_v3 }
 0x14f   : > { %v4008_v17 = vpop.f32.mrf.mxu0  ;;  %3133 = vmatprep.mubr.bf16.mxu1 %v3681_v14 }
 0x150   : > { %v4009_v20 = vadd.f32 %v4008_v17, %v4007_v15  ;;  %v4072_v21 = vpop.f32.mrf.mxu1 }
 0x151   : > { %v4073_v24 = vadd.f32 %v4072_v21, %v4071_v16  ;;  %v4010_v25 = vpop.f32.mrf.mxu0  ;;  %v716_v21 = vld [vmem:[%s5057_s16 + $0x2f0] sm:$0xff] }
 0x152   : > { %v4074_v27 = vpop.f32.mrf.mxu1 }
 0x153   : > { %v5296_v30 = vadd.f32 %v4073_v24, %v4009_v20  ;;  %v4011_v31 = vpop.f32.mrf.mxu0  ;;  %v708_v20 = vld [vmem:[%s5057_s16 + $0x2b0] sm:$0xff]  ;;  %v709_v24 = vld [vmem:[%s5057_s16 + $0x2b8] sm:$0xff] }
 0x154   : > { %v4012_v33 = vadd.f32 %v4011_v31, %v4010_v25  ;;  %v4075_v34 = vpop.f32.mrf.mxu1  ;;  %v717_v25 = vld [vmem:[%s5057_s16 + $0x2f8] sm:$0xff]  ;;  %v3728_v31 = vcombine.low %v693_v2, %v701_v3 }
 0x155   : > { %v4076_v35 = vadd.f32 %v4075_v34, %v4074_v27  ;;  %v4013_v36 = vpop.f32.mrf.mxu0  ;;  %3037 = vmatmul.mubr.bf16.gmra.mxu0 %v3678_v26 }
 0x156   : > { %v4077_v37 = vpop.f32.mrf.mxu1  ;;  %3134 = vmatmul.mubr.bf16.gmra.mxu1 %v3680_v28  ;;  %3044 = vmatprep.mubr.bf16.mxu0 %v3695_v29  ;;  %v3726_v28 = vcombine.low %v692_v62, %v700_v63 }
 0x157   : > { %v5298_v38 = vadd.f32 %v4076_v35, %v4012_v33  ;;  %v4014_v39 = vpop.f32.mrf.mxu0  ;;  %3141 = vmatprep.mubr.bf16.mxu1 %v3697_v32  ;;  %v3743_v32 = vcombine.high %v708_v20, %v716_v21  ;;  %v3745_v35 = vcombine.high %v709_v24, %v717_v25 }
 0x158   : > { %v4015_v42 = vadd.f32 %v4014_v39, %v4013_v36  ;;  %v4078_v43 = vpop.f32.mrf.mxu1 }
 0x159   : > { %v4079_v46 = vadd.f32 %v4078_v43, %v4077_v37  ;;  %v4016_v47 = vpop.f32.mrf.mxu0 }
 0x15a   : > { %v4080_v49 = vpop.f32.mrf.mxu1 }
 0x15b   : > { %v5304_v52 = vadd.f32 %v4079_v46, %v4015_v42  ;;  %v4017_v53 = vpop.f32.mrf.mxu0 }
 0x15c   : > { %v4018_v55 = vadd.f32 %v4017_v53, %v4016_v47  ;;  %v4081_v56 = vpop.f32.mrf.mxu1  ;;  %v3742_v53 = vcombine.low %v708_v20, %v716_v21 }
 0x15d   : > { %v4082_v57 = vadd.f32 %v4081_v56, %v4080_v49  ;;  %v4019_v58 = vpop.f32.mrf.mxu0  ;;  %3045 = vmatmul.mubr.bf16.gmra.mxu0 %v3694_v48  ;;  %v725_v48 = vld [vmem:[%s5057_s16 + $0x338] sm:$0xff]  ;;  %v3759_v56 = vcombine.high %v724_v44, %v732_v45 }
 0x15e   : > { %v4083_v59 = vpop.f32.mrf.mxu1  ;;  %3142 = vmatmul.mubr.bf16.gmra.mxu1 %v3696_v50  ;;  %3052 = vmatprep.mubr.bf16.mxu0 %v3711_v51  ;;  %v733_v49 = vld [vmem:[%s5057_s16 + $0x378] sm:$0xff] }
 0x15f   : > { %v5306_v60 = vadd.f32 %v4082_v57, %v4018_v55  ;;  %v4020_v61 = vpop.f32.mrf.mxu0  ;;  %3149 = vmatprep.mubr.bf16.mxu1 %v3713_v54  ;;  %v3744_v55 = vcombine.low %v709_v24, %v717_v25 }
 0x160   : > { %v4021_v0 = vadd.f32 %v4020_v61, %v4019_v58  ;;  %v4084_v1 = vpop.f32.mrf.mxu1 }
 0x161   : > { %v4085_v4 = vadd.f32 %v4084_v1, %v4083_v59  ;;  %v4022_v5 = vpop.f32.mrf.mxu0  ;;  %v3761_v59 = vcombine.high %v725_v48, %v733_v49 }
 0x162   : > { %v4086_v7 = vpop.f32.mrf.mxu1 }
 0x163   : > { %v5312_v10 = vadd.f32 %v4085_v4, %v4021_v0  ;;  %v4023_v11 = vpop.f32.mrf.mxu0  ;;  %v740_v4 = vld [vmem:[%s5057_s16 + $0x3b0] sm:$0xff] }
 0x164   : > { %v4024_v13 = vadd.f32 %v4023_v11, %v4022_v5  ;;  %v4087_v14 = vpop.f32.mrf.mxu1  ;;  %v748_v5 = vld [vmem:[%s5057_s16 + $0x3f0] sm:$0xff] }
 0x165   : > { %v4088_v15 = vadd.f32 %v4087_v14, %v4086_v7  ;;  %v4025_v16 = vpop.f32.mrf.mxu0  ;;  %3053 = vmatmul.mubr.bf16.gmra.mxu0 %v3710_v6 }
 0x166   : > { %v4089_v17 = vpop.f32.mrf.mxu1  ;;  %3150 = vmatmul.mubr.bf16.gmra.mxu1 %v3712_v8  ;;  %3060 = vmatprep.mubr.bf16.mxu0 %v3727_v9  ;;  %v741_v8 = vld [vmem:[%s5057_s16 + $0x3b8] sm:$0xff] }
 0x167   : > { %v5314_v18 = vadd.f32 %v4088_v15, %v4024_v13  ;;  %v4026_v19 = vpop.f32.mrf.mxu0  ;;  %3157 = vmatprep.mubr.bf16.mxu1 %v3729_v12  ;;  %v749_v9 = vld [vmem:[%s5057_s16 + $0x3f8] sm:$0xff]  ;;  %v3758_v13 = vcombine.low %v724_v44, %v732_v45  ;;  %v3760_v15 = vcombine.low %v725_v48, %v733_v49 }
 0x168   : > { %v4027_v22 = vadd.f32 %v4026_v19, %v4025_v16  ;;  %v4090_v23 = vpop.f32.mrf.mxu1  ;;  %v3775_v16 = vcombine.high %v740_v4, %v748_v5  ;;  %v3777_v20 = vcombine.high %v741_v8, %v749_v9 }
 0x169   : > { %v4091_v26 = vadd.f32 %v4090_v23, %v4089_v17  ;;  %v4028_v27 = vpop.f32.mrf.mxu0 }
 0x16a   : > { %v4092_v29 = vpop.f32.mrf.mxu1 }
 0x16b   : > { %v5320_v33 = vadd.f32 %v4091_v26, %v4027_v22  ;;  %v4029_v34 = vpop.f32.mrf.mxu0 }
 0x16c   : > { %v4030_v36 = vadd.f32 %v4029_v34, %v4028_v27  ;;  %v4093_v37 = vpop.f32.mrf.mxu1  ;;  %v3774_v34 = vcombine.low %v740_v4, %v748_v5 }
 0x16d   : > { %v4094_v39 = vadd.f32 %v4093_v37, %v4092_v29  ;;  %v4031_v40 = vpop.f32.mrf.mxu0  ;;  %3061 = vmatmul.mubr.bf16.gmra.mxu0 %v3726_v28 }
 0x16e   : > { %v4095_v41 = vpop.f32.mrf.mxu1  ;;  %3158 = vmatmul.mubr.bf16.gmra.mxu1 %v3728_v31  ;;  %3068 = vmatprep.mubr.bf16.mxu0 %v3743_v32 }
 0x16f   : > { %v5322_v42 = vadd.f32 %v4094_v39, %v4030_v36  ;;  %v4032_v43 = vpop.f32.mrf.mxu0  ;;  %3165 = vmatprep.mubr.bf16.mxu1 %v3745_v35  ;;  %v3776_v36 = vcombine.low %v741_v8, %v749_v9 }
 0x170   : > { %v4033_v46 = vadd.f32 %v4032_v43, %v4031_v40  ;;  %v4096_v47 = vpop.f32.mrf.mxu1 }
 0x171   : > { %v4097_v50 = vadd.f32 %v4096_v47, %v4095_v41  ;;  %v4034_v51 = vpop.f32.mrf.mxu0 }
 0x172   : > { %v4098_v54 = vpop.f32.mrf.mxu1 }
 0x173   : > { %v5328_v57 = vadd.f32 %v4097_v50, %v4033_v46  ;;  %v4035_v58 = vpop.f32.mrf.mxu0 }
 0x174   : > { %v4036_v61 = vadd.f32 %v4035_v58, %v4034_v51  ;;  %v4099_v62 = vpop.f32.mrf.mxu1 }
 0x175   : > { %v4100_v63 = vadd.f32 %v4099_v62, %v4098_v54  ;;  %v4037_v0 = vpop.f32.mrf.mxu0  ;;  %3069 = vmatmul.mubr.bf16.gmra.mxu0 %v3742_v53 }
 0x176   : > { %v4101_v1 = vpop.f32.mrf.mxu1  ;;  %3166 = vmatmul.mubr.bf16.gmra.mxu1 %v3744_v55  ;;  %3076 = vmatprep.mubr.bf16.mxu0 %v3759_v56 }
 0x177   : > { %v5330_v2 = vadd.f32 %v4100_v63, %v4036_v61  ;;  %v4038_v3 = vpop.f32.mrf.mxu0  ;;  %3173 = vmatprep.mubr.bf16.mxu1 %v3761_v59 }
 0x178   : > { %v4039_v6 = vadd.f32 %v4038_v3, %v4037_v0  ;;  %v4102_v7 = vpop.f32.mrf.mxu1 }
 0x179   : > { %v4103_v11 = vadd.f32 %v4102_v7, %v4101_v1  ;;  %v4040_v12 = vpop.f32.mrf.mxu0 }
 0x17a   : > { %v4104_v14 = vpop.f32.mrf.mxu1 }
 0x17b   : > { %v5336_v17 = vadd.f32 %v4103_v11, %v4039_v6  ;;  %v4041_v19 = vpop.f32.mrf.mxu0 }
 0x17c   : > { %v4042_v21 = vadd.f32 %v4041_v19, %v4040_v12  ;;  %v4105_v22 = vpop.f32.mrf.mxu1 }
 0x17d   : > { %v4106_v23 = vadd.f32 %v4105_v22, %v4104_v14  ;;  %v4043_v24 = vpop.f32.mrf.mxu0  ;;  %3077 = vmatmul.mubr.bf16.gmra.mxu0 %v3758_v13 }
 0x17e   : > { %v4107_v25 = vpop.f32.mrf.mxu1  ;;  %3174 = vmatmul.mubr.bf16.gmra.mxu1 %v3760_v15  ;;  %3084 = vmatprep.mubr.bf16.mxu0 %v3775_v16 }
 0x17f   : > { %v5338_v26 = vadd.f32 %v4106_v23, %v4042_v21  ;;  %v4044_v27 = vpop.f32.mrf.mxu0  ;;  %3181 = vmatprep.mubr.bf16.mxu1 %v3777_v20 }
 0x180   : > { %v4045_v28 = vadd.f32 %v4044_v27, %v4043_v24  ;;  %v4108_v29 = vpop.f32.mrf.mxu1 }
 0x181   : > { %v4109_v31 = vadd.f32 %v4108_v29, %v4107_v25  ;;  %v4046_v32 = vpop.f32.mrf.mxu0 }
 0x182   : > { %v4110_v35 = vpop.f32.mrf.mxu1 }
 0x183   : > { %v5340_v37 = vadd.f32 %v4109_v31, %v4045_v28  ;;  %v4047_v39 = vpop.f32.mrf.mxu0 }
 0x184   : > { %v4048_v40 = vadd.f32 %v4047_v39, %v4046_v32  ;;  %v4111_v41 = vpop.f32.mrf.mxu1 }
 0x185   : > { %v4112_v43 = vadd.f32 %v4111_v41, %v4110_v35  ;;  %v4049_v44 = vpop.f32.mrf.mxu0  ;;  %3085 = vmatmul.mubr.bf16.gmra.mxu0 %v3774_v34 }
 0x186   : > { %v4113_v45 = vpop.f32.mrf.mxu1  ;;  %3182 = vmatmul.mubr.bf16.gmra.mxu1 %v3776_v36 }
 0x187   : > { %v5342_v46 = vadd.f32 %v4112_v43, %v4048_v40  ;;  %v4050_v47 = vpop.f32.mrf.mxu0 }
 0x188   : > { %v4051_v48 = vadd.f32 %v4050_v47, %v4049_v44  ;;  %v4114_v49 = vpop.f32.mrf.mxu1 }
 0x189   : > { %v4115_v50 = vadd.f32 %v4114_v49, %v4113_v45  ;;  %v4052_v51 = vpop.f32.mrf.mxu0 }
 0x18a   : > { %v4116_v53 = vpop.f32.mrf.mxu1 }
 0x18b   : > { %v5344_v54 = vadd.f32 %v4115_v50, %v4051_v48  ;;  %v4053_v55 = vpop.f32.mrf.mxu0 }
 0x18c   : > { %v4054_v56 = vadd.f32 %v4053_v55, %v4052_v51  ;;  %v4117_v58 = vpop.f32.mrf.mxu1 }
 0x18d   : > { %v4118_v59 = vadd.f32 %v4117_v58, %v4116_v53  ;;  %v4135_v61 = vpop.f32.mrf.mxu0 }
 0x18e   : > { %v4199_v62 = vpop.f32.mrf.mxu1 }
 0x18f   : > { %v5346_v63 = vadd.f32 %v4118_v59, %v4054_v56  ;;  %v4136_v0 = vpop.f32.mrf.mxu0 }
 0x190   : > { %v4137_v1 = vadd.f32 %v4136_v0, %v4135_v61  ;;  %v4200_v3 = vpop.f32.mrf.mxu1 }
 0x191   : > { %v4201_v4 = vadd.f32 %v4200_v3, %v4199_v62  ;;  %v4138_v5 = vpop.f32.mrf.mxu0 }
 0x192   : > { %v2643_v6 = vadd.f32 %v4137_v1, %v5296_v30  ;;  %v4202_v7 = vpop.f32.mrf.mxu1 }
 0x193   : > { %v4139_v8 = vpop.f32.mrf.mxu0 }
 0x194   : > { %v5349_v9 = vadd.f32 %v4201_v4, %v2643_v6  ;;  %v4140_v11 = vadd.f32 %v4139_v8, %v4138_v5  ;;  %v4203_v12 = vpop.f32.mrf.mxu1 }
 0x195   : > { %v4204_v13 = vadd.f32 %v4203_v12, %v4202_v7  ;;  %v4141_v14 = vpop.f32.mrf.mxu0 }
 0x196   : > { %v2646_v15 = vadd.f32 %v4140_v11, %v5298_v38  ;;  %v4205_v16 = vpop.f32.mrf.mxu1 }
 0x197   : > { %v4142_v19 = vpop.f32.mrf.mxu0 }
 0x198   : > { %v5352_v20 = vadd.f32 %v4204_v13, %v2646_v15  ;;  %v4143_v21 = vadd.f32 %v4142_v19, %v4141_v14  ;;  %v4206_v22 = vpop.f32.mrf.mxu1 }
 0x199   : > { %v4207_v23 = vadd.f32 %v4206_v22, %v4205_v16  ;;  %v4144_v24 = vpop.f32.mrf.mxu0 }
 0x19a   : > { %v2651_v30 = vadd.f32 %v4143_v21, %v5304_v52  ;;  %v4208_v25 = vpop.f32.mrf.mxu1 }
 0x19b   : > { %v4145_v27 = vpop.f32.mrf.mxu0 }
 0x19c   : > { %v5355_v28 = vadd.f32 %v4207_v23, %v2651_v30  ;;  %v4146_v29 = vadd.f32 %v4145_v27, %v4144_v24  ;;  %v4209_v31 = vpop.f32.mrf.mxu1 }
 0x19d   : > { %v4210_v32 = vadd.f32 %v4209_v31, %v4208_v25  ;;  %v4147_v34 = vpop.f32.mrf.mxu0 }
 0x19e   : > { %v2654_v38 = vadd.f32 %v4146_v29, %v5306_v60  ;;  %v4211_v35 = vpop.f32.mrf.mxu1 }
 0x19f   : > { %v4148_v36 = vpop.f32.mrf.mxu0 }
 0x1a0   : > { %v5358_v39 = vadd.f32 %v4210_v32, %v2654_v38  ;;  %v4149_v40 = vadd.f32 %v4148_v36, %v4147_v34  ;;  %v4212_v41 = vpop.f32.mrf.mxu1 }
 0x1a1   : > { %v4213_v43 = vadd.f32 %v4212_v41, %v4211_v35  ;;  %v4150_v44 = vpop.f32.mrf.mxu0 }
 0x1a2   : > { %v2659_v52 = vadd.f32 %v4149_v40, %v5312_v10  ;;  %v4214_v45 = vpop.f32.mrf.mxu1 }
 0x1a3   : > { %v4151_v47 = vpop.f32.mrf.mxu0 }
 0x1a4   : > { %v5361_v48 = vadd.f32 %v4213_v43, %v2659_v52  ;;  %v4152_v49 = vadd.f32 %v4151_v47, %v4150_v44  ;;  %v4215_v50 = vpop.f32.mrf.mxu1 }
 0x1a5   : > { %v4216_v51 = vadd.f32 %v4215_v50, %v4214_v45  ;;  %v4153_v53 = vpop.f32.mrf.mxu0 }
 0x1a6   : > { %v2662_v60 = vadd.f32 %v4152_v49, %v5314_v18  ;;  %v4217_v55 = vpop.f32.mrf.mxu1 }
 0x1a7   : > { %v4154_v56 = vpop.f32.mrf.mxu0 }
 0x1a8   : > { %v5364_v58 = vadd.f32 %v4216_v51, %v2662_v60  ;;  %v4155_v59 = vadd.f32 %v4154_v56, %v4153_v53  ;;  %v4218_v61 = vpop.f32.mrf.mxu1 }
 0x1a9   : > { %v4219_v62 = vadd.f32 %v4218_v61, %v4217_v55  ;;  %v4156_v0 = vpop.f32.mrf.mxu0 }
 0x1aa   : > { %v2667_v10 = vadd.f32 %v4155_v59, %v5320_v33  ;;  %v4220_v1 = vpop.f32.mrf.mxu1 }
 0x1ab   : > { %v4157_v3 = vpop.f32.mrf.mxu0 }
 0x1ac   : > { %v5367_v4 = vadd.f32 %v4219_v62, %v2667_v10  ;;  %v4158_v5 = vadd.f32 %v4157_v3, %v4156_v0  ;;  %v4221_v6 = vpop.f32.mrf.mxu1 }
 0x1ad   : > { %v4222_v7 = vadd.f32 %v4221_v6, %v4220_v1  ;;  %v4159_v8 = vpop.f32.mrf.mxu0 }
 0x1ae   : > { %v2670_v18 = vadd.f32 %v4158_v5, %v5322_v42  ;;  %v4223_v11 = vpop.f32.mrf.mxu1 }
 0x1af   : > { %v4160_v12 = vpop.f32.mrf.mxu0 }
 0x1b0   : > { %v5370_v13 = vadd.f32 %v4222_v7, %v2670_v18  ;;  %v4161_v14 = vadd.f32 %v4160_v12, %v4159_v8  ;;  %v4224_v15 = vpop.f32.mrf.mxu1 }
 0x1b1   : > { %v4225_v16 = vadd.f32 %v4224_v15, %v4223_v11  ;;  %v4162_v19 = vpop.f32.mrf.mxu0 }
 0x1b2   : > { %v2675_v33 = vadd.f32 %v4161_v14, %v5328_v57  ;;  %v4226_v21 = vpop.f32.mrf.mxu1 }
 0x1b3   : > { %v4163_v22 = vpop.f32.mrf.mxu0 }
 0x1b4   : > { %v5373_v23 = vadd.f32 %v4225_v16, %v2675_v33  ;;  %v4164_v24 = vadd.f32 %v4163_v22, %v4162_v19  ;;  %v4227_v30 = vpop.f32.mrf.mxu1 }
 0x1b5   : > { %v4228_v25 = vadd.f32 %v4227_v30, %v4226_v21  ;;  %v4165_v27 = vpop.f32.mrf.mxu0 }
 0x1b6   : > { %v2678_v42 = vadd.f32 %v4164_v24, %v5330_v2  ;;  %v4229_v29 = vpop.f32.mrf.mxu1 }
 0x1b7   : > { %v4166_v31 = vpop.f32.mrf.mxu0 }
 0x1b8   : > { %v5376_v32 = vadd.f32 %v4228_v25, %v2678_v42  ;;  %v4167_v34 = vadd.f32 %v4166_v31, %v4165_v27  ;;  %v4230_v38 = vpop.f32.mrf.mxu1 }
 0x1b9   : > { %v4231_v35 = vadd.f32 %v4230_v38, %v4229_v29  ;;  %v4168_v36 = vpop.f32.mrf.mxu0 }
 0x1ba   : > { %v2683_v57 = vadd.f32 %v4167_v34, %v5336_v17  ;;  %v4232_v40 = vpop.f32.mrf.mxu1 }
 0x1bb   : > { %v4169_v41 = vpop.f32.mrf.mxu0 }
 0x1bc   : > { %v5379_v43 = vadd.f32 %v4231_v35, %v2683_v57  ;;  %v4170_v44 = vadd.f32 %v4169_v41, %v4168_v36  ;;  %v4233_v52 = vpop.f32.mrf.mxu1 }
 0x1bd   : > { %v4234_v45 = vadd.f32 %v4233_v52, %v4232_v40  ;;  %v4171_v47 = vpop.f32.mrf.mxu0 }
 0x1be   : > { %5782 = vst [vmem:[#allocation4_spill] sm:$0xff] %v5379_v43  ;;  %v2686_v2 = vadd.f32 %v4170_v44, %v5338_v26  ;;  %v4235_v49 = vpop.f32.mrf.mxu1 }
 0x1bf   : > { %v4172_v50 = vpop.f32.mrf.mxu0 }
 0x1c0   : > { %v5382_v51 = vadd.f32 %v4234_v45, %v2686_v2  ;;  %v4173_v53 = vadd.f32 %v4172_v50, %v4171_v47  ;;  %v4236_v60 = vpop.f32.mrf.mxu1 }
 0x1c1   : > { %v4237_v55 = vadd.f32 %v4236_v60, %v4235_v49  ;;  %v4174_v56 = vpop.f32.mrf.mxu0 }
 0x1c2   : > { %5783 = vst [vmem:[#allocation5_spill] sm:$0xff] %v5382_v51  ;;  %v2691_v17 = vadd.f32 %v4173_v53, %v5340_v37  ;;  %v4238_v59 = vpop.f32.mrf.mxu1 }
 0x1c3   : > { %v4175_v61 = vpop.f32.mrf.mxu0 }
 0x1c4   : > { %v5385_v62 = vadd.f32 %v4237_v55, %v2691_v17  ;;  %v4176_v0 = vadd.f32 %v4175_v61, %v4174_v56  ;;  %v4239_v10 = vpop.f32.mrf.mxu1 }
 0x1c5   : > { %v4240_v1 = vadd.f32 %v4239_v10, %v4238_v59  ;;  %v4177_v3 = vpop.f32.mrf.mxu0 }
 0x1c6   : > { %5784 = vst [vmem:[#allocation6_spill] sm:$0xff] %v5385_v62  ;;  %v2694_v26 = vadd.f32 %v4176_v0, %v5342_v46  ;;  %v4241_v5 = vpop.f32.mrf.mxu1 }
 0x1c7   : > { %v4178_v6 = vpop.f32.mrf.mxu0 }
 0x1c8   : > { %v5388_v7 = vadd.f32 %v4240_v1, %v2694_v26  ;;  %v4179_v8 = vadd.f32 %v4178_v6, %v4177_v3  ;;  %v4242_v18 = vpop.f32.mrf.mxu1 }
 0x1c9   : > { %v4243_v11 = vadd.f32 %v4242_v18, %v4241_v5  ;;  %v4180_v12 = vpop.f32.mrf.mxu0 }
 0x1ca   : > { %5785 = vst [vmem:[#allocation7_spill] sm:$0xff] %v5388_v7  ;;  %v2699_v37 = vadd.f32 %v4179_v8, %v5344_v54  ;;  %v4244_v14 = vpop.f32.mrf.mxu1 }
 0x1cb   : > { %v4181_v15 = vpop.f32.mrf.mxu0 }
 0x1cc   : > { %v5391_v16 = vadd.f32 %v4243_v11, %v2699_v37  ;;  %v4182_v19 = vadd.f32 %v4181_v15, %v4180_v12  ;;  %v4245_v33 = vpop.f32.mrf.mxu1 }
 0x1cd   : > { %v4246_v21 = vadd.f32 %v4245_v33, %v4244_v14  ;;  %v4263_v22 = vpop.f32.mrf.mxu0 }
 0x1ce   : > { %5786 = vst [vmem:[#allocation8_spill] sm:$0xff] %v5391_v16  ;;  %v2702_v46 = vadd.f32 %v4182_v19, %v5346_v63  ;;  %v5394_v24 = vpop.f32.mrf.mxu1 }
 0x1cf   : > { %v4264_v30 = vpop.f32.mrf.mxu0 }
 0x1d0   : > { %v5396_v25 = vadd.f32 %v4246_v21, %v2702_v46  ;;  %v5398_v27 = vpop.f32.mrf.mxu1 }
 0x1d1   : > { %v4266_v42 = vpop.f32.mrf.mxu0 }
 0x1d2   : > { %5787 = vst [vmem:[#allocation9_spill] sm:$0xff] %v5396_v25  ;;  %v5400_v29 = vpop.f32.mrf.mxu1 }
 0x1d3   : > { %v4267_v54 = vpop.f32.mrf.mxu0 }
 0x1d4   : > { %v5402_v31 = vpop.f32.mrf.mxu1 }
 0x1d5   : > { %v5404_v34 = vpop.f32.mrf.mxu0 }
 0x1d6   : > { %v5406_v38 = vpop.f32.mrf.mxu1 }
 0x1d7   : > { %v5408_v35 = vpop.f32.mrf.mxu0 }
 0x1d8   : > { %v5410_v63 = vpop.f32.mrf.mxu1 }
 0x1d9   : > { %v5412_v36 = vpop.f32.mrf.mxu0 }
 0x1da   : > { %v5414_v57 = vpop.f32.mrf.mxu1 }
 0x1db   : > { %v5416_v40 = vpop.f32.mrf.mxu0 }
 0x1dc   : > { %v5418_v41 = vpop.f32.mrf.mxu1 }
 0x1dd   : > { %v5420_v44 = vpop.f32.mrf.mxu0 }
 0x1de   : > { %v5422_v52 = vpop.f32.mrf.mxu1 }
 0x1df   : > { %v5424_v45 = vpop.f32.mrf.mxu0 }
 0x1e0   : > { %v5426_v47 = vpop.f32.mrf.mxu1 }
 0x1e1   : > { %v5428_v2 = vpop.f32.mrf.mxu0 }
 0x1e2   : > { %v5430_v49 = vpop.f32.mrf.mxu1 }
 0x1e3   : > { %v5432_v50 = vpop.f32.mrf.mxu0 }
 0x1e4   : > { %v5434_v53 = vpop.f32.mrf.mxu1 }
 0x1e5   : > { %v5436_v60 = vpop.f32.mrf.mxu0 }
 0x1e6   : > { %v5438_v55 = vpop.f32.mrf.mxu1 }
 0x1e7   : > { %v5440_v56 = vpop.f32.mrf.mxu0 }
 0x1e8   : > { %v5442_v17 = vpop.f32.mrf.mxu1 }
 0x1e9   : > { %v5444_v59 = vpop.f32.mrf.mxu0 }
 0x1ea   : > { %v5446_v61 = vpop.f32.mrf.mxu1 }
 0x1eb   : > { %v5448_v0 = vpop.f32.mrf.mxu0 }
 0x1ec   : > { %v5450_v10 = vpop.f32.mrf.mxu1 }
 0x1ed   : > { %v5452_v1 = vpop.f32.mrf.mxu0 }
 0x1ee   : > { %v5454_v3 = vpop.f32.mrf.mxu1 }
 0x1ef   : > { %v5456_v26 = vpop.f32.mrf.mxu0 }
 0x1f0   : > { %v5458_v5 = vpop.f32.mrf.mxu1 }
 0x1f1   : > { %v5460_v6 = vpop.f32.mrf.mxu0 }
 0x1f2   : > { %v5462_v8 = vpop.f32.mrf.mxu1 }
 0x1f3   : > { %v5464_v18 = vpop.f32.mrf.mxu0 }
 0x1f4   : > { %v5466_v11 = vpop.f32.mrf.mxu1 }
 0x1f5   : > { %5788 = vst [vmem:[#allocation10_spill] sm:$0xff] %v5466_v11  ;;  %v5468_v12 = vpop.f32.mrf.mxu0  ;;  %v606_v11 = vld [vmem:[#allocation2 + $0x30] sm:$0xff] }
 0x1f6   : > { %v5470_v37 = vpop.f32.mrf.mxu1 }
 0x1f7   : > { %5789 = vst [vmem:[#allocation11_spill] sm:$0xff] %v5470_v37  ;;  %v5472_v14 = vpop.f32.mrf.mxu0 }
 0x1f8   : > { %v5474_v15 = vpop.f32.mrf.mxu1 }
 0x1f9   : > { %5790 = vst [vmem:[#allocation12_spill] sm:$0xff] %v5474_v15  ;;  %v5476_v19 = vpop.f32.mrf.mxu0 }
 0x1fa   : > { %5791 = vst [vmem:[#allocation13_spill] sm:$0xff] %v5476_v19  ;;  %v5478_v33 = vpop.f32.mrf.mxu1 }
 0x1fb   : > { %5792 = vst [vmem:[#allocation14_spill] sm:$0xff] %v5478_v33  ;;  %v5480_v21 = vpop.f32.mrf.mxu0 }
 0x1fc   : > { %5793 = vst [vmem:[#allocation15_spill] sm:$0xff] %v5480_v21  ;;  %v5482_v46 = vpop.f32.mrf.mxu1 }
 0x1fd   : > { %5794 = vst [vmem:[#allocation16_spill] sm:$0xff] %v5482_v46  ;;  %v5484_v25 = vpop.f32.mrf.mxu0 }
 0x1fe   : > { %5795 = vst [vmem:[#allocation17_spill] sm:$0xff] %v5484_v25  ;;  %v5486_v16 = vpop.f32.mrf.mxu1  ;;  %v4265_v25 = vadd.f32 %v4264_v30, %v4263_v22 }
 0x1ff   : > { %5796 = vst [vmem:[#allocation18_spill] sm:$0xff] %v5486_v16  ;;  %v5488_v7 = vpop.f32.mrf.mxu0 }
 0x200   : > { %5797 = vst [vmem:[#allocation19_spill] sm:$0xff] %v5488_v7  ;;  %v5490_v62 = vpop.f32.mrf.mxu1 }
 0x201   : > { %5798 = vst [vmem:[#allocation20_spill] sm:$0xff] %v5490_v62  ;;  %v5492_v51 = vpop.f32.mrf.mxu0 }
 0x202   : > { %5799 = vst [vmem:[#allocation21_spill] sm:$0xff] %v5492_v51  ;;  %v5494_v37 = vpop.f32.mrf.mxu1  ;;  %v4268_v51 = vadd.f32 %v4267_v54, %v4266_v42  ;;  %v4332_v54 = vadd.f32 %v5402_v31, %v5400_v29 }
 0x203   : > { %5800 = vst [vmem:[#allocation22_spill] sm:$0xff] %v5494_v37  ;;  %v5496_v15 = vpop.f32.mrf.mxu0  ;;  %v2837_v37 = vadd.f32 %v4265_v25, %v5349_v9 }
 0x204   : > { %5801 = vst [vmem:[#allocation23_spill] sm:$0xff] %v5496_v15  ;;  %v5498_v19 = vpop.f32.mrf.mxu1  ;;  %v2840_v22 = vadd.f32 %v4268_v51, %v5352_v20  ;;  %v4274_v20 = vadd.f32 %v5416_v40, %v5412_v36 }
 0x205   : > { %5802 = vst [vmem:[#allocation24_spill] sm:$0xff] %v5498_v19  ;;  %v5500_v33 = vpop.f32.mrf.mxu0 }
 0x206   : > { %5803 = vst [vmem:[#allocation25_spill] sm:$0xff] %v5500_v33  ;;  %v5502_v21 = vpop.f32.mrf.mxu1 }
 0x207   : > { %5804 = vst [vmem:[#allocation26_spill] sm:$0xff] %v5502_v21  ;;  %v5504_v46 = vpop.f32.mrf.mxu0  ;;  %v4329_v21 = vadd.f32 %v5398_v27, %v5394_v24 }
 0x208   : > { %5805 = vst [vmem:[#allocation27_spill] sm:$0xff] %v5504_v46  ;;  %v5506_v16 = vpop.f32.mrf.mxu1  ;;  %v2937_v46 = vadd.f32 %v4332_v54, %v2840_v22 }
 0x209   : > { %5806 = vst [vmem:[#allocation28_spill] sm:$0xff] %v5506_v16  ;;  %v5508_v7 = vpop.f32.mrf.mxu0  ;;  %v2934_v16 = vadd.f32 %v4329_v21, %v2837_v37  ;;  %v607_v21 = vld [vmem:[#allocation2] sm:$0xff] }
 0x20a   : > { %5807 = vst [vmem:[#allocation29_spill] sm:$0xff] %v5508_v7  ;;  %v5510_v62 = vpop.f32.mrf.mxu1  ;;  %v4271_v7 = vadd.f32 %v5408_v35, %v5404_v34 }
 0x20b   : > { %5808 = vst [vmem:[#allocation30_spill] sm:$0xff] %v5510_v62  ;;  %v5512_v43 = vpop.f32.mrf.mxu0 }
 0x20c   : > { %5809 = vst [vmem:[#allocation31_spill] sm:$0xff] %v5512_v43  ;;  %v5515_v15 = vpop.f32.mrf.mxu1  ;;  %v2845_v27 = vadd.f32 %v4271_v7, %v5355_v28  ;;  %v2848_v7 = vadd.f32 %v4274_v20, %v5358_v39  ;;  %v4280_v39 = vadd.f32 %v5432_v50, %v5428_v2  ;;  %v4283_v2 = vadd.f32 %v5440_v56, %v5436_v60 }
 0x20d   : > { %5810 = vst [vmem:[#allocation32_spill] sm:$0xff] %v5515_v15  ;;  %v4391_v19 = vpop.f32.mrf.mxu0 }
 0x20e   : > { %v4455_v33 = vpop.f32.mrf.mxu1  ;;  %v2861_v60 = vadd.f32 %v4283_v2, %v5367_v4  ;;  %v4289_v4 = vadd.f32 %v5456_v26, %v5452_v1  ;;  %v4292_v1 = vadd.f32 %v5464_v18, %v5460_v6 }
 0x20f   : > { %v4392_v30 = vpop.f32.mrf.mxu0 }
 0x210   : > { %v4393_v62 = vadd.f32 %v4392_v30, %v4391_v19  ;;  %v4456_v42 = vpop.f32.mrf.mxu1  ;;  %v4335_v19 = vadd.f32 %v5410_v63, %v5406_v38  ;;  %v4338_v38 = vadd.f32 %v5418_v41, %v5414_v57  ;;  %v2872_v6 = vadd.f32 %v4292_v1, %v5376_v32  ;;  %v5823_v1 = vld [vmem:[#allocation23_spill] sm:$0xff] }
 0x211   : > { %v4394_v9 = vpop.f32.mrf.mxu0  ;;  %v4457_v15 = vadd.f32 %v4456_v42, %v4455_v33  ;;  %v4277_v33 = vadd.f32 %v5424_v45, %v5420_v44  ;;  %v608_v44 = vld [vmem:[#allocation2 + $0x58] sm:$0xff] }
 0x212   : > { %v3031_v25 = vadd.f32 %v4393_v62, %v2934_v16  ;;  %v4458_v43 = vpop.f32.mrf.mxu1  ;;  %v2942_v28 = vadd.f32 %v4335_v19, %v2845_v27  ;;  %v2945_v54 = vadd.f32 %v4338_v38, %v2848_v7  ;;  %v4341_v27 = vadd.f32 %v5426_v47, %v5422_v52 }
 0x213   : > { %v4395_v24 = vpop.f32.mrf.mxu0  ;;  %v2853_v42 = vadd.f32 %v4277_v33, %v5361_v48  ;;  %v609_v48 = vld [vmem:[#allocation2 + $0x18] sm:$0xff]  ;;  %v2856_v19 = vadd.f32 %v4280_v39, %v5364_v58  ;;  %v4344_v52 = vadd.f32 %v5434_v53, %v5430_v49  ;;  %v4347_v49 = vadd.f32 %v5442_v17, %v5438_v55 }
 0x214   : > { %v3128_v51 = vadd.f32 %v4457_v15, %v3031_v25  ;;  %v4396_v37 = vadd.f32 %v4395_v24, %v4394_v9  ;;  %v4459_v34 = vpop.f32.mrf.mxu1 }
 0x215   : > { %v4397_v35 = vpop.f32.mrf.mxu0  ;;  %v4460_v62 = vadd.f32 %v4459_v34, %v4458_v43  ;;  %v2950_v34 = vadd.f32 %v4341_v27, %v2853_v42  ;;  %v2953_v7 = vadd.f32 %v4344_v52, %v2856_v19  ;;  %v2869_v27 = vadd.f32 %v4289_v4, %v5373_v23  ;;  %v5819_v4 = vld [vmem:[#allocation19_spill] sm:$0xff] }
 0x216   : > { %v3190_v29 = vadd.f32 %v3128_v51, %v606_v11  ;;  %v3034_v31 = vadd.f32 %v4396_v37, %v2937_v46  ;;  %v4461_v16 = vpop.f32.mrf.mxu1 }
 0x217   : > { %v4398_v22 = vpop.f32.mrf.mxu0 }
 0x218   : > { %3206 = vst [vmem:[#allocation2 + $0x30] sm:$0xff] %v3190_v29  ;;  %v3131_v36 = vadd.f32 %v4460_v62, %v3034_v31  ;;  %v4399_v40 = vadd.f32 %v4398_v22, %v4397_v35  ;;  %v4462_v15 = vpop.f32.mrf.mxu1  ;;  %v4286_v22 = vadd.f32 %v5448_v0, %v5444_v59  ;;  %v611_v59 = vld [vmem:[#allocation2 + $0x68] sm:$0xff] }
 0x219   : > { %v4400_v30 = vpop.f32.mrf.mxu0  ;;  %v4463_v43 = vadd.f32 %v4462_v15, %v4461_v16 }
 0x21a   : > { %v3191_v63 = vadd.f32 %v3131_v36, %v607_v21  ;;  %v3039_v11 = vadd.f32 %v4399_v40, %v2942_v28  ;;  %v4464_v46 = vpop.f32.mrf.mxu1  ;;  %v610_v28 = vld [vmem:[#allocation2 + $0x50] sm:$0xff] }
 0x21b   : > { %v4401_v45 = vpop.f32.mrf.mxu0 }
 0x21c   : > { %3207 = vst [vmem:[#allocation2] sm:$0xff] %v3191_v63  ;;  %v3136_v9 = vadd.f32 %v4463_v43, %v3039_v11  ;;  %v4402_v25 = vadd.f32 %v4401_v45, %v4400_v30  ;;  %v4465_v24 = vpop.f32.mrf.mxu1  ;;  %v2864_v11 = vadd.f32 %v4286_v22, %v5370_v13  ;;  %v2958_v43 = vadd.f32 %v4347_v49, %v2861_v60  ;;  %v612_v13 = vld [vmem:[#allocation2 + $0x8] sm:$0xff] }
 0x21d   : > { %v4403_v57 = vpop.f32.mrf.mxu0  ;;  %v4466_v51 = vadd.f32 %v4465_v24, %v4464_v46  ;;  %v4350_v45 = vadd.f32 %v5450_v10, %v5446_v61  ;;  %v4353_v61 = vadd.f32 %v5458_v5, %v5454_v3  ;;  %v5813_v22 = vld [vmem:[#allocation13_spill] sm:$0xff] }
 0x21e   : > { %v3192_v41 = vadd.f32 %v3136_v9, %v608_v44  ;;  %v3042_v20 = vadd.f32 %v4402_v25, %v2945_v54  ;;  %v4467_v37 = vpop.f32.mrf.mxu1 }
 0x21f   : > { %v4404_v35 = vpop.f32.mrf.mxu0  ;;  %v2961_v25 = vadd.f32 %v4350_v45, %v2864_v11  ;;  %v2966_v19 = vadd.f32 %v4353_v61, %v2869_v27  ;;  %v5822_v27 = vld [vmem:[#allocation21_spill] sm:$0xff]  ;;  %v5824_v61 = vld [vmem:[#allocation6_spill] sm:$0xff] }
 0x220   : > { %3208 = vst [vmem:[#allocation2 + $0x58] sm:$0xff] %v3192_v41  ;;  %v3139_v50 = vadd.f32 %v4466_v51, %v3042_v20  ;;  %v4405_v29 = vadd.f32 %v4404_v35, %v4403_v57  ;;  %v4468_v31 = vpop.f32.mrf.mxu1  ;;  %v613_v35 = vld [vmem:[#allocation2 + $0x48] sm:$0xff] }
 0x221   : > { %v4406_v62 = vpop.f32.mrf.mxu0  ;;  %v4469_v33 = vadd.f32 %v4468_v31, %v4467_v37  ;;  %v5811_v31 = vld [vmem:[#allocation10_spill] sm:$0xff] }
 0x222   : > { %v3193_v47 = vadd.f32 %v3139_v50, %v609_v48  ;;  %v3047_v16 = vadd.f32 %v4405_v29, %v2950_v34  ;;  %v4470_v21 = vpop.f32.mrf.mxu1  ;;  %v4295_v48 = vadd.f32 %v5472_v14, %v5468_v12  ;;  %v4356_v3 = vadd.f32 %v5811_v31, %v5462_v8  ;;  %v614_v12 = vld [vmem:[#allocation2 + $0x40] sm:$0xff] }
 0x223   : > { %v4407_v58 = vpop.f32.mrf.mxu0 }
 0x224   : > { %3209 = vst [vmem:[#allocation2 + $0x18] sm:$0xff] %v3193_v47  ;;  %v3144_v56 = vadd.f32 %v4469_v33, %v3047_v16  ;;  %v4408_v36 = vadd.f32 %v4407_v58, %v4406_v62  ;;  %v4471_v40 = vpop.f32.mrf.mxu1  ;;  %v5812_v16 = vld [vmem:[#allocation4_spill] sm:$0xff] }
 0x225   : > { %v4409_v15 = vpop.f32.mrf.mxu0  ;;  %v4472_v38 = vadd.f32 %v4471_v40, %v4470_v21  ;;  %v2877_v33 = vadd.f32 %v4295_v48, %v5812_v16  ;;  %v2969_v21 = vadd.f32 %v4356_v3, %v2872_v6  ;;  %v617_v3 = vld [vmem:[#allocation2 + $0x38] sm:$0xff] }
 0x226   : > { %v3194_v53 = vadd.f32 %v3144_v56, %v610_v28  ;;  %v3050_v30 = vadd.f32 %v4408_v36, %v2953_v7  ;;  %v4473_v63 = vpop.f32.mrf.mxu1  ;;  %v5814_v28 = vld [vmem:[#allocation15_spill] sm:$0xff]  ;;  %v5816_v36 = vld [vmem:[#allocation12_spill] sm:$0xff] }
 0x227   : > { %v4410_v0 = vpop.f32.mrf.mxu0  ;;  %v4298_v32 = vadd.f32 %v5814_v28, %v5813_v22  ;;  %v5815_v56 = vld [vmem:[#allocation11_spill] sm:$0xff]  ;;  %v5831_v22 = vld [vmem:[#allocation24_spill] sm:$0xff] }
 0x228   : > { %3210 = vst [vmem:[#allocation2 + $0x50] sm:$0xff] %v3194_v53  ;;  %v3147_v46 = vadd.f32 %v4472_v38, %v3050_v30  ;;  %v4411_v42 = vadd.f32 %v4410_v0, %v4409_v15  ;;  %v4474_v44 = vpop.f32.mrf.mxu1  ;;  %v4359_v40 = vadd.f32 %v5816_v36, %v5815_v56 }
 0x229   : > { %v4412_v55 = vpop.f32.mrf.mxu0  ;;  %v4475_v39 = vadd.f32 %v4474_v44, %v4473_v63  ;;  %v615_v63 = vld [vmem:[#allocation2 + $0x20] sm:$0xff] }
 0x22a   : > { %v3195_v17 = vadd.f32 %v3147_v46, %v611_v59  ;;  %v3055_v54 = vadd.f32 %v4411_v42, %v2958_v43  ;;  %v4476_v9 = vpop.f32.mrf.mxu1  ;;  %v2974_v38 = vadd.f32 %v4359_v40, %v2877_v33  ;;  %v5817_v59 = vld [vmem:[#allocation5_spill] sm:$0xff]  ;;  %v618_v40 = vld [vmem:[#allocation2 + $0x60] sm:$0xff] }
 0x22b   : > { %v4413_v24 = vpop.f32.mrf.mxu0  ;;  %v2880_v0 = vadd.f32 %v4298_v32, %v5817_v59  ;;  %v5818_v43 = vld [vmem:[#allocation17_spill] sm:$0xff] }
 0x22c   : > { %3211 = vst [vmem:[#allocation2 + $0x68] sm:$0xff] %v3195_v17  ;;  %v3152_v26 = vadd.f32 %v4475_v39, %v3055_v54  ;;  %v4414_v57 = vadd.f32 %v4413_v24, %v4412_v55  ;;  %v4477_v41 = vpop.f32.mrf.mxu1  ;;  %v4301_v46 = vadd.f32 %v5819_v4, %v5818_v43  ;;  %v5820_v17 = vld [vmem:[#allocation14_spill] sm:$0xff]  ;;  %v5821_v54 = vld [vmem:[#allocation16_spill] sm:$0xff] }
 0x22d   : > { %v4415_v20 = vpop.f32.mrf.mxu0  ;;  %v4478_v37 = vadd.f32 %v4477_v41, %v4476_v9  ;;  %v4362_v39 = vadd.f32 %v5821_v54, %v5820_v17  ;;  %v5835_v43 = vld [vmem:[#allocation26_spill] sm:$0xff]  ;;  %v5836_v4 = vld [vmem:[#allocation28_spill] sm:$0xff] }
 0x22e   : > { %v3196_v10 = vadd.f32 %v3152_v26, %v612_v13  ;;  %v3058_v51 = vadd.f32 %v4414_v57, %v2961_v25  ;;  %v4479_v34 = vpop.f32.mrf.mxu1  ;;  %v4304_v26 = vadd.f32 %v5823_v1, %v5822_v27  ;;  %v616_v57 = vld [vmem:[#allocation2 + $0x10] sm:$0xff] }
 0x22f   : > { %v4416_v23 = vpop.f32.mrf.mxu0  ;;  %v619_v17 = vld [vmem:[#allocation2 + $0x70] sm:$0xff] }
 0x230   : > { %3212 = vst [vmem:[#allocation2 + $0x8] sm:$0xff] %v3196_v10  ;;  %v3155_v18 = vadd.f32 %v4478_v37, %v3058_v51  ;;  %v4417_v2 = vadd.f32 %v4416_v23, %v4415_v20  ;;  %v4480_v50 = vpop.f32.mrf.mxu1  ;;  %v2977_v20 = vadd.f32 %v4362_v39, %v2880_v0  ;;  %v2885_v10 = vadd.f32 %v4301_v46, %v5824_v61  ;;  %v5826_v23 = vld [vmem:[#allocation20_spill] sm:$0xff] }
 0x231   : > { %v4418_v29 = vpop.f32.mrf.mxu0  ;;  %v4481_v52 = vadd.f32 %v4480_v50, %v4479_v34  ;;  %v4371_v46 = vadd.f32 %v5836_v4, %v5835_v43 }
 0x232   : > { %v3197_v5 = vadd.f32 %v3155_v18, %v613_v35  ;;  %v3063_v62 = vadd.f32 %v4417_v2, %v2966_v19  ;;  %v4482_v47 = vpop.f32.mrf.mxu1  ;;  %v5825_v35 = vld [vmem:[#allocation18_spill] sm:$0xff] }
 0x233   : > { %v4419_v14 = vpop.f32.mrf.mxu0  ;;  %v4365_v19 = vadd.f32 %v5826_v23, %v5825_v35 }
 0x234   : > { %3213 = vst [vmem:[#allocation2 + $0x48] sm:$0xff] %v3197_v5  ;;  %v3160_v58 = vadd.f32 %v4481_v52, %v3063_v62  ;;  %v4420_v7 = vadd.f32 %v4419_v14, %v4418_v29  ;;  %v4483_v60 = vpop.f32.mrf.mxu1  ;;  %v5827_v29 = vld [vmem:[#allocation7_spill] sm:$0xff]  ;;  %v5828_v52 = vld [vmem:[#allocation25_spill] sm:$0xff] }
 0x235   : > { %v4421_v8 = vpop.f32.mrf.mxu0  ;;  %v4484_v53 = vadd.f32 %v4483_v60, %v4482_v47  ;;  %v2888_v31 = vadd.f32 %v4304_v26, %v5827_v29  ;;  %v2982_v62 = vadd.f32 %v4365_v19, %v2885_v10  ;;  %v5829_v47 = vld [vmem:[#allocation27_spill] sm:$0xff]  ;;  %v5838_v26 = vld [vmem:[#allocation30_spill] sm:$0xff] }
 0x236   : > { %v3198_v15 = vadd.f32 %v3160_v58, %v614_v12  ;;  %v3066_v49 = vadd.f32 %v4420_v7, %v2969_v21  ;;  %v4485_v30 = vpop.f32.mrf.mxu1  ;;  %v4307_v16 = vadd.f32 %v5829_v47, %v5828_v52  ;;  %v5830_v21 = vld [vmem:[#allocation22_spill] sm:$0xff] }
 0x237   : > { %v4422_v11 = vpop.f32.mrf.mxu0  ;;  %v4368_v28 = vadd.f32 %v5831_v22, %v5830_v21 }
 0x238   : > { %3214 = vst [vmem:[#allocation2 + $0x40] sm:$0xff] %v3198_v15  ;;  %v3163_v42 = vadd.f32 %v4484_v53, %v3066_v49  ;;  %v4423_v44 = vadd.f32 %v4422_v11, %v4421_v8  ;;  %v4486_v45 = vpop.f32.mrf.mxu1  ;;  %v5832_v15 = vld [vmem:[#allocation8_spill] sm:$0xff]  ;;  %v5833_v53 = vld [vmem:[#allocation29_spill] sm:$0xff] }
 0x239   : > { %v4424_v55 = vpop.f32.mrf.mxu0  ;;  %v4487_v13 = vadd.f32 %v4486_v45, %v4485_v30  ;;  %v2985_v36 = vadd.f32 %v4368_v28, %v2888_v31  ;;  %v2893_v49 = vadd.f32 %v4307_v16, %v5832_v15  ;;  %v5834_v30 = vld [vmem:[#allocation31_spill] sm:$0xff] }
 0x23a   : > { %v3199_v9 = vadd.f32 %v3163_v42, %v615_v63  ;;  %v3071_v25 = vadd.f32 %v4423_v44, %v2974_v38  ;;  %v4488_v24 = vpop.f32.mrf.mxu1  ;;  %v4310_v38 = vadd.f32 %v5834_v30, %v5833_v53 }
 0x23b   : > { %v4425_v41 = vpop.f32.mrf.mxu0  ;;  %v2990_v39 = vadd.f32 %v4371_v46, %v2893_v49 }
 0x23c   : > { %3215 = vst [vmem:[#allocation2 + $0x20] sm:$0xff] %v3199_v9  ;;  %v3168_v51 = vadd.f32 %v4487_v13, %v3071_v25  ;;  %v4426_v37 = vadd.f32 %v4425_v41, %v4424_v55  ;;  %v4489_v34 = vpop.f32.mrf.mxu1  ;;  %v5837_v9 = vld [vmem:[#allocation9_spill] sm:$0xff] }
 0x23d   : > { %v4427_v48 = vpop.f32.mrf.mxu0  ;;  %v4490_v2 = vadd.f32 %v4489_v34, %v4488_v24  ;;  %v2896_v25 = vadd.f32 %v4310_v38, %v5837_v9 }
 0x23e   : > { %v3200_v6 = vadd.f32 %v3168_v51, %v616_v57  ;;  %v3074_v18 = vadd.f32 %v4426_v37, %v2977_v20  ;;  %v4491_v50 = vpop.f32.mrf.mxu1  ;;  %v5839_v57 = vld [vmem:[#allocation32_spill] sm:$0xff]  ;;  %v620_v37 = vld [vmem:[#allocation2 + $0x78] sm:$0xff] }
 0x23f   : > { %v4428_v5 = vpop.f32.mrf.mxu0  ;;  %v4374_v41 = vadd.f32 %v5839_v57, %v5838_v26 }
 0x240   : > { %3216 = vst [vmem:[#allocation2 + $0x10] sm:$0xff] %v3200_v6  ;;  %v3171_v33 = vadd.f32 %v4490_v2, %v3074_v18  ;;  %v4429_v12 = vadd.f32 %v4428_v5, %v4427_v48  ;;  %v4492_v14 = vpop.f32.mrf.mxu1 }
 0x241   : > { %v4430_v32 = vpop.f32.mrf.mxu0  ;;  %v4493_v60 = vadd.f32 %v4492_v14, %v4491_v50  ;;  %v2993_v48 = vadd.f32 %v4374_v41, %v2896_v25  ;;  %v621_v50 = vld [vmem:[#allocation2 + $0x28] sm:$0xff] }
 0x242   : > { %v3201_v58 = vadd.f32 %v3171_v33, %v617_v3  ;;  %v3079_v7 = vadd.f32 %v4429_v12, %v2982_v62  ;;  %v4494_v56 = vpop.f32.mrf.mxu1 }
 0x243   : > { %v4431_v8 = vpop.f32.mrf.mxu0 }
 0x244   : > { %3217 = vst [vmem:[#allocation2 + $0x38] sm:$0xff] %v3201_v58  ;;  %v3176_v63 = vadd.f32 %v4493_v60, %v3079_v7  ;;  %v4432_v11 = vadd.f32 %v4431_v8, %v4430_v32  ;;  %v4495_v59 = vpop.f32.mrf.mxu1 }
 0x245   : > { %v4433_v0 = vpop.f32.mrf.mxu0  ;;  %v4496_v45 = vadd.f32 %v4495_v59, %v4494_v56 }
 0x246   : > { %v3202_v42 = vadd.f32 %v3176_v63, %v618_v40  ;;  %v3082_v44 = vadd.f32 %v4432_v11, %v2985_v36  ;;  %v4497_v55 = vpop.f32.mrf.mxu1 }
 0x247   : > { %v4434_v54 = vpop.f32.mrf.mxu0 }
 0x248   : > { %3218 = vst [vmem:[#allocation2 + $0x60] sm:$0xff] %v3202_v42  ;;  %v3179_v13 = vadd.f32 %v4496_v45, %v3082_v44  ;;  %v4435_v24 = vadd.f32 %v4434_v54, %v4433_v0  ;;  %v4498_v27 = vpop.f32.mrf.mxu1 }
 0x249   : > { %v4436_v1 = vpop.f32.mrf.mxu0  ;;  %v4499_v10 = vadd.f32 %v4498_v27, %v4497_v55 }
 0x24a   : > { %v3203_v20 = vadd.f32 %v3179_v13, %v619_v17  ;;  %v3087_v61 = vadd.f32 %v4435_v24, %v2990_v39  ;;  %v4500_v51 = vpop.f32.mrf.mxu1 }
 0x24b   : > { %v4437_v34 = vpop.f32.mrf.mxu0 }
 0x24c   : > { %3219 = vst [vmem:[#allocation2 + $0x70] sm:$0xff] %v3203_v20  ;;  %v3184_v35 = vadd.f32 %v4499_v10, %v3087_v61  ;;  %v4438_v23 = vadd.f32 %v4437_v34, %v4436_v1  ;;  %v4501_v19 = vpop.f32.mrf.mxu1 }
 0x24d   : > { %v4502_v2 = vadd.f32 %v4501_v19, %v4500_v51 }
 0x24e   : > { %v3204_v6 = vadd.f32 %v3184_v35, %v620_v37  ;;  %v3090_v18 = vadd.f32 %v4438_v23, %v2993_v48 }
 0x250   : > { %3220 = vst [vmem:[#allocation2 + $0x78] sm:$0xff] %v3204_v6  ;;  %v3187_v29 = vadd.f32 %v4502_v2, %v3090_v18  ;;  %3225 = sbr.rel (%p3906_p11) target bundleno = 742 (0x2e6), region = 71 }
 0x252   : > { %v3205_v31 = vadd.f32 %v3187_v29, %v621_v50 }
 0x254   : > { %3221 = vst [vmem:[#allocation2 + $0x28] sm:$0xff] %v3205_v31 }
 0x255   : > { %v3226_v3 = vld [vmem:[#allocation2 + $0x30] sm:$0xff]  ;;  %v3227_v5 = vld [vmem:[#allocation2] sm:$0xff]  ;;  %v3228_v62 = vld [vmem:[#allocation2 + $0x58] sm:$0xff] }
 0x256   : > { %v3907_v52 = vld [vmem:[%s5778_s2] ss:$0 sm:$0xff]  ;;  %v3229_v33 = vld [vmem:[#allocation2 + $0x18] sm:$0xff]  ;;  %v3230_v14 = vld [vmem:[#allocation2 + $0x50] sm:$0xff] }
 0x257   : > { %v5596_v47 = vadd.f32 %v3907_v52, %v3226_v3  ;;  %v5598_v16 = vadd.f32 %v3907_v52, %v3227_v5  ;;  %v5600_v12 = vadd.f32 %v3907_v52, %v3228_v62  ;;  %v5602_v21 = vadd.f32 %v3907_v52, %v3229_v33  ;;  %v3231_v28 = vld [vmem:[#allocation2 + $0x68] sm:$0xff]  ;;  %v3234_v15 = vld [vmem:[#allocation2 + $0x40] sm:$0xff]  ;;  %v3236_v11 = vld [vmem:[#allocation2 + $0x10] sm:$0xff] }
 0x258   : > { %v5606_v32 = vadd.f32 %v3907_v52, %v3230_v14  ;;  %v3232_v7 = vld [vmem:[#allocation2 + $0x8] sm:$0xff]  ;;  %v5609_v60 = vadd.f32 %v3907_v52, %v3231_v28  ;;  %v3235_v30 = vld [vmem:[#allocation2 + $0x20] sm:$0xff]  ;;  %v5618_v38 = vadd.f32 %v3907_v52, %v3234_v15  ;;  %v3237_v43 = vld [vmem:[#allocation2 + $0x38] sm:$0xff]  ;;  %v5624_v4 = vadd.f32 %v3907_v52, %v3236_v11 }
 0x259   : > { %v3265_v22 = vadd.f32 %v5598_v16, %v5596_v47  ;;  %v3233_v36 = vld [vmem:[#allocation2 + $0x48] sm:$0xff]  ;;  %v5612_v40 = vadd.f32 %v3907_v52, %v3232_v7  ;;  %v5621_v59 = vadd.f32 %v3907_v52, %v3235_v30  ;;  %v3238_v42 = vld [vmem:[#allocation2 + $0x60] sm:$0xff]  ;;  %v5627_v44 = vadd.f32 %v3907_v52, %v3237_v43  ;;  %v3239_v55 = vld [vmem:[#allocation2 + $0x70] sm:$0xff] }
 0x25a   : > { %v5615_v49 = vadd.f32 %v3907_v52, %v3233_v36  ;;  %v5630_v17 = vadd.f32 %v3907_v52, %v3238_v42  ;;  %v3240_v39 = vld [vmem:[#allocation2 + $0x78] sm:$0xff]  ;;  %v5633_v9 = vadd.f32 %v3907_v52, %v3239_v55 }
 0x25b   : > { %v3266_v58 = vadd.f32 %v3265_v22, %v5600_v12  ;;  %v3241_v13 = vld [vmem:[#allocation2 + $0x28] sm:$0xff]  ;;  %v5636_v24 = vadd.f32 %v3907_v52, %v3240_v39 }
 0x25c   : > { %v5639_v1 = vadd.f32 %v3907_v52, %v3241_v13 }
 0x25d   : > { %v3267_v56 = vadd.f32 %v3266_v58, %v5602_v21 }
 0x25f   : > { %v3268_v8 = vadd.f32 %v3267_v56, %v5606_v32 }
 0x261   : > { %v3269_v53 = vadd.f32 %v3268_v8, %v5609_v60 }
 0x263   : > { %v3270_v63 = vadd.f32 %v3269_v53, %v5612_v40 }
 0x265   : > { %v3271_v0 = vadd.f32 %v3270_v63, %v5615_v49 }
 0x267   : > { %v3272_v46 = vadd.f32 %v3271_v0, %v5618_v38 }
 0x269   : > { %v3273_v45 = vadd.f32 %v3272_v46, %v5621_v59 }
 0x26b   : > { %v3274_v54 = vadd.f32 %v3273_v45, %v5624_v4 }
 0x26d   : > { %v3275_v25 = vadd.f32 %v3274_v54, %v5627_v44 }
 0x26f   : > { %v3276_v27 = vadd.f32 %v3275_v25, %v5630_v17 }
 0x271   : > { %v3277_v26 = vadd.f32 %v3276_v27, %v5633_v9 }
 0x273   : > { %v3278_v57 = vadd.f32 %v3277_v26, %v5636_v24 }
 0x275   : > { %v3279_v41 = vadd.f32 %v3278_v57, %v5639_v1 }
 0x277   : > { %v3280_v20 = vrot.slane %v3279_v41, 4 }
 0x279   : > { %v3281_v61 = vadd.f32 %v3280_v20, %v3279_v41 }
 0x27b   : > { %v3282_v10 = vrot.slane %v3281_v61, 2 }
 0x27d   : > { %v3283_v51 = vadd.f32 %v3282_v10, %v3281_v61 }
 0x27f   : > { %v3284_v37 = vrot.slane %v3283_v51, 1 }
 0x281   : > { %v3285_v34 = vadd.f32 %v3284_v37, %v3283_v51 }
 0x283   : > { %v5644_v48 = vmul.f32 0.0078125, %v3285_v34 }
 0x285   : > { %v3287_v35 = vsub.f32 %v5596_v47, %v5644_v48  ;;  %v3288_v23 = vsub.f32 %v5598_v16, %v5644_v48  ;;  %v3289_v19 = vsub.f32 %v5600_v12, %v5644_v48  ;;  %v3290_v6 = vsub.f32 %v5602_v21, %v5644_v48 }
 0x286   : > { %v3291_v50 = vsub.f32 %v5606_v32, %v5644_v48  ;;  %v3292_v31 = vsub.f32 %v5609_v60, %v5644_v48  ;;  %v3293_v62 = vsub.f32 %v5612_v40, %v5644_v48  ;;  %v3294_v14 = vsub.f32 %v5615_v49, %v5644_v48 }
 0x287   : > { %v3303_v18 = vmul.f32 %v3287_v35, %v3287_v35  ;;  %v3304_v2 = vmul.f32 %v3288_v23, %v3288_v23  ;;  %v3305_v29 = vmul.f32 %v3289_v19, %v3289_v19  ;;  %v3306_v3 = vmul.f32 %v3290_v6, %v3290_v6 }
 0x288   : > { %v3307_v52 = vmul.f32 %v3291_v50, %v3291_v50  ;;  %v3308_v22 = vmul.f32 %v3292_v31, %v3292_v31  ;;  %v3295_v58 = vsub.f32 %v5618_v38, %v5644_v48  ;;  %v3309_v7 = vmul.f32 %v3293_v62, %v3293_v62 }
 0x289   : > { %v3319_v5 = vadd.f32 %v3304_v2, %v3303_v18  ;;  %v3296_v36 = vsub.f32 %v5621_v59, %v5644_v48  ;;  %v3310_v8 = vmul.f32 %v3294_v14, %v3294_v14  ;;  %v3297_v53 = vsub.f32 %v5624_v4, %v5644_v48  ;;  %v3345_v14 = vld [vmem:[%s5780_s4] sm:$0x1] }
 0x28a   : > { %v3311_v30 = vmul.f32 %v3295_v58, %v3295_v58  ;;  %v3298_v11 = vsub.f32 %v5627_v44, %v5644_v48  ;;  %v3299_v46 = vsub.f32 %v5630_v17, %v5644_v48  ;;  %v3300_v55 = vsub.f32 %v5633_v9, %v5644_v48 }
 0x28b   : > { %v3320_v33 = vadd.f32 %v3319_v5, %v3305_v29  ;;  %v3312_v0 = vmul.f32 %v3296_v36, %v3296_v36  ;;  %v3313_v42 = vmul.f32 %v3297_v53, %v3297_v53  ;;  %v3301_v25 = vsub.f32 %v5636_v24, %v5644_v48  ;;  %v3341_v5 = vld [vmem:[%s5779_s3] sm:$0x1] }
 0x28c   : > { %v3314_v54 = vmul.f32 %v3298_v11, %v3298_v11  ;;  %v3315_v13 = vmul.f32 %v3299_v46, %v3299_v46  ;;  %v3302_v26 = vsub.f32 %v5639_v1, %v5644_v48  ;;  %v3316_v57 = vmul.f32 %v3300_v55, %v3300_v55 }
 0x28d   : > { %v3321_v28 = vadd.f32 %v3320_v33, %v3306_v3  ;;  %v3317_v20 = vmul.f32 %v3301_v25, %v3301_v25  ;;  %v3349_v31 = vlaneseq }
 0x28e   : > { %v3318_v10 = vmul.f32 %v3302_v26, %v3302_v26 }
 0x28f   : > { %v3322_v56 = vadd.f32 %v3321_v28, %v3307_v52  ;;  %v3350_v3 = vshrl.u32 %v3349_v31, 7 }
 0x291   : > { %v3323_v15 = vadd.f32 %v3322_v56, %v3308_v22  ;;  %v3351_v62 = vsub.s32 0, %v3350_v3 }
 0x293   : > { %v3324_v63 = vadd.f32 %v3323_v15, %v3309_v7 }
 0x295   : > { %v3325_v43 = vadd.f32 %v3324_v63, %v3310_v8 }
 0x297   : > { %v3326_v45 = vadd.f32 %v3325_v43, %v3311_v30 }
 0x299   : > { %v3327_v39 = vadd.f32 %v3326_v45, %v3312_v0 }
 0x29b   : > { %v3328_v27 = vadd.f32 %v3327_v39, %v3313_v42 }
 0x29d   : > { %v3329_v41 = vadd.f32 %v3328_v27, %v3314_v54 }
 0x29f   : > { %v3330_v61 = vadd.f32 %v3329_v41, %v3315_v13 }
 0x2a1   : > { %v3331_v51 = vadd.f32 %v3330_v61, %v3316_v57 }
 0x2a3   : > { %v3332_v37 = vadd.f32 %v3331_v51, %v3317_v20 }
 0x2a5   : > { %v3333_v34 = vadd.f32 %v3332_v37, %v3318_v10 }
 0x2a7   : > { %v3334_v35 = vrot.slane %v3333_v34, 4 }
 0x2a9   : > { %v3335_v23 = vadd.f32 %v3334_v35, %v3333_v34 }
 0x2ab   : > { %v3336_v19 = vrot.slane %v3335_v23, 2 }
 0x2ad   : > { %v3337_v6 = vadd.f32 %v3336_v19, %v3335_v23 }
 0x2af   : > { %v3338_v18 = vrot.slane %v3337_v6, 1 }
 0x2b1   : > { %v3339_v2 = vadd.f32 %v3338_v18, %v3337_v6 }
 0x2b3   : > { %v3340_v50 = vmul.f32 0.0078125, %v3339_v2 }
 0x2b5   : > { %v3342_v29 = vadd.f32 1e-05, %v3340_v50 }
 0x2b7   : > { %4672 = vrsqrt.f32 %v3342_v29 }
 0x2c4   : > { %v4673_v52 = vpop.eup %4672 }
 0x2c5   : > { %v3344_v33 = vmul.f32 %v4673_v52, %v3341_v5 }
 0x2c7   : > { %v3346_v22 = vmul.f32 %v3344_v33, %v5644_v48  ;;  %v5685_v28 = vrot.slane %v3344_v33, %v3351_v62 }
 0x2c9   : > { %v3347_v58 = vsub.f32 %v3345_v14, %v3346_v22  ;;  %v3354_v7 = vmul.f32 %v5685_v28, %v5596_v47  ;;  %v3355_v56 = vmul.f32 %v5685_v28, %v5598_v16  ;;  %v3356_v36 = vmul.f32 %v5685_v28, %v5600_v12 }
 0x2ca   : > { %v3357_v8 = vmul.f32 %v5685_v28, %v5602_v21  ;;  %v3358_v15 = vmul.f32 %v5685_v28, %v5606_v32  ;;  %v3359_v48 = vmul.f32 %v5685_v28, %v5609_v60  ;;  %v3360_v53 = vmul.f32 %v5685_v28, %v5612_v40 }
 0x2cb   : > { %v5701_v30 = vrot.slane %v3347_v58, %v3351_v62  ;;  %v3361_v47 = vmul.f32 %v5685_v28, %v5615_v49  ;;  %v3362_v16 = vmul.f32 %v5685_v28, %v5618_v38  ;;  %v3363_v12 = vmul.f32 %v5685_v28, %v5621_v59 }
 0x2cc   : > { %v3364_v21 = vmul.f32 %v5685_v28, %v5624_v4  ;;  %v3365_v32 = vmul.f32 %v5685_v28, %v5627_v44  ;;  %v3366_v60 = vmul.f32 %v5685_v28, %v5630_v17  ;;  %v3367_v40 = vmul.f32 %v5685_v28, %v5633_v9 }
 0x2cd   : > { %v3376_v49 = vadd.f32 %v5701_v30, %v3354_v7  ;;  %v3377_v63 = vadd.f32 %v5701_v30, %v3355_v56  ;;  %v3378_v38 = vadd.f32 %v5701_v30, %v3356_v36  ;;  %v3379_v59 = vadd.f32 %v5701_v30, %v3357_v8 }
 0x2ce   : > { %v3380_v11 = vadd.f32 %v5701_v30, %v3358_v15  ;;  %v3381_v4 = vadd.f32 %v5701_v30, %v3359_v48  ;;  %v3382_v44 = vadd.f32 %v5701_v30, %v3360_v53  ;;  %v3383_v0 = vadd.f32 %v5701_v30, %v3361_v47 }
 0x2cf   : > { %vm3392_vm0 = vcmp.gt.f32.partialorder %v3376_v49, 0.0  ;;  %vm3393_vm1 = vcmp.gt.f32.partialorder %v3377_v63, 0.0  ;;  %v3408_v17 = vmul.f32 0.2, %v3376_v49  ;;  %v3409_v9 = vmul.f32 0.2, %v3377_v63 }
 0x2d0   : > { %vm3394_vm2 = vcmp.gt.f32.partialorder %v3378_v38, 0.0  ;;  %vm3395_vm3 = vcmp.gt.f32.partialorder %v3379_v59, 0.0  ;;  %v3410_v43 = vmul.f32 0.2, %v3378_v38  ;;  %v3411_v46 = vmul.f32 0.2, %v3379_v59 }
 0x2d1   : > { %v3424_v42 = vsel %vm3392_vm0, %v3376_v49, %v3408_v17  ;;  %v3425_v45 = vsel %vm3393_vm1, %v3377_v63, %v3409_v9  ;;  %vm3396_vm4 = vcmp.gt.f32.partialorder %v3380_v11, 0.0  ;;  %vm3397_vm5 = vcmp.gt.f32.partialorder %v3381_v4, 0.0 }
 0x2d2   : > { %v3947_v55 = vpack.c.bf16 %v3425_v45, %v3424_v42  ;;  %v3426_v54 = vsel %vm3394_vm2, %v3378_v38, %v3410_v43  ;;  %v3427_v39 = vsel %vm3395_vm3, %v3379_v59, %v3411_v46  ;;  %v3412_v25 = vmul.f32 0.2, %v3380_v11 }
 0x2d3   : > { %v3952_v13 = vpack.c.bf16 %v3427_v39, %v3426_v54  ;;  %v3413_v27 = vmul.f32 0.2, %v3381_v4  ;;  %vm3398_vm6 = vcmp.gt.f32.partialorder %v3382_v44, 0.0  ;;  %vm3399_vm7 = vcmp.gt.f32.partialorder %v3383_v0, 0.0 }
 0x2d4   : > { %3948 = vst [vmem:[%s5781_s5] sm:$0xff] %v3947_v55   ;;  %v3428_v26 = vsel %vm3396_vm4, %v3380_v11, %v3412_v25  ;;  %v3414_v57 = vmul.f32 0.2, %v3382_v44  ;;  %v3415_v41 = vmul.f32 0.2, %v3383_v0  ;;  %v3384_v20 = vadd.f32 %v5701_v30, %v3362_v16 }
 0x2d5   : > { %3984 = vst [vmem:[%s5781_s5 + $0x8] sm:$0xff] %v3952_v13   ;;  %v3429_v61 = vsel %vm3397_vm5, %v3381_v4, %v3413_v27  ;;  %v3385_v10 = vadd.f32 %v5701_v30, %v3363_v12  ;;  %v3386_v51 = vadd.f32 %v5701_v30, %v3364_v21  ;;  %v3387_v37 = vadd.f32 %v5701_v30, %v3365_v32 }
 0x2d6   : > { %v3957_v34 = vpack.c.bf16 %v3429_v61, %v3428_v26  ;;  %v3430_v35 = vsel %vm3398_vm6, %v3382_v44, %v3414_v57  ;;  %v3431_v23 = vsel %vm3399_vm7, %v3383_v0, %v3415_v41  ;;  %vm3400_vm8 = vcmp.gt.f32.partialorder %v3384_v20, 0.0 }
 0x2d7   : > { %v3962_v19 = vpack.c.bf16 %v3431_v23, %v3430_v35  ;;  %vm3401_vm9 = vcmp.gt.f32.partialorder %v3385_v10, 0.0  ;;  %v3416_v6 = vmul.f32 0.2, %v3384_v20  ;;  %v3417_v18 = vmul.f32 0.2, %v3385_v10 }
 0x2d8   : > { %3985 = vst [vmem:[%s5781_s5 + $0x10] sm:$0xff] %v3957_v34   ;;  %vm3402_vm10 = vcmp.gt.f32.partialorder %v3386_v51, 0.0  ;;  %vm3403_vm11 = vcmp.gt.f32.partialorder %v3387_v37, 0.0  ;;  %v3418_v2 = vmul.f32 0.2, %v3386_v51  ;;  %v3388_v3 = vadd.f32 %v5701_v30, %v3366_v60 }
 0x2d9   : > { %v3419_v50 = vmul.f32 0.2, %v3387_v37  ;;  %3986 = vst [vmem:[%s5781_s5 + $0x18] sm:$0xff] %v3962_v19   ;;  %v3432_v29 = vsel %vm3400_vm8, %v3384_v20, %v3416_v6  ;;  %v3433_v31 = vsel %vm3401_vm9, %v3385_v10, %v3417_v18  ;;  %v3389_v5 = vadd.f32 %v5701_v30, %v3367_v40 }
 0x2da   : > { %v3967_v62 = vpack.c.bf16 %v3433_v31, %v3432_v29  ;;  %v3434_v52 = vsel %vm3402_vm10, %v3386_v51, %v3418_v2  ;;  %v3368_v14 = vmul.f32 %v5685_v28, %v5636_v24  ;;  %vm3404_vm12 = vcmp.gt.f32.partialorder %v3388_v3, 0.0 }
 0x2db   : > { %v3435_v33 = vsel %vm3403_vm11, %v3387_v37, %v3419_v50  ;;  %vm3405_vm13 = vcmp.gt.f32.partialorder %v3389_v5, 0.0  ;;  %v3420_v58 = vmul.f32 0.2, %v3388_v3  ;;  %v3421_v7 = vmul.f32 0.2, %v3389_v5 }
 0x2dc   : > { %v3972_v22 = vpack.c.bf16 %v3435_v33, %v3434_v52  ;;  %3987 = vst [vmem:[%s5781_s5 + $0x20] sm:$0xff] %v3967_v62   ;;  %v3369_v56 = vmul.f32 %v5685_v28, %v5639_v1  ;;  %v3390_v36 = vadd.f32 %v5701_v30, %v3368_v14 }
 0x2dd   : > { %v3436_v8 = vsel %vm3404_vm12, %v3388_v3, %v3420_v58  ;;  %v3437_v24 = vsel %vm3405_vm13, %v3389_v5, %v3421_v7 }
 0x2de   : > { %3988 = vst [vmem:[%s5781_s5 + $0x28] sm:$0xff] %v3972_v22   ;;  %v3391_v15 = vadd.f32 %v5701_v30, %v3369_v56  ;;  %vm3406_vm14 = vcmp.gt.f32.partialorder %v3390_v36, 0.0  ;;  %v3422_v48 = vmul.f32 0.2, %v3390_v36  ;;  %v3977_v53 = vpack.c.bf16 %v3437_v24, %v3436_v8 }
 0x2e0   : > { %vm3407_vm15 = vcmp.gt.f32.partialorder %v3391_v15, 0.0  ;;  %v3423_v47 = vmul.f32 0.2, %v3391_v15  ;;  %v3438_v16 = vsel %vm3406_vm14, %v3390_v36, %v3422_v48  ;;  %3989 = vst [vmem:[%s5781_s5 + $0x30] sm:$0xff] %v3977_v53  }
 0x2e2   : > { %v3439_v1 = vsel %vm3407_vm15, %v3391_v15, %v3423_v47 }
 0x2e3   : > { %v3982_v28 = vpack.c.bf16 %v3439_v1, %v3438_v16 }
 0x2e5   : > { %3990 = vst [vmem:[%s5781_s5 + $0x38] sm:$0xff] %v3982_v28  }
 0x2e6 PF: > { %s15_s22 = sadd.s32 1, %s4712_s22   ;;  %s5840_s18 = smov %s4700_s19 }
 0x2e7   : > { %p12_p12 = scmp.ge.s32.totalorder %s15_s22, 4   ;;  %s5841_s19 = smov %s4780_s26 }
 0x2e8   : > { %s5842_s20 = smov %s4708_s21  ;;  %s5843_s21 = smov %s5845_s23 }
 0x2e9   :  { %14 = sbr.rel (!%p12_p12) target bundleno = 3 (0x3), region = 118 }

// kernel: fwd.7
= control target key start
LH: loop header
LB: loop body
LE: loop exit
PB: predicated region body
PF: predicated region fallthrough
CT: control target
= control target key end

     0   :  { %s10430_s0 = inlined_call_operand.vmem [shape: bf16[16,8192], index: 0, kind: input, shape index: {}]   ;;  %s10431_s1 = inlined_call_operand.vmem [shape: bf16[8192,256], index: 1, kind: input, shape index: {}]   ;;  %s10432_s2 = inlined_call_operand.vmem [shape: f32[1,256], index: 2, kind: input, shape index: {}]   ;;  %s10433_s3 = inlined_call_operand.vmem [shape: f32[1,256], index: 3, kind: input, shape index: {}]   ;;  %s10434_s4 = inlined_call_operand.vmem [shape: f32[1,256], index: 4, kind: input, shape index: {}]   ;;  %s10435_s5 = inlined_call_operand.vmem [shape: bf16[16,256], index: 5, kind: output, shape index: {}]  }
   0x1   :  { %10439 = sst [smem:[#allocation9_spill]] %s10430_s0 }
   0x2   :  { %10440 = sst [smem:[#allocation10_spill]] %s10431_s1 }
   0x3   :  { %s8846_s18 = smov 0   ;;  %s8848_s19 = smov 0  }
   0x4   :  { %s8850_s20 = smov 0   ;;  %s8852_s21 = smov 0  }
   0x5   :  { %s8854_s22 = smov 0   ;;  %s8856_s23 = smov 0  }
   0x6   :  { %s8858_s24 = smov 0   ;;  %s8860_s25 = smov 0  }
   0x7   :  { %s8862_s26 = smov 0   ;;  %s8864_s27 = smov 0  }
   0x8   :  { %s8866_s28 = smov 0  }
   0x9 LB: > { %10441 = sst [smem:[#allocation6_spill]] %s8809_s27  ;;  %s7707_s29 = sadd.s32 4294967295, %s8813_s28   ;;  %s8813_s28 = sphi %s8866_s28, %s15_s28   ;;  %s8809_s27 = sphi %s8864_s27, %s10451_s27   ;;  %s8805_s26 = sphi %s8862_s26, %s10459_s26   ;;  %s8801_s25 = sphi %s8860_s25, %s10449_s25   ;;  %s8797_s24 = sphi %s8858_s24, %s10458_s24   ;;  %s8793_s23 = sphi %s8856_s23, %s10457_s23   ;;  %s8789_s22 = sphi %s8854_s22, %s10456_s22   ;;  %s8785_s21 = sphi %s8852_s21, %s10455_s21   ;;  %s8781_s20 = sphi %s8850_s20, %s10454_s20   ;;  %s8777_s19 = sphi %s8848_s19, %s10453_s19   ;;  %s8773_s18 = sphi %s8846_s18, %s10452_s18  }
   0xa   : > { %s24_s30 = sadd.s32 1, %s8805_s26  ;;  %s27_s6 = sadd.s32 1, %s8809_s27 }
   0xb   : > { %p25_p0 = scmp.ge.s32.totalorder %s24_s30, 2  ;;  %s34_s7 = sadd.s32 1, %s8793_s23 }
   0xc   : > { %p41_p1 = scmp.ne.s32.totalorder %s8793_s23, %s8789_s22  ;;  %p42_p2 = scmp.eq.s32.totalorder %s8813_s28, 0 }
   0xd   : > { %s10461_s30 = smov (%p25_p0, %s24_s30), 0  ;;  %s10463_s6 = smov (!%p25_p0, %s27_s6), %s8809_s27 }
   0xe   : > { %10442 = sst [smem:[#allocation7_spill]] %s10461_s30  ;;  %s31_s8 = ssub.s32 %s8805_s26, %s10461_s30 }
   0xf   : > { %p29_p3 = scmp.ge.s32.totalorder %s10463_s6, 2  ;;  %p32_p4 = scmp.eq.s32.totalorder %s31_s8, 0 }
  0x10   : > { %p8913_p5 = por %p42_p2, %p41_p1  ;;  %s62_s10 = sadd.s32 1, %s8785_s21 }
  0x11   : > { %s10465_s6 = smov (%p29_p3, %s10463_s6), 0  ;;  %p69_p6 = scmp.ne.s32.totalorder %s8785_s21, %s8781_s20 }
  0x12   : > { %10444 = sst [smem:[#allocation8_spill]] %s10465_s6  ;;  %s58_s12 = ssub.s32 %s8809_s27, %s10465_s6 }
  0x13   : > { %s8921_s11 = scalar_select %p32_p4, %s8793_s23, %s34_s7  }
  0x14   : > { %s59_s13 = sor.u32 %s58_s12, %s31_s8  ;;  %p164_p7 = scmp.eq.s32.totalorder %s58_s12, 0 }
  0x15   : > { %p60_p8 = scmp.eq.s32.totalorder %s59_s13, 0  ;;  %p8927_p9 = por %p69_p6, %p42_p2 }
  0x16   : > { %s166_s15 = sadd.s32 1, %s8777_s19  ;;  %p176_p10 = scmp.ne.s32.totalorder %s8777_s19, %s8773_s18 }
  0x17   : > { %s8935_s16 = scalar_select %p60_p8, %s8785_s21, %s62_s10  }
  0x18   : > { %s8938_s17 = scalar_select %p164_p7, %s8777_s19, %s166_s15  }
  0x19   : > { %p177_p11 = scmp.eq.s32.totalorder %s7707_s29, 3  ;;  %p7710_p13 = scmp.ge.s32.totalorder %s8813_s28, 4 }
  0x1b   : > { %p8940_p12 = por %p177_p11, %p176_p10  ;;  %199 = sbr.rel (%p7710_p13) target bundleno = 409 (0x199), region = 16 }
  0x20   : > { %202 = sbr.rel (!%p8913_p5) target bundleno = 58 (0x3a), region = 20  ;;  %s204_s7 = sand.u32 (%p8913_p5), 1, %s8793_s23  }
  0x21   : > { %s8019_s8 = sshll.u32 (%p8913_p5), %s8805_s26, 7  ;;  %s7711_s12 = sshll.u32 (%p8913_p5), %s204_s7, 8 }
  0x22   : > { %s10447_s0 = sld [smem:[#allocation9_spill]] (%p8913_p5)  ;;  %s8957_s29 = scalar_lea.vmem (%p8913_p5), [#allocation3], %s7711_s12 }
  0x28   : > { %s8952_s15 = scalar_lea.vmem %s10447_s0, %s8019_s8 }
  0x29   : > { %v222_v0 = vld [vmem:[%s8952_s15] sm:$0xff]  ;;  %v224_v1 = vld [vmem:[%s8952_s15 + $0x8] sm:$0xff]  ;;  %v226_v2 = vld [vmem:[%s8952_s15 + $0x10] sm:$0xff] }
  0x2a   : > { %223 = vst [vmem:[%s8957_s29] sm:$0xff] %v222_v0  ;;  %225 = vst [vmem:[%s8957_s29 + $0x8] sm:$0xff] %v224_v1  ;;  %v228_v3 = vld [vmem:[%s8952_s15 + $0x18] sm:$0xff]  ;;  %v230_v4 = vld [vmem:[%s8952_s15 + $0x20] sm:$0xff] }
  0x2b   : > { %227 = vst [vmem:[%s8957_s29 + $0x10] sm:$0xff] %v226_v2  ;;  %v232_v5 = vld [vmem:[%s8952_s15 + $0x28] sm:$0xff]  ;;  %229 = vst [vmem:[%s8957_s29 + $0x18] sm:$0xff] %v228_v3  ;;  %v234_v6 = vld [vmem:[%s8952_s15 + $0x30] sm:$0xff] }
  0x2c   : > { %231 = vst [vmem:[%s8957_s29 + $0x20] sm:$0xff] %v230_v4  ;;  %233 = vst [vmem:[%s8957_s29 + $0x28] sm:$0xff] %v232_v5  ;;  %v236_v7 = vld [vmem:[%s8952_s15 + $0x38] sm:$0xff]  ;;  %v238_v8 = vld [vmem:[%s8952_s15 + $0x40] sm:$0xff] }
  0x2d   : > { %235 = vst [vmem:[%s8957_s29 + $0x30] sm:$0xff] %v234_v6  ;;  %237 = vst [vmem:[%s8957_s29 + $0x38] sm:$0xff] %v236_v7  ;;  %v240_v9 = vld [vmem:[%s8952_s15 + $0x48] sm:$0xff]  ;;  %v242_v10 = vld [vmem:[%s8952_s15 + $0x50] sm:$0xff] }
  0x2e   : > { %239 = vst [vmem:[%s8957_s29 + $0x40] sm:$0xff] %v238_v8  ;;  %v244_v11 = vld [vmem:[%s8952_s15 + $0x58] sm:$0xff]  ;;  %241 = vst [vmem:[%s8957_s29 + $0x48] sm:$0xff] %v240_v9  ;;  %v246_v12 = vld [vmem:[%s8952_s15 + $0x60] sm:$0xff] }
  0x2f   : > { %243 = vst [vmem:[%s8957_s29 + $0x50] sm:$0xff] %v242_v10  ;;  %245 = vst [vmem:[%s8957_s29 + $0x58] sm:$0xff] %v244_v11  ;;  %v248_v13 = vld [vmem:[%s8952_s15 + $0x68] sm:$0xff]  ;;  %v250_v14 = vld [vmem:[%s8952_s15 + $0x70] sm:$0xff] }
  0x30   : > { %247 = vst [vmem:[%s8957_s29 + $0x60] sm:$0xff] %v246_v12  ;;  %249 = vst [vmem:[%s8957_s29 + $0x68] sm:$0xff] %v248_v13  ;;  %v252_v15 = vld [vmem:[%s8952_s15 + $0x78] sm:$0xff]  ;;  %v254_v16 = vld [vmem:[%s8952_s15 + $0x100] sm:$0xff] }
  0x31   : > { %251 = vst [vmem:[%s8957_s29 + $0x70] sm:$0xff] %v250_v14  ;;  %v256_v17 = vld [vmem:[%s8952_s15 + $0x108] sm:$0xff]  ;;  %253 = vst [vmem:[%s8957_s29 + $0x78] sm:$0xff] %v252_v15  ;;  %v258_v18 = vld [vmem:[%s8952_s15 + $0x110] sm:$0xff] }
  0x32   : > { %255 = vst [vmem:[%s8957_s29 + $0x80] sm:$0xff] %v254_v16  ;;  %257 = vst [vmem:[%s8957_s29 + $0x88] sm:$0xff] %v256_v17  ;;  %v260_v19 = vld [vmem:[%s8952_s15 + $0x118] sm:$0xff]  ;;  %v262_v20 = vld [vmem:[%s8952_s15 + $0x120] sm:$0xff] }
  0x33   : > { %259 = vst [vmem:[%s8957_s29 + $0x90] sm:$0xff] %v258_v18  ;;  %261 = vst [vmem:[%s8957_s29 + $0x98] sm:$0xff] %v260_v19  ;;  %v264_v21 = vld [vmem:[%s8952_s15 + $0x128] sm:$0xff]  ;;  %v266_v22 = vld [vmem:[%s8952_s15 + $0x130] sm:$0xff] }
  0x34   : > { %263 = vst [vmem:[%s8957_s29 + $0xa0] sm:$0xff] %v262_v20  ;;  %v268_v23 = vld [vmem:[%s8952_s15 + $0x138] sm:$0xff]  ;;  %265 = vst [vmem:[%s8957_s29 + $0xa8] sm:$0xff] %v264_v21  ;;  %v270_v24 = vld [vmem:[%s8952_s15 + $0x140] sm:$0xff] }
  0x35   : > { %267 = vst [vmem:[%s8957_s29 + $0xb0] sm:$0xff] %v266_v22  ;;  %269 = vst [vmem:[%s8957_s29 + $0xb8] sm:$0xff] %v268_v23  ;;  %v272_v25 = vld [vmem:[%s8952_s15 + $0x148] sm:$0xff]  ;;  %v274_v26 = vld [vmem:[%s8952_s15 + $0x150] sm:$0xff] }
  0x36   : > { %271 = vst [vmem:[%s8957_s29 + $0xc0] sm:$0xff] %v270_v24  ;;  %273 = vst [vmem:[%s8957_s29 + $0xc8] sm:$0xff] %v272_v25  ;;  %v276_v27 = vld [vmem:[%s8952_s15 + $0x158] sm:$0xff]  ;;  %v278_v28 = vld [vmem:[%s8952_s15 + $0x160] sm:$0xff] }
  0x37   : > { %275 = vst [vmem:[%s8957_s29 + $0xd0] sm:$0xff] %v274_v26  ;;  %v280_v29 = vld [vmem:[%s8952_s15 + $0x168] sm:$0xff]  ;;  %277 = vst [vmem:[%s8957_s29 + $0xd8] sm:$0xff] %v276_v27  ;;  %v282_v30 = vld [vmem:[%s8952_s15 + $0x170] sm:$0xff] }
  0x38   : > { %279 = vst [vmem:[%s8957_s29 + $0xe0] sm:$0xff] %v278_v28  ;;  %281 = vst [vmem:[%s8957_s29 + $0xe8] sm:$0xff] %v280_v29  ;;  %v284_v31 = vld [vmem:[%s8952_s15 + $0x178] sm:$0xff] }
  0x39   : > { %283 = vst [vmem:[%s8957_s29 + $0xf0] sm:$0xff] %v282_v30  ;;  %285 = vst [vmem:[%s8957_s29 + $0xf8] sm:$0xff] %v284_v31 }
  0x3a PF: > { %291 = sbr.rel (!%p8927_p9) target bundleno = 409 (0x199), region = 43  ;;  %s293_s9 = sand.u32 (%p8927_p9), 1, %s8785_s21  }
  0x3b   : > { %s8020_s7 = sshll.u32 (%p8927_p9), %s8805_s26, 10  ;;  %s7714_s8 = sshll.u32 (%p8927_p9), %s293_s9, 11 }
  0x3c   : > { %s298_s12 = sadd.s32 (%p8927_p9), %s8809_s27, %s8020_s7  ;;  %s10448_s1 = sld [smem:[#allocation10_spill]] (%p8927_p9) }
  0x3d   : > { %s7717_s10 = sshll.u32 (%p8927_p9), %s298_s12, 2  ;;  %s9033_s14 = scalar_lea.vmem (%p8927_p9), [#allocation4], %s7714_s8 }
  0x42   : > { %s9028_s6 = scalar_lea.vmem %s10448_s1, %s7717_s10 }
  0x43   : > { %v317_v32 = vld [vmem:[%s9028_s6] sm:$0xf]  ;;  %v319_v33 = vld [vmem:[%s9028_s6 + $0x8] sm:$0xf]  ;;  %v321_v34 = vld [vmem:[%s9028_s6 + $0x10] sm:$0xf] }
  0x44   : > { %318 = vst [vmem:[%s9033_s14] sm:$0xf] %v317_v32  ;;  %320 = vst [vmem:[%s9033_s14 + $0x4] sm:$0xf] %v319_v33  ;;  %v323_v35 = vld [vmem:[%s9028_s6 + $0x18] sm:$0xf] }
  0x45   : > { %322 = vst [vmem:[%s9033_s14 + $0x8] sm:$0xf] %v321_v34  ;;  %v325_v36 = vld [vmem:[%s9028_s6 + $0x20] sm:$0xf]  ;;  %v327_v37 = vld [vmem:[%s9028_s6 + $0x28] sm:$0xf] }
  0x46   : > { %324 = vst [vmem:[%s9033_s14 + $0xc] sm:$0xf] %v323_v35  ;;  %326 = vst [vmem:[%s9033_s14 + $0x10] sm:$0xf] %v325_v36  ;;  %v329_v38 = vld [vmem:[%s9028_s6 + $0x30] sm:$0xf] }
  0x47   : > { %328 = vst [vmem:[%s9033_s14 + $0x14] sm:$0xf] %v327_v37  ;;  %v331_v39 = vld [vmem:[%s9028_s6 + $0x38] sm:$0xf]  ;;  %v333_v40 = vld [vmem:[%s9028_s6 + $0x40] sm:$0xf] }
  0x48   : > { %330 = vst [vmem:[%s9033_s14 + $0x18] sm:$0xf] %v329_v38  ;;  %332 = vst [vmem:[%s9033_s14 + $0x1c] sm:$0xf] %v331_v39  ;;  %v335_v41 = vld [vmem:[%s9028_s6 + $0x48] sm:$0xf] }
  0x49   : > { %334 = vst [vmem:[%s9033_s14 + $0x20] sm:$0xf] %v333_v40  ;;  %v337_v42 = vld [vmem:[%s9028_s6 + $0x50] sm:$0xf]  ;;  %v339_v43 = vld [vmem:[%s9028_s6 + $0x58] sm:$0xf] }
  0x4a   : > { %336 = vst [vmem:[%s9033_s14 + $0x24] sm:$0xf] %v335_v41  ;;  %338 = vst [vmem:[%s9033_s14 + $0x28] sm:$0xf] %v337_v42  ;;  %v341_v44 = vld [vmem:[%s9028_s6 + $0x60] sm:$0xf] }
  0x4b   : > { %340 = vst [vmem:[%s9033_s14 + $0x2c] sm:$0xf] %v339_v43  ;;  %v343_v45 = vld [vmem:[%s9028_s6 + $0x68] sm:$0xf]  ;;  %v345_v46 = vld [vmem:[%s9028_s6 + $0x70] sm:$0xf] }
  0x4c   : > { %342 = vst [vmem:[%s9033_s14 + $0x30] sm:$0xf] %v341_v44  ;;  %344 = vst [vmem:[%s9033_s14 + $0x34] sm:$0xf] %v343_v45  ;;  %v347_v47 = vld [vmem:[%s9028_s6 + $0x78] sm:$0xf] }
  0x4d   : > { %346 = vst [vmem:[%s9033_s14 + $0x38] sm:$0xf] %v345_v46  ;;  %v349_v48 = vld [vmem:[%s9028_s6 + $0x80] sm:$0xf]  ;;  %v351_v49 = vld [vmem:[%s9028_s6 + $0x88] sm:$0xf] }
  0x4e   : > { %348 = vst [vmem:[%s9033_s14 + $0x3c] sm:$0xf] %v347_v47  ;;  %350 = vst [vmem:[%s9033_s14 + $0x40] sm:$0xf] %v349_v48  ;;  %v353_v50 = vld [vmem:[%s9028_s6 + $0x90] sm:$0xf] }
  0x4f   : > { %352 = vst [vmem:[%s9033_s14 + $0x44] sm:$0xf] %v351_v49  ;;  %v355_v51 = vld [vmem:[%s9028_s6 + $0x98] sm:$0xf]  ;;  %v357_v52 = vld [vmem:[%s9028_s6 + $0xa0] sm:$0xf] }
  0x50   : > { %354 = vst [vmem:[%s9033_s14 + $0x48] sm:$0xf] %v353_v50  ;;  %356 = vst [vmem:[%s9033_s14 + $0x4c] sm:$0xf] %v355_v51  ;;  %v359_v53 = vld [vmem:[%s9028_s6 + $0xa8] sm:$0xf] }
  0x51   : > { %358 = vst [vmem:[%s9033_s14 + $0x50] sm:$0xf] %v357_v52  ;;  %v361_v54 = vld [vmem:[%s9028_s6 + $0xb0] sm:$0xf]  ;;  %v363_v55 = vld [vmem:[%s9028_s6 + $0xb8] sm:$0xf] }
  0x52   : > { %360 = vst [vmem:[%s9033_s14 + $0x54] sm:$0xf] %v359_v53  ;;  %362 = vst [vmem:[%s9033_s14 + $0x58] sm:$0xf] %v361_v54  ;;  %v365_v56 = vld [vmem:[%s9028_s6 + $0xc0] sm:$0xf] }
  0x53   : > { %364 = vst [vmem:[%s9033_s14 + $0x5c] sm:$0xf] %v363_v55  ;;  %v367_v57 = vld [vmem:[%s9028_s6 + $0xc8] sm:$0xf]  ;;  %v369_v58 = vld [vmem:[%s9028_s6 + $0xd0] sm:$0xf] }
  0x54   : > { %366 = vst [vmem:[%s9033_s14 + $0x60] sm:$0xf] %v365_v56  ;;  %368 = vst [vmem:[%s9033_s14 + $0x64] sm:$0xf] %v367_v57  ;;  %v371_v59 = vld [vmem:[%s9028_s6 + $0xd8] sm:$0xf] }
  0x55   : > { %370 = vst [vmem:[%s9033_s14 + $0x68] sm:$0xf] %v369_v58  ;;  %v373_v60 = vld [vmem:[%s9028_s6 + $0xe0] sm:$0xf]  ;;  %v375_v61 = vld [vmem:[%s9028_s6 + $0xe8] sm:$0xf] }
  0x56   : > { %372 = vst [vmem:[%s9033_s14 + $0x6c] sm:$0xf] %v371_v59  ;;  %374 = vst [vmem:[%s9033_s14 + $0x70] sm:$0xf] %v373_v60  ;;  %v377_v62 = vld [vmem:[%s9028_s6 + $0xf0] sm:$0xf] }
  0x57   : > { %376 = vst [vmem:[%s9033_s14 + $0x74] sm:$0xf] %v375_v61  ;;  %v379_v63 = vld [vmem:[%s9028_s6 + $0xf8] sm:$0xf]  ;;  %v381_v0 = vld [vmem:[%s9028_s6 + $0x100] sm:$0xf] }
  0x58   : > { %378 = vst [vmem:[%s9033_s14 + $0x78] sm:$0xf] %v377_v62  ;;  %380 = vst [vmem:[%s9033_s14 + $0x7c] sm:$0xf] %v379_v63  ;;  %v383_v1 = vld [vmem:[%s9028_s6 + $0x108] sm:$0xf] }
  0x59   : > { %382 = vst [vmem:[%s9033_s14 + $0x80] sm:$0xf] %v381_v0  ;;  %v385_v2 = vld [vmem:[%s9028_s6 + $0x110] sm:$0xf]  ;;  %v387_v3 = vld [vmem:[%s9028_s6 + $0x118] sm:$0xf] }
  0x5a   : > { %384 = vst [vmem:[%s9033_s14 + $0x84] sm:$0xf] %v383_v1  ;;  %386 = vst [vmem:[%s9033_s14 + $0x88] sm:$0xf] %v385_v2  ;;  %v389_v4 = vld [vmem:[%s9028_s6 + $0x120] sm:$0xf] }
  0x5b   : > { %388 = vst [vmem:[%s9033_s14 + $0x8c] sm:$0xf] %v387_v3  ;;  %v391_v5 = vld [vmem:[%s9028_s6 + $0x128] sm:$0xf]  ;;  %v393_v6 = vld [vmem:[%s9028_s6 + $0x130] sm:$0xf] }
  0x5c   : > { %390 = vst [vmem:[%s9033_s14 + $0x90] sm:$0xf] %v389_v4  ;;  %392 = vst [vmem:[%s9033_s14 + $0x94] sm:$0xf] %v391_v5  ;;  %v395_v7 = vld [vmem:[%s9028_s6 + $0x138] sm:$0xf] }
  0x5d   : > { %394 = vst [vmem:[%s9033_s14 + $0x98] sm:$0xf] %v393_v6  ;;  %v397_v8 = vld [vmem:[%s9028_s6 + $0x140] sm:$0xf]  ;;  %v399_v9 = vld [vmem:[%s9028_s6 + $0x148] sm:$0xf] }
  0x5e   : > { %396 = vst [vmem:[%s9033_s14 + $0x9c] sm:$0xf] %v395_v7  ;;  %398 = vst [vmem:[%s9033_s14 + $0xa0] sm:$0xf] %v397_v8  ;;  %v401_v10 = vld [vmem:[%s9028_s6 + $0x150] sm:$0xf] }
  0x5f   : > { %400 = vst [vmem:[%s9033_s14 + $0xa4] sm:$0xf] %v399_v9  ;;  %v403_v11 = vld [vmem:[%s9028_s6 + $0x158] sm:$0xf]  ;;  %v405_v12 = vld [vmem:[%s9028_s6 + $0x160] sm:$0xf] }
  0x60   : > { %402 = vst [vmem:[%s9033_s14 + $0xa8] sm:$0xf] %v401_v10  ;;  %404 = vst [vmem:[%s9033_s14 + $0xac] sm:$0xf] %v403_v11  ;;  %v407_v13 = vld [vmem:[%s9028_s6 + $0x168] sm:$0xf] }
  0x61   : > { %406 = vst [vmem:[%s9033_s14 + $0xb0] sm:$0xf] %v405_v12  ;;  %v409_v14 = vld [vmem:[%s9028_s6 + $0x170] sm:$0xf]  ;;  %v411_v15 = vld [vmem:[%s9028_s6 + $0x178] sm:$0xf] }
  0x62   : > { %408 = vst [vmem:[%s9033_s14 + $0xb4] sm:$0xf] %v407_v13  ;;  %410 = vst [vmem:[%s9033_s14 + $0xb8] sm:$0xf] %v409_v14  ;;  %v413_v16 = vld [vmem:[%s9028_s6 + $0x180] sm:$0xf] }
  0x63   : > { %412 = vst [vmem:[%s9033_s14 + $0xbc] sm:$0xf] %v411_v15  ;;  %v415_v17 = vld [vmem:[%s9028_s6 + $0x188] sm:$0xf]  ;;  %v417_v18 = vld [vmem:[%s9028_s6 + $0x190] sm:$0xf] }
  0x64   : > { %414 = vst [vmem:[%s9033_s14 + $0xc0] sm:$0xf] %v413_v16  ;;  %416 = vst [vmem:[%s9033_s14 + $0xc4] sm:$0xf] %v415_v17  ;;  %v419_v19 = vld [vmem:[%s9028_s6 + $0x198] sm:$0xf] }
  0x65   : > { %418 = vst [vmem:[%s9033_s14 + $0xc8] sm:$0xf] %v417_v18  ;;  %v421_v20 = vld [vmem:[%s9028_s6 + $0x1a0] sm:$0xf]  ;;  %v423_v21 = vld [vmem:[%s9028_s6 + $0x1a8] sm:$0xf] }
  0x66   : > { %420 = vst [vmem:[%s9033_s14 + $0xcc] sm:$0xf] %v419_v19  ;;  %422 = vst [vmem:[%s9033_s14 + $0xd0] sm:$0xf] %v421_v20  ;;  %v425_v22 = vld [vmem:[%s9028_s6 + $0x1b0] sm:$0xf] }
  0x67   : > { %424 = vst [vmem:[%s9033_s14 + $0xd4] sm:$0xf] %v423_v21  ;;  %v427_v23 = vld [vmem:[%s9028_s6 + $0x1b8] sm:$0xf]  ;;  %v429_v24 = vld [vmem:[%s9028_s6 + $0x1c0] sm:$0xf] }
  0x68   : > { %426 = vst [vmem:[%s9033_s14 + $0xd8] sm:$0xf] %v425_v22  ;;  %428 = vst [vmem:[%s9033_s14 + $0xdc] sm:$0xf] %v427_v23  ;;  %v431_v25 = vld [vmem:[%s9028_s6 + $0x1c8] sm:$0xf] }
  0x69   : > { %430 = vst [vmem:[%s9033_s14 + $0xe0] sm:$0xf] %v429_v24  ;;  %v433_v26 = vld [vmem:[%s9028_s6 + $0x1d0] sm:$0xf]  ;;  %v435_v27 = vld [vmem:[%s9028_s6 + $0x1d8] sm:$0xf] }
  0x6a   : > { %432 = vst [vmem:[%s9033_s14 + $0xe4] sm:$0xf] %v431_v25  ;;  %434 = vst [vmem:[%s9033_s14 + $0xe8] sm:$0xf] %v433_v26  ;;  %v437_v28 = vld [vmem:[%s9028_s6 + $0x1e0] sm:$0xf] }
  0x6b   : > { %436 = vst [vmem:[%s9033_s14 + $0xec] sm:$0xf] %v435_v27  ;;  %v439_v29 = vld [vmem:[%s9028_s6 + $0x1e8] sm:$0xf]  ;;  %v441_v30 = vld [vmem:[%s9028_s6 + $0x1f0] sm:$0xf] }
  0x6c   : > { %438 = vst [vmem:[%s9033_s14 + $0xf0] sm:$0xf] %v437_v28  ;;  %440 = vst [vmem:[%s9033_s14 + $0xf4] sm:$0xf] %v439_v29  ;;  %v443_v31 = vld [vmem:[%s9028_s6 + $0x1f8] sm:$0xf] }
  0x6d   : > { %442 = vst [vmem:[%s9033_s14 + $0xf8] sm:$0xf] %v441_v30  ;;  %v445_v32 = vld [vmem:[%s9028_s6 + $0x200] sm:$0xf]  ;;  %v447_v33 = vld [vmem:[%s9028_s6 + $0x208] sm:$0xf] }
  0x6e   : > { %444 = vst [vmem:[%s9033_s14 + $0xfc] sm:$0xf] %v443_v31  ;;  %446 = vst [vmem:[%s9033_s14 + $0x100] sm:$0xf] %v445_v32  ;;  %v449_v34 = vld [vmem:[%s9028_s6 + $0x210] sm:$0xf] }
  0x6f   : > { %448 = vst [vmem:[%s9033_s14 + $0x104] sm:$0xf] %v447_v33  ;;  %v451_v35 = vld [vmem:[%s9028_s6 + $0x218] sm:$0xf]  ;;  %v453_v36 = vld [vmem:[%s9028_s6 + $0x220] sm:$0xf] }
  0x70   : > { %450 = vst [vmem:[%s9033_s14 + $0x108] sm:$0xf] %v449_v34  ;;  %452 = vst [vmem:[%s9033_s14 + $0x10c] sm:$0xf] %v451_v35  ;;  %v455_v37 = vld [vmem:[%s9028_s6 + $0x228] sm:$0xf] }
  0x71   : > { %454 = vst [vmem:[%s9033_s14 + $0x110] sm:$0xf] %v453_v36  ;;  %v457_v38 = vld [vmem:[%s9028_s6 + $0x230] sm:$0xf]  ;;  %v459_v39 = vld [vmem:[%s9028_s6 + $0x238] sm:$0xf] }
  0x72   : > { %456 = vst [vmem:[%s9033_s14 + $0x114] sm:$0xf] %v455_v37  ;;  %458 = vst [vmem:[%s9033_s14 + $0x118] sm:$0xf] %v457_v38  ;;  %v461_v40 = vld [vmem:[%s9028_s6 + $0x240] sm:$0xf] }
  0x73   : > { %460 = vst [vmem:[%s9033_s14 + $0x11c] sm:$0xf] %v459_v39  ;;  %v463_v41 = vld [vmem:[%s9028_s6 + $0x248] sm:$0xf]  ;;  %v465_v42 = vld [vmem:[%s9028_s6 + $0x250] sm:$0xf] }
  0x74   : > { %462 = vst [vmem:[%s9033_s14 + $0x120] sm:$0xf] %v461_v40  ;;  %464 = vst [vmem:[%s9033_s14 + $0x124] sm:$0xf] %v463_v41  ;;  %v467_v43 = vld [vmem:[%s9028_s6 + $0x258] sm:$0xf] }
  0x75   : > { %466 = vst [vmem:[%s9033_s14 + $0x128] sm:$0xf] %v465_v42  ;;  %v469_v44 = vld [vmem:[%s9028_s6 + $0x260] sm:$0xf]  ;;  %v471_v45 = vld [vmem:[%s9028_s6 + $0x268] sm:$0xf] }
  0x76   : > { %468 = vst [vmem:[%s9033_s14 + $0x12c] sm:$0xf] %v467_v43  ;;  %470 = vst [vmem:[%s9033_s14 + $0x130] sm:$0xf] %v469_v44  ;;  %v473_v46 = vld [vmem:[%s9028_s6 + $0x270] sm:$0xf] }
  0x77   : > { %472 = vst [vmem:[%s9033_s14 + $0x134] sm:$0xf] %v471_v45  ;;  %v475_v47 = vld [vmem:[%s9028_s6 + $0x278] sm:$0xf]  ;;  %v477_v48 = vld [vmem:[%s9028_s6 + $0x280] sm:$0xf] }
  0x78   : > { %474 = vst [vmem:[%s9033_s14 + $0x138] sm:$0xf] %v473_v46  ;;  %476 = vst [vmem:[%s9033_s14 + $0x13c] sm:$0xf] %v475_v47  ;;  %v479_v49 = vld [vmem:[%s9028_s6 + $0x288] sm:$0xf] }
  0x79   : > { %478 = vst [vmem:[%s9033_s14 + $0x140] sm:$0xf] %v477_v48  ;;  %v481_v50 = vld [vmem:[%s9028_s6 + $0x290] sm:$0xf]  ;;  %v483_v51 = vld [vmem:[%s9028_s6 + $0x298] sm:$0xf] }
  0x7a   : > { %480 = vst [vmem:[%s9033_s14 + $0x144] sm:$0xf] %v479_v49  ;;  %482 = vst [vmem:[%s9033_s14 + $0x148] sm:$0xf] %v481_v50  ;;  %v485_v52 = vld [vmem:[%s9028_s6 + $0x2a0] sm:$0xf] }
  0x7b   : > { %484 = vst [vmem:[%s9033_s14 + $0x14c] sm:$0xf] %v483_v51  ;;  %v487_v53 = vld [vmem:[%s9028_s6 + $0x2a8] sm:$0xf]  ;;  %v489_v54 = vld [vmem:[%s9028_s6 + $0x2b0] sm:$0xf] }
  0x7c   : > { %486 = vst [vmem:[%s9033_s14 + $0x150] sm:$0xf] %v485_v52  ;;  %488 = vst [vmem:[%s9033_s14 + $0x154] sm:$0xf] %v487_v53  ;;  %v491_v55 = vld [vmem:[%s9028_s6 + $0x2b8] sm:$0xf] }
  0x7d   : > { %490 = vst [vmem:[%s9033_s14 + $0x158] sm:$0xf] %v489_v54  ;;  %v493_v56 = vld [vmem:[%s9028_s6 + $0x2c0] sm:$0xf]  ;;  %v495_v57 = vld [vmem:[%s9028_s6 + $0x2c8] sm:$0xf] }
  0x7e   : > { %492 = vst [vmem:[%s9033_s14 + $0x15c] sm:$0xf] %v491_v55  ;;  %494 = vst [vmem:[%s9033_s14 + $0x160] sm:$0xf] %v493_v56  ;;  %v497_v58 = vld [vmem:[%s9028_s6 + $0x2d0] sm:$0xf] }
  0x7f   : > { %496 = vst [vmem:[%s9033_s14 + $0x164] sm:$0xf] %v495_v57  ;;  %v499_v59 = vld [vmem:[%s9028_s6 + $0x2d8] sm:$0xf]  ;;  %v501_v60 = vld [vmem:[%s9028_s6 + $0x2e0] sm:$0xf] }
  0x80   : > { %498 = vst [vmem:[%s9033_s14 + $0x168] sm:$0xf] %v497_v58  ;;  %500 = vst [vmem:[%s9033_s14 + $0x16c] sm:$0xf] %v499_v59  ;;  %v503_v61 = vld [vmem:[%s9028_s6 + $0x2e8] sm:$0xf] }
  0x81   : > { %502 = vst [vmem:[%s9033_s14 + $0x170] sm:$0xf] %v501_v60  ;;  %v505_v62 = vld [vmem:[%s9028_s6 + $0x2f0] sm:$0xf]  ;;  %v507_v63 = vld [vmem:[%s9028_s6 + $0x2f8] sm:$0xf] }
  0x82   : > { %504 = vst [vmem:[%s9033_s14 + $0x174] sm:$0xf] %v503_v61  ;;  %506 = vst [vmem:[%s9033_s14 + $0x178] sm:$0xf] %v505_v62  ;;  %v509_v0 = vld [vmem:[%s9028_s6 + $0x300] sm:$0xf] }
  0x83   : > { %508 = vst [vmem:[%s9033_s14 + $0x17c] sm:$0xf] %v507_v63  ;;  %v511_v1 = vld [vmem:[%s9028_s6 + $0x308] sm:$0xf]  ;;  %v513_v2 = vld [vmem:[%s9028_s6 + $0x310] sm:$0xf] }
  0x84   : > { %510 = vst [vmem:[%s9033_s14 + $0x180] sm:$0xf] %v509_v0  ;;  %512 = vst [vmem:[%s9033_s14 + $0x184] sm:$0xf] %v511_v1  ;;  %v515_v3 = vld [vmem:[%s9028_s6 + $0x318] sm:$0xf] }
  0x85   : > { %514 = vst [vmem:[%s9033_s14 + $0x188] sm:$0xf] %v513_v2  ;;  %v517_v4 = vld [vmem:[%s9028_s6 + $0x320] sm:$0xf]  ;;  %v519_v5 = vld [vmem:[%s9028_s6 + $0x328] sm:$0xf] }
  0x86   : > { %516 = vst [vmem:[%s9033_s14 + $0x18c] sm:$0xf] %v515_v3  ;;  %518 = vst [vmem:[%s9033_s14 + $0x190] sm:$0xf] %v517_v4  ;;  %v521_v6 = vld [vmem:[%s9028_s6 + $0x330] sm:$0xf] }
  0x87   : > { %520 = vst [vmem:[%s9033_s14 + $0x194] sm:$0xf] %v519_v5  ;;  %v523_v7 = vld [vmem:[%s9028_s6 + $0x338] sm:$0xf]  ;;  %v525_v8 = vld [vmem:[%s9028_s6 + $0x340] sm:$0xf] }
  0x88   : > { %522 = vst [vmem:[%s9033_s14 + $0x198] sm:$0xf] %v521_v6  ;;  %524 = vst [vmem:[%s9033_s14 + $0x19c] sm:$0xf] %v523_v7  ;;  %v527_v9 = vld [vmem:[%s9028_s6 + $0x348] sm:$0xf] }
  0x89   : > { %526 = vst [vmem:[%s9033_s14 + $0x1a0] sm:$0xf] %v525_v8  ;;  %v529_v10 = vld [vmem:[%s9028_s6 + $0x350] sm:$0xf]  ;;  %v531_v11 = vld [vmem:[%s9028_s6 + $0x358] sm:$0xf] }
  0x8a   : > { %528 = vst [vmem:[%s9033_s14 + $0x1a4] sm:$0xf] %v527_v9  ;;  %530 = vst [vmem:[%s9033_s14 + $0x1a8] sm:$0xf] %v529_v10  ;;  %v533_v12 = vld [vmem:[%s9028_s6 + $0x360] sm:$0xf] }
  0x8b   : > { %532 = vst [vmem:[%s9033_s14 + $0x1ac] sm:$0xf] %v531_v11  ;;  %v535_v13 = vld [vmem:[%s9028_s6 + $0x368] sm:$0xf]  ;;  %v537_v14 = vld [vmem:[%s9028_s6 + $0x370] sm:$0xf] }
  0x8c   : > { %534 = vst [vmem:[%s9033_s14 + $0x1b0] sm:$0xf] %v533_v12  ;;  %536 = vst [vmem:[%s9033_s14 + $0x1b4] sm:$0xf] %v535_v13  ;;  %v539_v15 = vld [vmem:[%s9028_s6 + $0x378] sm:$0xf] }
  0x8d   : > { %538 = vst [vmem:[%s9033_s14 + $0x1b8] sm:$0xf] %v537_v14  ;;  %v541_v16 = vld [vmem:[%s9028_s6 + $0x380] sm:$0xf]  ;;  %v543_v17 = vld [vmem:[%s9028_s6 + $0x388] sm:$0xf] }
  0x8e   : > { %540 = vst [vmem:[%s9033_s14 + $0x1bc] sm:$0xf] %v539_v15  ;;  %542 = vst [vmem:[%s9033_s14 + $0x1c0] sm:$0xf] %v541_v16  ;;  %v545_v18 = vld [vmem:[%s9028_s6 + $0x390] sm:$0xf] }
  0x8f   : > { %544 = vst [vmem:[%s9033_s14 + $0x1c4] sm:$0xf] %v543_v17  ;;  %v547_v19 = vld [vmem:[%s9028_s6 + $0x398] sm:$0xf]  ;;  %v549_v20 = vld [vmem:[%s9028_s6 + $0x3a0] sm:$0xf] }
  0x90   : > { %546 = vst [vmem:[%s9033_s14 + $0x1c8] sm:$0xf] %v545_v18  ;;  %548 = vst [vmem:[%s9033_s14 + $0x1cc] sm:$0xf] %v547_v19  ;;  %v551_v21 = vld [vmem:[%s9028_s6 + $0x3a8] sm:$0xf] }
  0x91   : > { %550 = vst [vmem:[%s9033_s14 + $0x1d0] sm:$0xf] %v549_v20  ;;  %v553_v22 = vld [vmem:[%s9028_s6 + $0x3b0] sm:$0xf]  ;;  %v555_v23 = vld [vmem:[%s9028_s6 + $0x3b8] sm:$0xf] }
  0x92   : > { %552 = vst [vmem:[%s9033_s14 + $0x1d4] sm:$0xf] %v551_v21  ;;  %554 = vst [vmem:[%s9033_s14 + $0x1d8] sm:$0xf] %v553_v22  ;;  %v557_v24 = vld [vmem:[%s9028_s6 + $0x3c0] sm:$0xf] }
  0x93   : > { %556 = vst [vmem:[%s9033_s14 + $0x1dc] sm:$0xf] %v555_v23  ;;  %v559_v25 = vld [vmem:[%s9028_s6 + $0x3c8] sm:$0xf]  ;;  %v561_v26 = vld [vmem:[%s9028_s6 + $0x3d0] sm:$0xf] }
  0x94   : > { %558 = vst [vmem:[%s9033_s14 + $0x1e0] sm:$0xf] %v557_v24  ;;  %560 = vst [vmem:[%s9033_s14 + $0x1e4] sm:$0xf] %v559_v25  ;;  %v563_v27 = vld [vmem:[%s9028_s6 + $0x3d8] sm:$0xf] }
  0x95   : > { %562 = vst [vmem:[%s9033_s14 + $0x1e8] sm:$0xf] %v561_v26  ;;  %v565_v28 = vld [vmem:[%s9028_s6 + $0x3e0] sm:$0xf]  ;;  %v567_v29 = vld [vmem:[%s9028_s6 + $0x3e8] sm:$0xf] }
  0x96   : > { %564 = vst [vmem:[%s9033_s14 + $0x1ec] sm:$0xf] %v563_v27  ;;  %566 = vst [vmem:[%s9033_s14 + $0x1f0] sm:$0xf] %v565_v28  ;;  %v569_v30 = vld [vmem:[%s9028_s6 + $0x3f0] sm:$0xf] }
  0x97   : > { %568 = vst [vmem:[%s9033_s14 + $0x1f4] sm:$0xf] %v567_v29  ;;  %v571_v31 = vld [vmem:[%s9028_s6 + $0x3f8] sm:$0xf]  ;;  %v573_v32 = vld [vmem:[%s9028_s6 + $0x400] sm:$0xf] }
  0x98   : > { %570 = vst [vmem:[%s9033_s14 + $0x1f8] sm:$0xf] %v569_v30  ;;  %572 = vst [vmem:[%s9033_s14 + $0x1fc] sm:$0xf] %v571_v31  ;;  %v575_v33 = vld [vmem:[%s9028_s6 + $0x408] sm:$0xf] }
  0x99   : > { %574 = vst [vmem:[%s9033_s14 + $0x200] sm:$0xf] %v573_v32  ;;  %v577_v34 = vld [vmem:[%s9028_s6 + $0x410] sm:$0xf]  ;;  %v579_v35 = vld [vmem:[%s9028_s6 + $0x418] sm:$0xf] }
  0x9a   : > { %576 = vst [vmem:[%s9033_s14 + $0x204] sm:$0xf] %v575_v33  ;;  %578 = vst [vmem:[%s9033_s14 + $0x208] sm:$0xf] %v577_v34  ;;  %v581_v36 = vld [vmem:[%s9028_s6 + $0x420] sm:$0xf] }
  0x9b   : > { %580 = vst [vmem:[%s9033_s14 + $0x20c] sm:$0xf] %v579_v35  ;;  %v583_v37 = vld [vmem:[%s9028_s6 + $0x428] sm:$0xf]  ;;  %v585_v38 = vld [vmem:[%s9028_s6 + $0x430] sm:$0xf] }
  0x9c   : > { %582 = vst [vmem:[%s9033_s14 + $0x210] sm:$0xf] %v581_v36  ;;  %584 = vst [vmem:[%s9033_s14 + $0x214] sm:$0xf] %v583_v37  ;;  %v587_v39 = vld [vmem:[%s9028_s6 + $0x438] sm:$0xf] }
  0x9d   : > { %586 = vst [vmem:[%s9033_s14 + $0x218] sm:$0xf] %v585_v38  ;;  %v589_v40 = vld [vmem:[%s9028_s6 + $0x440] sm:$0xf]  ;;  %v591_v41 = vld [vmem:[%s9028_s6 + $0x448] sm:$0xf] }
  0x9e   : > { %588 = vst [vmem:[%s9033_s14 + $0x21c] sm:$0xf] %v587_v39  ;;  %590 = vst [vmem:[%s9033_s14 + $0x220] sm:$0xf] %v589_v40  ;;  %v593_v42 = vld [vmem:[%s9028_s6 + $0x450] sm:$0xf] }
  0x9f   : > { %592 = vst [vmem:[%s9033_s14 + $0x224] sm:$0xf] %v591_v41  ;;  %v595_v43 = vld [vmem:[%s9028_s6 + $0x458] sm:$0xf]  ;;  %v597_v44 = vld [vmem:[%s9028_s6 + $0x460] sm:$0xf] }
  0xa0   : > { %594 = vst [vmem:[%s9033_s14 + $0x228] sm:$0xf] %v593_v42  ;;  %596 = vst [vmem:[%s9033_s14 + $0x22c] sm:$0xf] %v595_v43  ;;  %v599_v45 = vld [vmem:[%s9028_s6 + $0x468] sm:$0xf] }
  0xa1   : > { %598 = vst [vmem:[%s9033_s14 + $0x230] sm:$0xf] %v597_v44  ;;  %v601_v46 = vld [vmem:[%s9028_s6 + $0x470] sm:$0xf]  ;;  %v603_v47 = vld [vmem:[%s9028_s6 + $0x478] sm:$0xf] }
  0xa2   : > { %600 = vst [vmem:[%s9033_s14 + $0x234] sm:$0xf] %v599_v45  ;;  %602 = vst [vmem:[%s9033_s14 + $0x238] sm:$0xf] %v601_v46  ;;  %v605_v48 = vld [vmem:[%s9028_s6 + $0x480] sm:$0xf] }
  0xa3   : > { %604 = vst [vmem:[%s9033_s14 + $0x23c] sm:$0xf] %v603_v47  ;;  %v607_v49 = vld [vmem:[%s9028_s6 + $0x488] sm:$0xf]  ;;  %v609_v50 = vld [vmem:[%s9028_s6 + $0x490] sm:$0xf] }
  0xa4   : > { %606 = vst [vmem:[%s9033_s14 + $0x240] sm:$0xf] %v605_v48  ;;  %608 = vst [vmem:[%s9033_s14 + $0x244] sm:$0xf] %v607_v49  ;;  %v611_v51 = vld [vmem:[%s9028_s6 + $0x498] sm:$0xf] }
  0xa5   : > { %610 = vst [vmem:[%s9033_s14 + $0x248] sm:$0xf] %v609_v50  ;;  %v613_v52 = vld [vmem:[%s9028_s6 + $0x4a0] sm:$0xf]  ;;  %v615_v53 = vld [vmem:[%s9028_s6 + $0x4a8] sm:$0xf] }
  0xa6   : > { %612 = vst [vmem:[%s9033_s14 + $0x24c] sm:$0xf] %v611_v51  ;;  %614 = vst [vmem:[%s9033_s14 + $0x250] sm:$0xf] %v613_v52  ;;  %v617_v54 = vld [vmem:[%s9028_s6 + $0x4b0] sm:$0xf] }
  0xa7   : > { %616 = vst [vmem:[%s9033_s14 + $0x254] sm:$0xf] %v615_v53  ;;  %v619_v55 = vld [vmem:[%s9028_s6 + $0x4b8] sm:$0xf]  ;;  %v621_v56 = vld [vmem:[%s9028_s6 + $0x4c0] sm:$0xf] }
  0xa8   : > { %618 = vst [vmem:[%s9033_s14 + $0x258] sm:$0xf] %v617_v54  ;;  %620 = vst [vmem:[%s9033_s14 + $0x25c] sm:$0xf] %v619_v55  ;;  %v623_v57 = vld [vmem:[%s9028_s6 + $0x4c8] sm:$0xf] }
  0xa9   : > { %622 = vst [vmem:[%s9033_s14 + $0x260] sm:$0xf] %v621_v56  ;;  %v625_v58 = vld [vmem:[%s9028_s6 + $0x4d0] sm:$0xf]  ;;  %v627_v59 = vld [vmem:[%s9028_s6 + $0x4d8] sm:$0xf] }
  0xaa   : > { %624 = vst [vmem:[%s9033_s14 + $0x264] sm:$0xf] %v623_v57  ;;  %626 = vst [vmem:[%s9033_s14 + $0x268] sm:$0xf] %v625_v58  ;;  %v629_v60 = vld [vmem:[%s9028_s6 + $0x4e0] sm:$0xf] }
  0xab   : > { %628 = vst [vmem:[%s9033_s14 + $0x26c] sm:$0xf] %v627_v59  ;;  %v631_v61 = vld [vmem:[%s9028_s6 + $0x4e8] sm:$0xf]  ;;  %v633_v62 = vld [vmem:[%s9028_s6 + $0x4f0] sm:$0xf] }
  0xac   : > { %630 = vst [vmem:[%s9033_s14 + $0x270] sm:$0xf] %v629_v60  ;;  %632 = vst [vmem:[%s9033_s14 + $0x274] sm:$0xf] %v631_v61  ;;  %v635_v63 = vld [vmem:[%s9028_s6 + $0x4f8] sm:$0xf] }
  0xad   : > { %634 = vst [vmem:[%s9033_s14 + $0x278] sm:$0xf] %v633_v62  ;;  %v637_v0 = vld [vmem:[%s9028_s6 + $0x500] sm:$0xf]  ;;  %v639_v1 = vld [vmem:[%s9028_s6 + $0x508] sm:$0xf] }
  0xae   : > { %636 = vst [vmem:[%s9033_s14 + $0x27c] sm:$0xf] %v635_v63  ;;  %638 = vst [vmem:[%s9033_s14 + $0x280] sm:$0xf] %v637_v0  ;;  %v641_v2 = vld [vmem:[%s9028_s6 + $0x510] sm:$0xf] }
  0xaf   : > { %640 = vst [vmem:[%s9033_s14 + $0x284] sm:$0xf] %v639_v1  ;;  %v643_v3 = vld [vmem:[%s9028_s6 + $0x518] sm:$0xf]  ;;  %v645_v4 = vld [vmem:[%s9028_s6 + $0x520] sm:$0xf] }
  0xb0   : > { %642 = vst [vmem:[%s9033_s14 + $0x288] sm:$0xf] %v641_v2  ;;  %644 = vst [vmem:[%s9033_s14 + $0x28c] sm:$0xf] %v643_v3  ;;  %v647_v5 = vld [vmem:[%s9028_s6 + $0x528] sm:$0xf] }
  0xb1   : > { %646 = vst [vmem:[%s9033_s14 + $0x290] sm:$0xf] %v645_v4  ;;  %v649_v6 = vld [vmem:[%s9028_s6 + $0x530] sm:$0xf]  ;;  %v651_v7 = vld [vmem:[%s9028_s6 + $0x538] sm:$0xf] }
  0xb2   : > { %648 = vst [vmem:[%s9033_s14 + $0x294] sm:$0xf] %v647_v5  ;;  %650 = vst [vmem:[%s9033_s14 + $0x298] sm:$0xf] %v649_v6  ;;  %v653_v8 = vld [vmem:[%s9028_s6 + $0x540] sm:$0xf] }
  0xb3   : > { %652 = vst [vmem:[%s9033_s14 + $0x29c] sm:$0xf] %v651_v7  ;;  %v655_v9 = vld [vmem:[%s9028_s6 + $0x548] sm:$0xf]  ;;  %v657_v10 = vld [vmem:[%s9028_s6 + $0x550] sm:$0xf] }
  0xb4   : > { %654 = vst [vmem:[%s9033_s14 + $0x2a0] sm:$0xf] %v653_v8  ;;  %656 = vst [vmem:[%s9033_s14 + $0x2a4] sm:$0xf] %v655_v9  ;;  %v659_v11 = vld [vmem:[%s9028_s6 + $0x558] sm:$0xf] }
  0xb5   : > { %658 = vst [vmem:[%s9033_s14 + $0x2a8] sm:$0xf] %v657_v10  ;;  %v661_v12 = vld [vmem:[%s9028_s6 + $0x560] sm:$0xf]  ;;  %v663_v13 = vld [vmem:[%s9028_s6 + $0x568] sm:$0xf] }
  0xb6   : > { %660 = vst [vmem:[%s9033_s14 + $0x2ac] sm:$0xf] %v659_v11  ;;  %662 = vst [vmem:[%s9033_s14 + $0x2b0] sm:$0xf] %v661_v12  ;;  %v665_v14 = vld [vmem:[%s9028_s6 + $0x570] sm:$0xf] }
  0xb7   : > { %664 = vst [vmem:[%s9033_s14 + $0x2b4] sm:$0xf] %v663_v13  ;;  %v667_v15 = vld [vmem:[%s9028_s6 + $0x578] sm:$0xf]  ;;  %v669_v16 = vld [vmem:[%s9028_s6 + $0x580] sm:$0xf] }
  0xb8   : > { %666 = vst [vmem:[%s9033_s14 + $0x2b8] sm:$0xf] %v665_v14  ;;  %668 = vst [vmem:[%s9033_s14 + $0x2bc] sm:$0xf] %v667_v15  ;;  %v671_v17 = vld [vmem:[%s9028_s6 + $0x588] sm:$0xf] }
  0xb9   : > { %670 = vst [vmem:[%s9033_s14 + $0x2c0] sm:$0xf] %v669_v16  ;;  %v673_v18 = vld [vmem:[%s9028_s6 + $0x590] sm:$0xf]  ;;  %v675_v19 = vld [vmem:[%s9028_s6 + $0x598] sm:$0xf] }
  0xba   : > { %672 = vst [vmem:[%s9033_s14 + $0x2c4] sm:$0xf] %v671_v17  ;;  %674 = vst [vmem:[%s9033_s14 + $0x2c8] sm:$0xf] %v673_v18  ;;  %v677_v20 = vld [vmem:[%s9028_s6 + $0x5a0] sm:$0xf] }
  0xbb   : > { %676 = vst [vmem:[%s9033_s14 + $0x2cc] sm:$0xf] %v675_v19  ;;  %v679_v21 = vld [vmem:[%s9028_s6 + $0x5a8] sm:$0xf]  ;;  %v681_v22 = vld [vmem:[%s9028_s6 + $0x5b0] sm:$0xf] }
  0xbc   : > { %678 = vst [vmem:[%s9033_s14 + $0x2d0] sm:$0xf] %v677_v20  ;;  %680 = vst [vmem:[%s9033_s14 + $0x2d4] sm:$0xf] %v679_v21  ;;  %v683_v23 = vld [vmem:[%s9028_s6 + $0x5b8] sm:$0xf] }
  0xbd   : > { %682 = vst [vmem:[%s9033_s14 + $0x2d8] sm:$0xf] %v681_v22  ;;  %v685_v24 = vld [vmem:[%s9028_s6 + $0x5c0] sm:$0xf]  ;;  %v687_v25 = vld [vmem:[%s9028_s6 + $0x5c8] sm:$0xf] }
  0xbe   : > { %684 = vst [vmem:[%s9033_s14 + $0x2dc] sm:$0xf] %v683_v23  ;;  %686 = vst [vmem:[%s9033_s14 + $0x2e0] sm:$0xf] %v685_v24  ;;  %v689_v26 = vld [vmem:[%s9028_s6 + $0x5d0] sm:$0xf] }
  0xbf   : > { %688 = vst [vmem:[%s9033_s14 + $0x2e4] sm:$0xf] %v687_v25  ;;  %v691_v27 = vld [vmem:[%s9028_s6 + $0x5d8] sm:$0xf]  ;;  %v693_v28 = vld [vmem:[%s9028_s6 + $0x5e0] sm:$0xf] }
  0xc0   : > { %690 = vst [vmem:[%s9033_s14 + $0x2e8] sm:$0xf] %v689_v26  ;;  %692 = vst [vmem:[%s9033_s14 + $0x2ec] sm:$0xf] %v691_v27  ;;  %v695_v29 = vld [vmem:[%s9028_s6 + $0x5e8] sm:$0xf] }
  0xc1   : > { %694 = vst [vmem:[%s9033_s14 + $0x2f0] sm:$0xf] %v693_v28  ;;  %v697_v30 = vld [vmem:[%s9028_s6 + $0x5f0] sm:$0xf]  ;;  %v699_v31 = vld [vmem:[%s9028_s6 + $0x5f8] sm:$0xf] }
  0xc2   : > { %696 = vst [vmem:[%s9033_s14 + $0x2f4] sm:$0xf] %v695_v29  ;;  %698 = vst [vmem:[%s9033_s14 + $0x2f8] sm:$0xf] %v697_v30  ;;  %v701_v32 = vld [vmem:[%s9028_s6 + $0x600] sm:$0xf] }
  0xc3   : > { %700 = vst [vmem:[%s9033_s14 + $0x2fc] sm:$0xf] %v699_v31  ;;  %v703_v33 = vld [vmem:[%s9028_s6 + $0x608] sm:$0xf]  ;;  %v705_v34 = vld [vmem:[%s9028_s6 + $0x610] sm:$0xf] }
  0xc4   : > { %702 = vst [vmem:[%s9033_s14 + $0x300] sm:$0xf] %v701_v32  ;;  %704 = vst [vmem:[%s9033_s14 + $0x304] sm:$0xf] %v703_v33  ;;  %v707_v35 = vld [vmem:[%s9028_s6 + $0x618] sm:$0xf] }
  0xc5   : > { %706 = vst [vmem:[%s9033_s14 + $0x308] sm:$0xf] %v705_v34  ;;  %v709_v36 = vld [vmem:[%s9028_s6 + $0x620] sm:$0xf]  ;;  %v711_v37 = vld [vmem:[%s9028_s6 + $0x628] sm:$0xf] }
  0xc6   : > { %708 = vst [vmem:[%s9033_s14 + $0x30c] sm:$0xf] %v707_v35  ;;  %710 = vst [vmem:[%s9033_s14 + $0x310] sm:$0xf] %v709_v36  ;;  %v713_v38 = vld [vmem:[%s9028_s6 + $0x630] sm:$0xf] }
  0xc7   : > { %712 = vst [vmem:[%s9033_s14 + $0x314] sm:$0xf] %v711_v37  ;;  %v715_v39 = vld [vmem:[%s9028_s6 + $0x638] sm:$0xf]  ;;  %v717_v40 = vld [vmem:[%s9028_s6 + $0x640] sm:$0xf] }
  0xc8   : > { %714 = vst [vmem:[%s9033_s14 + $0x318] sm:$0xf] %v713_v38  ;;  %716 = vst [vmem:[%s9033_s14 + $0x31c] sm:$0xf] %v715_v39  ;;  %v719_v41 = vld [vmem:[%s9028_s6 + $0x648] sm:$0xf] }
  0xc9   : > { %718 = vst [vmem:[%s9033_s14 + $0x320] sm:$0xf] %v717_v40  ;;  %v721_v42 = vld [vmem:[%s9028_s6 + $0x650] sm:$0xf]  ;;  %v723_v43 = vld [vmem:[%s9028_s6 + $0x658] sm:$0xf] }
  0xca   : > { %720 = vst [vmem:[%s9033_s14 + $0x324] sm:$0xf] %v719_v41  ;;  %722 = vst [vmem:[%s9033_s14 + $0x328] sm:$0xf] %v721_v42  ;;  %v725_v44 = vld [vmem:[%s9028_s6 + $0x660] sm:$0xf] }
  0xcb   : > { %724 = vst [vmem:[%s9033_s14 + $0x32c] sm:$0xf] %v723_v43  ;;  %v727_v45 = vld [vmem:[%s9028_s6 + $0x668] sm:$0xf]  ;;  %v729_v46 = vld [vmem:[%s9028_s6 + $0x670] sm:$0xf] }
  0xcc   : > { %726 = vst [vmem:[%s9033_s14 + $0x330] sm:$0xf] %v725_v44  ;;  %728 = vst [vmem:[%s9033_s14 + $0x334] sm:$0xf] %v727_v45  ;;  %v731_v47 = vld [vmem:[%s9028_s6 + $0x678] sm:$0xf] }
  0xcd   : > { %730 = vst [vmem:[%s9033_s14 + $0x338] sm:$0xf] %v729_v46  ;;  %v733_v48 = vld [vmem:[%s9028_s6 + $0x680] sm:$0xf]  ;;  %v735_v49 = vld [vmem:[%s9028_s6 + $0x688] sm:$0xf] }
  0xce   : > { %732 = vst [vmem:[%s9033_s14 + $0x33c] sm:$0xf] %v731_v47  ;;  %734 = vst [vmem:[%s9033_s14 + $0x340] sm:$0xf] %v733_v48  ;;  %v737_v50 = vld [vmem:[%s9028_s6 + $0x690] sm:$0xf] }
  0xcf   : > { %736 = vst [vmem:[%s9033_s14 + $0x344] sm:$0xf] %v735_v49  ;;  %v739_v51 = vld [vmem:[%s9028_s6 + $0x698] sm:$0xf]  ;;  %v741_v52 = vld [vmem:[%s9028_s6 + $0x6a0] sm:$0xf] }
  0xd0   : > { %738 = vst [vmem:[%s9033_s14 + $0x348] sm:$0xf] %v737_v50  ;;  %740 = vst [vmem:[%s9033_s14 + $0x34c] sm:$0xf] %v739_v51  ;;  %v743_v53 = vld [vmem:[%s9028_s6 + $0x6a8] sm:$0xf] }
  0xd1   : > { %742 = vst [vmem:[%s9033_s14 + $0x350] sm:$0xf] %v741_v52  ;;  %v745_v54 = vld [vmem:[%s9028_s6 + $0x6b0] sm:$0xf]  ;;  %v747_v55 = vld [vmem:[%s9028_s6 + $0x6b8] sm:$0xf] }
  0xd2   : > { %744 = vst [vmem:[%s9033_s14 + $0x354] sm:$0xf] %v743_v53  ;;  %746 = vst [vmem:[%s9033_s14 + $0x358] sm:$0xf] %v745_v54  ;;  %v749_v56 = vld [vmem:[%s9028_s6 + $0x6c0] sm:$0xf] }
  0xd3   : > { %748 = vst [vmem:[%s9033_s14 + $0x35c] sm:$0xf] %v747_v55  ;;  %v751_v57 = vld [vmem:[%s9028_s6 + $0x6c8] sm:$0xf]  ;;  %v753_v58 = vld [vmem:[%s9028_s6 + $0x6d0] sm:$0xf] }
  0xd4   : > { %750 = vst [vmem:[%s9033_s14 + $0x360] sm:$0xf] %v749_v56  ;;  %752 = vst [vmem:[%s9033_s14 + $0x364] sm:$0xf] %v751_v57  ;;  %v755_v59 = vld [vmem:[%s9028_s6 + $0x6d8] sm:$0xf] }
  0xd5   : > { %754 = vst [vmem:[%s9033_s14 + $0x368] sm:$0xf] %v753_v58  ;;  %v757_v60 = vld [vmem:[%s9028_s6 + $0x6e0] sm:$0xf]  ;;  %v759_v61 = vld [vmem:[%s9028_s6 + $0x6e8] sm:$0xf] }
  0xd6   : > { %756 = vst [vmem:[%s9033_s14 + $0x36c] sm:$0xf] %v755_v59  ;;  %758 = vst [vmem:[%s9033_s14 + $0x370] sm:$0xf] %v757_v60  ;;  %v761_v62 = vld [vmem:[%s9028_s6 + $0x6f0] sm:$0xf] }
  0xd7   : > { %760 = vst [vmem:[%s9033_s14 + $0x374] sm:$0xf] %v759_v61  ;;  %v763_v63 = vld [vmem:[%s9028_s6 + $0x6f8] sm:$0xf]  ;;  %v765_v0 = vld [vmem:[%s9028_s6 + $0x700] sm:$0xf] }
  0xd8   : > { %762 = vst [vmem:[%s9033_s14 + $0x378] sm:$0xf] %v761_v62  ;;  %764 = vst [vmem:[%s9033_s14 + $0x37c] sm:$0xf] %v763_v63  ;;  %v767_v1 = vld [vmem:[%s9028_s6 + $0x708] sm:$0xf] }
  0xd9   : > { %766 = vst [vmem:[%s9033_s14 + $0x380] sm:$0xf] %v765_v0  ;;  %v769_v2 = vld [vmem:[%s9028_s6 + $0x710] sm:$0xf]  ;;  %v771_v3 = vld [vmem:[%s9028_s6 + $0x718] sm:$0xf] }
  0xda   : > { %768 = vst [vmem:[%s9033_s14 + $0x384] sm:$0xf] %v767_v1  ;;  %770 = vst [vmem:[%s9033_s14 + $0x388] sm:$0xf] %v769_v2  ;;  %v773_v4 = vld [vmem:[%s9028_s6 + $0x720] sm:$0xf] }
  0xdb   : > { %772 = vst [vmem:[%s9033_s14 + $0x38c] sm:$0xf] %v771_v3  ;;  %v775_v5 = vld [vmem:[%s9028_s6 + $0x728] sm:$0xf]  ;;  %v777_v6 = vld [vmem:[%s9028_s6 + $0x730] sm:$0xf] }
  0xdc   : > { %774 = vst [vmem:[%s9033_s14 + $0x390] sm:$0xf] %v773_v4  ;;  %776 = vst [vmem:[%s9033_s14 + $0x394] sm:$0xf] %v775_v5  ;;  %v779_v7 = vld [vmem:[%s9028_s6 + $0x738] sm:$0xf] }
  0xdd   : > { %778 = vst [vmem:[%s9033_s14 + $0x398] sm:$0xf] %v777_v6  ;;  %v781_v8 = vld [vmem:[%s9028_s6 + $0x740] sm:$0xf]  ;;  %v783_v9 = vld [vmem:[%s9028_s6 + $0x748] sm:$0xf] }
  0xde   : > { %780 = vst [vmem:[%s9033_s14 + $0x39c] sm:$0xf] %v779_v7  ;;  %782 = vst [vmem:[%s9033_s14 + $0x3a0] sm:$0xf] %v781_v8  ;;  %v785_v10 = vld [vmem:[%s9028_s6 + $0x750] sm:$0xf] }
  0xdf   : > { %784 = vst [vmem:[%s9033_s14 + $0x3a4] sm:$0xf] %v783_v9  ;;  %v787_v11 = vld [vmem:[%s9028_s6 + $0x758] sm:$0xf]  ;;  %v789_v12 = vld [vmem:[%s9028_s6 + $0x760] sm:$0xf] }
  0xe0   : > { %786 = vst [vmem:[%s9033_s14 + $0x3a8] sm:$0xf] %v785_v10  ;;  %788 = vst [vmem:[%s9033_s14 + $0x3ac] sm:$0xf] %v787_v11  ;;  %v791_v13 = vld [vmem:[%s9028_s6 + $0x768] sm:$0xf] }
  0xe1   : > { %790 = vst [vmem:[%s9033_s14 + $0x3b0] sm:$0xf] %v789_v12  ;;  %v793_v14 = vld [vmem:[%s9028_s6 + $0x770] sm:$0xf]  ;;  %v795_v15 = vld [vmem:[%s9028_s6 + $0x778] sm:$0xf] }
  0xe2   : > { %792 = vst [vmem:[%s9033_s14 + $0x3b4] sm:$0xf] %v791_v13  ;;  %794 = vst [vmem:[%s9033_s14 + $0x3b8] sm:$0xf] %v793_v14  ;;  %v797_v16 = vld [vmem:[%s9028_s6 + $0x780] sm:$0xf] }
  0xe3   : > { %796 = vst [vmem:[%s9033_s14 + $0x3bc] sm:$0xf] %v795_v15  ;;  %v799_v17 = vld [vmem:[%s9028_s6 + $0x788] sm:$0xf]  ;;  %v801_v18 = vld [vmem:[%s9028_s6 + $0x790] sm:$0xf] }
  0xe4   : > { %798 = vst [vmem:[%s9033_s14 + $0x3c0] sm:$0xf] %v797_v16  ;;  %800 = vst [vmem:[%s9033_s14 + $0x3c4] sm:$0xf] %v799_v17  ;;  %v803_v19 = vld [vmem:[%s9028_s6 + $0x798] sm:$0xf] }
  0xe5   : > { %802 = vst [vmem:[%s9033_s14 + $0x3c8] sm:$0xf] %v801_v18  ;;  %v805_v20 = vld [vmem:[%s9028_s6 + $0x7a0] sm:$0xf]  ;;  %v807_v21 = vld [vmem:[%s9028_s6 + $0x7a8] sm:$0xf] }
  0xe6   : > { %804 = vst [vmem:[%s9033_s14 + $0x3cc] sm:$0xf] %v803_v19  ;;  %806 = vst [vmem:[%s9033_s14 + $0x3d0] sm:$0xf] %v805_v20  ;;  %v809_v22 = vld [vmem:[%s9028_s6 + $0x7b0] sm:$0xf] }
  0xe7   : > { %808 = vst [vmem:[%s9033_s14 + $0x3d4] sm:$0xf] %v807_v21  ;;  %v811_v23 = vld [vmem:[%s9028_s6 + $0x7b8] sm:$0xf]  ;;  %v813_v24 = vld [vmem:[%s9028_s6 + $0x7c0] sm:$0xf] }
  0xe8   : > { %810 = vst [vmem:[%s9033_s14 + $0x3d8] sm:$0xf] %v809_v22  ;;  %812 = vst [vmem:[%s9033_s14 + $0x3dc] sm:$0xf] %v811_v23  ;;  %v815_v25 = vld [vmem:[%s9028_s6 + $0x7c8] sm:$0xf] }
  0xe9   : > { %814 = vst [vmem:[%s9033_s14 + $0x3e0] sm:$0xf] %v813_v24  ;;  %v817_v26 = vld [vmem:[%s9028_s6 + $0x7d0] sm:$0xf]  ;;  %v819_v27 = vld [vmem:[%s9028_s6 + $0x7d8] sm:$0xf] }
  0xea   : > { %816 = vst [vmem:[%s9033_s14 + $0x3e4] sm:$0xf] %v815_v25  ;;  %818 = vst [vmem:[%s9033_s14 + $0x3e8] sm:$0xf] %v817_v26  ;;  %v821_v28 = vld [vmem:[%s9028_s6 + $0x7e0] sm:$0xf] }
  0xeb   : > { %820 = vst [vmem:[%s9033_s14 + $0x3ec] sm:$0xf] %v819_v27  ;;  %v823_v29 = vld [vmem:[%s9028_s6 + $0x7e8] sm:$0xf]  ;;  %v825_v30 = vld [vmem:[%s9028_s6 + $0x7f0] sm:$0xf] }
  0xec   : > { %822 = vst [vmem:[%s9033_s14 + $0x3f0] sm:$0xf] %v821_v28  ;;  %824 = vst [vmem:[%s9033_s14 + $0x3f4] sm:$0xf] %v823_v29  ;;  %v827_v31 = vld [vmem:[%s9028_s6 + $0x7f8] sm:$0xf] }
  0xed   : > { %826 = vst [vmem:[%s9033_s14 + $0x3f8] sm:$0xf] %v825_v30  ;;  %v829_v32 = vld [vmem:[%s9028_s6 + $0x800] sm:$0xf]  ;;  %v831_v33 = vld [vmem:[%s9028_s6 + $0x808] sm:$0xf] }
  0xee   : > { %828 = vst [vmem:[%s9033_s14 + $0x3fc] sm:$0xf] %v827_v31  ;;  %830 = vst [vmem:[%s9033_s14 + $0x400] sm:$0xf] %v829_v32  ;;  %v833_v34 = vld [vmem:[%s9028_s6 + $0x810] sm:$0xf] }
  0xef   : > { %832 = vst [vmem:[%s9033_s14 + $0x404] sm:$0xf] %v831_v33  ;;  %v835_v35 = vld [vmem:[%s9028_s6 + $0x818] sm:$0xf]  ;;  %v837_v36 = vld [vmem:[%s9028_s6 + $0x820] sm:$0xf] }
  0xf0   : > { %834 = vst [vmem:[%s9033_s14 + $0x408] sm:$0xf] %v833_v34  ;;  %836 = vst [vmem:[%s9033_s14 + $0x40c] sm:$0xf] %v835_v35  ;;  %v839_v37 = vld [vmem:[%s9028_s6 + $0x828] sm:$0xf] }
  0xf1   : > { %838 = vst [vmem:[%s9033_s14 + $0x410] sm:$0xf] %v837_v36  ;;  %v841_v38 = vld [vmem:[%s9028_s6 + $0x830] sm:$0xf]  ;;  %v843_v39 = vld [vmem:[%s9028_s6 + $0x838] sm:$0xf] }
  0xf2   : > { %840 = vst [vmem:[%s9033_s14 + $0x414] sm:$0xf] %v839_v37  ;;  %842 = vst [vmem:[%s9033_s14 + $0x418] sm:$0xf] %v841_v38  ;;  %v845_v40 = vld [vmem:[%s9028_s6 + $0x840] sm:$0xf] }
  0xf3   : > { %844 = vst [vmem:[%s9033_s14 + $0x41c] sm:$0xf] %v843_v39  ;;  %v847_v41 = vld [vmem:[%s9028_s6 + $0x848] sm:$0xf]  ;;  %v849_v42 = vld [vmem:[%s9028_s6 + $0x850] sm:$0xf] }
  0xf4   : > { %846 = vst [vmem:[%s9033_s14 + $0x420] sm:$0xf] %v845_v40  ;;  %848 = vst [vmem:[%s9033_s14 + $0x424] sm:$0xf] %v847_v41  ;;  %v851_v43 = vld [vmem:[%s9028_s6 + $0x858] sm:$0xf] }
  0xf5   : > { %850 = vst [vmem:[%s9033_s14 + $0x428] sm:$0xf] %v849_v42  ;;  %v853_v44 = vld [vmem:[%s9028_s6 + $0x860] sm:$0xf]  ;;  %v855_v45 = vld [vmem:[%s9028_s6 + $0x868] sm:$0xf] }
  0xf6   : > { %852 = vst [vmem:[%s9033_s14 + $0x42c] sm:$0xf] %v851_v43  ;;  %854 = vst [vmem:[%s9033_s14 + $0x430] sm:$0xf] %v853_v44  ;;  %v857_v46 = vld [vmem:[%s9028_s6 + $0x870] sm:$0xf] }
  0xf7   : > { %856 = vst [vmem:[%s9033_s14 + $0x434] sm:$0xf] %v855_v45  ;;  %v859_v47 = vld [vmem:[%s9028_s6 + $0x878] sm:$0xf]  ;;  %v861_v48 = vld [vmem:[%s9028_s6 + $0x880] sm:$0xf] }
  0xf8   : > { %858 = vst [vmem:[%s9033_s14 + $0x438] sm:$0xf] %v857_v46  ;;  %860 = vst [vmem:[%s9033_s14 + $0x43c] sm:$0xf] %v859_v47  ;;  %v863_v49 = vld [vmem:[%s9028_s6 + $0x888] sm:$0xf] }
  0xf9   : > { %862 = vst [vmem:[%s9033_s14 + $0x440] sm:$0xf] %v861_v48  ;;  %v865_v50 = vld [vmem:[%s9028_s6 + $0x890] sm:$0xf]  ;;  %v867_v51 = vld [vmem:[%s9028_s6 + $0x898] sm:$0xf] }
  0xfa   : > { %864 = vst [vmem:[%s9033_s14 + $0x444] sm:$0xf] %v863_v49  ;;  %866 = vst [vmem:[%s9033_s14 + $0x448] sm:$0xf] %v865_v50  ;;  %v869_v52 = vld [vmem:[%s9028_s6 + $0x8a0] sm:$0xf] }
  0xfb   : > { %868 = vst [vmem:[%s9033_s14 + $0x44c] sm:$0xf] %v867_v51  ;;  %v871_v53 = vld [vmem:[%s9028_s6 + $0x8a8] sm:$0xf]  ;;  %v873_v54 = vld [vmem:[%s9028_s6 + $0x8b0] sm:$0xf] }
  0xfc   : > { %870 = vst [vmem:[%s9033_s14 + $0x450] sm:$0xf] %v869_v52  ;;  %872 = vst [vmem:[%s9033_s14 + $0x454] sm:$0xf] %v871_v53  ;;  %v875_v55 = vld [vmem:[%s9028_s6 + $0x8b8] sm:$0xf] }
  0xfd   : > { %874 = vst [vmem:[%s9033_s14 + $0x458] sm:$0xf] %v873_v54  ;;  %v877_v56 = vld [vmem:[%s9028_s6 + $0x8c0] sm:$0xf]  ;;  %v879_v57 = vld [vmem:[%s9028_s6 + $0x8c8] sm:$0xf] }
  0xfe   : > { %876 = vst [vmem:[%s9033_s14 + $0x45c] sm:$0xf] %v875_v55  ;;  %878 = vst [vmem:[%s9033_s14 + $0x460] sm:$0xf] %v877_v56  ;;  %v881_v58 = vld [vmem:[%s9028_s6 + $0x8d0] sm:$0xf] }
  0xff   : > { %880 = vst [vmem:[%s9033_s14 + $0x464] sm:$0xf] %v879_v57  ;;  %v883_v59 = vld [vmem:[%s9028_s6 + $0x8d8] sm:$0xf]  ;;  %v885_v60 = vld [vmem:[%s9028_s6 + $0x8e0] sm:$0xf] }
 0x100   : > { %882 = vst [vmem:[%s9033_s14 + $0x468] sm:$0xf] %v881_v58  ;;  %884 = vst [vmem:[%s9033_s14 + $0x46c] sm:$0xf] %v883_v59  ;;  %v887_v61 = vld [vmem:[%s9028_s6 + $0x8e8] sm:$0xf] }
 0x101   : > { %886 = vst [vmem:[%s9033_s14 + $0x470] sm:$0xf] %v885_v60  ;;  %v889_v62 = vld [vmem:[%s9028_s6 + $0x8f0] sm:$0xf]  ;;  %v891_v63 = vld [vmem:[%s9028_s6 + $0x8f8] sm:$0xf] }
 0x102   : > { %888 = vst [vmem:[%s9033_s14 + $0x474] sm:$0xf] %v887_v61  ;;  %890 = vst [vmem:[%s9033_s14 + $0x478] sm:$0xf] %v889_v62  ;;  %v893_v0 = vld [vmem:[%s9028_s6 + $0x900] sm:$0xf] }
 0x103   : > { %892 = vst [vmem:[%s9033_s14 + $0x47c] sm:$0xf] %v891_v63  ;;  %v895_v1 = vld [vmem:[%s9028_s6 + $0x908] sm:$0xf]  ;;  %v897_v2 = vld [vmem:[%s9028_s6 + $0x910] sm:$0xf] }
 0x104   : > { %894 = vst [vmem:[%s9033_s14 + $0x480] sm:$0xf] %v893_v0  ;;  %896 = vst [vmem:[%s9033_s14 + $0x484] sm:$0xf] %v895_v1  ;;  %v899_v3 = vld [vmem:[%s9028_s6 + $0x918] sm:$0xf] }
 0x105   : > { %898 = vst [vmem:[%s9033_s14 + $0x488] sm:$0xf] %v897_v2  ;;  %v901_v4 = vld [vmem:[%s9028_s6 + $0x920] sm:$0xf]  ;;  %v903_v5 = vld [vmem:[%s9028_s6 + $0x928] sm:$0xf] }
 0x106   : > { %900 = vst [vmem:[%s9033_s14 + $0x48c] sm:$0xf] %v899_v3  ;;  %902 = vst [vmem:[%s9033_s14 + $0x490] sm:$0xf] %v901_v4  ;;  %v905_v6 = vld [vmem:[%s9028_s6 + $0x930] sm:$0xf] }
 0x107   : > { %904 = vst [vmem:[%s9033_s14 + $0x494] sm:$0xf] %v903_v5  ;;  %v907_v7 = vld [vmem:[%s9028_s6 + $0x938] sm:$0xf]  ;;  %v909_v8 = vld [vmem:[%s9028_s6 + $0x940] sm:$0xf] }
 0x108   : > { %906 = vst [vmem:[%s9033_s14 + $0x498] sm:$0xf] %v905_v6  ;;  %908 = vst [vmem:[%s9033_s14 + $0x49c] sm:$0xf] %v907_v7  ;;  %v911_v9 = vld [vmem:[%s9028_s6 + $0x948] sm:$0xf] }
 0x109   : > { %910 = vst [vmem:[%s9033_s14 + $0x4a0] sm:$0xf] %v909_v8  ;;  %v913_v10 = vld [vmem:[%s9028_s6 + $0x950] sm:$0xf]  ;;  %v915_v11 = vld [vmem:[%s9028_s6 + $0x958] sm:$0xf] }
 0x10a   : > { %912 = vst [vmem:[%s9033_s14 + $0x4a4] sm:$0xf] %v911_v9  ;;  %914 = vst [vmem:[%s9033_s14 + $0x4a8] sm:$0xf] %v913_v10  ;;  %v917_v12 = vld [vmem:[%s9028_s6 + $0x960] sm:$0xf] }
 0x10b   : > { %916 = vst [vmem:[%s9033_s14 + $0x4ac] sm:$0xf] %v915_v11  ;;  %v919_v13 = vld [vmem:[%s9028_s6 + $0x968] sm:$0xf]  ;;  %v921_v14 = vld [vmem:[%s9028_s6 + $0x970] sm:$0xf] }
 0x10c   : > { %918 = vst [vmem:[%s9033_s14 + $0x4b0] sm:$0xf] %v917_v12  ;;  %920 = vst [vmem:[%s9033_s14 + $0x4b4] sm:$0xf] %v919_v13  ;;  %v923_v15 = vld [vmem:[%s9028_s6 + $0x978] sm:$0xf] }
 0x10d   : > { %922 = vst [vmem:[%s9033_s14 + $0x4b8] sm:$0xf] %v921_v14  ;;  %v925_v16 = vld [vmem:[%s9028_s6 + $0x980] sm:$0xf]  ;;  %v927_v17 = vld [vmem:[%s9028_s6 + $0x988] sm:$0xf] }
 0x10e   : > { %924 = vst [vmem:[%s9033_s14 + $0x4bc] sm:$0xf] %v923_v15  ;;  %926 = vst [vmem:[%s9033_s14 + $0x4c0] sm:$0xf] %v925_v16  ;;  %v929_v18 = vld [vmem:[%s9028_s6 + $0x990] sm:$0xf] }
 0x10f   : > { %928 = vst [vmem:[%s9033_s14 + $0x4c4] sm:$0xf] %v927_v17  ;;  %v931_v19 = vld [vmem:[%s9028_s6 + $0x998] sm:$0xf]  ;;  %v933_v20 = vld [vmem:[%s9028_s6 + $0x9a0] sm:$0xf] }
 0x110   : > { %930 = vst [vmem:[%s9033_s14 + $0x4c8] sm:$0xf] %v929_v18  ;;  %932 = vst [vmem:[%s9033_s14 + $0x4cc] sm:$0xf] %v931_v19  ;;  %v935_v21 = vld [vmem:[%s9028_s6 + $0x9a8] sm:$0xf] }
 0x111   : > { %934 = vst [vmem:[%s9033_s14 + $0x4d0] sm:$0xf] %v933_v20  ;;  %v937_v22 = vld [vmem:[%s9028_s6 + $0x9b0] sm:$0xf]  ;;  %v939_v23 = vld [vmem:[%s9028_s6 + $0x9b8] sm:$0xf] }
 0x112   : > { %936 = vst [vmem:[%s9033_s14 + $0x4d4] sm:$0xf] %v935_v21  ;;  %938 = vst [vmem:[%s9033_s14 + $0x4d8] sm:$0xf] %v937_v22  ;;  %v941_v24 = vld [vmem:[%s9028_s6 + $0x9c0] sm:$0xf] }
 0x113   : > { %940 = vst [vmem:[%s9033_s14 + $0x4dc] sm:$0xf] %v939_v23  ;;  %v943_v25 = vld [vmem:[%s9028_s6 + $0x9c8] sm:$0xf]  ;;  %v945_v26 = vld [vmem:[%s9028_s6 + $0x9d0] sm:$0xf] }
 0x114   : > { %942 = vst [vmem:[%s9033_s14 + $0x4e0] sm:$0xf] %v941_v24  ;;  %944 = vst [vmem:[%s9033_s14 + $0x4e4] sm:$0xf] %v943_v25  ;;  %v947_v27 = vld [vmem:[%s9028_s6 + $0x9d8] sm:$0xf] }
 0x115   : > { %946 = vst [vmem:[%s9033_s14 + $0x4e8] sm:$0xf] %v945_v26  ;;  %v949_v28 = vld [vmem:[%s9028_s6 + $0x9e0] sm:$0xf]  ;;  %v951_v29 = vld [vmem:[%s9028_s6 + $0x9e8] sm:$0xf] }
 0x116   : > { %948 = vst [vmem:[%s9033_s14 + $0x4ec] sm:$0xf] %v947_v27  ;;  %950 = vst [vmem:[%s9033_s14 + $0x4f0] sm:$0xf] %v949_v28  ;;  %v953_v30 = vld [vmem:[%s9028_s6 + $0x9f0] sm:$0xf] }
 0x117   : > { %952 = vst [vmem:[%s9033_s14 + $0x4f4] sm:$0xf] %v951_v29  ;;  %v955_v31 = vld [vmem:[%s9028_s6 + $0x9f8] sm:$0xf]  ;;  %v957_v32 = vld [vmem:[%s9028_s6 + $0xa00] sm:$0xf] }
 0x118   : > { %954 = vst [vmem:[%s9033_s14 + $0x4f8] sm:$0xf] %v953_v30  ;;  %956 = vst [vmem:[%s9033_s14 + $0x4fc] sm:$0xf] %v955_v31  ;;  %v959_v33 = vld [vmem:[%s9028_s6 + $0xa08] sm:$0xf] }
 0x119   : > { %958 = vst [vmem:[%s9033_s14 + $0x500] sm:$0xf] %v957_v32  ;;  %v961_v34 = vld [vmem:[%s9028_s6 + $0xa10] sm:$0xf]  ;;  %v963_v35 = vld [vmem:[%s9028_s6 + $0xa18] sm:$0xf] }
 0x11a   : > { %960 = vst [vmem:[%s9033_s14 + $0x504] sm:$0xf] %v959_v33  ;;  %962 = vst [vmem:[%s9033_s14 + $0x508] sm:$0xf] %v961_v34  ;;  %v965_v36 = vld [vmem:[%s9028_s6 + $0xa20] sm:$0xf] }
 0x11b   : > { %964 = vst [vmem:[%s9033_s14 + $0x50c] sm:$0xf] %v963_v35  ;;  %v967_v37 = vld [vmem:[%s9028_s6 + $0xa28] sm:$0xf]  ;;  %v969_v38 = vld [vmem:[%s9028_s6 + $0xa30] sm:$0xf] }
 0x11c   : > { %966 = vst [vmem:[%s9033_s14 + $0x510] sm:$0xf] %v965_v36  ;;  %968 = vst [vmem:[%s9033_s14 + $0x514] sm:$0xf] %v967_v37  ;;  %v971_v39 = vld [vmem:[%s9028_s6 + $0xa38] sm:$0xf] }
 0x11d   : > { %970 = vst [vmem:[%s9033_s14 + $0x518] sm:$0xf] %v969_v38  ;;  %v973_v40 = vld [vmem:[%s9028_s6 + $0xa40] sm:$0xf]  ;;  %v975_v41 = vld [vmem:[%s9028_s6 + $0xa48] sm:$0xf] }
 0x11e   : > { %972 = vst [vmem:[%s9033_s14 + $0x51c] sm:$0xf] %v971_v39  ;;  %974 = vst [vmem:[%s9033_s14 + $0x520] sm:$0xf] %v973_v40  ;;  %v977_v42 = vld [vmem:[%s9028_s6 + $0xa50] sm:$0xf] }
 0x11f   : > { %976 = vst [vmem:[%s9033_s14 + $0x524] sm:$0xf] %v975_v41  ;;  %v979_v43 = vld [vmem:[%s9028_s6 + $0xa58] sm:$0xf]  ;;  %v981_v44 = vld [vmem:[%s9028_s6 + $0xa60] sm:$0xf] }
 0x120   : > { %978 = vst [vmem:[%s9033_s14 + $0x528] sm:$0xf] %v977_v42  ;;  %980 = vst [vmem:[%s9033_s14 + $0x52c] sm:$0xf] %v979_v43  ;;  %v983_v45 = vld [vmem:[%s9028_s6 + $0xa68] sm:$0xf] }
 0x121   : > { %982 = vst [vmem:[%s9033_s14 + $0x530] sm:$0xf] %v981_v44  ;;  %v985_v46 = vld [vmem:[%s9028_s6 + $0xa70] sm:$0xf]  ;;  %v987_v47 = vld [vmem:[%s9028_s6 + $0xa78] sm:$0xf] }
 0x122   : > { %984 = vst [vmem:[%s9033_s14 + $0x534] sm:$0xf] %v983_v45  ;;  %986 = vst [vmem:[%s9033_s14 + $0x538] sm:$0xf] %v985_v46  ;;  %v989_v48 = vld [vmem:[%s9028_s6 + $0xa80] sm:$0xf] }
 0x123   : > { %988 = vst [vmem:[%s9033_s14 + $0x53c] sm:$0xf] %v987_v47  ;;  %v991_v49 = vld [vmem:[%s9028_s6 + $0xa88] sm:$0xf]  ;;  %v993_v50 = vld [vmem:[%s9028_s6 + $0xa90] sm:$0xf] }
 0x124   : > { %990 = vst [vmem:[%s9033_s14 + $0x540] sm:$0xf] %v989_v48  ;;  %992 = vst [vmem:[%s9033_s14 + $0x544] sm:$0xf] %v991_v49  ;;  %v995_v51 = vld [vmem:[%s9028_s6 + $0xa98] sm:$0xf] }
 0x125   : > { %994 = vst [vmem:[%s9033_s14 + $0x548] sm:$0xf] %v993_v50  ;;  %v997_v52 = vld [vmem:[%s9028_s6 + $0xaa0] sm:$0xf]  ;;  %v999_v53 = vld [vmem:[%s9028_s6 + $0xaa8] sm:$0xf] }
 0x126   : > { %996 = vst [vmem:[%s9033_s14 + $0x54c] sm:$0xf] %v995_v51  ;;  %998 = vst [vmem:[%s9033_s14 + $0x550] sm:$0xf] %v997_v52  ;;  %v1001_v54 = vld [vmem:[%s9028_s6 + $0xab0] sm:$0xf] }
 0x127   : > { %1000 = vst [vmem:[%s9033_s14 + $0x554] sm:$0xf] %v999_v53  ;;  %v1003_v55 = vld [vmem:[%s9028_s6 + $0xab8] sm:$0xf]  ;;  %v1005_v56 = vld [vmem:[%s9028_s6 + $0xac0] sm:$0xf] }
 0x128   : > { %1002 = vst [vmem:[%s9033_s14 + $0x558] sm:$0xf] %v1001_v54  ;;  %1004 = vst [vmem:[%s9033_s14 + $0x55c] sm:$0xf] %v1003_v55  ;;  %v1007_v57 = vld [vmem:[%s9028_s6 + $0xac8] sm:$0xf] }
 0x129   : > { %1006 = vst [vmem:[%s9033_s14 + $0x560] sm:$0xf] %v1005_v56  ;;  %v1009_v58 = vld [vmem:[%s9028_s6 + $0xad0] sm:$0xf]  ;;  %v1011_v59 = vld [vmem:[%s9028_s6 + $0xad8] sm:$0xf] }
 0x12a   : > { %1008 = vst [vmem:[%s9033_s14 + $0x564] sm:$0xf] %v1007_v57  ;;  %1010 = vst [vmem:[%s9033_s14 + $0x568] sm:$0xf] %v1009_v58  ;;  %v1013_v60 = vld [vmem:[%s9028_s6 + $0xae0] sm:$0xf] }
 0x12b   : > { %1012 = vst [vmem:[%s9033_s14 + $0x56c] sm:$0xf] %v1011_v59  ;;  %v1015_v61 = vld [vmem:[%s9028_s6 + $0xae8] sm:$0xf]  ;;  %v1017_v62 = vld [vmem:[%s9028_s6 + $0xaf0] sm:$0xf] }
 0x12c   : > { %1014 = vst [vmem:[%s9033_s14 + $0x570] sm:$0xf] %v1013_v60  ;;  %1016 = vst [vmem:[%s9033_s14 + $0x574] sm:$0xf] %v1015_v61  ;;  %v1019_v63 = vld [vmem:[%s9028_s6 + $0xaf8] sm:$0xf] }
 0x12d   : > { %1018 = vst [vmem:[%s9033_s14 + $0x578] sm:$0xf] %v1017_v62  ;;  %v1021_v0 = vld [vmem:[%s9028_s6 + $0xb00] sm:$0xf]  ;;  %v1023_v1 = vld [vmem:[%s9028_s6 + $0xb08] sm:$0xf] }
 0x12e   : > { %1020 = vst [vmem:[%s9033_s14 + $0x57c] sm:$0xf] %v1019_v63  ;;  %1022 = vst [vmem:[%s9033_s14 + $0x580] sm:$0xf] %v1021_v0  ;;  %v1025_v2 = vld [vmem:[%s9028_s6 + $0xb10] sm:$0xf] }
 0x12f   : > { %1024 = vst [vmem:[%s9033_s14 + $0x584] sm:$0xf] %v1023_v1  ;;  %v1027_v3 = vld [vmem:[%s9028_s6 + $0xb18] sm:$0xf]  ;;  %v1029_v4 = vld [vmem:[%s9028_s6 + $0xb20] sm:$0xf] }
 0x130   : > { %1026 = vst [vmem:[%s9033_s14 + $0x588] sm:$0xf] %v1025_v2  ;;  %1028 = vst [vmem:[%s9033_s14 + $0x58c] sm:$0xf] %v1027_v3  ;;  %v1031_v5 = vld [vmem:[%s9028_s6 + $0xb28] sm:$0xf] }
 0x131   : > { %1030 = vst [vmem:[%s9033_s14 + $0x590] sm:$0xf] %v1029_v4  ;;  %v1033_v6 = vld [vmem:[%s9028_s6 + $0xb30] sm:$0xf]  ;;  %v1035_v7 = vld [vmem:[%s9028_s6 + $0xb38] sm:$0xf] }
 0x132   : > { %1032 = vst [vmem:[%s9033_s14 + $0x594] sm:$0xf] %v1031_v5  ;;  %1034 = vst [vmem:[%s9033_s14 + $0x598] sm:$0xf] %v1033_v6  ;;  %v1037_v8 = vld [vmem:[%s9028_s6 + $0xb40] sm:$0xf] }
 0x133   : > { %1036 = vst [vmem:[%s9033_s14 + $0x59c] sm:$0xf] %v1035_v7  ;;  %v1039_v9 = vld [vmem:[%s9028_s6 + $0xb48] sm:$0xf]  ;;  %v1041_v10 = vld [vmem:[%s9028_s6 + $0xb50] sm:$0xf] }
 0x134   : > { %1038 = vst [vmem:[%s9033_s14 + $0x5a0] sm:$0xf] %v1037_v8  ;;  %1040 = vst [vmem:[%s9033_s14 + $0x5a4] sm:$0xf] %v1039_v9  ;;  %v1043_v11 = vld [vmem:[%s9028_s6 + $0xb58] sm:$0xf] }
 0x135   : > { %1042 = vst [vmem:[%s9033_s14 + $0x5a8] sm:$0xf] %v1041_v10  ;;  %v1045_v12 = vld [vmem:[%s9028_s6 + $0xb60] sm:$0xf]  ;;  %v1047_v13 = vld [vmem:[%s9028_s6 + $0xb68] sm:$0xf] }
 0x136   : > { %1044 = vst [vmem:[%s9033_s14 + $0x5ac] sm:$0xf] %v1043_v11  ;;  %1046 = vst [vmem:[%s9033_s14 + $0x5b0] sm:$0xf] %v1045_v12  ;;  %v1049_v14 = vld [vmem:[%s9028_s6 + $0xb70] sm:$0xf] }
 0x137   : > { %1048 = vst [vmem:[%s9033_s14 + $0x5b4] sm:$0xf] %v1047_v13  ;;  %v1051_v15 = vld [vmem:[%s9028_s6 + $0xb78] sm:$0xf]  ;;  %v1053_v16 = vld [vmem:[%s9028_s6 + $0xb80] sm:$0xf] }
 0x138   : > { %1050 = vst [vmem:[%s9033_s14 + $0x5b8] sm:$0xf] %v1049_v14  ;;  %1052 = vst [vmem:[%s9033_s14 + $0x5bc] sm:$0xf] %v1051_v15  ;;  %v1055_v17 = vld [vmem:[%s9028_s6 + $0xb88] sm:$0xf] }
 0x139   : > { %1054 = vst [vmem:[%s9033_s14 + $0x5c0] sm:$0xf] %v1053_v16  ;;  %v1057_v18 = vld [vmem:[%s9028_s6 + $0xb90] sm:$0xf]  ;;  %v1059_v19 = vld [vmem:[%s9028_s6 + $0xb98] sm:$0xf] }
 0x13a   : > { %1056 = vst [vmem:[%s9033_s14 + $0x5c4] sm:$0xf] %v1055_v17  ;;  %1058 = vst [vmem:[%s9033_s14 + $0x5c8] sm:$0xf] %v1057_v18  ;;  %v1061_v20 = vld [vmem:[%s9028_s6 + $0xba0] sm:$0xf] }
 0x13b   : > { %1060 = vst [vmem:[%s9033_s14 + $0x5cc] sm:$0xf] %v1059_v19  ;;  %v1063_v21 = vld [vmem:[%s9028_s6 + $0xba8] sm:$0xf]  ;;  %v1065_v22 = vld [vmem:[%s9028_s6 + $0xbb0] sm:$0xf] }
 0x13c   : > { %1062 = vst [vmem:[%s9033_s14 + $0x5d0] sm:$0xf] %v1061_v20  ;;  %1064 = vst [vmem:[%s9033_s14 + $0x5d4] sm:$0xf] %v1063_v21  ;;  %v1067_v23 = vld [vmem:[%s9028_s6 + $0xbb8] sm:$0xf] }
 0x13d   : > { %1066 = vst [vmem:[%s9033_s14 + $0x5d8] sm:$0xf] %v1065_v22  ;;  %v1069_v24 = vld [vmem:[%s9028_s6 + $0xbc0] sm:$0xf]  ;;  %v1071_v25 = vld [vmem:[%s9028_s6 + $0xbc8] sm:$0xf] }
 0x13e   : > { %1068 = vst [vmem:[%s9033_s14 + $0x5dc] sm:$0xf] %v1067_v23  ;;  %1070 = vst [vmem:[%s9033_s14 + $0x5e0] sm:$0xf] %v1069_v24  ;;  %v1073_v26 = vld [vmem:[%s9028_s6 + $0xbd0] sm:$0xf] }
 0x13f   : > { %1072 = vst [vmem:[%s9033_s14 + $0x5e4] sm:$0xf] %v1071_v25  ;;  %v1075_v27 = vld [vmem:[%s9028_s6 + $0xbd8] sm:$0xf]  ;;  %v1077_v28 = vld [vmem:[%s9028_s6 + $0xbe0] sm:$0xf] }
 0x140   : > { %1074 = vst [vmem:[%s9033_s14 + $0x5e8] sm:$0xf] %v1073_v26  ;;  %1076 = vst [vmem:[%s9033_s14 + $0x5ec] sm:$0xf] %v1075_v27  ;;  %v1079_v29 = vld [vmem:[%s9028_s6 + $0xbe8] sm:$0xf] }
 0x141   : > { %1078 = vst [vmem:[%s9033_s14 + $0x5f0] sm:$0xf] %v1077_v28  ;;  %v1081_v30 = vld [vmem:[%s9028_s6 + $0xbf0] sm:$0xf]  ;;  %v1083_v31 = vld [vmem:[%s9028_s6 + $0xbf8] sm:$0xf] }
 0x142   : > { %1080 = vst [vmem:[%s9033_s14 + $0x5f4] sm:$0xf] %v1079_v29  ;;  %1082 = vst [vmem:[%s9033_s14 + $0x5f8] sm:$0xf] %v1081_v30  ;;  %v1085_v32 = vld [vmem:[%s9028_s6 + $0xc00] sm:$0xf] }
 0x143   : > { %1084 = vst [vmem:[%s9033_s14 + $0x5fc] sm:$0xf] %v1083_v31  ;;  %v1087_v33 = vld [vmem:[%s9028_s6 + $0xc08] sm:$0xf]  ;;  %v1089_v34 = vld [vmem:[%s9028_s6 + $0xc10] sm:$0xf] }
 0x144   : > { %1086 = vst [vmem:[%s9033_s14 + $0x600] sm:$0xf] %v1085_v32  ;;  %1088 = vst [vmem:[%s9033_s14 + $0x604] sm:$0xf] %v1087_v33  ;;  %v1091_v35 = vld [vmem:[%s9028_s6 + $0xc18] sm:$0xf] }
 0x145   : > { %1090 = vst [vmem:[%s9033_s14 + $0x608] sm:$0xf] %v1089_v34  ;;  %v1093_v36 = vld [vmem:[%s9028_s6 + $0xc20] sm:$0xf]  ;;  %v1095_v37 = vld [vmem:[%s9028_s6 + $0xc28] sm:$0xf] }
 0x146   : > { %1092 = vst [vmem:[%s9033_s14 + $0x60c] sm:$0xf] %v1091_v35  ;;  %1094 = vst [vmem:[%s9033_s14 + $0x610] sm:$0xf] %v1093_v36  ;;  %v1097_v38 = vld [vmem:[%s9028_s6 + $0xc30] sm:$0xf] }
 0x147   : > { %1096 = vst [vmem:[%s9033_s14 + $0x614] sm:$0xf] %v1095_v37  ;;  %v1099_v39 = vld [vmem:[%s9028_s6 + $0xc38] sm:$0xf]  ;;  %v1101_v40 = vld [vmem:[%s9028_s6 + $0xc40] sm:$0xf] }
 0x148   : > { %1098 = vst [vmem:[%s9033_s14 + $0x618] sm:$0xf] %v1097_v38  ;;  %1100 = vst [vmem:[%s9033_s14 + $0x61c] sm:$0xf] %v1099_v39  ;;  %v1103_v41 = vld [vmem:[%s9028_s6 + $0xc48] sm:$0xf] }
 0x149   : > { %1102 = vst [vmem:[%s9033_s14 + $0x620] sm:$0xf] %v1101_v40  ;;  %v1105_v42 = vld [vmem:[%s9028_s6 + $0xc50] sm:$0xf]  ;;  %v1107_v43 = vld [vmem:[%s9028_s6 + $0xc58] sm:$0xf] }
 0x14a   : > { %1104 = vst [vmem:[%s9033_s14 + $0x624] sm:$0xf] %v1103_v41  ;;  %1106 = vst [vmem:[%s9033_s14 + $0x628] sm:$0xf] %v1105_v42  ;;  %v1109_v44 = vld [vmem:[%s9028_s6 + $0xc60] sm:$0xf] }
 0x14b   : > { %1108 = vst [vmem:[%s9033_s14 + $0x62c] sm:$0xf] %v1107_v43  ;;  %v1111_v45 = vld [vmem:[%s9028_s6 + $0xc68] sm:$0xf]  ;;  %v1113_v46 = vld [vmem:[%s9028_s6 + $0xc70] sm:$0xf] }
 0x14c   : > { %1110 = vst [vmem:[%s9033_s14 + $0x630] sm:$0xf] %v1109_v44  ;;  %1112 = vst [vmem:[%s9033_s14 + $0x634] sm:$0xf] %v1111_v45  ;;  %v1115_v47 = vld [vmem:[%s9028_s6 + $0xc78] sm:$0xf] }
 0x14d   : > { %1114 = vst [vmem:[%s9033_s14 + $0x638] sm:$0xf] %v1113_v46  ;;  %v1117_v48 = vld [vmem:[%s9028_s6 + $0xc80] sm:$0xf]  ;;  %v1119_v49 = vld [vmem:[%s9028_s6 + $0xc88] sm:$0xf] }
 0x14e   : > { %1116 = vst [vmem:[%s9033_s14 + $0x63c] sm:$0xf] %v1115_v47  ;;  %1118 = vst [vmem:[%s9033_s14 + $0x640] sm:$0xf] %v1117_v48  ;;  %v1121_v50 = vld [vmem:[%s9028_s6 + $0xc90] sm:$0xf] }
 0x14f   : > { %1120 = vst [vmem:[%s9033_s14 + $0x644] sm:$0xf] %v1119_v49  ;;  %v1123_v51 = vld [vmem:[%s9028_s6 + $0xc98] sm:$0xf]  ;;  %v1125_v52 = vld [vmem:[%s9028_s6 + $0xca0] sm:$0xf] }
 0x150   : > { %1122 = vst [vmem:[%s9033_s14 + $0x648] sm:$0xf] %v1121_v50  ;;  %1124 = vst [vmem:[%s9033_s14 + $0x64c] sm:$0xf] %v1123_v51  ;;  %v1127_v53 = vld [vmem:[%s9028_s6 + $0xca8] sm:$0xf] }
 0x151   : > { %1126 = vst [vmem:[%s9033_s14 + $0x650] sm:$0xf] %v1125_v52  ;;  %v1129_v54 = vld [vmem:[%s9028_s6 + $0xcb0] sm:$0xf]  ;;  %v1131_v55 = vld [vmem:[%s9028_s6 + $0xcb8] sm:$0xf] }
 0x152   : > { %1128 = vst [vmem:[%s9033_s14 + $0x654] sm:$0xf] %v1127_v53  ;;  %1130 = vst [vmem:[%s9033_s14 + $0x658] sm:$0xf] %v1129_v54  ;;  %v1133_v56 = vld [vmem:[%s9028_s6 + $0xcc0] sm:$0xf] }
 0x153   : > { %1132 = vst [vmem:[%s9033_s14 + $0x65c] sm:$0xf] %v1131_v55  ;;  %v1135_v57 = vld [vmem:[%s9028_s6 + $0xcc8] sm:$0xf]  ;;  %v1137_v58 = vld [vmem:[%s9028_s6 + $0xcd0] sm:$0xf] }
 0x154   : > { %1134 = vst [vmem:[%s9033_s14 + $0x660] sm:$0xf] %v1133_v56  ;;  %1136 = vst [vmem:[%s9033_s14 + $0x664] sm:$0xf] %v1135_v57  ;;  %v1139_v59 = vld [vmem:[%s9028_s6 + $0xcd8] sm:$0xf] }
 0x155   : > { %1138 = vst [vmem:[%s9033_s14 + $0x668] sm:$0xf] %v1137_v58  ;;  %v1141_v60 = vld [vmem:[%s9028_s6 + $0xce0] sm:$0xf]  ;;  %v1143_v61 = vld [vmem:[%s9028_s6 + $0xce8] sm:$0xf] }
 0x156   : > { %1140 = vst [vmem:[%s9033_s14 + $0x66c] sm:$0xf] %v1139_v59  ;;  %1142 = vst [vmem:[%s9033_s14 + $0x670] sm:$0xf] %v1141_v60  ;;  %v1145_v62 = vld [vmem:[%s9028_s6 + $0xcf0] sm:$0xf] }
 0x157   : > { %1144 = vst [vmem:[%s9033_s14 + $0x674] sm:$0xf] %v1143_v61  ;;  %v1147_v63 = vld [vmem:[%s9028_s6 + $0xcf8] sm:$0xf]  ;;  %v1149_v0 = vld [vmem:[%s9028_s6 + $0xd00] sm:$0xf] }
 0x158   : > { %1146 = vst [vmem:[%s9033_s14 + $0x678] sm:$0xf] %v1145_v62  ;;  %1148 = vst [vmem:[%s9033_s14 + $0x67c] sm:$0xf] %v1147_v63  ;;  %v1151_v1 = vld [vmem:[%s9028_s6 + $0xd08] sm:$0xf] }
 0x159   : > { %1150 = vst [vmem:[%s9033_s14 + $0x680] sm:$0xf] %v1149_v0  ;;  %v1153_v2 = vld [vmem:[%s9028_s6 + $0xd10] sm:$0xf]  ;;  %v1155_v3 = vld [vmem:[%s9028_s6 + $0xd18] sm:$0xf] }
 0x15a   : > { %1152 = vst [vmem:[%s9033_s14 + $0x684] sm:$0xf] %v1151_v1  ;;  %1154 = vst [vmem:[%s9033_s14 + $0x688] sm:$0xf] %v1153_v2  ;;  %v1157_v4 = vld [vmem:[%s9028_s6 + $0xd20] sm:$0xf] }
 0x15b   : > { %1156 = vst [vmem:[%s9033_s14 + $0x68c] sm:$0xf] %v1155_v3  ;;  %v1159_v5 = vld [vmem:[%s9028_s6 + $0xd28] sm:$0xf]  ;;  %v1161_v6 = vld [vmem:[%s9028_s6 + $0xd30] sm:$0xf] }
 0x15c   : > { %1158 = vst [vmem:[%s9033_s14 + $0x690] sm:$0xf] %v1157_v4  ;;  %1160 = vst [vmem:[%s9033_s14 + $0x694] sm:$0xf] %v1159_v5  ;;  %v1163_v7 = vld [vmem:[%s9028_s6 + $0xd38] sm:$0xf] }
 0x15d   : > { %1162 = vst [vmem:[%s9033_s14 + $0x698] sm:$0xf] %v1161_v6  ;;  %v1165_v8 = vld [vmem:[%s9028_s6 + $0xd40] sm:$0xf]  ;;  %v1167_v9 = vld [vmem:[%s9028_s6 + $0xd48] sm:$0xf] }
 0x15e   : > { %1164 = vst [vmem:[%s9033_s14 + $0x69c] sm:$0xf] %v1163_v7  ;;  %1166 = vst [vmem:[%s9033_s14 + $0x6a0] sm:$0xf] %v1165_v8  ;;  %v1169_v10 = vld [vmem:[%s9028_s6 + $0xd50] sm:$0xf] }
 0x15f   : > { %1168 = vst [vmem:[%s9033_s14 + $0x6a4] sm:$0xf] %v1167_v9  ;;  %v1171_v11 = vld [vmem:[%s9028_s6 + $0xd58] sm:$0xf]  ;;  %v1173_v12 = vld [vmem:[%s9028_s6 + $0xd60] sm:$0xf] }
 0x160   : > { %1170 = vst [vmem:[%s9033_s14 + $0x6a8] sm:$0xf] %v1169_v10  ;;  %1172 = vst [vmem:[%s9033_s14 + $0x6ac] sm:$0xf] %v1171_v11  ;;  %v1175_v13 = vld [vmem:[%s9028_s6 + $0xd68] sm:$0xf] }
 0x161   : > { %1174 = vst [vmem:[%s9033_s14 + $0x6b0] sm:$0xf] %v1173_v12  ;;  %v1177_v14 = vld [vmem:[%s9028_s6 + $0xd70] sm:$0xf]  ;;  %v1179_v15 = vld [vmem:[%s9028_s6 + $0xd78] sm:$0xf] }
 0x162   : > { %1176 = vst [vmem:[%s9033_s14 + $0x6b4] sm:$0xf] %v1175_v13  ;;  %1178 = vst [vmem:[%s9033_s14 + $0x6b8] sm:$0xf] %v1177_v14  ;;  %v1181_v16 = vld [vmem:[%s9028_s6 + $0xd80] sm:$0xf] }
 0x163   : > { %1180 = vst [vmem:[%s9033_s14 + $0x6bc] sm:$0xf] %v1179_v15  ;;  %v1183_v17 = vld [vmem:[%s9028_s6 + $0xd88] sm:$0xf]  ;;  %v1185_v18 = vld [vmem:[%s9028_s6 + $0xd90] sm:$0xf] }
 0x164   : > { %1182 = vst [vmem:[%s9033_s14 + $0x6c0] sm:$0xf] %v1181_v16  ;;  %1184 = vst [vmem:[%s9033_s14 + $0x6c4] sm:$0xf] %v1183_v17  ;;  %v1187_v19 = vld [vmem:[%s9028_s6 + $0xd98] sm:$0xf] }
 0x165   : > { %1186 = vst [vmem:[%s9033_s14 + $0x6c8] sm:$0xf] %v1185_v18  ;;  %v1189_v20 = vld [vmem:[%s9028_s6 + $0xda0] sm:$0xf]  ;;  %v1191_v21 = vld [vmem:[%s9028_s6 + $0xda8] sm:$0xf] }
 0x166   : > { %1188 = vst [vmem:[%s9033_s14 + $0x6cc] sm:$0xf] %v1187_v19  ;;  %1190 = vst [vmem:[%s9033_s14 + $0x6d0] sm:$0xf] %v1189_v20  ;;  %v1193_v22 = vld [vmem:[%s9028_s6 + $0xdb0] sm:$0xf] }
 0x167   : > { %1192 = vst [vmem:[%s9033_s14 + $0x6d4] sm:$0xf] %v1191_v21  ;;  %v1195_v23 = vld [vmem:[%s9028_s6 + $0xdb8] sm:$0xf]  ;;  %v1197_v24 = vld [vmem:[%s9028_s6 + $0xdc0] sm:$0xf] }
 0x168   : > { %1194 = vst [vmem:[%s9033_s14 + $0x6d8] sm:$0xf] %v1193_v22  ;;  %1196 = vst [vmem:[%s9033_s14 + $0x6dc] sm:$0xf] %v1195_v23  ;;  %v1199_v25 = vld [vmem:[%s9028_s6 + $0xdc8] sm:$0xf] }
 0x169   : > { %1198 = vst [vmem:[%s9033_s14 + $0x6e0] sm:$0xf] %v1197_v24  ;;  %v1201_v26 = vld [vmem:[%s9028_s6 + $0xdd0] sm:$0xf]  ;;  %v1203_v27 = vld [vmem:[%s9028_s6 + $0xdd8] sm:$0xf] }
 0x16a   : > { %1200 = vst [vmem:[%s9033_s14 + $0x6e4] sm:$0xf] %v1199_v25  ;;  %1202 = vst [vmem:[%s9033_s14 + $0x6e8] sm:$0xf] %v1201_v26  ;;  %v1205_v28 = vld [vmem:[%s9028_s6 + $0xde0] sm:$0xf] }
 0x16b   : > { %1204 = vst [vmem:[%s9033_s14 + $0x6ec] sm:$0xf] %v1203_v27  ;;  %v1207_v29 = vld [vmem:[%s9028_s6 + $0xde8] sm:$0xf]  ;;  %v1209_v30 = vld [vmem:[%s9028_s6 + $0xdf0] sm:$0xf] }
 0x16c   : > { %1206 = vst [vmem:[%s9033_s14 + $0x6f0] sm:$0xf] %v1205_v28  ;;  %1208 = vst [vmem:[%s9033_s14 + $0x6f4] sm:$0xf] %v1207_v29  ;;  %v1211_v31 = vld [vmem:[%s9028_s6 + $0xdf8] sm:$0xf] }
 0x16d   : > { %1210 = vst [vmem:[%s9033_s14 + $0x6f8] sm:$0xf] %v1209_v30  ;;  %v1213_v32 = vld [vmem:[%s9028_s6 + $0xe00] sm:$0xf]  ;;  %v1215_v33 = vld [vmem:[%s9028_s6 + $0xe08] sm:$0xf] }
 0x16e   : > { %1212 = vst [vmem:[%s9033_s14 + $0x6fc] sm:$0xf] %v1211_v31  ;;  %1214 = vst [vmem:[%s9033_s14 + $0x700] sm:$0xf] %v1213_v32  ;;  %v1217_v34 = vld [vmem:[%s9028_s6 + $0xe10] sm:$0xf] }
 0x16f   : > { %1216 = vst [vmem:[%s9033_s14 + $0x704] sm:$0xf] %v1215_v33  ;;  %v1219_v35 = vld [vmem:[%s9028_s6 + $0xe18] sm:$0xf]  ;;  %v1221_v36 = vld [vmem:[%s9028_s6 + $0xe20] sm:$0xf] }
 0x170   : > { %1218 = vst [vmem:[%s9033_s14 + $0x708] sm:$0xf] %v1217_v34  ;;  %1220 = vst [vmem:[%s9033_s14 + $0x70c] sm:$0xf] %v1219_v35  ;;  %v1223_v37 = vld [vmem:[%s9028_s6 + $0xe28] sm:$0xf] }
 0x171   : > { %1222 = vst [vmem:[%s9033_s14 + $0x710] sm:$0xf] %v1221_v36  ;;  %v1225_v38 = vld [vmem:[%s9028_s6 + $0xe30] sm:$0xf]  ;;  %v1227_v39 = vld [vmem:[%s9028_s6 + $0xe38] sm:$0xf] }
 0x172   : > { %1224 = vst [vmem:[%s9033_s14 + $0x714] sm:$0xf] %v1223_v37  ;;  %1226 = vst [vmem:[%s9033_s14 + $0x718] sm:$0xf] %v1225_v38  ;;  %v1229_v40 = vld [vmem:[%s9028_s6 + $0xe40] sm:$0xf] }
 0x173   : > { %1228 = vst [vmem:[%s9033_s14 + $0x71c] sm:$0xf] %v1227_v39  ;;  %v1231_v41 = vld [vmem:[%s9028_s6 + $0xe48] sm:$0xf]  ;;  %v1233_v42 = vld [vmem:[%s9028_s6 + $0xe50] sm:$0xf] }
 0x174   : > { %1230 = vst [vmem:[%s9033_s14 + $0x720] sm:$0xf] %v1229_v40  ;;  %1232 = vst [vmem:[%s9033_s14 + $0x724] sm:$0xf] %v1231_v41  ;;  %v1235_v43 = vld [vmem:[%s9028_s6 + $0xe58] sm:$0xf] }
 0x175   : > { %1234 = vst [vmem:[%s9033_s14 + $0x728] sm:$0xf] %v1233_v42  ;;  %v1237_v44 = vld [vmem:[%s9028_s6 + $0xe60] sm:$0xf]  ;;  %v1239_v45 = vld [vmem:[%s9028_s6 + $0xe68] sm:$0xf] }
 0x176   : > { %1236 = vst [vmem:[%s9033_s14 + $0x72c] sm:$0xf] %v1235_v43  ;;  %1238 = vst [vmem:[%s9033_s14 + $0x730] sm:$0xf] %v1237_v44  ;;  %v1241_v46 = vld [vmem:[%s9028_s6 + $0xe70] sm:$0xf] }
 0x177   : > { %1240 = vst [vmem:[%s9033_s14 + $0x734] sm:$0xf] %v1239_v45  ;;  %v1243_v47 = vld [vmem:[%s9028_s6 + $0xe78] sm:$0xf]  ;;  %v1245_v48 = vld [vmem:[%s9028_s6 + $0xe80] sm:$0xf] }
 0x178   : > { %1242 = vst [vmem:[%s9033_s14 + $0x738] sm:$0xf] %v1241_v46  ;;  %1244 = vst [vmem:[%s9033_s14 + $0x73c] sm:$0xf] %v1243_v47  ;;  %v1247_v49 = vld [vmem:[%s9028_s6 + $0xe88] sm:$0xf] }
 0x179   : > { %1246 = vst [vmem:[%s9033_s14 + $0x740] sm:$0xf] %v1245_v48  ;;  %v1249_v50 = vld [vmem:[%s9028_s6 + $0xe90] sm:$0xf]  ;;  %v1251_v51 = vld [vmem:[%s9028_s6 + $0xe98] sm:$0xf] }
 0x17a   : > { %1248 = vst [vmem:[%s9033_s14 + $0x744] sm:$0xf] %v1247_v49  ;;  %1250 = vst [vmem:[%s9033_s14 + $0x748] sm:$0xf] %v1249_v50  ;;  %v1253_v52 = vld [vmem:[%s9028_s6 + $0xea0] sm:$0xf] }
 0x17b   : > { %1252 = vst [vmem:[%s9033_s14 + $0x74c] sm:$0xf] %v1251_v51  ;;  %v1255_v53 = vld [vmem:[%s9028_s6 + $0xea8] sm:$0xf]  ;;  %v1257_v54 = vld [vmem:[%s9028_s6 + $0xeb0] sm:$0xf] }
 0x17c   : > { %1254 = vst [vmem:[%s9033_s14 + $0x750] sm:$0xf] %v1253_v52  ;;  %1256 = vst [vmem:[%s9033_s14 + $0x754] sm:$0xf] %v1255_v53  ;;  %v1259_v55 = vld [vmem:[%s9028_s6 + $0xeb8] sm:$0xf] }
 0x17d   : > { %1258 = vst [vmem:[%s9033_s14 + $0x758] sm:$0xf] %v1257_v54  ;;  %v1261_v56 = vld [vmem:[%s9028_s6 + $0xec0] sm:$0xf]  ;;  %v1263_v57 = vld [vmem:[%s9028_s6 + $0xec8] sm:$0xf] }
 0x17e   : > { %1260 = vst [vmem:[%s9033_s14 + $0x75c] sm:$0xf] %v1259_v55  ;;  %1262 = vst [vmem:[%s9033_s14 + $0x760] sm:$0xf] %v1261_v56  ;;  %v1265_v58 = vld [vmem:[%s9028_s6 + $0xed0] sm:$0xf] }
 0x17f   : > { %1264 = vst [vmem:[%s9033_s14 + $0x764] sm:$0xf] %v1263_v57  ;;  %v1267_v59 = vld [vmem:[%s9028_s6 + $0xed8] sm:$0xf]  ;;  %v1269_v60 = vld [vmem:[%s9028_s6 + $0xee0] sm:$0xf] }
 0x180   : > { %1266 = vst [vmem:[%s9033_s14 + $0x768] sm:$0xf] %v1265_v58  ;;  %1268 = vst [vmem:[%s9033_s14 + $0x76c] sm:$0xf] %v1267_v59  ;;  %v1271_v61 = vld [vmem:[%s9028_s6 + $0xee8] sm:$0xf] }
 0x181   : > { %1270 = vst [vmem:[%s9033_s14 + $0x770] sm:$0xf] %v1269_v60  ;;  %v1273_v62 = vld [vmem:[%s9028_s6 + $0xef0] sm:$0xf]  ;;  %v1275_v63 = vld [vmem:[%s9028_s6 + $0xef8] sm:$0xf] }
 0x182   : > { %1272 = vst [vmem:[%s9033_s14 + $0x774] sm:$0xf] %v1271_v61  ;;  %1274 = vst [vmem:[%s9033_s14 + $0x778] sm:$0xf] %v1273_v62  ;;  %v1277_v0 = vld [vmem:[%s9028_s6 + $0xf00] sm:$0xf] }
 0x183   : > { %1276 = vst [vmem:[%s9033_s14 + $0x77c] sm:$0xf] %v1275_v63  ;;  %v1279_v1 = vld [vmem:[%s9028_s6 + $0xf08] sm:$0xf]  ;;  %v1281_v2 = vld [vmem:[%s9028_s6 + $0xf10] sm:$0xf] }
 0x184   : > { %1278 = vst [vmem:[%s9033_s14 + $0x780] sm:$0xf] %v1277_v0  ;;  %1280 = vst [vmem:[%s9033_s14 + $0x784] sm:$0xf] %v1279_v1  ;;  %v1283_v3 = vld [vmem:[%s9028_s6 + $0xf18] sm:$0xf] }
 0x185   : > { %1282 = vst [vmem:[%s9033_s14 + $0x788] sm:$0xf] %v1281_v2  ;;  %v1285_v4 = vld [vmem:[%s9028_s6 + $0xf20] sm:$0xf]  ;;  %v1287_v5 = vld [vmem:[%s9028_s6 + $0xf28] sm:$0xf] }
 0x186   : > { %1284 = vst [vmem:[%s9033_s14 + $0x78c] sm:$0xf] %v1283_v3  ;;  %1286 = vst [vmem:[%s9033_s14 + $0x790] sm:$0xf] %v1285_v4  ;;  %v1289_v6 = vld [vmem:[%s9028_s6 + $0xf30] sm:$0xf] }
 0x187   : > { %1288 = vst [vmem:[%s9033_s14 + $0x794] sm:$0xf] %v1287_v5  ;;  %v1291_v7 = vld [vmem:[%s9028_s6 + $0xf38] sm:$0xf]  ;;  %v1293_v8 = vld [vmem:[%s9028_s6 + $0xf40] sm:$0xf] }
 0x188   : > { %1290 = vst [vmem:[%s9033_s14 + $0x798] sm:$0xf] %v1289_v6  ;;  %1292 = vst [vmem:[%s9033_s14 + $0x79c] sm:$0xf] %v1291_v7  ;;  %v1295_v9 = vld [vmem:[%s9028_s6 + $0xf48] sm:$0xf] }
 0x189   : > { %1294 = vst [vmem:[%s9033_s14 + $0x7a0] sm:$0xf] %v1293_v8  ;;  %v1297_v10 = vld [vmem:[%s9028_s6 + $0xf50] sm:$0xf]  ;;  %v1299_v11 = vld [vmem:[%s9028_s6 + $0xf58] sm:$0xf] }
 0x18a   : > { %1296 = vst [vmem:[%s9033_s14 + $0x7a4] sm:$0xf] %v1295_v9  ;;  %1298 = vst [vmem:[%s9033_s14 + $0x7a8] sm:$0xf] %v1297_v10  ;;  %v1301_v12 = vld [vmem:[%s9028_s6 + $0xf60] sm:$0xf] }
 0x18b   : > { %1300 = vst [vmem:[%s9033_s14 + $0x7ac] sm:$0xf] %v1299_v11  ;;  %v1303_v13 = vld [vmem:[%s9028_s6 + $0xf68] sm:$0xf]  ;;  %v1305_v14 = vld [vmem:[%s9028_s6 + $0xf70] sm:$0xf] }
 0x18c   : > { %1302 = vst [vmem:[%s9033_s14 + $0x7b0] sm:$0xf] %v1301_v12  ;;  %1304 = vst [vmem:[%s9033_s14 + $0x7b4] sm:$0xf] %v1303_v13  ;;  %v1307_v15 = vld [vmem:[%s9028_s6 + $0xf78] sm:$0xf] }
 0x18d   : > { %1306 = vst [vmem:[%s9033_s14 + $0x7b8] sm:$0xf] %v1305_v14  ;;  %v1309_v16 = vld [vmem:[%s9028_s6 + $0xf80] sm:$0xf]  ;;  %v1311_v17 = vld [vmem:[%s9028_s6 + $0xf88] sm:$0xf] }
 0x18e   : > { %1308 = vst [vmem:[%s9033_s14 + $0x7bc] sm:$0xf] %v1307_v15  ;;  %1310 = vst [vmem:[%s9033_s14 + $0x7c0] sm:$0xf] %v1309_v16  ;;  %v1313_v18 = vld [vmem:[%s9028_s6 + $0xf90] sm:$0xf] }
 0x18f   : > { %1312 = vst [vmem:[%s9033_s14 + $0x7c4] sm:$0xf] %v1311_v17  ;;  %v1315_v19 = vld [vmem:[%s9028_s6 + $0xf98] sm:$0xf]  ;;  %v1317_v20 = vld [vmem:[%s9028_s6 + $0xfa0] sm:$0xf] }
 0x190   : > { %1314 = vst [vmem:[%s9033_s14 + $0x7c8] sm:$0xf] %v1313_v18  ;;  %1316 = vst [vmem:[%s9033_s14 + $0x7cc] sm:$0xf] %v1315_v19  ;;  %v1319_v21 = vld [vmem:[%s9028_s6 + $0xfa8] sm:$0xf] }
 0x191   : > { %1318 = vst [vmem:[%s9033_s14 + $0x7d0] sm:$0xf] %v1317_v20  ;;  %v1321_v22 = vld [vmem:[%s9028_s6 + $0xfb0] sm:$0xf]  ;;  %v1323_v23 = vld [vmem:[%s9028_s6 + $0xfb8] sm:$0xf] }
 0x192   : > { %1320 = vst [vmem:[%s9033_s14 + $0x7d4] sm:$0xf] %v1319_v21  ;;  %1322 = vst [vmem:[%s9033_s14 + $0x7d8] sm:$0xf] %v1321_v22  ;;  %v1325_v24 = vld [vmem:[%s9028_s6 + $0xfc0] sm:$0xf] }
 0x193   : > { %1324 = vst [vmem:[%s9033_s14 + $0x7dc] sm:$0xf] %v1323_v23  ;;  %v1327_v25 = vld [vmem:[%s9028_s6 + $0xfc8] sm:$0xf]  ;;  %v1329_v26 = vld [vmem:[%s9028_s6 + $0xfd0] sm:$0xf] }
 0x194   : > { %1326 = vst [vmem:[%s9033_s14 + $0x7e0] sm:$0xf] %v1325_v24  ;;  %1328 = vst [vmem:[%s9033_s14 + $0x7e4] sm:$0xf] %v1327_v25  ;;  %v1331_v27 = vld [vmem:[%s9028_s6 + $0xfd8] sm:$0xf] }
 0x195   : > { %1330 = vst [vmem:[%s9033_s14 + $0x7e8] sm:$0xf] %v1329_v26  ;;  %v1333_v28 = vld [vmem:[%s9028_s6 + $0xfe0] sm:$0xf]  ;;  %v1335_v29 = vld [vmem:[%s9028_s6 + $0xfe8] sm:$0xf] }
 0x196   : > { %1332 = vst [vmem:[%s9033_s14 + $0x7ec] sm:$0xf] %v1331_v27  ;;  %1334 = vst [vmem:[%s9033_s14 + $0x7f0] sm:$0xf] %v1333_v28  ;;  %v1337_v30 = vld [vmem:[%s9028_s6 + $0xff0] sm:$0xf] }
 0x197   : > { %1336 = vst [vmem:[%s9033_s14 + $0x7f4] sm:$0xf] %v1335_v29  ;;  %v1339_v31 = vld [vmem:[%s9028_s6 + $0xff8] sm:$0xf]  ;;  %1338 = vst [vmem:[%s9033_s14 + $0x7f8] sm:$0xf] %v1337_v30 }
 0x198   : > { %1340 = vst [vmem:[%s9033_s14 + $0x7fc] sm:$0xf] %v1339_v31 }
 0x199 PF: > { %p7718_p0 = scmp.ge.s32.totalorder %s8813_s28, 1  ;;  %p4483_p1 = scmp.lt.s32.totalorder %s8813_s28, 5 }
 0x19b   : > { %p4484_p2 = pnand %p7718_p0, %p4483_p1 }
 0x19c   : > { %s4490_s0 = sand.u32 (!%p4484_p2), 1, %s8789_s22   ;;  %s4497_s15 = sand.u32 (!%p4484_p2), 1, %s8781_s20  }
 0x19d   : > { %4487 = sbr.rel (%p4484_p2) target bundleno = 977 (0x3d1), region = 107  ;;  %s7719_s29 = sshll.u32 (!%p4484_p2), %s4490_s0, 8 }
 0x19e   : > { %s7720_s9 = sshll.u32 (!%p4484_p2), %s4497_s15, 11  ;;  %s4533_s6 = sand.u32 (!%p4484_p2), 1, %s8773_s18  }
 0x19f   : > { %p4538_p3 = scmp.lt.s32.totalorder (!%p4484_p2), %s8801_s25, 1  ;;  %s7721_s7 = sshll.u32 (!%p4484_p2), %s4533_s6, 3 }
 0x1a0   : > { %s10077_s18 = scalar_lea.vmem (!%p4484_p2), [#allocation3], %s7719_s29  ;;  %s10079_s15 = scalar_lea.vmem (!%p4484_p2), [#allocation4], %s7720_s9 }
 0x1a1   : > { %s10081_s6 = scalar_lea.vmem (!%p4484_p2), [#allocation5], %s7721_s7  ;;  %p7722_p4 = scmp.ne.s32.totalorder (!%p4484_p2), %s8797_s24, 0 }
 0x1a2   : > { %s10063_s8 = scalar_select %p4538_p3, %s8801_s25, 1 }
 0x1a3   : > { %4551 = sbr.rel (%p7722_p4) target bundleno = 426 (0x1aa), region = 119 }
 0x1a4   : > { %s4540_s13 = scalar_lea.vmem %s10432_s2, %s10063_s8  ;;  %s4543_s27 = scalar_lea.vmem %s10433_s3, %s10063_s8 }
 0x1a5   : > { %s4546_s0 = scalar_lea.vmem %s10434_s4, %s10063_s8 }
 0x1a8   : > { %v8815_v32 = vmov 0.0  }
 0x1a9   : > { %4552 = vst [vmem:[#allocation2] sm:$0xff] %v8815_v32  ;;  %4553 = vst [vmem:[#allocation2 + $0x8] sm:$0xff] %v8815_v32 }
 0x1aa PF: > { %v8469_v33 = vld [vmem:[%s10079_s15 + $0x78] sm:$0xff]   ;;  %v8473_v37 = vld [vmem:[%s10079_s15 + $0x70] sm:$0xff]   ;;  %v8477_v41 = vld [vmem:[%s10079_s15 + $0x68] sm:$0xff]   ;;  %p8011_p5 = scmp.ne.s32.totalorder %s8797_s24, 1 }
 0x1ab   : > { %v8470_v34 = vld [vmem:[%s10079_s15 + $0xf8] sm:$0xff]   ;;  %8028 = vmatprep.subr.bf16.mxu0 %v8469_v33  ;;  %v8474_v38 = vld [vmem:[%s10079_s15 + $0xf0] sm:$0xff]   ;;  %v8478_v42 = vld [vmem:[%s10079_s15 + $0xe8] sm:$0xff]  }
 0x1ac   : > { %v8471_v35 = vld [vmem:[%s10079_s15 + $0x38] sm:$0xff]   ;;  %8050 = vmatprep.subr.bf16.mxu1 %v8470_v34  ;;  %v8475_v39 = vld [vmem:[%s10079_s15 + $0x30] sm:$0xff]   ;;  %v8479_v43 = vld [vmem:[%s10079_s15 + $0x28] sm:$0xff]  }
 0x1ad   : > { %v8472_v36 = vld [vmem:[%s10079_s15 + $0xb8] sm:$0xff]   ;;  %8029 = vmatpush3.bf16.msra.mxu0 %v8471_v35  ;;  %v8476_v40 = vld [vmem:[%s10079_s15 + $0xb0] sm:$0xff]   ;;  %v8480_v44 = vld [vmem:[%s10079_s15 + $0xa8] sm:$0xff]  }
 0x1ae   : > { %8051 = vmatpush3.bf16.msra.mxu1 %v8472_v36  ;;  %8030 = vmatprep.subr.bf16.mxu0 %v8473_v37  ;;  %v8481_v45 = vld [vmem:[%s10079_s15 + $0x60] sm:$0xff]   ;;  %v8485_v49 = vld [vmem:[%s10079_s15 + $0x58] sm:$0xff]   ;;  %v8489_v53 = vld [vmem:[%s10079_s15 + $0x50] sm:$0xff]  }
 0x1af   : > { %8052 = vmatprep.subr.bf16.mxu1 %v8474_v38  ;;  %v8482_v46 = vld [vmem:[%s10079_s15 + $0xe0] sm:$0xff]   ;;  %v8486_v50 = vld [vmem:[%s10079_s15 + $0xd8] sm:$0xff]   ;;  %v8490_v54 = vld [vmem:[%s10079_s15 + $0xd0] sm:$0xff]  }
 0x1b0   : > { %v8483_v47 = vld [vmem:[%s10079_s15 + $0x20] sm:$0xff]   ;;  %v8487_v51 = vld [vmem:[%s10079_s15 + $0x18] sm:$0xff]   ;;  %v8491_v55 = vld [vmem:[%s10079_s15 + $0x10] sm:$0xff]  }
 0x1b1   : > { %8031 = vmatpush3.bf16.msra.mxu0 %v8475_v39  ;;  %v8484_v48 = vld [vmem:[%s10079_s15 + $0xa0] sm:$0xff]   ;;  %v8488_v52 = vld [vmem:[%s10079_s15 + $0x98] sm:$0xff]   ;;  %v8492_v56 = vld [vmem:[%s10079_s15 + $0x90] sm:$0xff]  }
 0x1b2   : > { %8053 = vmatpush3.bf16.msra.mxu1 %v8476_v40  ;;  %8032 = vmatprep.subr.bf16.mxu0 %v8477_v41  ;;  %v8493_v57 = vld [vmem:[%s10079_s15 + $0x48] sm:$0xff]   ;;  %v8497_v61 = vld [vmem:[%s10079_s15 + $0x40] sm:$0xff]   ;;  %v8501_v9 = vld [vmem:[%s10079_s15 + $0x178] sm:$0xff]  }
 0x1b3   : > { %8054 = vmatprep.subr.bf16.mxu1 %v8478_v42  ;;  %v8494_v58 = vld [vmem:[%s10079_s15 + $0xc8] sm:$0xff]   ;;  %v8498_v62 = vld [vmem:[%s10079_s15 + $0xc0] sm:$0xff]   ;;  %v8502_v10 = vld [vmem:[%s10079_s15 + $0x1f8] sm:$0xff]  }
 0x1b4   : > { %v8495_v59 = vld [vmem:[%s10079_s15 + $0x8] sm:$0xff]   ;;  %v8499_v63 = vld [vmem:[%s10079_s15] sm:$0xff]   ;;  %v8503_v11 = vld [vmem:[%s10079_s15 + $0x138] sm:$0xff]  }
 0x1b5   : > { %8033 = vmatpush3.bf16.msra.mxu0 %v8479_v43  ;;  %v8496_v60 = vld [vmem:[%s10079_s15 + $0x88] sm:$0xff]   ;;  %v8500_v0 = vld [vmem:[%s10079_s15 + $0x80] sm:$0xff]   ;;  %v8504_v12 = vld [vmem:[%s10079_s15 + $0x1b8] sm:$0xff]  }
 0x1b6   : > { %8055 = vmatpush3.bf16.msra.mxu1 %v8480_v44  ;;  %8034 = vmatprep.subr.bf16.mxu0 %v8481_v45  ;;  %v4556_v1 = vld [vmem:[%s10077_s18] sm:$0xff]  ;;  %v4557_v3 = vld [vmem:[%s10077_s18 + $0x8] sm:$0xff]  ;;  %v8505_v13 = vld [vmem:[%s10079_s15 + $0x170] sm:$0xff]  }
 0x1b7   : > { %8056 = vmatprep.subr.bf16.mxu1 %v8482_v46  ;;  %v4572_v2 = vld [vmem:[%s10077_s18 + $0x80] sm:$0xff]  ;;  %v4573_v6 = vld [vmem:[%s10077_s18 + $0x88] sm:$0xff]  ;;  %v8506_v14 = vld [vmem:[%s10079_s15 + $0x1f0] sm:$0xff]  }
 0x1b8   : > { %v7723_v4 = vcombine.low %v4556_v1, %v4572_v2  ;;  %v7724_v5 = vcombine.high %v4556_v1, %v4572_v2  ;;  %v7725_v7 = vcombine.low %v4557_v3, %v4573_v6  ;;  %v7726_v8 = vcombine.high %v4557_v3, %v4573_v6  ;;  %v8507_v15 = vld [vmem:[%s10079_s15 + $0x130] sm:$0xff]   ;;  %v8509_v17 = vld [vmem:[%s10079_s15 + $0x168] sm:$0xff]   ;;  %v8513_v21 = vld [vmem:[%s10079_s15 + $0x160] sm:$0xff]  }
 0x1b9   : > { %8035 = vmatpush3.bf16.msra.mxu0 %v8483_v47  ;;  %v8508_v16 = vld [vmem:[%s10079_s15 + $0x1b0] sm:$0xff]   ;;  %v8510_v18 = vld [vmem:[%s10079_s15 + $0x1e8] sm:$0xff]   ;;  %v8514_v22 = vld [vmem:[%s10079_s15 + $0x1e0] sm:$0xff]  }
 0x1ba   : > { %8057 = vmatpush3.bf16.msra.mxu1 %v8484_v48  ;;  %8036 = vmatprep.subr.bf16.mxu0 %v8485_v49  ;;  %v8511_v19 = vld [vmem:[%s10079_s15 + $0x128] sm:$0xff]   ;;  %v8515_v23 = vld [vmem:[%s10079_s15 + $0x120] sm:$0xff]   ;;  %v8517_v25 = vld [vmem:[%s10079_s15 + $0x158] sm:$0xff]  }
 0x1bb   : > { %8058 = vmatprep.subr.bf16.mxu1 %v8486_v50  ;;  %6828 = vmatprep.mubr.bf16.mxu0 %v7724_v5  ;;  %v8512_v20 = vld [vmem:[%s10079_s15 + $0x1a8] sm:$0xff]   ;;  %v8516_v24 = vld [vmem:[%s10079_s15 + $0x1a0] sm:$0xff]   ;;  %v8518_v26 = vld [vmem:[%s10079_s15 + $0x1d8] sm:$0xff]  }
 0x1bc   : > { %6869 = vmatprep.mubr.bf16.mxu1 %v7726_v8  ;;  %v8519_v27 = vld [vmem:[%s10079_s15 + $0x118] sm:$0xff]   ;;  %v8521_v29 = vld [vmem:[%s10079_s15 + $0x150] sm:$0xff]   ;;  %v8525_v33 = vld [vmem:[%s10079_s15 + $0x148] sm:$0xff]  }
 0x1bd   : > { %8037 = vmatpush3.bf16.msra.mxu0 %v8487_v51  ;;  %v8520_v28 = vld [vmem:[%s10079_s15 + $0x198] sm:$0xff]   ;;  %v8522_v30 = vld [vmem:[%s10079_s15 + $0x1d0] sm:$0xff]   ;;  %v8526_v34 = vld [vmem:[%s10079_s15 + $0x1c8] sm:$0xff]  }
 0x1be   : > { %8059 = vmatpush3.bf16.msra.mxu1 %v8488_v52  ;;  %8038 = vmatprep.subr.bf16.mxu0 %v8489_v53  ;;  %v8523_v31 = vld [vmem:[%s10079_s15 + $0x110] sm:$0xff]   ;;  %v8527_v35 = vld [vmem:[%s10079_s15 + $0x108] sm:$0xff]   ;;  %v8529_v37 = vld [vmem:[%s10079_s15 + $0x140] sm:$0xff]  }
 0x1bf   : > { %8060 = vmatprep.subr.bf16.mxu1 %v8490_v54  ;;  %v8524_v32 = vld [vmem:[%s10079_s15 + $0x190] sm:$0xff]   ;;  %v8528_v36 = vld [vmem:[%s10079_s15 + $0x188] sm:$0xff]   ;;  %v8530_v38 = vld [vmem:[%s10079_s15 + $0x1c0] sm:$0xff]  }
 0x1c0   : > { %v8531_v39 = vld [vmem:[%s10079_s15 + $0x100] sm:$0xff]   ;;  %v4558_v41 = vld [vmem:[%s10077_s18 + $0x10] sm:$0xff]  ;;  %v4559_v45 = vld [vmem:[%s10077_s18 + $0x18] sm:$0xff] }
 0x1c1   : > { %8039 = vmatpush3.bf16.msra.mxu0 %v8491_v55  ;;  %v8532_v40 = vld [vmem:[%s10079_s15 + $0x180] sm:$0xff]   ;;  %v4574_v42 = vld [vmem:[%s10077_s18 + $0x90] sm:$0xff]  ;;  %v4575_v46 = vld [vmem:[%s10077_s18 + $0x98] sm:$0xff] }
 0x1c2   : > { %8061 = vmatpush3.bf16.msra.mxu1 %v8492_v56  ;;  %8040 = vmatprep.subr.bf16.mxu0 %v8493_v57  ;;  %v7727_v43 = vcombine.low %v4558_v41, %v4574_v42  ;;  %v7728_v44 = vcombine.high %v4558_v41, %v4574_v42  ;;  %v7729_v47 = vcombine.low %v4559_v45, %v4575_v46  ;;  %v8533_v49 = vld [vmem:[%s10079_s15 + $0x278] sm:$0xff]   ;;  %v8537_v53 = vld [vmem:[%s10079_s15 + $0x270] sm:$0xff]   ;;  %v8541_v57 = vld [vmem:[%s10079_s15 + $0x268] sm:$0xff]  }
 0x1c3   : > { %8062 = vmatprep.subr.bf16.mxu1 %v8494_v58  ;;  %v7730_v48 = vcombine.high %v4559_v45, %v4575_v46  ;;  %v8534_v50 = vld [vmem:[%s10079_s15 + $0x2f8] sm:$0xff]   ;;  %v8538_v54 = vld [vmem:[%s10079_s15 + $0x2f0] sm:$0xff]   ;;  %v8542_v58 = vld [vmem:[%s10079_s15 + $0x2e8] sm:$0xff]  }
 0x1c4   : > { %v8535_v51 = vld [vmem:[%s10079_s15 + $0x238] sm:$0xff]   ;;  %v8539_v55 = vld [vmem:[%s10079_s15 + $0x230] sm:$0xff]  }
 0x1c5   : > { %8041 = vmatpush3.bf16.msra.mxu0 %v8495_v59  ;;  %v8536_v52 = vld [vmem:[%s10079_s15 + $0x2b8] sm:$0xff]   ;;  %v8540_v56 = vld [vmem:[%s10079_s15 + $0x2b0] sm:$0xff]   ;;  %v8543_v59 = vld [vmem:[%s10079_s15 + $0x228] sm:$0xff]  }
 0x1c6   : > { %8063 = vmatpush3.bf16.msra.mxu1 %v8496_v60  ;;  %8042 = vmatprep.subr.bf16.mxu0 %v8497_v61  ;;  %v8544_v60 = vld [vmem:[%s10079_s15 + $0x2a8] sm:$0xff]   ;;  %v8545_v61 = vld [vmem:[%s10079_s15 + $0x260] sm:$0xff]   ;;  %v8549_v1 = vld [vmem:[%s10079_s15 + $0x258] sm:$0xff]  }
 0x1c7   : > { %8064 = vmatprep.subr.bf16.mxu1 %v8498_v62  ;;  %v8546_v62 = vld [vmem:[%s10079_s15 + $0x2e0] sm:$0xff]   ;;  %v8550_v2 = vld [vmem:[%s10079_s15 + $0x2d8] sm:$0xff]   ;;  %v8553_v5 = vld [vmem:[%s10079_s15 + $0x250] sm:$0xff]  }
 0x1c8   : > { %v8551_v3 = vld [vmem:[%s10079_s15 + $0x218] sm:$0xff]   ;;  %v8554_v6 = vld [vmem:[%s10079_s15 + $0x2d0] sm:$0xff]  }
 0x1c9   : > { %8043 = vmatpush3.bf16.msra.mxu0 %v8499_v63  ;;  %v8547_v63 = vld [vmem:[%s10079_s15 + $0x220] sm:$0xff]   ;;  %v8556_v8 = vld [vmem:[%s10079_s15 + $0x290] sm:$0xff]   ;;  %v8581_v41 = vld [vmem:[%s10079_s15 + $0x358] sm:$0xff]  }
 0x1ca   : > { %8065 = vmatpush3.bf16.msra.mxu1 %v8500_v0  ;;  %8072 = vmatprep.subr.bf16.mxu0 %v8501_v9  ;;  %v8548_v0 = vld [vmem:[%s10079_s15 + $0x2a0] sm:$0xff]   ;;  %v8557_v9 = vld [vmem:[%s10079_s15 + $0x248] sm:$0xff]   ;;  %v8582_v42 = vld [vmem:[%s10079_s15 + $0x3d8] sm:$0xff]  }
 0x1cb   : > { %8094 = vmatprep.subr.bf16.mxu1 %v8502_v10  ;;  %v8558_v10 = vld [vmem:[%s10079_s15 + $0x2c8] sm:$0xff]   ;;  %v8585_v45 = vld [vmem:[%s10079_s15 + $0x350] sm:$0xff]  }
 0x1cc   : > { %6829 = vmatmul.mubr.bf16.vlgmr.msra.gmra.mxu0 %v7723_v4  ;;  %v8552_v4 = vld [vmem:[%s10079_s15 + $0x298] sm:$0xff]   ;;  %v8586_v46 = vld [vmem:[%s10079_s15 + $0x3d0] sm:$0xff]  }
 0x1cd   : > { %6870 = vmatmul.mubr.bf16.vlgmr.msra.gmra.mxu1 %v7725_v7  ;;  %8073 = vmatpush3.bf16.msra.mxu0 %v8503_v11  ;;  %v8555_v7 = vld [vmem:[%s10079_s15 + $0x210] sm:$0xff]   ;;  %v8559_v11 = vld [vmem:[%s10079_s15 + $0x208] sm:$0xff]  }
 0x1ce   : > { %8095 = vmatpush3.bf16.msra.mxu1 %v8504_v12  ;;  %8074 = vmatprep.subr.bf16.mxu0 %v8505_v13  ;;  %v8560_v12 = vld [vmem:[%s10079_s15 + $0x288] sm:$0xff]   ;;  %v8561_v13 = vld [vmem:[%s10079_s15 + $0x240] sm:$0xff]  }
 0x1cf   : > { %8096 = vmatprep.subr.bf16.mxu1 %v8506_v14  ;;  %6910 = vmatprep.mubr.bf16.mxu0 %v7728_v44  ;;  %v8562_v14 = vld [vmem:[%s10079_s15 + $0x2c0] sm:$0xff]   ;;  %v8584_v44 = vld [vmem:[%s10079_s15 + $0x398] sm:$0xff]  }
 0x1d0   : > { %6951 = vmatprep.mubr.bf16.mxu1 %v7730_v48  ;;  %v8588_v48 = vld [vmem:[%s10079_s15 + $0x390] sm:$0xff]  }
 0x1d1   : > { %8075 = vmatpush3.bf16.msra.mxu0 %v8507_v15  ;;  %v8563_v15 = vld [vmem:[%s10079_s15 + $0x200] sm:$0xff]  }
 0x1d2   : > { %8097 = vmatpush3.bf16.msra.mxu1 %v8508_v16  ;;  %8076 = vmatprep.subr.bf16.mxu0 %v8509_v17  ;;  %v8564_v16 = vld [vmem:[%s10079_s15 + $0x280] sm:$0xff]  }
 0x1d3   : > { %8098 = vmatprep.subr.bf16.mxu1 %v8510_v18  ;;  %v4560_v17 = vld [vmem:[%s10077_s18 + $0x20] sm:$0xff] }
 0x1d4   : > { %v4576_v18 = vld [vmem:[%s10077_s18 + $0xa0] sm:$0xff] }
 0x1d5   : > { %8077 = vmatpush3.bf16.msra.mxu0 %v8511_v19  ;;  %v4561_v19 = vld [vmem:[%s10077_s18 + $0x28] sm:$0xff] }
 0x1d6   : > { %8099 = vmatpush3.bf16.msra.mxu1 %v8512_v20  ;;  %8078 = vmatprep.subr.bf16.mxu0 %v8513_v21  ;;  %v4577_v20 = vld [vmem:[%s10077_s18 + $0xa8] sm:$0xff]  ;;  %v7731_v21 = vcombine.low %v4560_v17, %v4576_v18 }
 0x1d7   : > { %8100 = vmatprep.subr.bf16.mxu1 %v8514_v22  ;;  %v7732_v22 = vcombine.high %v4560_v17, %v4576_v18  ;;  %v8613_v17 = vld [vmem:[%s10079_s15 + $0x458] sm:$0xff]  }
 0x1d8   : > { %v8614_v18 = vld [vmem:[%s10079_s15 + $0x4d8] sm:$0xff]  }
 0x1d9   : > { %8079 = vmatpush3.bf16.msra.mxu0 %v8515_v23  ;;  %v7733_v23 = vcombine.low %v4561_v19, %v4577_v20 }
 0x1da   : > { %8101 = vmatpush3.bf16.msra.mxu1 %v8516_v24  ;;  %8080 = vmatprep.subr.bf16.mxu0 %v8517_v25  ;;  %v7734_v24 = vcombine.high %v4561_v19, %v4577_v20  ;;  %v8565_v25 = vld [vmem:[%s10079_s15 + $0x378] sm:$0xff]  }
 0x1db   : > { %8102 = vmatprep.subr.bf16.mxu1 %v8518_v26  ;;  %v8566_v26 = vld [vmem:[%s10079_s15 + $0x3f8] sm:$0xff]  }
 0x1dc   : > { %v8615_v19 = vld [vmem:[%s10079_s15 + $0x418] sm:$0xff]  }
 0x1dd   : > { %8081 = vmatpush3.bf16.msra.mxu0 %v8519_v27  ;;  %v8567_v27 = vld [vmem:[%s10079_s15 + $0x338] sm:$0xff]  }
 0x1de   : > { %8103 = vmatpush3.bf16.msra.mxu1 %v8520_v28  ;;  %8082 = vmatprep.subr.bf16.mxu0 %v8521_v29  ;;  %v8568_v28 = vld [vmem:[%s10079_s15 + $0x3b8] sm:$0xff]   ;;  %v8569_v29 = vld [vmem:[%s10079_s15 + $0x370] sm:$0xff]  }
 0x1df   : > { %8104 = vmatprep.subr.bf16.mxu1 %v8522_v30  ;;  %v8570_v30 = vld [vmem:[%s10079_s15 + $0x3f0] sm:$0xff]   ;;  %v8616_v20 = vld [vmem:[%s10079_s15 + $0x498] sm:$0xff]  }
 0x1e1   : > { %8083 = vmatpush3.bf16.msra.mxu0 %v8523_v31  ;;  %v8571_v31 = vld [vmem:[%s10079_s15 + $0x330] sm:$0xff]  }
 0x1e2   : > { %8105 = vmatpush3.bf16.msra.mxu1 %v8524_v32  ;;  %8084 = vmatprep.subr.bf16.mxu0 %v8525_v33  ;;  %v8572_v32 = vld [vmem:[%s10079_s15 + $0x3b0] sm:$0xff]   ;;  %v8573_v33 = vld [vmem:[%s10079_s15 + $0x368] sm:$0xff]  }
 0x1e3   : > { %8106 = vmatprep.subr.bf16.mxu1 %v8526_v34  ;;  %v8574_v34 = vld [vmem:[%s10079_s15 + $0x3e8] sm:$0xff]  }
 0x1e5   : > { %8085 = vmatpush3.bf16.msra.mxu0 %v8527_v35  ;;  %v8575_v35 = vld [vmem:[%s10079_s15 + $0x328] sm:$0xff]  }
 0x1e6   : > { %8107 = vmatpush3.bf16.msra.mxu1 %v8528_v36  ;;  %8086 = vmatprep.subr.bf16.mxu0 %v8529_v37  ;;  %v8576_v36 = vld [vmem:[%s10079_s15 + $0x3a8] sm:$0xff]   ;;  %v8577_v37 = vld [vmem:[%s10079_s15 + $0x360] sm:$0xff]  }
 0x1e7   : > { %8108 = vmatprep.subr.bf16.mxu1 %v8530_v38  ;;  %v8578_v38 = vld [vmem:[%s10079_s15 + $0x3e0] sm:$0xff]  }
 0x1e9   : > { %8087 = vmatpush3.bf16.msra.mxu0 %v8531_v39  ;;  %v8579_v39 = vld [vmem:[%s10079_s15 + $0x320] sm:$0xff]  }
 0x1ea   : > { %8109 = vmatpush3.bf16.msra.mxu1 %v8532_v40  ;;  %8116 = vmatprep.subr.bf16.mxu0 %v8533_v49  ;;  %v8580_v40 = vld [vmem:[%s10079_s15 + $0x3a0] sm:$0xff]   ;;  %v8589_v49 = vld [vmem:[%s10079_s15 + $0x348] sm:$0xff]  }
 0x1eb   : > { %8138 = vmatprep.subr.bf16.mxu1 %v8534_v50  ;;  %v8590_v50 = vld [vmem:[%s10079_s15 + $0x3c8] sm:$0xff]  }
 0x1ec   : > { %6911 = vmatmul.mubr.bf16.vlgmr.msra.gmra.mxu0 %v7727_v43  ;;  %v8583_v43 = vld [vmem:[%s10079_s15 + $0x318] sm:$0xff]  }
 0x1ed   : > { %6952 = vmatmul.mubr.bf16.vlgmr.msra.gmra.mxu1 %v7729_v47  ;;  %8117 = vmatpush3.bf16.msra.mxu0 %v8535_v51  ;;  %v8587_v47 = vld [vmem:[%s10079_s15 + $0x310] sm:$0xff]   ;;  %v8591_v51 = vld [vmem:[%s10079_s15 + $0x308] sm:$0xff]  }
 0x1ee   : > { %8139 = vmatpush3.bf16.msra.mxu1 %v8536_v52  ;;  %8118 = vmatprep.subr.bf16.mxu0 %v8537_v53  ;;  %v8592_v52 = vld [vmem:[%s10079_s15 + $0x388] sm:$0xff]   ;;  %v8593_v53 = vld [vmem:[%s10079_s15 + $0x340] sm:$0xff]  }
 0x1ef   : > { %8140 = vmatprep.subr.bf16.mxu1 %v8538_v54  ;;  %6992 = vmatprep.mubr.bf16.mxu0 %v7732_v22  ;;  %v8594_v54 = vld [vmem:[%s10079_s15 + $0x3c0] sm:$0xff]   ;;  %v8618_v22 = vld [vmem:[%s10079_s15 + $0x4d0] sm:$0xff]  }
 0x1f0   : > { %7033 = vmatprep.mubr.bf16.mxu1 %v7734_v24  ;;  %v8620_v24 = vld [vmem:[%s10079_s15 + $0x490] sm:$0xff]  }
 0x1f1   : > { %8119 = vmatpush3.bf16.msra.mxu0 %v8539_v55  ;;  %v8595_v55 = vld [vmem:[%s10079_s15 + $0x300] sm:$0xff]  }
 0x1f2   : > { %8141 = vmatpush3.bf16.msra.mxu1 %v8540_v56  ;;  %8120 = vmatprep.subr.bf16.mxu0 %v8541_v57  ;;  %v8596_v56 = vld [vmem:[%s10079_s15 + $0x380] sm:$0xff]   ;;  %v4562_v57 = vld [vmem:[%s10077_s18 + $0x30] sm:$0xff] }
 0x1f3   : > { %8142 = vmatprep.subr.bf16.mxu1 %v8542_v58  ;;  %v4578_v58 = vld [vmem:[%s10077_s18 + $0xb0] sm:$0xff] }
 0x1f5   : > { %8121 = vmatpush3.bf16.msra.mxu0 %v8543_v59  ;;  %v4563_v59 = vld [vmem:[%s10077_s18 + $0x38] sm:$0xff] }
 0x1f6   : > { %8143 = vmatpush3.bf16.msra.mxu1 %v8544_v60  ;;  %8122 = vmatprep.subr.bf16.mxu0 %v8545_v61  ;;  %v7735_v60 = vcombine.low %v4562_v57, %v4578_v58  ;;  %v7736_v61 = vcombine.high %v4562_v57, %v4578_v58  ;;  %v8645_v57 = vld [vmem:[%s10079_s15 + $0x558] sm:$0xff]  }
 0x1f7   : > { %8144 = vmatprep.subr.bf16.mxu1 %v8546_v62  ;;  %v4579_v62 = vld [vmem:[%s10077_s18 + $0xb8] sm:$0xff] }
 0x1f8   : > { %v8646_v58 = vld [vmem:[%s10079_s15 + $0x5d8] sm:$0xff]  }
 0x1f9   : > { %8123 = vmatpush3.bf16.msra.mxu0 %v8547_v63  ;;  %v7737_v63 = vcombine.low %v4563_v59, %v4579_v62 }
 0x1fa   : > { %8145 = vmatpush3.bf16.msra.mxu1 %v8548_v0  ;;  %8124 = vmatprep.subr.bf16.mxu0 %v8549_v1  ;;  %v7738_v0 = vcombine.high %v4563_v59, %v4579_v62  ;;  %v8597_v1 = vld [vmem:[%s10079_s15 + $0x478] sm:$0xff]   ;;  %v8650_v62 = vld [vmem:[%s10079_s15 + $0x5d0] sm:$0xff]  }
 0x1fb   : > { %8146 = vmatprep.subr.bf16.mxu1 %v8550_v2  ;;  %v8598_v2 = vld [vmem:[%s10079_s15 + $0x4f8] sm:$0xff]  }
 0x1fc   : > { %v8647_v59 = vld [vmem:[%s10079_s15 + $0x518] sm:$0xff]  }
 0x1fd   : > { %8125 = vmatpush3.bf16.msra.mxu0 %v8551_v3  ;;  %v8599_v3 = vld [vmem:[%s10079_s15 + $0x438] sm:$0xff]  }
 0x1fe   : > { %8147 = vmatpush3.bf16.msra.mxu1 %v8552_v4  ;;  %8126 = vmatprep.subr.bf16.mxu0 %v8553_v5  ;;  %v8600_v4 = vld [vmem:[%s10079_s15 + $0x4b8] sm:$0xff]   ;;  %v8601_v5 = vld [vmem:[%s10079_s15 + $0x470] sm:$0xff]  }
 0x1ff   : > { %8148 = vmatprep.subr.bf16.mxu1 %v8554_v6  ;;  %v8602_v6 = vld [vmem:[%s10079_s15 + $0x4f0] sm:$0xff]  }
 0x201   : > { %8127 = vmatpush3.bf16.msra.mxu0 %v8555_v7  ;;  %v8603_v7 = vld [vmem:[%s10079_s15 + $0x430] sm:$0xff]  }
 0x202   : > { %8149 = vmatpush3.bf16.msra.mxu1 %v8556_v8  ;;  %8128 = vmatprep.subr.bf16.mxu0 %v8557_v9  ;;  %v8604_v8 = vld [vmem:[%s10079_s15 + $0x4b0] sm:$0xff]   ;;  %v8605_v9 = vld [vmem:[%s10079_s15 + $0x468] sm:$0xff]  }
 0x203   : > { %8150 = vmatprep.subr.bf16.mxu1 %v8558_v10  ;;  %v8606_v10 = vld [vmem:[%s10079_s15 + $0x4e8] sm:$0xff]  }
 0x205   : > { %8129 = vmatpush3.bf16.msra.mxu0 %v8559_v11  ;;  %v8607_v11 = vld [vmem:[%s10079_s15 + $0x428] sm:$0xff]  }
 0x206   : > { %8151 = vmatpush3.bf16.msra.mxu1 %v8560_v12  ;;  %8130 = vmatprep.subr.bf16.mxu0 %v8561_v13  ;;  %v8608_v12 = vld [vmem:[%s10079_s15 + $0x4a8] sm:$0xff]   ;;  %v8609_v13 = vld [vmem:[%s10079_s15 + $0x460] sm:$0xff]  }
 0x207   : > { %8152 = vmatprep.subr.bf16.mxu1 %v8562_v14  ;;  %v8610_v14 = vld [vmem:[%s10079_s15 + $0x4e0] sm:$0xff]  }
 0x209   : > { %8131 = vmatpush3.bf16.msra.mxu0 %v8563_v15  ;;  %v8611_v15 = vld [vmem:[%s10079_s15 + $0x420] sm:$0xff]  }
 0x20a   : > { %8153 = vmatpush3.bf16.msra.mxu1 %v8564_v16  ;;  %8160 = vmatprep.subr.bf16.mxu0 %v8565_v25  ;;  %v8612_v16 = vld [vmem:[%s10079_s15 + $0x4a0] sm:$0xff]   ;;  %v8621_v25 = vld [vmem:[%s10079_s15 + $0x448] sm:$0xff]  }
 0x20b   : > { %8182 = vmatprep.subr.bf16.mxu1 %v8566_v26  ;;  %v8622_v26 = vld [vmem:[%s10079_s15 + $0x4c8] sm:$0xff]  }
 0x20c   : > { %6993 = vmatmul.mubr.bf16.vlgmr.msra.gmra.mxu0 %v7731_v21  ;;  %v8617_v21 = vld [vmem:[%s10079_s15 + $0x450] sm:$0xff]  }
 0x20d   : > { %7034 = vmatmul.mubr.bf16.vlgmr.msra.gmra.mxu1 %v7733_v23  ;;  %8161 = vmatpush3.bf16.msra.mxu0 %v8567_v27  ;;  %v8619_v23 = vld [vmem:[%s10079_s15 + $0x410] sm:$0xff]   ;;  %v8623_v27 = vld [vmem:[%s10079_s15 + $0x408] sm:$0xff]  }
 0x20e   : > { %8183 = vmatpush3.bf16.msra.mxu1 %v8568_v28  ;;  %8162 = vmatprep.subr.bf16.mxu0 %v8569_v29  ;;  %v8624_v28 = vld [vmem:[%s10079_s15 + $0x488] sm:$0xff]   ;;  %v8625_v29 = vld [vmem:[%s10079_s15 + $0x440] sm:$0xff]  }
 0x20f   : > { %8184 = vmatprep.subr.bf16.mxu1 %v8570_v30  ;;  %7074 = vmatprep.mubr.bf16.mxu0 %v7736_v61  ;;  %v8626_v30 = vld [vmem:[%s10079_s15 + $0x4c0] sm:$0xff]   ;;  %v8649_v61 = vld [vmem:[%s10079_s15 + $0x550] sm:$0xff]  }
 0x210   : > { %7115 = vmatprep.mubr.bf16.mxu1 %v7738_v0  ;;  %v8652_v0 = vld [vmem:[%s10079_s15 + $0x590] sm:$0xff]  }
 0x211   : > { %8163 = vmatpush3.bf16.msra.mxu0 %v8571_v31  ;;  %v8627_v31 = vld [vmem:[%s10079_s15 + $0x400] sm:$0xff]  }
 0x212   : > { %8185 = vmatpush3.bf16.msra.mxu1 %v8572_v32  ;;  %8164 = vmatprep.subr.bf16.mxu0 %v8573_v33  ;;  %v8628_v32 = vld [vmem:[%s10079_s15 + $0x480] sm:$0xff]  }
 0x213   : > { %8186 = vmatprep.subr.bf16.mxu1 %v8574_v34  ;;  %v4564_v33 = vld [vmem:[%s10077_s18 + $0x40] sm:$0xff] }
 0x214   : > { %v4580_v34 = vld [vmem:[%s10077_s18 + $0xc0] sm:$0xff] }
 0x215   : > { %8165 = vmatpush3.bf16.msra.mxu0 %v8575_v35  ;;  %v7739_v35 = vcombine.low %v4564_v33, %v4580_v34 }
 0x216   : > { %8187 = vmatpush3.bf16.msra.mxu1 %v8576_v36  ;;  %8166 = vmatprep.subr.bf16.mxu0 %v8577_v37  ;;  %v7740_v36 = vcombine.high %v4564_v33, %v4580_v34  ;;  %v4565_v37 = vld [vmem:[%s10077_s18 + $0x48] sm:$0xff]  ;;  %v8677_v33 = vld [vmem:[%s10079_s15 + $0x658] sm:$0xff]  }
 0x217   : > { %8188 = vmatprep.subr.bf16.mxu1 %v8578_v38  ;;  %v4581_v38 = vld [vmem:[%s10077_s18 + $0xc8] sm:$0xff]  ;;  %v8678_v34 = vld [vmem:[%s10079_s15 + $0x6d8] sm:$0xff]  }
 0x219   : > { %8167 = vmatpush3.bf16.msra.mxu0 %v8579_v39  ;;  %v7741_v39 = vcombine.low %v4565_v37, %v4581_v38 }
 0x21a   : > { %8189 = vmatpush3.bf16.msra.mxu1 %v8580_v40  ;;  %8168 = vmatprep.subr.bf16.mxu0 %v8581_v41  ;;  %v7742_v40 = vcombine.high %v4565_v37, %v4581_v38  ;;  %v8629_v41 = vld [vmem:[%s10079_s15 + $0x578] sm:$0xff]   ;;  %v8681_v37 = vld [vmem:[%s10079_s15 + $0x650] sm:$0xff]  }
 0x21b   : > { %8190 = vmatprep.subr.bf16.mxu1 %v8582_v42  ;;  %v8630_v42 = vld [vmem:[%s10079_s15 + $0x5f8] sm:$0xff]   ;;  %v8682_v38 = vld [vmem:[%s10079_s15 + $0x6d0] sm:$0xff]  }
 0x21d   : > { %8169 = vmatpush3.bf16.msra.mxu0 %v8583_v43  ;;  %v8631_v43 = vld [vmem:[%s10079_s15 + $0x538] sm:$0xff]  }
 0x21e   : > { %8191 = vmatpush3.bf16.msra.mxu1 %v8584_v44  ;;  %8170 = vmatprep.subr.bf16.mxu0 %v8585_v45  ;;  %v8632_v44 = vld [vmem:[%s10079_s15 + $0x5b8] sm:$0xff]   ;;  %v8633_v45 = vld [vmem:[%s10079_s15 + $0x570] sm:$0xff]  }
 0x21f   : > { %8192 = vmatprep.subr.bf16.mxu1 %v8586_v46  ;;  %v8634_v46 = vld [vmem:[%s10079_s15 + $0x5f0] sm:$0xff]  }
 0x221   : > { %8171 = vmatpush3.bf16.msra.mxu0 %v8587_v47  ;;  %v8635_v47 = vld [vmem:[%s10079_s15 + $0x530] sm:$0xff]  }
 0x222   : > { %8193 = vmatpush3.bf16.msra.mxu1 %v8588_v48  ;;  %8172 = vmatprep.subr.bf16.mxu0 %v8589_v49  ;;  %v8636_v48 = vld [vmem:[%s10079_s15 + $0x5b0] sm:$0xff]   ;;  %v8637_v49 = vld [vmem:[%s10079_s15 + $0x568] sm:$0xff]  }
 0x223   : > { %8194 = vmatprep.subr.bf16.mxu1 %v8590_v50  ;;  %v8638_v50 = vld [vmem:[%s10079_s15 + $0x5e8] sm:$0xff]  }
 0x225   : > { %8173 = vmatpush3.bf16.msra.mxu0 %v8591_v51  ;;  %v8639_v51 = vld [vmem:[%s10079_s15 + $0x528] sm:$0xff]  }
 0x226   : > { %8195 = vmatpush3.bf16.msra.mxu1 %v8592_v52  ;;  %8174 = vmatprep.subr.bf16.mxu0 %v8593_v53  ;;  %v8640_v52 = vld [vmem:[%s10079_s15 + $0x5a8] sm:$0xff]   ;;  %v8641_v53 = vld [vmem:[%s10079_s15 + $0x560] sm:$0xff]  }
 0x227   : > { %8196 = vmatprep.subr.bf16.mxu1 %v8594_v54  ;;  %v8642_v54 = vld [vmem:[%s10079_s15 + $0x5e0] sm:$0xff]  }
 0x229   : > { %8175 = vmatpush3.bf16.msra.mxu0 %v8595_v55  ;;  %v8643_v55 = vld [vmem:[%s10079_s15 + $0x520] sm:$0xff]  }
 0x22a   : > { %8197 = vmatpush3.bf16.msra.mxu1 %v8596_v56  ;;  %8204 = vmatprep.subr.bf16.mxu0 %v8597_v1  ;;  %v8644_v56 = vld [vmem:[%s10079_s15 + $0x5a0] sm:$0xff]   ;;  %v8653_v1 = vld [vmem:[%s10079_s15 + $0x548] sm:$0xff]  }
 0x22b   : > { %8226 = vmatprep.subr.bf16.mxu1 %v8598_v2  ;;  %v8654_v2 = vld [vmem:[%s10079_s15 + $0x5c8] sm:$0xff]  }
 0x22c   : > { %7075 = vmatmul.mubr.bf16.vlgmr.msra.gmra.mxu0 %v7735_v60  ;;  %v8648_v60 = vld [vmem:[%s10079_s15 + $0x598] sm:$0xff]  }
 0x22d   : > { %7116 = vmatmul.mubr.bf16.vlgmr.msra.gmra.mxu1 %v7737_v63  ;;  %8205 = vmatpush3.bf16.msra.mxu0 %v8599_v3  ;;  %v8651_v63 = vld [vmem:[%s10079_s15 + $0x510] sm:$0xff]   ;;  %v8655_v3 = vld [vmem:[%s10079_s15 + $0x508] sm:$0xff]  }
 0x22e   : > { %8227 = vmatpush3.bf16.msra.mxu1 %v8600_v4  ;;  %8206 = vmatprep.subr.bf16.mxu0 %v8601_v5  ;;  %v8656_v4 = vld [vmem:[%s10079_s15 + $0x588] sm:$0xff]   ;;  %v8657_v5 = vld [vmem:[%s10079_s15 + $0x540] sm:$0xff]  }
 0x22f   : > { %8228 = vmatprep.subr.bf16.mxu1 %v8602_v6  ;;  %7156 = vmatprep.mubr.bf16.mxu0 %v7740_v36  ;;  %v8658_v6 = vld [vmem:[%s10079_s15 + $0x5c0] sm:$0xff]   ;;  %v8680_v36 = vld [vmem:[%s10079_s15 + $0x698] sm:$0xff]  }
 0x230   : > { %7197 = vmatprep.mubr.bf16.mxu1 %v7742_v40  ;;  %v8684_v40 = vld [vmem:[%s10079_s15 + $0x690] sm:$0xff]  }
 0x231   : > { %8207 = vmatpush3.bf16.msra.mxu0 %v8603_v7  ;;  %v8659_v7 = vld [vmem:[%s10079_s15 + $0x500] sm:$0xff]  }
 0x232   : > { %8229 = vmatpush3.bf16.msra.mxu1 %v8604_v8  ;;  %8208 = vmatprep.subr.bf16.mxu0 %v8605_v9  ;;  %v8660_v8 = vld [vmem:[%s10079_s15 + $0x580] sm:$0xff]   ;;  %v4566_v9 = vld [vmem:[%s10077_s18 + $0x50] sm:$0xff] }
 0x233   : > { %8230 = vmatprep.subr.bf16.mxu1 %v8606_v10  ;;  %v4582_v10 = vld [vmem:[%s10077_s18 + $0xd0] sm:$0xff] }
 0x235   : > { %8209 = vmatpush3.bf16.msra.mxu0 %v8607_v11  ;;  %v4567_v11 = vld [vmem:[%s10077_s18 + $0x58] sm:$0xff] }
 0x236   : > { %8231 = vmatpush3.bf16.msra.mxu1 %v8608_v12  ;;  %8210 = vmatprep.subr.bf16.mxu0 %v8609_v13  ;;  %v4583_v12 = vld [vmem:[%s10077_s18 + $0xd8] sm:$0xff]  ;;  %v7743_v13 = vcombine.low %v4566_v9, %v4582_v10 }
 0x237   : > { %8232 = vmatprep.subr.bf16.mxu1 %v8610_v14  ;;  %v7744_v14 = vcombine.high %v4566_v9, %v4582_v10  ;;  %v8709_v9 = vld [vmem:[%s10079_s15 + $0x758] sm:$0xff]  }
 0x238   : > { %v8710_v10 = vld [vmem:[%s10079_s15 + $0x7d8] sm:$0xff]  }
 0x239   : > { %8211 = vmatpush3.bf16.msra.mxu0 %v8611_v15  ;;  %v7745_v15 = vcombine.low %v4567_v11, %v4583_v12 }
 0x23a   : > { %8233 = vmatpush3.bf16.msra.mxu1 %v8612_v16  ;;  %8212 = vmatprep.subr.bf16.mxu0 %v8613_v17  ;;  %v7746_v16 = vcombine.high %v4567_v11, %v4583_v12  ;;  %v8661_v17 = vld [vmem:[%s10079_s15 + $0x678] sm:$0xff]  }
 0x23b   : > { %8234 = vmatprep.subr.bf16.mxu1 %v8614_v18  ;;  %v8662_v18 = vld [vmem:[%s10079_s15 + $0x6f8] sm:$0xff]  }
 0x23c   : > { %v8711_v11 = vld [vmem:[%s10079_s15 + $0x718] sm:$0xff]  }
 0x23d   : > { %8213 = vmatpush3.bf16.msra.mxu0 %v8615_v19  ;;  %v8663_v19 = vld [vmem:[%s10079_s15 + $0x638] sm:$0xff]  }
 0x23e   : > { %8235 = vmatpush3.bf16.msra.mxu1 %v8616_v20  ;;  %8214 = vmatprep.subr.bf16.mxu0 %v8617_v21  ;;  %v8664_v20 = vld [vmem:[%s10079_s15 + $0x6b8] sm:$0xff]   ;;  %v8665_v21 = vld [vmem:[%s10079_s15 + $0x670] sm:$0xff]  }
 0x23f   : > { %8236 = vmatprep.subr.bf16.mxu1 %v8618_v22  ;;  %v8666_v22 = vld [vmem:[%s10079_s15 + $0x6f0] sm:$0xff]   ;;  %v8712_v12 = vld [vmem:[%s10079_s15 + $0x798] sm:$0xff]  }
 0x241   : > { %8215 = vmatpush3.bf16.msra.mxu0 %v8619_v23  ;;  %v8667_v23 = vld [vmem:[%s10079_s15 + $0x630] sm:$0xff]  }
 0x242   : > { %8237 = vmatpush3.bf16.msra.mxu1 %v8620_v24  ;;  %8216 = vmatprep.subr.bf16.mxu0 %v8621_v25  ;;  %v8668_v24 = vld [vmem:[%s10079_s15 + $0x6b0] sm:$0xff]   ;;  %v8669_v25 = vld [vmem:[%s10079_s15 + $0x668] sm:$0xff]  }
 0x243   : > { %8238 = vmatprep.subr.bf16.mxu1 %v8622_v26  ;;  %v8670_v26 = vld [vmem:[%s10079_s15 + $0x6e8] sm:$0xff]  }
 0x245   : > { %8217 = vmatpush3.bf16.msra.mxu0 %v8623_v27  ;;  %v8671_v27 = vld [vmem:[%s10079_s15 + $0x628] sm:$0xff]  }
 0x246   : > { %8239 = vmatpush3.bf16.msra.mxu1 %v8624_v28  ;;  %8218 = vmatprep.subr.bf16.mxu0 %v8625_v29  ;;  %v8672_v28 = vld [vmem:[%s10079_s15 + $0x6a8] sm:$0xff]   ;;  %v8673_v29 = vld [vmem:[%s10079_s15 + $0x660] sm:$0xff]  }
 0x247   : > { %8240 = vmatprep.subr.bf16.mxu1 %v8626_v30  ;;  %v8674_v30 = vld [vmem:[%s10079_s15 + $0x6e0] sm:$0xff]  }
 0x249   : > { %8219 = vmatpush3.bf16.msra.mxu0 %v8627_v31  ;;  %v8675_v31 = vld [vmem:[%s10079_s15 + $0x620] sm:$0xff]  }
 0x24a   : > { %8241 = vmatpush3.bf16.msra.mxu1 %v8628_v32  ;;  %8248 = vmatprep.subr.bf16.mxu0 %v8629_v41  ;;  %v8676_v32 = vld [vmem:[%s10079_s15 + $0x6a0] sm:$0xff]   ;;  %v8685_v41 = vld [vmem:[%s10079_s15 + $0x648] sm:$0xff]  }
 0x24b   : > { %8270 = vmatprep.subr.bf16.mxu1 %v8630_v42  ;;  %v8686_v42 = vld [vmem:[%s10079_s15 + $0x6c8] sm:$0xff]  }
 0x24c   : > { %7157 = vmatmul.mubr.bf16.vlgmr.msra.gmra.mxu0 %v7739_v35  ;;  %v8679_v35 = vld [vmem:[%s10079_s15 + $0x618] sm:$0xff]  }
 0x24d   : > { %7198 = vmatmul.mubr.bf16.vlgmr.msra.gmra.mxu1 %v7741_v39  ;;  %8249 = vmatpush3.bf16.msra.mxu0 %v8631_v43  ;;  %v8683_v39 = vld [vmem:[%s10079_s15 + $0x610] sm:$0xff]   ;;  %v8687_v43 = vld [vmem:[%s10079_s15 + $0x608] sm:$0xff]  }
 0x24e   : > { %8271 = vmatpush3.bf16.msra.mxu1 %v8632_v44  ;;  %8250 = vmatprep.subr.bf16.mxu0 %v8633_v45  ;;  %v8688_v44 = vld [vmem:[%s10079_s15 + $0x688] sm:$0xff]   ;;  %v8689_v45 = vld [vmem:[%s10079_s15 + $0x640] sm:$0xff]  }
 0x24f   : > { %8272 = vmatprep.subr.bf16.mxu1 %v8634_v46  ;;  %7238 = vmatprep.mubr.bf16.mxu0 %v7744_v14  ;;  %v8690_v46 = vld [vmem:[%s10079_s15 + $0x6c0] sm:$0xff]   ;;  %v8714_v14 = vld [vmem:[%s10079_s15 + $0x7d0] sm:$0xff]  }
 0x250   : > { %7279 = vmatprep.mubr.bf16.mxu1 %v7746_v16  ;;  %v8716_v16 = vld [vmem:[%s10079_s15 + $0x790] sm:$0xff]  }
 0x251   : > { %8251 = vmatpush3.bf16.msra.mxu0 %v8635_v47  ;;  %v8691_v47 = vld [vmem:[%s10079_s15 + $0x600] sm:$0xff]  }
 0x252   : > { %8273 = vmatpush3.bf16.msra.mxu1 %v8636_v48  ;;  %8252 = vmatprep.subr.bf16.mxu0 %v8637_v49  ;;  %v8692_v48 = vld [vmem:[%s10079_s15 + $0x680] sm:$0xff]  }
 0x253   : > { %8274 = vmatprep.subr.bf16.mxu1 %v8638_v50  ;;  %v4568_v49 = vld [vmem:[%s10077_s18 + $0x60] sm:$0xff] }
 0x254   : > { %v4584_v50 = vld [vmem:[%s10077_s18 + $0xe0] sm:$0xff] }
 0x255   : > { %8253 = vmatpush3.bf16.msra.mxu0 %v8639_v51  ;;  %v4569_v51 = vld [vmem:[%s10077_s18 + $0x68] sm:$0xff] }
 0x256   : > { %8275 = vmatpush3.bf16.msra.mxu1 %v8640_v52  ;;  %8254 = vmatprep.subr.bf16.mxu0 %v8641_v53  ;;  %v7747_v52 = vcombine.low %v4568_v49, %v4584_v50  ;;  %v7748_v53 = vcombine.high %v4568_v49, %v4584_v50 }
 0x257   : > { %8276 = vmatprep.subr.bf16.mxu1 %v8642_v54  ;;  %v4585_v54 = vld [vmem:[%s10077_s18 + $0xe8] sm:$0xff] }
 0x259   : > { %8255 = vmatpush3.bf16.msra.mxu0 %v8643_v55  ;;  %v7749_v55 = vcombine.low %v4569_v51, %v4585_v54 }
 0x25a   : > { %8277 = vmatpush3.bf16.msra.mxu1 %v8644_v56  ;;  %8256 = vmatprep.subr.bf16.mxu0 %v8645_v57  ;;  %v7750_v56 = vcombine.high %v4569_v51, %v4585_v54  ;;  %v8693_v57 = vld [vmem:[%s10079_s15 + $0x778] sm:$0xff]  }
 0x25b   : > { %8278 = vmatprep.subr.bf16.mxu1 %v8646_v58  ;;  %v8694_v58 = vld [vmem:[%s10079_s15 + $0x7f8] sm:$0xff]  }
 0x25d   : > { %8257 = vmatpush3.bf16.msra.mxu0 %v8647_v59  ;;  %v8695_v59 = vld [vmem:[%s10079_s15 + $0x738] sm:$0xff]  }
 0x25e   : > { %8279 = vmatpush3.bf16.msra.mxu1 %v8648_v60  ;;  %8258 = vmatprep.subr.bf16.mxu0 %v8649_v61  ;;  %v8696_v60 = vld [vmem:[%s10079_s15 + $0x7b8] sm:$0xff]   ;;  %v8697_v61 = vld [vmem:[%s10079_s15 + $0x770] sm:$0xff]  }
 0x25f   : > { %8280 = vmatprep.subr.bf16.mxu1 %v8650_v62  ;;  %v8698_v62 = vld [vmem:[%s10079_s15 + $0x7f0] sm:$0xff]  }
 0x261   : > { %8259 = vmatpush3.bf16.msra.mxu0 %v8651_v63  ;;  %v8699_v63 = vld [vmem:[%s10079_s15 + $0x730] sm:$0xff]  }
 0x262   : > { %8281 = vmatpush3.bf16.msra.mxu1 %v8652_v0  ;;  %8260 = vmatprep.subr.bf16.mxu0 %v8653_v1  ;;  %v8700_v0 = vld [vmem:[%s10079_s15 + $0x7b0] sm:$0xff]   ;;  %v8701_v1 = vld [vmem:[%s10079_s15 + $0x768] sm:$0xff]  }
 0x263   : > { %8282 = vmatprep.subr.bf16.mxu1 %v8654_v2  ;;  %v8702_v2 = vld [vmem:[%s10079_s15 + $0x7e8] sm:$0xff]  }
 0x265   : > { %8261 = vmatpush3.bf16.msra.mxu0 %v8655_v3  ;;  %v8703_v3 = vld [vmem:[%s10079_s15 + $0x728] sm:$0xff]  }
 0x266   : > { %8283 = vmatpush3.bf16.msra.mxu1 %v8656_v4  ;;  %8262 = vmatprep.subr.bf16.mxu0 %v8657_v5  ;;  %v8704_v4 = vld [vmem:[%s10079_s15 + $0x7a8] sm:$0xff]   ;;  %v8705_v5 = vld [vmem:[%s10079_s15 + $0x760] sm:$0xff]  }
 0x267   : > { %8284 = vmatprep.subr.bf16.mxu1 %v8658_v6  ;;  %v8706_v6 = vld [vmem:[%s10079_s15 + $0x7e0] sm:$0xff]  }
 0x269   : > { %8263 = vmatpush3.bf16.msra.mxu0 %v8659_v7  ;;  %v8707_v7 = vld [vmem:[%s10079_s15 + $0x720] sm:$0xff]  }
 0x26a   : > { %8285 = vmatpush3.bf16.msra.mxu1 %v8660_v8  ;;  %8292 = vmatprep.subr.bf16.mxu0 %v8661_v17  ;;  %v8708_v8 = vld [vmem:[%s10079_s15 + $0x7a0] sm:$0xff]   ;;  %v8717_v17 = vld [vmem:[%s10079_s15 + $0x748] sm:$0xff]  }
 0x26b   : > { %8314 = vmatprep.subr.bf16.mxu1 %v8662_v18  ;;  %v8718_v18 = vld [vmem:[%s10079_s15 + $0x7c8] sm:$0xff]  }
 0x26c   : > { %7239 = vmatmul.mubr.bf16.vlgmr.msra.gmra.mxu0 %v7743_v13  ;;  %v8713_v13 = vld [vmem:[%s10079_s15 + $0x750] sm:$0xff]  }
 0x26d   : > { %7280 = vmatmul.mubr.bf16.vlgmr.msra.gmra.mxu1 %v7745_v15  ;;  %8293 = vmatpush3.bf16.msra.mxu0 %v8663_v19  ;;  %v8715_v15 = vld [vmem:[%s10079_s15 + $0x710] sm:$0xff]   ;;  %v8719_v19 = vld [vmem:[%s10079_s15 + $0x708] sm:$0xff]  }
 0x26e   : > { %8315 = vmatpush3.bf16.msra.mxu1 %v8664_v20  ;;  %8294 = vmatprep.subr.bf16.mxu0 %v8665_v21  ;;  %v8720_v20 = vld [vmem:[%s10079_s15 + $0x788] sm:$0xff]   ;;  %v8721_v21 = vld [vmem:[%s10079_s15 + $0x740] sm:$0xff]  }
 0x26f   : > { %8316 = vmatprep.subr.bf16.mxu1 %v8666_v22  ;;  %7320 = vmatprep.mubr.bf16.mxu0 %v7748_v53  ;;  %v8722_v22 = vld [vmem:[%s10079_s15 + $0x7c0] sm:$0xff]  }
 0x270   : > { %7361 = vmatprep.mubr.bf16.mxu1 %v7750_v56 }
 0x271   : > { %8295 = vmatpush3.bf16.msra.mxu0 %v8667_v23  ;;  %v8723_v23 = vld [vmem:[%s10079_s15 + $0x700] sm:$0xff]  }
 0x272   : > { %8317 = vmatpush3.bf16.msra.mxu1 %v8668_v24  ;;  %8296 = vmatprep.subr.bf16.mxu0 %v8669_v25  ;;  %v8724_v24 = vld [vmem:[%s10079_s15 + $0x780] sm:$0xff]   ;;  %v4570_v25 = vld [vmem:[%s10077_s18 + $0x70] sm:$0xff] }
 0x273   : > { %8318 = vmatprep.subr.bf16.mxu1 %v8670_v26  ;;  %v4586_v26 = vld [vmem:[%s10077_s18 + $0xf0] sm:$0xff] }
 0x275   : > { %8297 = vmatpush3.bf16.msra.mxu0 %v8671_v27  ;;  %v7751_v27 = vcombine.low %v4570_v25, %v4586_v26 }
 0x276   : > { %8319 = vmatpush3.bf16.msra.mxu1 %v8672_v28  ;;  %8298 = vmatprep.subr.bf16.mxu0 %v8673_v29  ;;  %v7752_v28 = vcombine.high %v4570_v25, %v4586_v26  ;;  %v4571_v29 = vld [vmem:[%s10077_s18 + $0x78] sm:$0xff] }
 0x277   : > { %8320 = vmatprep.subr.bf16.mxu1 %v8674_v30  ;;  %v4587_v30 = vld [vmem:[%s10077_s18 + $0xf8] sm:$0xff] }
 0x279   : > { %8299 = vmatpush3.bf16.msra.mxu0 %v8675_v31  ;;  %v7753_v31 = vcombine.low %v4571_v29, %v4587_v30 }
 0x27a   : > { %8321 = vmatpush3.bf16.msra.mxu1 %v8676_v32  ;;  %8300 = vmatprep.subr.bf16.mxu0 %v8677_v33  ;;  %v7754_v32 = vcombine.high %v4571_v29, %v4587_v30 }
 0x27b   : > { %8322 = vmatprep.subr.bf16.mxu1 %v8678_v34 }
 0x27d   : > { %8301 = vmatpush3.bf16.msra.mxu0 %v8679_v35 }
 0x27e   : > { %8323 = vmatpush3.bf16.msra.mxu1 %v8680_v36  ;;  %8302 = vmatprep.subr.bf16.mxu0 %v8681_v37 }
 0x27f   : > { %8324 = vmatprep.subr.bf16.mxu1 %v8682_v38 }
 0x281   : > { %8303 = vmatpush3.bf16.msra.mxu0 %v8683_v39 }
 0x282   : > { %8325 = vmatpush3.bf16.msra.mxu1 %v8684_v40  ;;  %8304 = vmatprep.subr.bf16.mxu0 %v8685_v41 }
 0x283   : > { %8326 = vmatprep.subr.bf16.mxu1 %v8686_v42 }
 0x285   : > { %8305 = vmatpush3.bf16.msra.mxu0 %v8687_v43 }
 0x286   : > { %8327 = vmatpush3.bf16.msra.mxu1 %v8688_v44  ;;  %8306 = vmatprep.subr.bf16.mxu0 %v8689_v45 }
 0x287   : > { %8328 = vmatprep.subr.bf16.mxu1 %v8690_v46 }
 0x289   : > { %8307 = vmatpush3.bf16.msra.mxu0 %v8691_v47 }
 0x28a   : > { %8329 = vmatpush3.bf16.msra.mxu1 %v8692_v48  ;;  %8336 = vmatprep.subr.bf16.mxu0 %v8693_v57 }
 0x28b   : > { %8358 = vmatprep.subr.bf16.mxu1 %v8694_v58 }
 0x28c   : > { %7321 = vmatmul.mubr.bf16.vlgmr.msra.gmra.mxu0 %v7747_v52  ;;  %v8044_v33 = vpop.f32.mrf.mxu0 }
 0x28d   : > { %7362 = vmatmul.mubr.bf16.vlgmr.msra.gmra.mxu1 %v7749_v55  ;;  %8337 = vmatpush3.bf16.msra.mxu0 %v8695_v59  ;;  %v8066_v34 = vpop.f32.mrf.mxu1 }
 0x28e   : > { %8359 = vmatpush3.bf16.msra.mxu1 %v8696_v60  ;;  %8338 = vmatprep.subr.bf16.mxu0 %v8697_v61  ;;  %v8045_v35 = vpop.f32.mrf.mxu0 }
 0x28f   : > { %8360 = vmatprep.subr.bf16.mxu1 %v8698_v62  ;;  %7402 = vmatprep.mubr.bf16.mxu0 %v7752_v28  ;;  %v8067_v36 = vpop.f32.mrf.mxu1 }
 0x290   : > { %7443 = vmatprep.mubr.bf16.mxu1 %v7754_v32  ;;  %v8047_v37 = vpop.f32.mrf.mxu0 }
 0x291   : > { %8339 = vmatpush3.bf16.msra.mxu0 %v8699_v63  ;;  %v8069_v38 = vpop.f32.mrf.mxu1 }
 0x292   : > { %8361 = vmatpush3.bf16.msra.mxu1 %v8700_v0  ;;  %8340 = vmatprep.subr.bf16.mxu0 %v8701_v1  ;;  %v8048_v39 = vpop.f32.mrf.mxu0 }
 0x293   : > { %8362 = vmatprep.subr.bf16.mxu1 %v8702_v2  ;;  %v8070_v41 = vpop.f32.mrf.mxu1 }
 0x295   : > { %8341 = vmatpush3.bf16.msra.mxu0 %v8703_v3 }
 0x296   : > { %8363 = vmatpush3.bf16.msra.mxu1 %v8704_v4  ;;  %8342 = vmatprep.subr.bf16.mxu0 %v8705_v5  ;;  %v8046_v4 = vadd.f32 %v8045_v35, %v8044_v33  ;;  %v8068_v5 = vadd.f32 %v8067_v36, %v8066_v34 }
 0x297   : > { %8364 = vmatprep.subr.bf16.mxu1 %v8706_v6 }
 0x299   : > { %8343 = vmatpush3.bf16.msra.mxu0 %v8707_v7 }
 0x29a   : > { %8365 = vmatpush3.bf16.msra.mxu1 %v8708_v8  ;;  %8344 = vmatprep.subr.bf16.mxu0 %v8709_v9  ;;  %v6872_v9 = vadd.f32 %v8068_v5, %v8046_v4 }
 0x29b   : > { %8366 = vmatprep.subr.bf16.mxu1 %v8710_v10  ;;  %v8049_v10 = vadd.f32 %v8048_v39, %v8047_v37 }
 0x29d   : > { %8345 = vmatpush3.bf16.msra.mxu0 %v8711_v11  ;;  %v8071_v11 = vadd.f32 %v8070_v41, %v8069_v38 }
 0x29e   : > { %8367 = vmatpush3.bf16.msra.mxu1 %v8712_v12  ;;  %8346 = vmatprep.subr.bf16.mxu0 %v8713_v13 }
 0x29f   : > { %8368 = vmatprep.subr.bf16.mxu1 %v8714_v14 }
 0x2a1   : > { %8347 = vmatpush3.bf16.msra.mxu0 %v8715_v15 }
 0x2a2   : > { %8369 = vmatpush3.bf16.msra.mxu1 %v8716_v16  ;;  %8348 = vmatprep.subr.bf16.mxu0 %v8717_v17 }
 0x2a3   : > { %8370 = vmatprep.subr.bf16.mxu1 %v8718_v18  ;;  %v6875_v18 = vadd.f32 %v8071_v11, %v8049_v10 }
 0x2a5   : > { %8349 = vmatpush3.bf16.msra.mxu0 %v8719_v19 }
 0x2a6   : > { %8371 = vmatpush3.bf16.msra.mxu1 %v8720_v20  ;;  %8350 = vmatprep.subr.bf16.mxu0 %v8721_v21 }
 0x2a7   : > { %8372 = vmatprep.subr.bf16.mxu1 %v8722_v22 }
 0x2a9   : > { %8351 = vmatpush3.bf16.msra.mxu0 %v8723_v23 }
 0x2aa   : > { %8373 = vmatpush3.bf16.msra.mxu1 %v8724_v24 }
 0x2ac   : > { %7403 = vmatmul.mubr.bf16.vlgmr.msra.gmra.mxu0 %v7751_v27  ;;  %v8088_v40 = vpop.f32.mrf.mxu0 }
 0x2ad   : > { %7444 = vmatmul.mubr.bf16.vlgmr.msra.gmra.mxu1 %v7753_v31  ;;  %v8110_v42 = vpop.f32.mrf.mxu1 }
 0x2ae   : > { %v8089_v43 = vpop.f32.mrf.mxu0 }
 0x2af   : > { %v8111_v44 = vpop.f32.mrf.mxu1  ;;  %v8090_v8 = vadd.f32 %v8089_v43, %v8088_v40 }
 0x2b0   : > { %v8091_v45 = vpop.f32.mrf.mxu0  ;;  %v8112_v15 = vadd.f32 %v8111_v44, %v8110_v42 }
 0x2b1   : > { %v8113_v46 = vpop.f32.mrf.mxu1  ;;  %v6913_v14 = vadd.f32 %v8090_v8, %v6872_v9 }
 0x2b2   : > { %v8092_v47 = vpop.f32.mrf.mxu0 }
 0x2b3   : > { %v8114_v49 = vpop.f32.mrf.mxu1  ;;  %v8093_v16 = vadd.f32 %v8092_v47, %v8091_v45  ;;  %v6954_v21 = vadd.f32 %v8112_v15, %v6913_v14 }
 0x2b4   : > { %v8115_v25 = vadd.f32 %v8114_v49, %v8113_v46 }
 0x2b5   : > { %v6916_v22 = vadd.f32 %v8093_v16, %v6875_v18 }
 0x2b7   : > { %v6957_v29 = vadd.f32 %v8115_v25, %v6916_v22 }
 0x2cc   : > { %v8132_v48 = vpop.f32.mrf.mxu0 }
 0x2cd   : > { %v8154_v50 = vpop.f32.mrf.mxu1 }
 0x2ce   : > { %v8133_v51 = vpop.f32.mrf.mxu0 }
 0x2cf   : > { %v8155_v52 = vpop.f32.mrf.mxu1  ;;  %v8134_v19 = vadd.f32 %v8133_v51, %v8132_v48 }
 0x2d0   : > { %v8135_v53 = vpop.f32.mrf.mxu0  ;;  %v8156_v27 = vadd.f32 %v8155_v52, %v8154_v50 }
 0x2d1   : > { %v8157_v54 = vpop.f32.mrf.mxu1  ;;  %v6995_v26 = vadd.f32 %v8134_v19, %v6954_v21 }
 0x2d2   : > { %v8136_v55 = vpop.f32.mrf.mxu0 }
 0x2d3   : > { %v8158_v57 = vpop.f32.mrf.mxu1  ;;  %v8137_v28 = vadd.f32 %v8136_v55, %v8135_v53  ;;  %v7036_v33 = vadd.f32 %v8156_v27, %v6995_v26 }
 0x2d4   : > { %v8159_v35 = vadd.f32 %v8158_v57, %v8157_v54 }
 0x2d5   : > { %v6998_v34 = vadd.f32 %v8137_v28, %v6957_v29 }
 0x2d7   : > { %v7039_v41 = vadd.f32 %v8159_v35, %v6998_v34 }
 0x2ec   : > { %v8176_v56 = vpop.f32.mrf.mxu0 }
 0x2ed   : > { %v8198_v58 = vpop.f32.mrf.mxu1 }
 0x2ee   : > { %v8177_v59 = vpop.f32.mrf.mxu0 }
 0x2ef   : > { %v8199_v60 = vpop.f32.mrf.mxu1  ;;  %v8178_v30 = vadd.f32 %v8177_v59, %v8176_v56 }
 0x2f0   : > { %v8179_v61 = vpop.f32.mrf.mxu0  ;;  %v8200_v37 = vadd.f32 %v8199_v60, %v8198_v58 }
 0x2f1   : > { %v8201_v62 = vpop.f32.mrf.mxu1  ;;  %v7077_v36 = vadd.f32 %v8178_v30, %v7036_v33 }
 0x2f2   : > { %v8180_v63 = vpop.f32.mrf.mxu0 }
 0x2f3   : > { %v8202_v1 = vpop.f32.mrf.mxu1  ;;  %v8181_v38 = vadd.f32 %v8180_v63, %v8179_v61  ;;  %v7118_v44 = vadd.f32 %v8200_v37, %v7077_v36 }
 0x2f4   : > { %v8203_v47 = vadd.f32 %v8202_v1, %v8201_v62 }
 0x2f5   : > { %v7080_v45 = vadd.f32 %v8181_v38, %v7039_v41 }
 0x2f7   : > { %v7121_v53 = vadd.f32 %v8203_v47, %v7080_v45 }
 0x30c   : > { %v8220_v0 = vpop.f32.mrf.mxu0 }
 0x30d   : > { %v8242_v2 = vpop.f32.mrf.mxu1 }
 0x30e   : > { %v8221_v3 = vpop.f32.mrf.mxu0 }
 0x30f   : > { %v8243_v6 = vpop.f32.mrf.mxu1  ;;  %v8222_v42 = vadd.f32 %v8221_v3, %v8220_v0 }
 0x310   : > { %v8223_v7 = vpop.f32.mrf.mxu0  ;;  %v8244_v49 = vadd.f32 %v8243_v6, %v8242_v2 }
 0x311   : > { %v8245_v12 = vpop.f32.mrf.mxu1  ;;  %v7159_v48 = vadd.f32 %v8222_v42, %v7118_v44 }
 0x312   : > { %v8224_v13 = vpop.f32.mrf.mxu0 }
 0x313   : > { %v8246_v20 = vpop.f32.mrf.mxu1  ;;  %v8225_v50 = vadd.f32 %v8224_v13, %v8223_v7  ;;  %v7200_v54 = vadd.f32 %v8244_v49, %v7159_v48 }
 0x314   : > { %v8247_v59 = vadd.f32 %v8246_v20, %v8245_v12 }
 0x315   : > { %v7162_v56 = vadd.f32 %v8225_v50, %v7121_v53 }
 0x317   : > { %v7203_v0 = vadd.f32 %v8247_v59, %v7162_v56 }
 0x32c   : > { %v8264_v17 = vpop.f32.mrf.mxu0 }
 0x32d   : > { %v8286_v23 = vpop.f32.mrf.mxu1 }
 0x32e   : > { %v8265_v24 = vpop.f32.mrf.mxu0 }
 0x32f   : > { %v8287_v31 = vpop.f32.mrf.mxu1  ;;  %v8266_v55 = vadd.f32 %v8265_v24, %v8264_v17 }
 0x330   : > { %v8267_v32 = vpop.f32.mrf.mxu0  ;;  %v8288_v61 = vadd.f32 %v8287_v31, %v8286_v23  ;;  %v4554_v23 = vld [vmem:[#allocation2] sm:$0xff] }
 0x331   : > { %v8289_v39 = vpop.f32.mrf.mxu1  ;;  %v7241_v60 = vadd.f32 %v8266_v55, %v7200_v54 }
 0x332   : > { %v8268_v40 = vpop.f32.mrf.mxu0 }
 0x333   : > { %v8290_v46 = vpop.f32.mrf.mxu1  ;;  %v8269_v63 = vadd.f32 %v8268_v40, %v8267_v32  ;;  %v7282_v62 = vadd.f32 %v8288_v61, %v7241_v60  ;;  %v4555_v32 = vld [vmem:[#allocation2 + $0x8] sm:$0xff] }
 0x334   : > { %v8291_v2 = vadd.f32 %v8290_v46, %v8289_v39 }
 0x335   : > { %v7244_v1 = vadd.f32 %v8269_v63, %v7203_v0 }
 0x337   : > { %v7285_v11 = vadd.f32 %v8291_v2, %v7244_v1 }
 0x34c   : > { %v8308_v43 = vpop.f32.mrf.mxu0 }
 0x34d   : > { %v8330_v51 = vpop.f32.mrf.mxu1 }
 0x34e   : > { %v8309_v52 = vpop.f32.mrf.mxu0 }
 0x34f   : > { %v8331_v57 = vpop.f32.mrf.mxu1  ;;  %v8310_v3 = vadd.f32 %v8309_v52, %v8308_v43 }
 0x350   : > { %v8311_v58 = vpop.f32.mrf.mxu0  ;;  %v8332_v7 = vadd.f32 %v8331_v57, %v8330_v51 }
 0x351   : > { %v8333_v4 = vpop.f32.mrf.mxu1  ;;  %v7323_v6 = vadd.f32 %v8310_v3, %v7282_v62 }
 0x352   : > { %v8312_v5 = vpop.f32.mrf.mxu0 }
 0x353   : > { %v8313_v8 = vadd.f32 %v8312_v5, %v8311_v58  ;;  %v8334_v9 = vpop.f32.mrf.mxu1  ;;  %v7364_v15 = vadd.f32 %v8332_v7, %v7323_v6 }
 0x354   : > { %v8335_v19 = vadd.f32 %v8334_v9, %v8333_v4 }
 0x355   : > { %v7326_v12 = vadd.f32 %v8313_v8, %v7285_v11 }
 0x357   : > { %v7367_v25 = vadd.f32 %v8335_v19, %v7326_v12 }
 0x36c   : > { %v8352_v10 = vpop.f32.mrf.mxu0 }
 0x36d   : > { %v8374_v13 = vpop.f32.mrf.mxu1 }
 0x36e   : > { %v8353_v14 = vpop.f32.mrf.mxu0 }
 0x36f   : > { %v8354_v16 = vadd.f32 %v8353_v14, %v8352_v10  ;;  %v8375_v17 = vpop.f32.mrf.mxu1 }
 0x370   : > { %v8355_v18 = vpop.f32.mrf.mxu0  ;;  %v8376_v21 = vadd.f32 %v8375_v17, %v8374_v13 }
 0x371   : > { %v7405_v20 = vadd.f32 %v8354_v16, %v7364_v15  ;;  %v8377_v22 = vpop.f32.mrf.mxu1 }
 0x372   : > { %v8356_v24 = vpop.f32.mrf.mxu0 }
 0x373   : > { %v7446_v26 = vadd.f32 %v8376_v21, %v7405_v20  ;;  %v8357_v27 = vadd.f32 %v8356_v24, %v8355_v18  ;;  %v8378_v28 = vpop.f32.mrf.mxu1 }
 0x374   : > { %v8379_v31 = vadd.f32 %v8378_v28, %v8377_v22 }
 0x375   : > { %v7452_v29 = vadd.f32 %v7446_v26, %v4554_v23  ;;  %v7408_v30 = vadd.f32 %v8357_v27, %v7367_v25 }
 0x377   : > { %7454 = vst [vmem:[#allocation2] sm:$0xff] %v7452_v29  ;;  %v7449_v33 = vadd.f32 %v8379_v31, %v7408_v30  ;;  %7459 = sbr.rel (%p8011_p5) target bundleno = 969 (0x3c9), region = 123 }
 0x379   : > { %v7453_v34 = vadd.f32 %v7449_v33, %v4555_v32 }
 0x37b   : > { %7455 = vst [vmem:[#allocation2 + $0x8] sm:$0xff] %v7453_v34 }
 0x37c   : > { %v8012_v37 = vld [vmem:[%s4540_s13] ss:$0 sm:$0xff]  ;;  %v7499_v61 = vlaneseq }
 0x37d   : > { %v7491_v0 = vld [vmem:[%s4543_s27] sm:$0x1] }
 0x37e   : > { %v7460_v35 = vld [vmem:[#allocation2] sm:$0xff]  ;;  %v7500_v63 = vshrl.u32 %v7499_v61, 7 }
 0x37f   : > { %v7469_v38 = vadd.f32 %v8012_v37, %v7460_v35  ;;  %v7495_v62 = vld [vmem:[%s4546_s0] sm:$0x1] }
 0x380   : > { %v7501_v3 = vsub.s32 0, %v7500_v63 }
 0x382   : > { %v7461_v36 = vld [vmem:[#allocation2 + $0x8] sm:$0xff] }
 0x383   : > { %v7470_v39 = vadd.f32 %v8012_v37, %v7461_v36 }
 0x385   : > { %v7471_v40 = vadd.f32 %v7470_v39, %v7469_v38 }
 0x387   : > { %v7472_v41 = vrot.slane %v7471_v40, 4 }
 0x389   : > { %v7473_v42 = vadd.f32 %v7472_v41, %v7471_v40 }
 0x38b   : > { %v7474_v43 = vrot.slane %v7473_v42, 2 }
 0x38d   : > { %v7475_v44 = vadd.f32 %v7474_v43, %v7473_v42 }
 0x38f   : > { %v7476_v45 = vrot.slane %v7475_v44, 1 }
 0x391   : > { %v7477_v46 = vadd.f32 %v7476_v45, %v7475_v44 }
 0x393   : > { %v7478_v47 = vmul.f32 0.0625, %v7477_v46 }
 0x395   : > { %v7479_v48 = vsub.f32 %v7469_v38, %v7478_v47  ;;  %v7480_v49 = vsub.f32 %v7470_v39, %v7478_v47 }
 0x397   : > { %v7481_v50 = vmul.f32 %v7479_v48, %v7479_v48  ;;  %v7482_v51 = vmul.f32 %v7480_v49, %v7480_v49 }
 0x399   : > { %v7483_v52 = vadd.f32 %v7482_v51, %v7481_v50 }
 0x39b   : > { %v7484_v53 = vrot.slane %v7483_v52, 4 }
 0x39d   : > { %v7485_v55 = vadd.f32 %v7484_v53, %v7483_v52 }
 0x39f   : > { %v7486_v54 = vrot.slane %v7485_v55, 2 }
 0x3a1   : > { %v7487_v56 = vadd.f32 %v7486_v54, %v7485_v55 }
 0x3a3   : > { %v7488_v57 = vrot.slane %v7487_v56, 1 }
 0x3a5   : > { %v7489_v58 = vadd.f32 %v7488_v57, %v7487_v56 }
 0x3a7   : > { %v7490_v59 = vmul.f32 0.0625, %v7489_v58 }
 0x3a9   : > { %v7492_v60 = vadd.f32 1e-05, %v7490_v59 }
 0x3ab   : > { %8725 = vrsqrt.f32 %v7492_v60 }
 0x3b8   : > { %v8726_v4 = vpop.eup %8725 }
 0x3b9   : > { %v7494_v5 = vmul.f32 %v8726_v4, %v7491_v0 }
 0x3bb   : > { %v7496_v1 = vmul.f32 %v7494_v5, %v7478_v47  ;;  %v7502_v2 = vrot.slane %v7494_v5, %v7501_v3 }
 0x3bd   : > { %v7497_v6 = vsub.f32 %v7495_v62, %v7496_v1  ;;  %v7504_v7 = vmul.f32 %v7502_v2, %v7469_v38  ;;  %v7505_v8 = vmul.f32 %v7502_v2, %v7470_v39 }
 0x3bf   : > { %v7510_v9 = vrot.slane %v7497_v6, %v7501_v3 }
 0x3c1   : > { %v7512_v10 = vadd.f32 %v7510_v9, %v7504_v7  ;;  %v7513_v11 = vadd.f32 %v7510_v9, %v7505_v8 }
 0x3c3   : > { %vm7514_vm0 = vcmp.gt.f32.partialorder %v7512_v10, 0.0  ;;  %vm7515_vm1 = vcmp.gt.f32.partialorder %v7513_v11, 0.0  ;;  %v7516_v13 = vmul.f32 0.2, %v7512_v10  ;;  %v7517_v14 = vmul.f32 0.2, %v7513_v11 }
 0x3c5   : > { %v7518_v15 = vsel %vm7514_vm0, %v7512_v10, %v7516_v13  ;;  %v7519_v12 = vsel %vm7515_vm1, %v7513_v11, %v7517_v14 }
 0x3c6   : > { %v8026_v16 = vpack.c.bf16 %v7519_v12, %v7518_v15 }
 0x3c8   : > { %8027 = vst [vmem:[%s10081_s6] sm:$0xff] %v8026_v16  }
 0x3c9 PF: > { %7536 = sbr.rel (!%p8940_p12) target bundleno = 977 (0x3d1), region = 127  ;;  %s8016_s27 = sshll.u32 (%p8940_p12), %s8801_s25, 2 }
 0x3ca   : > { %s7538_s13 = scalar_lea.vmem (%p8940_p12), %s10435_s5, %s8016_s27 }
 0x3cf   : > { %v7555_v17 = vld [vmem:[%s10081_s6] sm:$0xf]  ;;  %v7557_v18 = vld [vmem:[%s10081_s6 + $0x4] sm:$0xf] }
 0x3d0   : > { %7556 = vst [vmem:[%s7538_s13] sm:$0xf] %v7555_v17  ;;  %7558 = vst [vmem:[%s7538_s13 + $0x8] sm:$0xf] %v7557_v18 }
 0x3d1 PF: > { %s15_s28 = sadd.s32 1, %s8813_s28   ;;  %s10449_s25 = sld [smem:[#allocation6_spill]] }
 0x3d2   : > { %p12_p6 = scmp.ge.s32.totalorder %s15_s28, 6   ;;  %s10450_s30 = sld [smem:[#allocation7_spill]] }
 0x3d3   : > { %s10451_s27 = sld [smem:[#allocation8_spill]]  ;;  %s10452_s18 = smov %s8777_s19 }
 0x3d4   : > { %s10453_s19 = smov %s8938_s17  ;;  %s10454_s20 = smov %s8785_s21 }
 0x3d5   : > { %s10455_s21 = smov %s8935_s16  ;;  %s10456_s22 = smov %s8793_s23 }
 0x3d6   : > { %s10457_s23 = smov %s8921_s11  ;;  %s10458_s24 = smov %s8805_s26 }
 0x3d7   :  { %14 = sbr.rel (!%p12_p6) target bundleno = 9 (0x9), region = 220 }
 0x3d8   : > { %s10459_s26 = smov %s10450_s30 }

// kernel: fwd.9
= control target key start
LH: loop header
LB: loop body
LE: loop exit
PB: predicated region body
PF: predicated region fallthrough
CT: control target
= control target key end

     0   :  { %s717_s12 = smov 0   ;;  %s719_s13 = smov 0   ;;  %s780_s0 = inlined_call_operand.vmem [shape: bf16[8,512], index: 0, kind: input, shape index: {}]   ;;  %s781_s1 = inlined_call_operand.vmem [shape: bf16[512,128], index: 1, kind: input, shape index: {}]   ;;  %s782_s2 = inlined_call_operand.vmem [shape: f32[1,128], index: 2, kind: input, shape index: {}]   ;;  %s783_s3 = inlined_call_operand.vmem [shape: f32[8,128], index: 3, kind: output, shape index: {}]  }
   0x1   :  { %s721_s14 = smov 0  }
   0x2 LB: > { %s25_s15 = sadd.s32 1, %s690_s13  ;;  %p573_p0 = scmp.ge.s32.totalorder %s694_s14, 1  ;;  %s694_s14 = sphi %s721_s14, %s13_s14   ;;  %s690_s13 = sphi %s719_s13, %s785_s13   ;;  %s686_s12 = sphi %s717_s12, %s784_s12  }
   0x3   : > { %p26_p1 = scmp.ge.s32.totalorder %s25_s15, 2  ;;  %p189_p2 = scmp.lt.s32.totalorder %s694_s14, 3 }
   0x5   : > { %s787_s15 = smov (%p26_p1, %s25_s15), 0  ;;  %p190_p3 = pnand %p573_p0, %p189_p2 }
   0x6   : > { %s574_s16 = sshll.u32 (!%p190_p3), %s686_s12, 1  ;;  %s576_s17 = sshll.u32 (!%p190_p3), %s686_s12, 5 }
   0x7   : > { %193 = sbr.rel (%p190_p3) target bundleno = 297 (0x129), region = 32  ;;  %p233_p4 = scmp.lt.s32.totalorder (!%p190_p3), %s574_s16, 3 }
   0x8   : > { %p241_p5 = scmp.lt.s32.totalorder (!%p190_p3), %s576_s17, 63  ;;  %p578_p6 = scmp.ne.s32.totalorder (!%p190_p3), %s686_s12, 0 }
   0xc   : > { %s789_s16 = smov (!%p233_p4, %s574_s16), 3  ;;  %s791_s17 = smov (!%p241_p5, %s576_s17), 63 }
   0xd   : > { %s575_s18 = sshll.u32 %s789_s16, 2  ;;  %s577_s22 = sshll.u32 %s791_s17, 2 }
   0xe   : > { %s238_s21 = scalar_lea.vmem %s780_s0, %s575_s18  ;;  %s745_s25 = scalar_lea.vmem %s781_s1, %s577_s22 }
   0xf   : > { %263 = sbr.rel (%p578_p6) target bundleno = 22 (0x16), region = 36 }
  0x14   : > { %v696_v0 = vmov 0.0  }
  0x15   : > { %264 = vst [vmem:[#allocation2] sm:$0xff] %v696_v0 }
  0x16 PF: > { %v650_v1 = vld [vmem:[%s745_s25 + $0x78] sm:$0xff]   ;;  %v652_v3 = vld [vmem:[%s745_s25 + $0x70] sm:$0xff]   ;;  %v654_v5 = vld [vmem:[%s745_s25 + $0x68] sm:$0xff]   ;;  %p597_p7 = scmp.ne.s32.totalorder %s686_s12, 1 }
  0x17   : > { %v651_v2 = vld [vmem:[%s745_s25 + $0x38] sm:$0xff]   ;;  %603 = vmatprep.subr.bf16.mxu0 %v650_v1  ;;  %v653_v4 = vld [vmem:[%s745_s25 + $0x30] sm:$0xff]   ;;  %v655_v6 = vld [vmem:[%s745_s25 + $0x28] sm:$0xff]  }
  0x18   : > { %604 = vmatpush3.bf16.msra.mxu0 %v651_v2  ;;  %v656_v7 = vld [vmem:[%s745_s25 + $0x60] sm:$0xff]   ;;  %v658_v9 = vld [vmem:[%s745_s25 + $0x58] sm:$0xff]   ;;  %v660_v11 = vld [vmem:[%s745_s25 + $0x50] sm:$0xff]  }
  0x19   : > { %605 = vmatprep.subr.bf16.mxu0 %v652_v3  ;;  %v657_v8 = vld [vmem:[%s745_s25 + $0x20] sm:$0xff]   ;;  %v659_v10 = vld [vmem:[%s745_s25 + $0x18] sm:$0xff]   ;;  %v661_v14 = vld [vmem:[%s745_s25 + $0x10] sm:$0xff]  }
  0x1a   : > { %v266_v12 = vld [vmem:[%s238_s21] sm:$0xff]  ;;  %v662_v15 = vld [vmem:[%s745_s25 + $0x48] sm:$0xff]  }
  0x1b   : > { %v580_v13 = vcombine.high %v266_v12, %v266_v12  ;;  %v663_v16 = vld [vmem:[%s745_s25 + $0x8] sm:$0xff]   ;;  %v664_v17 = vld [vmem:[%s745_s25 + $0x40] sm:$0xff]   ;;  %v579_v19 = vcombine.low %v266_v12, %v266_v12 }
  0x1c   : > { %606 = vmatpush3.bf16.msra.mxu0 %v653_v4  ;;  %v665_v18 = vld [vmem:[%s745_s25] sm:$0xff]  }
  0x1d   : > { %607 = vmatprep.subr.bf16.mxu0 %v654_v5  ;;  %434 = vmatprep.mubr.bf16.mxu0 %v580_v13  ;;  %v265_v21 = vld [vmem:[#allocation2] sm:$0xff] }
  0x20   : > { %608 = vmatpush3.bf16.msra.mxu0 %v655_v6 }
  0x21   : > { %609 = vmatprep.subr.bf16.mxu0 %v656_v7 }
  0x24   : > { %610 = vmatpush3.bf16.msra.mxu0 %v657_v8 }
  0x25   : > { %611 = vmatprep.subr.bf16.mxu0 %v658_v9 }
  0x28   : > { %612 = vmatpush3.bf16.msra.mxu0 %v659_v10 }
  0x29   : > { %613 = vmatprep.subr.bf16.mxu0 %v660_v11 }
  0x2c   : > { %614 = vmatpush3.bf16.msra.mxu0 %v661_v14 }
  0x2d   : > { %615 = vmatprep.subr.bf16.mxu0 %v662_v15 }
  0x30   : > { %616 = vmatpush3.bf16.msra.mxu0 %v663_v16 }
  0x31   : > { %617 = vmatprep.subr.bf16.mxu0 %v664_v17 }
  0x34   : > { %618 = vmatpush3.bf16.msra.mxu0 %v665_v18 }
  0x37   : > { %435 = vmatmul.mubr.bf16.vlgmr.msra.gmra.mxu0 %v579_v19 }
  0xf7   : > { %v619_v20 = vpop.f32.mrf.mxu0 }
  0xf9   : > { %v620_v22 = vpop.f32.mrf.mxu0 }
  0xfa   : > { %v621_v23 = vadd.f32 %v620_v22, %v619_v20  ;;  %447 = sbr.rel (%p597_p7) target bundleno = 297 (0x129), region = 40 }
  0xfb   : > { %v622_v24 = vpop.f32.mrf.mxu0 }
  0xfc   : > { %v442_v25 = vadd.f32 %v621_v23, %v265_v21 }
  0xfd   : > { %v623_v26 = vpop.f32.mrf.mxu0 }
  0xfe   : > { %443 = vst [vmem:[#allocation2] sm:$0xff] %v442_v25 }
  0xff   : > { %v598_v28 = vld [vmem:[%s782_s2] ss:$0 sm:$0xff] }
 0x105   : > { %v448_v27 = vld [vmem:[#allocation2] sm:$0xff] }
 0x106   : > { %v456_v29 = vadd.f32 %v598_v28, %v448_v27 }
 0x108   : > { %v599_v30 = vmul.f32 -1.442695, %v456_v29 }
 0x10a   : > { %668 = vpow2.f32 %v599_v30 }
 0x117   : > { %v669_v31 = vpop.eup %668 }
 0x118   : > { %v460_v32 = vadd.f32 1.0, %v669_v31 }
 0x11a   : > { %670 = vrcp.f32 %v460_v32 }
 0x127   : > { %v671_v33 = vpop.eup %670 }
 0x128   : > { %463 = vst [vmem:[%s783_s3] sm:$0xff] %v671_v33 }
 0x129 PF: > { %s13_s14 = sadd.s32 1, %s694_s14   ;;  %s784_s12 = smov %s690_s13 }
 0x12a   : > { %p10_p8 = scmp.ge.s32.totalorder %s13_s14, 4   ;;  %s785_s13 = smov %s787_s15 }
 0x12c   :  { %12 = sbr.rel (!%p10_p8) target bundleno = 2 (0x2), region = 76 }

// kernel: fwd.8
= control target key start
LH: loop header
LB: loop body
LE: loop exit
PB: predicated region body
PF: predicated region fallthrough
CT: control target
= control target key end

     0   :  { %s10150_s18 = smov 0   ;;  %s10152_s19 = smov 0   ;;  %s11959_s0 = inlined_call_operand.vmem [shape: bf16[8,16384], index: 0, kind: input, shape index: {}]   ;;  %s11960_s1 = inlined_call_operand.vmem [shape: bf16[16384,512], index: 1, kind: input, shape index: {}]   ;;  %s11961_s2 = inlined_call_operand.vmem [shape: f32[1,512], index: 2, kind: input, shape index: {}]   ;;  %s11962_s3 = inlined_call_operand.vmem [shape: f32[1,512], index: 3, kind: input, shape index: {}]   ;;  %s11963_s4 = inlined_call_operand.vmem [shape: f32[1,512], index: 4, kind: input, shape index: {}]   ;;  %s11964_s5 = inlined_call_operand.vmem [shape: bf16[8,512], index: 5, kind: output, shape index: {}]  }
   0x1   :  { %s10154_s20 = smov 0   ;;  %s10156_s21 = smov 0  }
   0x2   :  { %s10158_s22 = smov 0   ;;  %s10160_s23 = smov 0  }
   0x3   :  { %s10162_s24 = smov 0  }
   0x4 LB: > { %s24_s25 = sadd.s32 1, %s10108_s22  ;;  %s27_s26 = sadd.s32 1, %s10112_s23  ;;  %s10116_s24 = sphi %s10162_s24, %s15_s24   ;;  %s10112_s23 = sphi %s10160_s23, %s11970_s23   ;;  %s10108_s22 = sphi %s10158_s22, %s11969_s22   ;;  %s10104_s21 = sphi %s10156_s21, %s11968_s21   ;;  %s10100_s20 = sphi %s10154_s20, %s11967_s20   ;;  %s10096_s19 = sphi %s10152_s19, %s11966_s19   ;;  %s10092_s18 = sphi %s10150_s18, %s11965_s18  }
   0x5   : > { %p25_p0 = scmp.ge.s32.totalorder %s24_s25, 4  ;;  %p69_p1 = scmp.ne.s32.totalorder %s10096_s19, %s10092_s18 }
   0x6   : > { %p70_p2 = scmp.eq.s32.totalorder %s10116_s24, 0  ;;  %s62_s30 = sadd.s32 1, %s10096_s19 }
   0x7   : > { %s11972_s25 = smov (%p25_p0, %s24_s25), 0  ;;  %s11974_s26 = smov (!%p25_p0, %s27_s26), %s10112_s23 }
   0x8   : > { %p71_p3 = por %p70_p2, %p69_p1  ;;  %p29_p4 = scmp.ge.s32.totalorder %s11974_s26, 2 }
   0x9   : > { %s57_s27 = ssub.s32 %s10108_s22, %s11972_s25  ;;  %p8634_p6 = scmp.ge.s32.totalorder %s10116_s24, 8 }
   0xa   : > { %s11976_s26 = smov (%p29_p4, %s11974_s26), 0 }
   0xb   : > { %s58_s28 = ssub.s32 %s10112_s23, %s11976_s26  ;;  %199 = sbr.rel (%p8634_p6) target bundleno = 279 (0x117), region = 16 }
   0xc   : > { %s59_s29 = sor.u32 %s58_s28, %s57_s27 }
   0xd   : > { %p60_p5 = scmp.eq.s32.totalorder %s59_s29, 0 }
   0xf   : > { %s10201_s6 = scalar_select %p60_p5, %s10096_s19, %s62_s30  }
  0x10   : > { %211 = sbr.rel (!%p71_p3) target bundleno = 279 (0x117), region = 24  ;;  %s213_s7 = sand.u32 (%p71_p3), 1, %s10096_s19  }
  0x11   : > { %s8637_s8 = sshll.u32 (%p71_p3), %s10112_s23, 1  ;;  %s8635_s9 = sshll.u32 (%p71_p3), %s213_s7, 12 }
  0x12   : > { %s9198_s10 = sshll.u32 (%p71_p3), %s10108_s22, 11  ;;  %s10215_s16 = scalar_lea.vmem (%p71_p3), [#allocation3], %s8635_s9 }
  0x13   : > { %s219_s11 = sadd.s32 (%p71_p3), %s9198_s10, %s8637_s8 }
  0x14   : > { %s8639_s12 = sshll.u32 (%p71_p3), %s219_s11, 2 }
  0x15   : > { %s10210_s15 = scalar_lea.vmem %s11960_s1, %s8639_s12 }
  0x16   : > { %v1275_v0 = vld [vmem:[%s10210_s15] sm:$0xff]  ;;  %v1277_v1 = vld [vmem:[%s10210_s15 + $0x10] sm:$0xff] }
  0x17   : > { %v1279_v2 = vld [vmem:[%s10210_s15 + $0x20] sm:$0xff]  ;;  %1276 = vst [vmem:[%s10215_s16] sm:$0xff] %v1275_v0  ;;  %1278 = vst [vmem:[%s10215_s16 + $0x8] sm:$0xff] %v1277_v1  ;;  %v1281_v3 = vld [vmem:[%s10210_s15 + $0x30] sm:$0xff] }
  0x18   : > { %1280 = vst [vmem:[%s10215_s16 + $0x10] sm:$0xff] %v1279_v2  ;;  %v1283_v4 = vld [vmem:[%s10210_s15 + $0x40] sm:$0xff]  ;;  %v1285_v5 = vld [vmem:[%s10210_s15 + $0x50] sm:$0xff]  ;;  %1282 = vst [vmem:[%s10215_s16 + $0x18] sm:$0xff] %v1281_v3 }
  0x19   : > { %1284 = vst [vmem:[%s10215_s16 + $0x20] sm:$0xff] %v1283_v4  ;;  %1286 = vst [vmem:[%s10215_s16 + $0x28] sm:$0xff] %v1285_v5  ;;  %v1287_v6 = vld [vmem:[%s10210_s15 + $0x60] sm:$0xff]  ;;  %v1289_v7 = vld [vmem:[%s10210_s15 + $0x70] sm:$0xff] }
  0x1a   : > { %v1291_v8 = vld [vmem:[%s10210_s15 + $0x80] sm:$0xff]  ;;  %1288 = vst [vmem:[%s10215_s16 + $0x30] sm:$0xff] %v1287_v6  ;;  %1290 = vst [vmem:[%s10215_s16 + $0x38] sm:$0xff] %v1289_v7  ;;  %v1293_v9 = vld [vmem:[%s10210_s15 + $0x90] sm:$0xff] }
  0x1b   : > { %1292 = vst [vmem:[%s10215_s16 + $0x40] sm:$0xff] %v1291_v8  ;;  %v1295_v10 = vld [vmem:[%s10210_s15 + $0xa0] sm:$0xff]  ;;  %v1297_v11 = vld [vmem:[%s10210_s15 + $0xb0] sm:$0xff]  ;;  %1294 = vst [vmem:[%s10215_s16 + $0x48] sm:$0xff] %v1293_v9 }
  0x1c   : > { %1296 = vst [vmem:[%s10215_s16 + $0x50] sm:$0xff] %v1295_v10  ;;  %1298 = vst [vmem:[%s10215_s16 + $0x58] sm:$0xff] %v1297_v11  ;;  %v1299_v12 = vld [vmem:[%s10210_s15 + $0xc0] sm:$0xff]  ;;  %v1301_v13 = vld [vmem:[%s10210_s15 + $0xd0] sm:$0xff] }
  0x1d   : > { %v1303_v14 = vld [vmem:[%s10210_s15 + $0xe0] sm:$0xff]  ;;  %1300 = vst [vmem:[%s10215_s16 + $0x60] sm:$0xff] %v1299_v12  ;;  %1302 = vst [vmem:[%s10215_s16 + $0x68] sm:$0xff] %v1301_v13  ;;  %v1305_v15 = vld [vmem:[%s10210_s15 + $0xf0] sm:$0xff] }
  0x1e   : > { %1304 = vst [vmem:[%s10215_s16 + $0x70] sm:$0xff] %v1303_v14  ;;  %v1307_v16 = vld [vmem:[%s10210_s15 + $0x100] sm:$0xff]  ;;  %v1309_v17 = vld [vmem:[%s10210_s15 + $0x110] sm:$0xff]  ;;  %1306 = vst [vmem:[%s10215_s16 + $0x78] sm:$0xff] %v1305_v15 }
  0x1f   : > { %1308 = vst [vmem:[%s10215_s16 + $0x80] sm:$0xff] %v1307_v16  ;;  %1310 = vst [vmem:[%s10215_s16 + $0x88] sm:$0xff] %v1309_v17  ;;  %v1311_v18 = vld [vmem:[%s10210_s15 + $0x120] sm:$0xff]  ;;  %v1313_v19 = vld [vmem:[%s10210_s15 + $0x130] sm:$0xff] }
  0x20   : > { %v1315_v20 = vld [vmem:[%s10210_s15 + $0x140] sm:$0xff]  ;;  %1312 = vst [vmem:[%s10215_s16 + $0x90] sm:$0xff] %v1311_v18  ;;  %1314 = vst [vmem:[%s10215_s16 + $0x98] sm:$0xff] %v1313_v19  ;;  %v1317_v21 = vld [vmem:[%s10210_s15 + $0x150] sm:$0xff] }
  0x21   : > { %1316 = vst [vmem:[%s10215_s16 + $0xa0] sm:$0xff] %v1315_v20  ;;  %v1319_v22 = vld [vmem:[%s10210_s15 + $0x160] sm:$0xff]  ;;  %v1321_v23 = vld [vmem:[%s10210_s15 + $0x170] sm:$0xff]  ;;  %1318 = vst [vmem:[%s10215_s16 + $0xa8] sm:$0xff] %v1317_v21 }
  0x22   : > { %1320 = vst [vmem:[%s10215_s16 + $0xb0] sm:$0xff] %v1319_v22  ;;  %1322 = vst [vmem:[%s10215_s16 + $0xb8] sm:$0xff] %v1321_v23  ;;  %v1323_v24 = vld [vmem:[%s10210_s15 + $0x180] sm:$0xff]  ;;  %v1325_v25 = vld [vmem:[%s10210_s15 + $0x190] sm:$0xff] }
  0x23   : > { %v1327_v26 = vld [vmem:[%s10210_s15 + $0x1a0] sm:$0xff]  ;;  %1324 = vst [vmem:[%s10215_s16 + $0xc0] sm:$0xff] %v1323_v24  ;;  %1326 = vst [vmem:[%s10215_s16 + $0xc8] sm:$0xff] %v1325_v25  ;;  %v1329_v27 = vld [vmem:[%s10210_s15 + $0x1b0] sm:$0xff] }
  0x24   : > { %1328 = vst [vmem:[%s10215_s16 + $0xd0] sm:$0xff] %v1327_v26  ;;  %v1331_v28 = vld [vmem:[%s10210_s15 + $0x1c0] sm:$0xff]  ;;  %v1333_v29 = vld [vmem:[%s10210_s15 + $0x1d0] sm:$0xff]  ;;  %1330 = vst [vmem:[%s10215_s16 + $0xd8] sm:$0xff] %v1329_v27 }
  0x25   : > { %1332 = vst [vmem:[%s10215_s16 + $0xe0] sm:$0xff] %v1331_v28  ;;  %1334 = vst [vmem:[%s10215_s16 + $0xe8] sm:$0xff] %v1333_v29  ;;  %v1335_v30 = vld [vmem:[%s10210_s15 + $0x1e0] sm:$0xff]  ;;  %v1337_v31 = vld [vmem:[%s10210_s15 + $0x1f0] sm:$0xff] }
  0x26   : > { %v1339_v32 = vld [vmem:[%s10210_s15 + $0x200] sm:$0xff]  ;;  %1336 = vst [vmem:[%s10215_s16 + $0xf0] sm:$0xff] %v1335_v30  ;;  %1338 = vst [vmem:[%s10215_s16 + $0xf8] sm:$0xff] %v1337_v31  ;;  %v1341_v33 = vld [vmem:[%s10210_s15 + $0x210] sm:$0xff] }
  0x27   : > { %1340 = vst [vmem:[%s10215_s16 + $0x100] sm:$0xff] %v1339_v32  ;;  %v1343_v34 = vld [vmem:[%s10210_s15 + $0x220] sm:$0xff]  ;;  %v1345_v35 = vld [vmem:[%s10210_s15 + $0x230] sm:$0xff]  ;;  %1342 = vst [vmem:[%s10215_s16 + $0x108] sm:$0xff] %v1341_v33 }
  0x28   : > { %1344 = vst [vmem:[%s10215_s16 + $0x110] sm:$0xff] %v1343_v34  ;;  %1346 = vst [vmem:[%s10215_s16 + $0x118] sm:$0xff] %v1345_v35  ;;  %v1347_v36 = vld [vmem:[%s10210_s15 + $0x240] sm:$0xff]  ;;  %v1349_v37 = vld [vmem:[%s10210_s15 + $0x250] sm:$0xff] }
  0x29   : > { %v1351_v38 = vld [vmem:[%s10210_s15 + $0x260] sm:$0xff]  ;;  %1348 = vst [vmem:[%s10215_s16 + $0x120] sm:$0xff] %v1347_v36  ;;  %1350 = vst [vmem:[%s10215_s16 + $0x128] sm:$0xff] %v1349_v37  ;;  %v1353_v39 = vld [vmem:[%s10210_s15 + $0x270] sm:$0xff] }
  0x2a   : > { %1352 = vst [vmem:[%s10215_s16 + $0x130] sm:$0xff] %v1351_v38  ;;  %v1355_v40 = vld [vmem:[%s10210_s15 + $0x280] sm:$0xff]  ;;  %v1357_v41 = vld [vmem:[%s10210_s15 + $0x290] sm:$0xff]  ;;  %1354 = vst [vmem:[%s10215_s16 + $0x138] sm:$0xff] %v1353_v39 }
  0x2b   : > { %1356 = vst [vmem:[%s10215_s16 + $0x140] sm:$0xff] %v1355_v40  ;;  %1358 = vst [vmem:[%s10215_s16 + $0x148] sm:$0xff] %v1357_v41  ;;  %v1359_v42 = vld [vmem:[%s10210_s15 + $0x2a0] sm:$0xff]  ;;  %v1361_v43 = vld [vmem:[%s10210_s15 + $0x2b0] sm:$0xff] }
  0x2c   : > { %v1363_v44 = vld [vmem:[%s10210_s15 + $0x2c0] sm:$0xff]  ;;  %1360 = vst [vmem:[%s10215_s16 + $0x150] sm:$0xff] %v1359_v42  ;;  %1362 = vst [vmem:[%s10215_s16 + $0x158] sm:$0xff] %v1361_v43  ;;  %v1365_v45 = vld [vmem:[%s10210_s15 + $0x2d0] sm:$0xff] }
  0x2d   : > { %1364 = vst [vmem:[%s10215_s16 + $0x160] sm:$0xff] %v1363_v44  ;;  %v1367_v46 = vld [vmem:[%s10210_s15 + $0x2e0] sm:$0xff]  ;;  %v1369_v47 = vld [vmem:[%s10210_s15 + $0x2f0] sm:$0xff]  ;;  %1366 = vst [vmem:[%s10215_s16 + $0x168] sm:$0xff] %v1365_v45 }
  0x2e   : > { %1368 = vst [vmem:[%s10215_s16 + $0x170] sm:$0xff] %v1367_v46  ;;  %1370 = vst [vmem:[%s10215_s16 + $0x178] sm:$0xff] %v1369_v47  ;;  %v1371_v48 = vld [vmem:[%s10210_s15 + $0x300] sm:$0xff]  ;;  %v1373_v49 = vld [vmem:[%s10210_s15 + $0x310] sm:$0xff] }
  0x2f   : > { %v1375_v50 = vld [vmem:[%s10210_s15 + $0x320] sm:$0xff]  ;;  %1372 = vst [vmem:[%s10215_s16 + $0x180] sm:$0xff] %v1371_v48  ;;  %1374 = vst [vmem:[%s10215_s16 + $0x188] sm:$0xff] %v1373_v49  ;;  %v1377_v51 = vld [vmem:[%s10210_s15 + $0x330] sm:$0xff] }
  0x30   : > { %1376 = vst [vmem:[%s10215_s16 + $0x190] sm:$0xff] %v1375_v50  ;;  %v1379_v52 = vld [vmem:[%s10210_s15 + $0x340] sm:$0xff]  ;;  %v1381_v53 = vld [vmem:[%s10210_s15 + $0x350] sm:$0xff]  ;;  %1378 = vst [vmem:[%s10215_s16 + $0x198] sm:$0xff] %v1377_v51 }
  0x31   : > { %1380 = vst [vmem:[%s10215_s16 + $0x1a0] sm:$0xff] %v1379_v52  ;;  %1382 = vst [vmem:[%s10215_s16 + $0x1a8] sm:$0xff] %v1381_v53  ;;  %v1383_v54 = vld [vmem:[%s10210_s15 + $0x360] sm:$0xff]  ;;  %v1385_v55 = vld [vmem:[%s10210_s15 + $0x370] sm:$0xff] }
  0x32   : > { %v1387_v56 = vld [vmem:[%s10210_s15 + $0x380] sm:$0xff]  ;;  %1384 = vst [vmem:[%s10215_s16 + $0x1b0] sm:$0xff] %v1383_v54  ;;  %1386 = vst [vmem:[%s10215_s16 + $0x1b8] sm:$0xff] %v1385_v55  ;;  %v1389_v57 = vld [vmem:[%s10210_s15 + $0x390] sm:$0xff] }
  0x33   : > { %1388 = vst [vmem:[%s10215_s16 + $0x1c0] sm:$0xff] %v1387_v56  ;;  %v1391_v58 = vld [vmem:[%s10210_s15 + $0x3a0] sm:$0xff]  ;;  %v1393_v59 = vld [vmem:[%s10210_s15 + $0x3b0] sm:$0xff]  ;;  %1390 = vst [vmem:[%s10215_s16 + $0x1c8] sm:$0xff] %v1389_v57 }
  0x34   : > { %1392 = vst [vmem:[%s10215_s16 + $0x1d0] sm:$0xff] %v1391_v58  ;;  %1394 = vst [vmem:[%s10215_s16 + $0x1d8] sm:$0xff] %v1393_v59  ;;  %v1395_v60 = vld [vmem:[%s10210_s15 + $0x3c0] sm:$0xff]  ;;  %v1397_v61 = vld [vmem:[%s10210_s15 + $0x3d0] sm:$0xff] }
  0x35   : > { %v1399_v62 = vld [vmem:[%s10210_s15 + $0x3e0] sm:$0xff]  ;;  %1396 = vst [vmem:[%s10215_s16 + $0x1e0] sm:$0xff] %v1395_v60  ;;  %1398 = vst [vmem:[%s10215_s16 + $0x1e8] sm:$0xff] %v1397_v61  ;;  %v1401_v63 = vld [vmem:[%s10210_s15 + $0x3f0] sm:$0xff] }
  0x36   : > { %1400 = vst [vmem:[%s10215_s16 + $0x1f0] sm:$0xff] %v1399_v62  ;;  %v1403_v0 = vld [vmem:[%s10210_s15 + $0x400] sm:$0xff]  ;;  %v1405_v1 = vld [vmem:[%s10210_s15 + $0x410] sm:$0xff]  ;;  %1402 = vst [vmem:[%s10215_s16 + $0x1f8] sm:$0xff] %v1401_v63 }
  0x37   : > { %1404 = vst [vmem:[%s10215_s16 + $0x200] sm:$0xff] %v1403_v0  ;;  %1406 = vst [vmem:[%s10215_s16 + $0x208] sm:$0xff] %v1405_v1  ;;  %v1407_v2 = vld [vmem:[%s10210_s15 + $0x420] sm:$0xff]  ;;  %v1409_v3 = vld [vmem:[%s10210_s15 + $0x430] sm:$0xff] }
  0x38   : > { %v1411_v4 = vld [vmem:[%s10210_s15 + $0x440] sm:$0xff]  ;;  %1408 = vst [vmem:[%s10215_s16 + $0x210] sm:$0xff] %v1407_v2  ;;  %1410 = vst [vmem:[%s10215_s16 + $0x218] sm:$0xff] %v1409_v3  ;;  %v1413_v5 = vld [vmem:[%s10210_s15 + $0x450] sm:$0xff] }
  0x39   : > { %1412 = vst [vmem:[%s10215_s16 + $0x220] sm:$0xff] %v1411_v4  ;;  %v1415_v6 = vld [vmem:[%s10210_s15 + $0x460] sm:$0xff]  ;;  %v1417_v7 = vld [vmem:[%s10210_s15 + $0x470] sm:$0xff]  ;;  %1414 = vst [vmem:[%s10215_s16 + $0x228] sm:$0xff] %v1413_v5 }
  0x3a   : > { %1416 = vst [vmem:[%s10215_s16 + $0x230] sm:$0xff] %v1415_v6  ;;  %1418 = vst [vmem:[%s10215_s16 + $0x238] sm:$0xff] %v1417_v7  ;;  %v1419_v8 = vld [vmem:[%s10210_s15 + $0x480] sm:$0xff]  ;;  %v1421_v9 = vld [vmem:[%s10210_s15 + $0x490] sm:$0xff] }
  0x3b   : > { %v1423_v10 = vld [vmem:[%s10210_s15 + $0x4a0] sm:$0xff]  ;;  %1420 = vst [vmem:[%s10215_s16 + $0x240] sm:$0xff] %v1419_v8  ;;  %1422 = vst [vmem:[%s10215_s16 + $0x248] sm:$0xff] %v1421_v9  ;;  %v1425_v11 = vld [vmem:[%s10210_s15 + $0x4b0] sm:$0xff] }
  0x3c   : > { %1424 = vst [vmem:[%s10215_s16 + $0x250] sm:$0xff] %v1423_v10  ;;  %v1427_v12 = vld [vmem:[%s10210_s15 + $0x4c0] sm:$0xff]  ;;  %v1429_v13 = vld [vmem:[%s10210_s15 + $0x4d0] sm:$0xff]  ;;  %1426 = vst [vmem:[%s10215_s16 + $0x258] sm:$0xff] %v1425_v11 }
  0x3d   : > { %1428 = vst [vmem:[%s10215_s16 + $0x260] sm:$0xff] %v1427_v12  ;;  %1430 = vst [vmem:[%s10215_s16 + $0x268] sm:$0xff] %v1429_v13  ;;  %v1431_v14 = vld [vmem:[%s10210_s15 + $0x4e0] sm:$0xff]  ;;  %v1433_v15 = vld [vmem:[%s10210_s15 + $0x4f0] sm:$0xff] }
  0x3e   : > { %v1435_v16 = vld [vmem:[%s10210_s15 + $0x500] sm:$0xff]  ;;  %1432 = vst [vmem:[%s10215_s16 + $0x270] sm:$0xff] %v1431_v14  ;;  %1434 = vst [vmem:[%s10215_s16 + $0x278] sm:$0xff] %v1433_v15  ;;  %v1437_v17 = vld [vmem:[%s10210_s15 + $0x510] sm:$0xff] }
  0x3f   : > { %1436 = vst [vmem:[%s10215_s16 + $0x280] sm:$0xff] %v1435_v16  ;;  %v1439_v18 = vld [vmem:[%s10210_s15 + $0x520] sm:$0xff]  ;;  %v1441_v19 = vld [vmem:[%s10210_s15 + $0x530] sm:$0xff]  ;;  %1438 = vst [vmem:[%s10215_s16 + $0x288] sm:$0xff] %v1437_v17 }
  0x40   : > { %1440 = vst [vmem:[%s10215_s16 + $0x290] sm:$0xff] %v1439_v18  ;;  %1442 = vst [vmem:[%s10215_s16 + $0x298] sm:$0xff] %v1441_v19  ;;  %v1443_v20 = vld [vmem:[%s10210_s15 + $0x540] sm:$0xff]  ;;  %v1445_v21 = vld [vmem:[%s10210_s15 + $0x550] sm:$0xff] }
  0x41   : > { %v1447_v22 = vld [vmem:[%s10210_s15 + $0x560] sm:$0xff]  ;;  %1444 = vst [vmem:[%s10215_s16 + $0x2a0] sm:$0xff] %v1443_v20  ;;  %1446 = vst [vmem:[%s10215_s16 + $0x2a8] sm:$0xff] %v1445_v21  ;;  %v1449_v23 = vld [vmem:[%s10210_s15 + $0x570] sm:$0xff] }
  0x42   : > { %1448 = vst [vmem:[%s10215_s16 + $0x2b0] sm:$0xff] %v1447_v22  ;;  %v1451_v24 = vld [vmem:[%s10210_s15 + $0x580] sm:$0xff]  ;;  %v1453_v25 = vld [vmem:[%s10210_s15 + $0x590] sm:$0xff]  ;;  %1450 = vst [vmem:[%s10215_s16 + $0x2b8] sm:$0xff] %v1449_v23 }
  0x43   : > { %1452 = vst [vmem:[%s10215_s16 + $0x2c0] sm:$0xff] %v1451_v24  ;;  %1454 = vst [vmem:[%s10215_s16 + $0x2c8] sm:$0xff] %v1453_v25  ;;  %v1455_v26 = vld [vmem:[%s10210_s15 + $0x5a0] sm:$0xff]  ;;  %v1457_v27 = vld [vmem:[%s10210_s15 + $0x5b0] sm:$0xff] }
  0x44   : > { %v1459_v28 = vld [vmem:[%s10210_s15 + $0x5c0] sm:$0xff]  ;;  %1456 = vst [vmem:[%s10215_s16 + $0x2d0] sm:$0xff] %v1455_v26  ;;  %1458 = vst [vmem:[%s10215_s16 + $0x2d8] sm:$0xff] %v1457_v27  ;;  %v1461_v29 = vld [vmem:[%s10210_s15 + $0x5d0] sm:$0xff] }
  0x45   : > { %1460 = vst [vmem:[%s10215_s16 + $0x2e0] sm:$0xff] %v1459_v28  ;;  %v1463_v30 = vld [vmem:[%s10210_s15 + $0x5e0] sm:$0xff]  ;;  %v1465_v31 = vld [vmem:[%s10210_s15 + $0x5f0] sm:$0xff]  ;;  %1462 = vst [vmem:[%s10215_s16 + $0x2e8] sm:$0xff] %v1461_v29 }
  0x46   : > { %1464 = vst [vmem:[%s10215_s16 + $0x2f0] sm:$0xff] %v1463_v30  ;;  %1466 = vst [vmem:[%s10215_s16 + $0x2f8] sm:$0xff] %v1465_v31  ;;  %v1467_v32 = vld [vmem:[%s10210_s15 + $0x600] sm:$0xff]  ;;  %v1469_v33 = vld [vmem:[%s10210_s15 + $0x610] sm:$0xff] }
  0x47   : > { %v1471_v34 = vld [vmem:[%s10210_s15 + $0x620] sm:$0xff]  ;;  %1468 = vst [vmem:[%s10215_s16 + $0x300] sm:$0xff] %v1467_v32  ;;  %1470 = vst [vmem:[%s10215_s16 + $0x308] sm:$0xff] %v1469_v33  ;;  %v1473_v35 = vld [vmem:[%s10210_s15 + $0x630] sm:$0xff] }
  0x48   : > { %1472 = vst [vmem:[%s10215_s16 + $0x310] sm:$0xff] %v1471_v34  ;;  %v1475_v36 = vld [vmem:[%s10210_s15 + $0x640] sm:$0xff]  ;;  %v1477_v37 = vld [vmem:[%s10210_s15 + $0x650] sm:$0xff]  ;;  %1474 = vst [vmem:[%s10215_s16 + $0x318] sm:$0xff] %v1473_v35 }
  0x49   : > { %1476 = vst [vmem:[%s10215_s16 + $0x320] sm:$0xff] %v1475_v36  ;;  %1478 = vst [vmem:[%s10215_s16 + $0x328] sm:$0xff] %v1477_v37  ;;  %v1479_v38 = vld [vmem:[%s10210_s15 + $0x660] sm:$0xff]  ;;  %v1481_v39 = vld [vmem:[%s10210_s15 + $0x670] sm:$0xff] }
  0x4a   : > { %v1483_v40 = vld [vmem:[%s10210_s15 + $0x680] sm:$0xff]  ;;  %1480 = vst [vmem:[%s10215_s16 + $0x330] sm:$0xff] %v1479_v38  ;;  %1482 = vst [vmem:[%s10215_s16 + $0x338] sm:$0xff] %v1481_v39  ;;  %v1485_v41 = vld [vmem:[%s10210_s15 + $0x690] sm:$0xff] }
  0x4b   : > { %1484 = vst [vmem:[%s10215_s16 + $0x340] sm:$0xff] %v1483_v40  ;;  %v1487_v42 = vld [vmem:[%s10210_s15 + $0x6a0] sm:$0xff]  ;;  %v1489_v43 = vld [vmem:[%s10210_s15 + $0x6b0] sm:$0xff]  ;;  %1486 = vst [vmem:[%s10215_s16 + $0x348] sm:$0xff] %v1485_v41 }
  0x4c   : > { %1488 = vst [vmem:[%s10215_s16 + $0x350] sm:$0xff] %v1487_v42  ;;  %1490 = vst [vmem:[%s10215_s16 + $0x358] sm:$0xff] %v1489_v43  ;;  %v1491_v44 = vld [vmem:[%s10210_s15 + $0x6c0] sm:$0xff]  ;;  %v1493_v45 = vld [vmem:[%s10210_s15 + $0x6d0] sm:$0xff] }
  0x4d   : > { %v1495_v46 = vld [vmem:[%s10210_s15 + $0x6e0] sm:$0xff]  ;;  %1492 = vst [vmem:[%s10215_s16 + $0x360] sm:$0xff] %v1491_v44  ;;  %1494 = vst [vmem:[%s10215_s16 + $0x368] sm:$0xff] %v1493_v45  ;;  %v1497_v47 = vld [vmem:[%s10210_s15 + $0x6f0] sm:$0xff] }
  0x4e   : > { %1496 = vst [vmem:[%s10215_s16 + $0x370] sm:$0xff] %v1495_v46  ;;  %v1499_v48 = vld [vmem:[%s10210_s15 + $0x700] sm:$0xff]  ;;  %v1501_v49 = vld [vmem:[%s10210_s15 + $0x710] sm:$0xff]  ;;  %1498 = vst [vmem:[%s10215_s16 + $0x378] sm:$0xff] %v1497_v47 }
  0x4f   : > { %1500 = vst [vmem:[%s10215_s16 + $0x380] sm:$0xff] %v1499_v48  ;;  %1502 = vst [vmem:[%s10215_s16 + $0x388] sm:$0xff] %v1501_v49  ;;  %v1503_v50 = vld [vmem:[%s10210_s15 + $0x720] sm:$0xff]  ;;  %v1505_v51 = vld [vmem:[%s10210_s15 + $0x730] sm:$0xff] }
  0x50   : > { %v1507_v52 = vld [vmem:[%s10210_s15 + $0x740] sm:$0xff]  ;;  %1504 = vst [vmem:[%s10215_s16 + $0x390] sm:$0xff] %v1503_v50  ;;  %1506 = vst [vmem:[%s10215_s16 + $0x398] sm:$0xff] %v1505_v51  ;;  %v1509_v53 = vld [vmem:[%s10210_s15 + $0x750] sm:$0xff] }
  0x51   : > { %1508 = vst [vmem:[%s10215_s16 + $0x3a0] sm:$0xff] %v1507_v52  ;;  %v1511_v54 = vld [vmem:[%s10210_s15 + $0x760] sm:$0xff]  ;;  %v1513_v55 = vld [vmem:[%s10210_s15 + $0x770] sm:$0xff]  ;;  %1510 = vst [vmem:[%s10215_s16 + $0x3a8] sm:$0xff] %v1509_v53 }
  0x52   : > { %1512 = vst [vmem:[%s10215_s16 + $0x3b0] sm:$0xff] %v1511_v54  ;;  %1514 = vst [vmem:[%s10215_s16 + $0x3b8] sm:$0xff] %v1513_v55  ;;  %v1515_v56 = vld [vmem:[%s10210_s15 + $0x780] sm:$0xff]  ;;  %v1517_v57 = vld [vmem:[%s10210_s15 + $0x790] sm:$0xff] }
  0x53   : > { %v1519_v58 = vld [vmem:[%s10210_s15 + $0x7a0] sm:$0xff]  ;;  %1516 = vst [vmem:[%s10215_s16 + $0x3c0] sm:$0xff] %v1515_v56  ;;  %1518 = vst [vmem:[%s10215_s16 + $0x3c8] sm:$0xff] %v1517_v57  ;;  %v1521_v59 = vld [vmem:[%s10210_s15 + $0x7b0] sm:$0xff] }
  0x54   : > { %1520 = vst [vmem:[%s10215_s16 + $0x3d0] sm:$0xff] %v1519_v58  ;;  %v1523_v60 = vld [vmem:[%s10210_s15 + $0x7c0] sm:$0xff]  ;;  %v1525_v61 = vld [vmem:[%s10210_s15 + $0x7d0] sm:$0xff]  ;;  %1522 = vst [vmem:[%s10215_s16 + $0x3d8] sm:$0xff] %v1521_v59 }
  0x55   : > { %1524 = vst [vmem:[%s10215_s16 + $0x3e0] sm:$0xff] %v1523_v60  ;;  %1526 = vst [vmem:[%s10215_s16 + $0x3e8] sm:$0xff] %v1525_v61  ;;  %v1527_v62 = vld [vmem:[%s10210_s15 + $0x7e0] sm:$0xff]  ;;  %v1529_v63 = vld [vmem:[%s10210_s15 + $0x7f0] sm:$0xff] }
  0x56   : > { %v1531_v0 = vld [vmem:[%s10210_s15 + $0x800] sm:$0xff]  ;;  %1528 = vst [vmem:[%s10215_s16 + $0x3f0] sm:$0xff] %v1527_v62  ;;  %1530 = vst [vmem:[%s10215_s16 + $0x3f8] sm:$0xff] %v1529_v63  ;;  %v1533_v1 = vld [vmem:[%s10210_s15 + $0x810] sm:$0xff] }
  0x57   : > { %1532 = vst [vmem:[%s10215_s16 + $0x400] sm:$0xff] %v1531_v0  ;;  %v1535_v2 = vld [vmem:[%s10210_s15 + $0x820] sm:$0xff]  ;;  %v1537_v3 = vld [vmem:[%s10210_s15 + $0x830] sm:$0xff]  ;;  %1534 = vst [vmem:[%s10215_s16 + $0x408] sm:$0xff] %v1533_v1 }
  0x58   : > { %1536 = vst [vmem:[%s10215_s16 + $0x410] sm:$0xff] %v1535_v2  ;;  %1538 = vst [vmem:[%s10215_s16 + $0x418] sm:$0xff] %v1537_v3  ;;  %v1539_v4 = vld [vmem:[%s10210_s15 + $0x840] sm:$0xff]  ;;  %v1541_v5 = vld [vmem:[%s10210_s15 + $0x850] sm:$0xff] }
  0x59   : > { %v1543_v6 = vld [vmem:[%s10210_s15 + $0x860] sm:$0xff]  ;;  %1540 = vst [vmem:[%s10215_s16 + $0x420] sm:$0xff] %v1539_v4  ;;  %1542 = vst [vmem:[%s10215_s16 + $0x428] sm:$0xff] %v1541_v5  ;;  %v1545_v7 = vld [vmem:[%s10210_s15 + $0x870] sm:$0xff] }
  0x5a   : > { %1544 = vst [vmem:[%s10215_s16 + $0x430] sm:$0xff] %v1543_v6  ;;  %v1547_v8 = vld [vmem:[%s10210_s15 + $0x880] sm:$0xff]  ;;  %v1549_v9 = vld [vmem:[%s10210_s15 + $0x890] sm:$0xff]  ;;  %1546 = vst [vmem:[%s10215_s16 + $0x438] sm:$0xff] %v1545_v7 }
  0x5b   : > { %1548 = vst [vmem:[%s10215_s16 + $0x440] sm:$0xff] %v1547_v8  ;;  %1550 = vst [vmem:[%s10215_s16 + $0x448] sm:$0xff] %v1549_v9  ;;  %v1551_v10 = vld [vmem:[%s10210_s15 + $0x8a0] sm:$0xff]  ;;  %v1553_v11 = vld [vmem:[%s10210_s15 + $0x8b0] sm:$0xff] }
  0x5c   : > { %v1555_v12 = vld [vmem:[%s10210_s15 + $0x8c0] sm:$0xff]  ;;  %1552 = vst [vmem:[%s10215_s16 + $0x450] sm:$0xff] %v1551_v10  ;;  %1554 = vst [vmem:[%s10215_s16 + $0x458] sm:$0xff] %v1553_v11  ;;  %v1557_v13 = vld [vmem:[%s10210_s15 + $0x8d0] sm:$0xff] }
  0x5d   : > { %1556 = vst [vmem:[%s10215_s16 + $0x460] sm:$0xff] %v1555_v12  ;;  %v1559_v14 = vld [vmem:[%s10210_s15 + $0x8e0] sm:$0xff]  ;;  %v1561_v15 = vld [vmem:[%s10210_s15 + $0x8f0] sm:$0xff]  ;;  %1558 = vst [vmem:[%s10215_s16 + $0x468] sm:$0xff] %v1557_v13 }
  0x5e   : > { %1560 = vst [vmem:[%s10215_s16 + $0x470] sm:$0xff] %v1559_v14  ;;  %1562 = vst [vmem:[%s10215_s16 + $0x478] sm:$0xff] %v1561_v15  ;;  %v1563_v16 = vld [vmem:[%s10210_s15 + $0x900] sm:$0xff]  ;;  %v1565_v17 = vld [vmem:[%s10210_s15 + $0x910] sm:$0xff] }
  0x5f   : > { %v1567_v18 = vld [vmem:[%s10210_s15 + $0x920] sm:$0xff]  ;;  %1564 = vst [vmem:[%s10215_s16 + $0x480] sm:$0xff] %v1563_v16  ;;  %1566 = vst [vmem:[%s10215_s16 + $0x488] sm:$0xff] %v1565_v17  ;;  %v1569_v19 = vld [vmem:[%s10210_s15 + $0x930] sm:$0xff] }
  0x60   : > { %1568 = vst [vmem:[%s10215_s16 + $0x490] sm:$0xff] %v1567_v18  ;;  %v1571_v20 = vld [vmem:[%s10210_s15 + $0x940] sm:$0xff]  ;;  %v1573_v21 = vld [vmem:[%s10210_s15 + $0x950] sm:$0xff]  ;;  %1570 = vst [vmem:[%s10215_s16 + $0x498] sm:$0xff] %v1569_v19 }
  0x61   : > { %1572 = vst [vmem:[%s10215_s16 + $0x4a0] sm:$0xff] %v1571_v20  ;;  %1574 = vst [vmem:[%s10215_s16 + $0x4a8] sm:$0xff] %v1573_v21  ;;  %v1575_v22 = vld [vmem:[%s10210_s15 + $0x960] sm:$0xff]  ;;  %v1577_v23 = vld [vmem:[%s10210_s15 + $0x970] sm:$0xff] }
  0x62   : > { %v1579_v24 = vld [vmem:[%s10210_s15 + $0x980] sm:$0xff]  ;;  %1576 = vst [vmem:[%s10215_s16 + $0x4b0] sm:$0xff] %v1575_v22  ;;  %1578 = vst [vmem:[%s10215_s16 + $0x4b8] sm:$0xff] %v1577_v23  ;;  %v1581_v25 = vld [vmem:[%s10210_s15 + $0x990] sm:$0xff] }
  0x63   : > { %1580 = vst [vmem:[%s10215_s16 + $0x4c0] sm:$0xff] %v1579_v24  ;;  %v1583_v26 = vld [vmem:[%s10210_s15 + $0x9a0] sm:$0xff]  ;;  %v1585_v27 = vld [vmem:[%s10210_s15 + $0x9b0] sm:$0xff]  ;;  %1582 = vst [vmem:[%s10215_s16 + $0x4c8] sm:$0xff] %v1581_v25 }
  0x64   : > { %1584 = vst [vmem:[%s10215_s16 + $0x4d0] sm:$0xff] %v1583_v26  ;;  %1586 = vst [vmem:[%s10215_s16 + $0x4d8] sm:$0xff] %v1585_v27  ;;  %v1587_v28 = vld [vmem:[%s10210_s15 + $0x9c0] sm:$0xff]  ;;  %v1589_v29 = vld [vmem:[%s10210_s15 + $0x9d0] sm:$0xff] }
  0x65   : > { %v1591_v30 = vld [vmem:[%s10210_s15 + $0x9e0] sm:$0xff]  ;;  %1588 = vst [vmem:[%s10215_s16 + $0x4e0] sm:$0xff] %v1587_v28  ;;  %1590 = vst [vmem:[%s10215_s16 + $0x4e8] sm:$0xff] %v1589_v29  ;;  %v1593_v31 = vld [vmem:[%s10210_s15 + $0x9f0] sm:$0xff] }
  0x66   : > { %1592 = vst [vmem:[%s10215_s16 + $0x4f0] sm:$0xff] %v1591_v30  ;;  %v1595_v32 = vld [vmem:[%s10210_s15 + $0xa00] sm:$0xff]  ;;  %v1597_v33 = vld [vmem:[%s10210_s15 + $0xa10] sm:$0xff]  ;;  %1594 = vst [vmem:[%s10215_s16 + $0x4f8] sm:$0xff] %v1593_v31 }
  0x67   : > { %1596 = vst [vmem:[%s10215_s16 + $0x500] sm:$0xff] %v1595_v32  ;;  %1598 = vst [vmem:[%s10215_s16 + $0x508] sm:$0xff] %v1597_v33  ;;  %v1599_v34 = vld [vmem:[%s10210_s15 + $0xa20] sm:$0xff]  ;;  %v1601_v35 = vld [vmem:[%s10210_s15 + $0xa30] sm:$0xff] }
  0x68   : > { %v1603_v36 = vld [vmem:[%s10210_s15 + $0xa40] sm:$0xff]  ;;  %1600 = vst [vmem:[%s10215_s16 + $0x510] sm:$0xff] %v1599_v34  ;;  %1602 = vst [vmem:[%s10215_s16 + $0x518] sm:$0xff] %v1601_v35  ;;  %v1605_v37 = vld [vmem:[%s10210_s15 + $0xa50] sm:$0xff] }
  0x69   : > { %1604 = vst [vmem:[%s10215_s16 + $0x520] sm:$0xff] %v1603_v36  ;;  %v1607_v38 = vld [vmem:[%s10210_s15 + $0xa60] sm:$0xff]  ;;  %v1609_v39 = vld [vmem:[%s10210_s15 + $0xa70] sm:$0xff]  ;;  %1606 = vst [vmem:[%s10215_s16 + $0x528] sm:$0xff] %v1605_v37 }
  0x6a   : > { %1608 = vst [vmem:[%s10215_s16 + $0x530] sm:$0xff] %v1607_v38  ;;  %1610 = vst [vmem:[%s10215_s16 + $0x538] sm:$0xff] %v1609_v39  ;;  %v1611_v40 = vld [vmem:[%s10210_s15 + $0xa80] sm:$0xff]  ;;  %v1613_v41 = vld [vmem:[%s10210_s15 + $0xa90] sm:$0xff] }
  0x6b   : > { %v1615_v42 = vld [vmem:[%s10210_s15 + $0xaa0] sm:$0xff]  ;;  %1612 = vst [vmem:[%s10215_s16 + $0x540] sm:$0xff] %v1611_v40  ;;  %1614 = vst [vmem:[%s10215_s16 + $0x548] sm:$0xff] %v1613_v41  ;;  %v1617_v43 = vld [vmem:[%s10210_s15 + $0xab0] sm:$0xff] }
  0x6c   : > { %1616 = vst [vmem:[%s10215_s16 + $0x550] sm:$0xff] %v1615_v42  ;;  %v1619_v44 = vld [vmem:[%s10210_s15 + $0xac0] sm:$0xff]  ;;  %v1621_v45 = vld [vmem:[%s10210_s15 + $0xad0] sm:$0xff]  ;;  %1618 = vst [vmem:[%s10215_s16 + $0x558] sm:$0xff] %v1617_v43 }
  0x6d   : > { %1620 = vst [vmem:[%s10215_s16 + $0x560] sm:$0xff] %v1619_v44  ;;  %1622 = vst [vmem:[%s10215_s16 + $0x568] sm:$0xff] %v1621_v45  ;;  %v1623_v46 = vld [vmem:[%s10210_s15 + $0xae0] sm:$0xff]  ;;  %v1625_v47 = vld [vmem:[%s10210_s15 + $0xaf0] sm:$0xff] }
  0x6e   : > { %v1627_v48 = vld [vmem:[%s10210_s15 + $0xb00] sm:$0xff]  ;;  %1624 = vst [vmem:[%s10215_s16 + $0x570] sm:$0xff] %v1623_v46  ;;  %1626 = vst [vmem:[%s10215_s16 + $0x578] sm:$0xff] %v1625_v47  ;;  %v1629_v49 = vld [vmem:[%s10210_s15 + $0xb10] sm:$0xff] }
  0x6f   : > { %1628 = vst [vmem:[%s10215_s16 + $0x580] sm:$0xff] %v1627_v48  ;;  %v1631_v50 = vld [vmem:[%s10210_s15 + $0xb20] sm:$0xff]  ;;  %v1633_v51 = vld [vmem:[%s10210_s15 + $0xb30] sm:$0xff]  ;;  %1630 = vst [vmem:[%s10215_s16 + $0x588] sm:$0xff] %v1629_v49 }
  0x70   : > { %1632 = vst [vmem:[%s10215_s16 + $0x590] sm:$0xff] %v1631_v50  ;;  %1634 = vst [vmem:[%s10215_s16 + $0x598] sm:$0xff] %v1633_v51  ;;  %v1635_v52 = vld [vmem:[%s10210_s15 + $0xb40] sm:$0xff]  ;;  %v1637_v53 = vld [vmem:[%s10210_s15 + $0xb50] sm:$0xff] }
  0x71   : > { %v1639_v54 = vld [vmem:[%s10210_s15 + $0xb60] sm:$0xff]  ;;  %1636 = vst [vmem:[%s10215_s16 + $0x5a0] sm:$0xff] %v1635_v52  ;;  %1638 = vst [vmem:[%s10215_s16 + $0x5a8] sm:$0xff] %v1637_v53  ;;  %v1641_v55 = vld [vmem:[%s10210_s15 + $0xb70] sm:$0xff] }
  0x72   : > { %1640 = vst [vmem:[%s10215_s16 + $0x5b0] sm:$0xff] %v1639_v54  ;;  %v1643_v56 = vld [vmem:[%s10210_s15 + $0xb80] sm:$0xff]  ;;  %v1645_v57 = vld [vmem:[%s10210_s15 + $0xb90] sm:$0xff]  ;;  %1642 = vst [vmem:[%s10215_s16 + $0x5b8] sm:$0xff] %v1641_v55 }
  0x73   : > { %1644 = vst [vmem:[%s10215_s16 + $0x5c0] sm:$0xff] %v1643_v56  ;;  %1646 = vst [vmem:[%s10215_s16 + $0x5c8] sm:$0xff] %v1645_v57  ;;  %v1647_v58 = vld [vmem:[%s10210_s15 + $0xba0] sm:$0xff]  ;;  %v1649_v59 = vld [vmem:[%s10210_s15 + $0xbb0] sm:$0xff] }
  0x74   : > { %v1651_v60 = vld [vmem:[%s10210_s15 + $0xbc0] sm:$0xff]  ;;  %1648 = vst [vmem:[%s10215_s16 + $0x5d0] sm:$0xff] %v1647_v58  ;;  %1650 = vst [vmem:[%s10215_s16 + $0x5d8] sm:$0xff] %v1649_v59  ;;  %v1653_v61 = vld [vmem:[%s10210_s15 + $0xbd0] sm:$0xff] }
  0x75   : > { %1652 = vst [vmem:[%s10215_s16 + $0x5e0] sm:$0xff] %v1651_v60  ;;  %v1655_v62 = vld [vmem:[%s10210_s15 + $0xbe0] sm:$0xff]  ;;  %v1657_v63 = vld [vmem:[%s10210_s15 + $0xbf0] sm:$0xff]  ;;  %1654 = vst [vmem:[%s10215_s16 + $0x5e8] sm:$0xff] %v1653_v61 }
  0x76   : > { %1656 = vst [vmem:[%s10215_s16 + $0x5f0] sm:$0xff] %v1655_v62  ;;  %1658 = vst [vmem:[%s10215_s16 + $0x5f8] sm:$0xff] %v1657_v63  ;;  %v1659_v0 = vld [vmem:[%s10210_s15 + $0xc00] sm:$0xff]  ;;  %v1661_v1 = vld [vmem:[%s10210_s15 + $0xc10] sm:$0xff] }
  0x77   : > { %v1663_v2 = vld [vmem:[%s10210_s15 + $0xc20] sm:$0xff]  ;;  %1660 = vst [vmem:[%s10215_s16 + $0x600] sm:$0xff] %v1659_v0  ;;  %1662 = vst [vmem:[%s10215_s16 + $0x608] sm:$0xff] %v1661_v1  ;;  %v1665_v3 = vld [vmem:[%s10210_s15 + $0xc30] sm:$0xff] }
  0x78   : > { %1664 = vst [vmem:[%s10215_s16 + $0x610] sm:$0xff] %v1663_v2  ;;  %v1667_v4 = vld [vmem:[%s10210_s15 + $0xc40] sm:$0xff]  ;;  %v1669_v5 = vld [vmem:[%s10210_s15 + $0xc50] sm:$0xff]  ;;  %1666 = vst [vmem:[%s10215_s16 + $0x618] sm:$0xff] %v1665_v3 }
  0x79   : > { %1668 = vst [vmem:[%s10215_s16 + $0x620] sm:$0xff] %v1667_v4  ;;  %1670 = vst [vmem:[%s10215_s16 + $0x628] sm:$0xff] %v1669_v5  ;;  %v1671_v6 = vld [vmem:[%s10210_s15 + $0xc60] sm:$0xff]  ;;  %v1673_v7 = vld [vmem:[%s10210_s15 + $0xc70] sm:$0xff] }
  0x7a   : > { %v1675_v8 = vld [vmem:[%s10210_s15 + $0xc80] sm:$0xff]  ;;  %1672 = vst [vmem:[%s10215_s16 + $0x630] sm:$0xff] %v1671_v6  ;;  %1674 = vst [vmem:[%s10215_s16 + $0x638] sm:$0xff] %v1673_v7  ;;  %v1677_v9 = vld [vmem:[%s10210_s15 + $0xc90] sm:$0xff] }
  0x7b   : > { %1676 = vst [vmem:[%s10215_s16 + $0x640] sm:$0xff] %v1675_v8  ;;  %v1679_v10 = vld [vmem:[%s10210_s15 + $0xca0] sm:$0xff]  ;;  %v1681_v11 = vld [vmem:[%s10210_s15 + $0xcb0] sm:$0xff]  ;;  %1678 = vst [vmem:[%s10215_s16 + $0x648] sm:$0xff] %v1677_v9 }
  0x7c   : > { %1680 = vst [vmem:[%s10215_s16 + $0x650] sm:$0xff] %v1679_v10  ;;  %1682 = vst [vmem:[%s10215_s16 + $0x658] sm:$0xff] %v1681_v11  ;;  %v1683_v12 = vld [vmem:[%s10210_s15 + $0xcc0] sm:$0xff]  ;;  %v1685_v13 = vld [vmem:[%s10210_s15 + $0xcd0] sm:$0xff] }
  0x7d   : > { %v1687_v14 = vld [vmem:[%s10210_s15 + $0xce0] sm:$0xff]  ;;  %1684 = vst [vmem:[%s10215_s16 + $0x660] sm:$0xff] %v1683_v12  ;;  %1686 = vst [vmem:[%s10215_s16 + $0x668] sm:$0xff] %v1685_v13  ;;  %v1689_v15 = vld [vmem:[%s10210_s15 + $0xcf0] sm:$0xff] }
  0x7e   : > { %1688 = vst [vmem:[%s10215_s16 + $0x670] sm:$0xff] %v1687_v14  ;;  %v1691_v16 = vld [vmem:[%s10210_s15 + $0xd00] sm:$0xff]  ;;  %v1693_v17 = vld [vmem:[%s10210_s15 + $0xd10] sm:$0xff]  ;;  %1690 = vst [vmem:[%s10215_s16 + $0x678] sm:$0xff] %v1689_v15 }
  0x7f   : > { %1692 = vst [vmem:[%s10215_s16 + $0x680] sm:$0xff] %v1691_v16  ;;  %1694 = vst [vmem:[%s10215_s16 + $0x688] sm:$0xff] %v1693_v17  ;;  %v1695_v18 = vld [vmem:[%s10210_s15 + $0xd20] sm:$0xff]  ;;  %v1697_v19 = vld [vmem:[%s10210_s15 + $0xd30] sm:$0xff] }
  0x80   : > { %v1699_v20 = vld [vmem:[%s10210_s15 + $0xd40] sm:$0xff]  ;;  %1696 = vst [vmem:[%s10215_s16 + $0x690] sm:$0xff] %v1695_v18  ;;  %1698 = vst [vmem:[%s10215_s16 + $0x698] sm:$0xff] %v1697_v19  ;;  %v1701_v21 = vld [vmem:[%s10210_s15 + $0xd50] sm:$0xff] }
  0x81   : > { %1700 = vst [vmem:[%s10215_s16 + $0x6a0] sm:$0xff] %v1699_v20  ;;  %v1703_v22 = vld [vmem:[%s10210_s15 + $0xd60] sm:$0xff]  ;;  %v1705_v23 = vld [vmem:[%s10210_s15 + $0xd70] sm:$0xff]  ;;  %1702 = vst [vmem:[%s10215_s16 + $0x6a8] sm:$0xff] %v1701_v21 }
  0x82   : > { %1704 = vst [vmem:[%s10215_s16 + $0x6b0] sm:$0xff] %v1703_v22  ;;  %1706 = vst [vmem:[%s10215_s16 + $0x6b8] sm:$0xff] %v1705_v23  ;;  %v1707_v24 = vld [vmem:[%s10210_s15 + $0xd80] sm:$0xff]  ;;  %v1709_v25 = vld [vmem:[%s10210_s15 + $0xd90] sm:$0xff] }
  0x83   : > { %v1711_v26 = vld [vmem:[%s10210_s15 + $0xda0] sm:$0xff]  ;;  %1708 = vst [vmem:[%s10215_s16 + $0x6c0] sm:$0xff] %v1707_v24  ;;  %1710 = vst [vmem:[%s10215_s16 + $0x6c8] sm:$0xff] %v1709_v25  ;;  %v1713_v27 = vld [vmem:[%s10210_s15 + $0xdb0] sm:$0xff] }
  0x84   : > { %1712 = vst [vmem:[%s10215_s16 + $0x6d0] sm:$0xff] %v1711_v26  ;;  %v1715_v28 = vld [vmem:[%s10210_s15 + $0xdc0] sm:$0xff]  ;;  %v1717_v29 = vld [vmem:[%s10210_s15 + $0xdd0] sm:$0xff]  ;;  %1714 = vst [vmem:[%s10215_s16 + $0x6d8] sm:$0xff] %v1713_v27 }
  0x85   : > { %1716 = vst [vmem:[%s10215_s16 + $0x6e0] sm:$0xff] %v1715_v28  ;;  %1718 = vst [vmem:[%s10215_s16 + $0x6e8] sm:$0xff] %v1717_v29  ;;  %v1719_v30 = vld [vmem:[%s10210_s15 + $0xde0] sm:$0xff]  ;;  %v1721_v31 = vld [vmem:[%s10210_s15 + $0xdf0] sm:$0xff] }
  0x86   : > { %v1723_v32 = vld [vmem:[%s10210_s15 + $0xe00] sm:$0xff]  ;;  %1720 = vst [vmem:[%s10215_s16 + $0x6f0] sm:$0xff] %v1719_v30  ;;  %1722 = vst [vmem:[%s10215_s16 + $0x6f8] sm:$0xff] %v1721_v31  ;;  %v1725_v33 = vld [vmem:[%s10210_s15 + $0xe10] sm:$0xff] }
  0x87   : > { %1724 = vst [vmem:[%s10215_s16 + $0x700] sm:$0xff] %v1723_v32  ;;  %v1727_v34 = vld [vmem:[%s10210_s15 + $0xe20] sm:$0xff]  ;;  %v1729_v35 = vld [vmem:[%s10210_s15 + $0xe30] sm:$0xff]  ;;  %1726 = vst [vmem:[%s10215_s16 + $0x708] sm:$0xff] %v1725_v33 }
  0x88   : > { %1728 = vst [vmem:[%s10215_s16 + $0x710] sm:$0xff] %v1727_v34  ;;  %1730 = vst [vmem:[%s10215_s16 + $0x718] sm:$0xff] %v1729_v35  ;;  %v1731_v36 = vld [vmem:[%s10210_s15 + $0xe40] sm:$0xff]  ;;  %v1733_v37 = vld [vmem:[%s10210_s15 + $0xe50] sm:$0xff] }
  0x89   : > { %v1735_v38 = vld [vmem:[%s10210_s15 + $0xe60] sm:$0xff]  ;;  %1732 = vst [vmem:[%s10215_s16 + $0x720] sm:$0xff] %v1731_v36  ;;  %1734 = vst [vmem:[%s10215_s16 + $0x728] sm:$0xff] %v1733_v37  ;;  %v1737_v39 = vld [vmem:[%s10210_s15 + $0xe70] sm:$0xff] }
  0x8a   : > { %1736 = vst [vmem:[%s10215_s16 + $0x730] sm:$0xff] %v1735_v38  ;;  %v1739_v40 = vld [vmem:[%s10210_s15 + $0xe80] sm:$0xff]  ;;  %v1741_v41 = vld [vmem:[%s10210_s15 + $0xe90] sm:$0xff]  ;;  %1738 = vst [vmem:[%s10215_s16 + $0x738] sm:$0xff] %v1737_v39 }
  0x8b   : > { %1740 = vst [vmem:[%s10215_s16 + $0x740] sm:$0xff] %v1739_v40  ;;  %1742 = vst [vmem:[%s10215_s16 + $0x748] sm:$0xff] %v1741_v41  ;;  %v1743_v42 = vld [vmem:[%s10210_s15 + $0xea0] sm:$0xff]  ;;  %v1745_v43 = vld [vmem:[%s10210_s15 + $0xeb0] sm:$0xff] }
  0x8c   : > { %v1747_v44 = vld [vmem:[%s10210_s15 + $0xec0] sm:$0xff]  ;;  %1744 = vst [vmem:[%s10215_s16 + $0x750] sm:$0xff] %v1743_v42  ;;  %1746 = vst [vmem:[%s10215_s16 + $0x758] sm:$0xff] %v1745_v43  ;;  %v1749_v45 = vld [vmem:[%s10210_s15 + $0xed0] sm:$0xff] }
  0x8d   : > { %1748 = vst [vmem:[%s10215_s16 + $0x760] sm:$0xff] %v1747_v44  ;;  %v1751_v46 = vld [vmem:[%s10210_s15 + $0xee0] sm:$0xff]  ;;  %v1753_v47 = vld [vmem:[%s10210_s15 + $0xef0] sm:$0xff]  ;;  %1750 = vst [vmem:[%s10215_s16 + $0x768] sm:$0xff] %v1749_v45 }
  0x8e   : > { %1752 = vst [vmem:[%s10215_s16 + $0x770] sm:$0xff] %v1751_v46  ;;  %1754 = vst [vmem:[%s10215_s16 + $0x778] sm:$0xff] %v1753_v47  ;;  %v1755_v48 = vld [vmem:[%s10210_s15 + $0xf00] sm:$0xff]  ;;  %v1757_v49 = vld [vmem:[%s10210_s15 + $0xf10] sm:$0xff] }
  0x8f   : > { %v1759_v50 = vld [vmem:[%s10210_s15 + $0xf20] sm:$0xff]  ;;  %1756 = vst [vmem:[%s10215_s16 + $0x780] sm:$0xff] %v1755_v48  ;;  %1758 = vst [vmem:[%s10215_s16 + $0x788] sm:$0xff] %v1757_v49  ;;  %v1761_v51 = vld [vmem:[%s10210_s15 + $0xf30] sm:$0xff] }
  0x90   : > { %1760 = vst [vmem:[%s10215_s16 + $0x790] sm:$0xff] %v1759_v50  ;;  %v1763_v52 = vld [vmem:[%s10210_s15 + $0xf40] sm:$0xff]  ;;  %v1765_v53 = vld [vmem:[%s10210_s15 + $0xf50] sm:$0xff]  ;;  %1762 = vst [vmem:[%s10215_s16 + $0x798] sm:$0xff] %v1761_v51 }
  0x91   : > { %1764 = vst [vmem:[%s10215_s16 + $0x7a0] sm:$0xff] %v1763_v52  ;;  %1766 = vst [vmem:[%s10215_s16 + $0x7a8] sm:$0xff] %v1765_v53  ;;  %v1767_v54 = vld [vmem:[%s10210_s15 + $0xf60] sm:$0xff]  ;;  %v1769_v55 = vld [vmem:[%s10210_s15 + $0xf70] sm:$0xff] }
  0x92   : > { %v1771_v56 = vld [vmem:[%s10210_s15 + $0xf80] sm:$0xff]  ;;  %1768 = vst [vmem:[%s10215_s16 + $0x7b0] sm:$0xff] %v1767_v54  ;;  %1770 = vst [vmem:[%s10215_s16 + $0x7b8] sm:$0xff] %v1769_v55  ;;  %v1773_v57 = vld [vmem:[%s10210_s15 + $0xf90] sm:$0xff] }
  0x93   : > { %1772 = vst [vmem:[%s10215_s16 + $0x7c0] sm:$0xff] %v1771_v56  ;;  %v1775_v58 = vld [vmem:[%s10210_s15 + $0xfa0] sm:$0xff]  ;;  %v1777_v59 = vld [vmem:[%s10210_s15 + $0xfb0] sm:$0xff]  ;;  %1774 = vst [vmem:[%s10215_s16 + $0x7c8] sm:$0xff] %v1773_v57 }
  0x94   : > { %1776 = vst [vmem:[%s10215_s16 + $0x7d0] sm:$0xff] %v1775_v58  ;;  %1778 = vst [vmem:[%s10215_s16 + $0x7d8] sm:$0xff] %v1777_v59  ;;  %v1779_v60 = vld [vmem:[%s10210_s15 + $0xfc0] sm:$0xff]  ;;  %v1781_v61 = vld [vmem:[%s10210_s15 + $0xfd0] sm:$0xff] }
  0x95   : > { %v1783_v62 = vld [vmem:[%s10210_s15 + $0xfe0] sm:$0xff]  ;;  %1780 = vst [vmem:[%s10215_s16 + $0x7e0] sm:$0xff] %v1779_v60  ;;  %1782 = vst [vmem:[%s10215_s16 + $0x7e8] sm:$0xff] %v1781_v61  ;;  %v1785_v63 = vld [vmem:[%s10210_s15 + $0xff0] sm:$0xff] }
  0x96   : > { %1784 = vst [vmem:[%s10215_s16 + $0x7f0] sm:$0xff] %v1783_v62  ;;  %v1787_v0 = vld [vmem:[%s10210_s15 + $0x1000] sm:$0xff]  ;;  %v1789_v1 = vld [vmem:[%s10210_s15 + $0x1010] sm:$0xff]  ;;  %1786 = vst [vmem:[%s10215_s16 + $0x7f8] sm:$0xff] %v1785_v63 }
  0x97   : > { %1788 = vst [vmem:[%s10215_s16 + $0x800] sm:$0xff] %v1787_v0  ;;  %1790 = vst [vmem:[%s10215_s16 + $0x808] sm:$0xff] %v1789_v1  ;;  %v1791_v2 = vld [vmem:[%s10210_s15 + $0x1020] sm:$0xff]  ;;  %v1793_v3 = vld [vmem:[%s10210_s15 + $0x1030] sm:$0xff] }
  0x98   : > { %v1795_v4 = vld [vmem:[%s10210_s15 + $0x1040] sm:$0xff]  ;;  %1792 = vst [vmem:[%s10215_s16 + $0x810] sm:$0xff] %v1791_v2  ;;  %1794 = vst [vmem:[%s10215_s16 + $0x818] sm:$0xff] %v1793_v3  ;;  %v1797_v5 = vld [vmem:[%s10210_s15 + $0x1050] sm:$0xff] }
  0x99   : > { %1796 = vst [vmem:[%s10215_s16 + $0x820] sm:$0xff] %v1795_v4  ;;  %v1799_v6 = vld [vmem:[%s10210_s15 + $0x1060] sm:$0xff]  ;;  %v1801_v7 = vld [vmem:[%s10210_s15 + $0x1070] sm:$0xff]  ;;  %1798 = vst [vmem:[%s10215_s16 + $0x828] sm:$0xff] %v1797_v5 }
  0x9a   : > { %1800 = vst [vmem:[%s10215_s16 + $0x830] sm:$0xff] %v1799_v6  ;;  %1802 = vst [vmem:[%s10215_s16 + $0x838] sm:$0xff] %v1801_v7  ;;  %v1803_v8 = vld [vmem:[%s10210_s15 + $0x1080] sm:$0xff]  ;;  %v1805_v9 = vld [vmem:[%s10210_s15 + $0x1090] sm:$0xff] }
  0x9b   : > { %v1807_v10 = vld [vmem:[%s10210_s15 + $0x10a0] sm:$0xff]  ;;  %1804 = vst [vmem:[%s10215_s16 + $0x840] sm:$0xff] %v1803_v8  ;;  %1806 = vst [vmem:[%s10215_s16 + $0x848] sm:$0xff] %v1805_v9  ;;  %v1809_v11 = vld [vmem:[%s10210_s15 + $0x10b0] sm:$0xff] }
  0x9c   : > { %1808 = vst [vmem:[%s10215_s16 + $0x850] sm:$0xff] %v1807_v10  ;;  %v1811_v12 = vld [vmem:[%s10210_s15 + $0x10c0] sm:$0xff]  ;;  %v1813_v13 = vld [vmem:[%s10210_s15 + $0x10d0] sm:$0xff]  ;;  %1810 = vst [vmem:[%s10215_s16 + $0x858] sm:$0xff] %v1809_v11 }
  0x9d   : > { %1812 = vst [vmem:[%s10215_s16 + $0x860] sm:$0xff] %v1811_v12  ;;  %1814 = vst [vmem:[%s10215_s16 + $0x868] sm:$0xff] %v1813_v13  ;;  %v1815_v14 = vld [vmem:[%s10210_s15 + $0x10e0] sm:$0xff]  ;;  %v1817_v15 = vld [vmem:[%s10210_s15 + $0x10f0] sm:$0xff] }
  0x9e   : > { %v1819_v16 = vld [vmem:[%s10210_s15 + $0x1100] sm:$0xff]  ;;  %1816 = vst [vmem:[%s10215_s16 + $0x870] sm:$0xff] %v1815_v14  ;;  %1818 = vst [vmem:[%s10215_s16 + $0x878] sm:$0xff] %v1817_v15  ;;  %v1821_v17 = vld [vmem:[%s10210_s15 + $0x1110] sm:$0xff] }
  0x9f   : > { %1820 = vst [vmem:[%s10215_s16 + $0x880] sm:$0xff] %v1819_v16  ;;  %v1823_v18 = vld [vmem:[%s10210_s15 + $0x1120] sm:$0xff]  ;;  %v1825_v19 = vld [vmem:[%s10210_s15 + $0x1130] sm:$0xff]  ;;  %1822 = vst [vmem:[%s10215_s16 + $0x888] sm:$0xff] %v1821_v17 }
  0xa0   : > { %1824 = vst [vmem:[%s10215_s16 + $0x890] sm:$0xff] %v1823_v18  ;;  %1826 = vst [vmem:[%s10215_s16 + $0x898] sm:$0xff] %v1825_v19  ;;  %v1827_v20 = vld [vmem:[%s10210_s15 + $0x1140] sm:$0xff]  ;;  %v1829_v21 = vld [vmem:[%s10210_s15 + $0x1150] sm:$0xff] }
  0xa1   : > { %v1831_v22 = vld [vmem:[%s10210_s15 + $0x1160] sm:$0xff]  ;;  %1828 = vst [vmem:[%s10215_s16 + $0x8a0] sm:$0xff] %v1827_v20  ;;  %1830 = vst [vmem:[%s10215_s16 + $0x8a8] sm:$0xff] %v1829_v21  ;;  %v1833_v23 = vld [vmem:[%s10210_s15 + $0x1170] sm:$0xff] }
  0xa2   : > { %1832 = vst [vmem:[%s10215_s16 + $0x8b0] sm:$0xff] %v1831_v22  ;;  %v1835_v24 = vld [vmem:[%s10210_s15 + $0x1180] sm:$0xff]  ;;  %v1837_v25 = vld [vmem:[%s10210_s15 + $0x1190] sm:$0xff]  ;;  %1834 = vst [vmem:[%s10215_s16 + $0x8b8] sm:$0xff] %v1833_v23 }
  0xa3   : > { %1836 = vst [vmem:[%s10215_s16 + $0x8c0] sm:$0xff] %v1835_v24  ;;  %1838 = vst [vmem:[%s10215_s16 + $0x8c8] sm:$0xff] %v1837_v25  ;;  %v1839_v26 = vld [vmem:[%s10210_s15 + $0x11a0] sm:$0xff]  ;;  %v1841_v27 = vld [vmem:[%s10210_s15 + $0x11b0] sm:$0xff] }
  0xa4   : > { %v1843_v28 = vld [vmem:[%s10210_s15 + $0x11c0] sm:$0xff]  ;;  %1840 = vst [vmem:[%s10215_s16 + $0x8d0] sm:$0xff] %v1839_v26  ;;  %1842 = vst [vmem:[%s10215_s16 + $0x8d8] sm:$0xff] %v1841_v27  ;;  %v1845_v29 = vld [vmem:[%s10210_s15 + $0x11d0] sm:$0xff] }
  0xa5   : > { %1844 = vst [vmem:[%s10215_s16 + $0x8e0] sm:$0xff] %v1843_v28  ;;  %v1847_v30 = vld [vmem:[%s10210_s15 + $0x11e0] sm:$0xff]  ;;  %v1849_v31 = vld [vmem:[%s10210_s15 + $0x11f0] sm:$0xff]  ;;  %1846 = vst [vmem:[%s10215_s16 + $0x8e8] sm:$0xff] %v1845_v29 }
  0xa6   : > { %1848 = vst [vmem:[%s10215_s16 + $0x8f0] sm:$0xff] %v1847_v30  ;;  %1850 = vst [vmem:[%s10215_s16 + $0x8f8] sm:$0xff] %v1849_v31  ;;  %v1851_v32 = vld [vmem:[%s10210_s15 + $0x1200] sm:$0xff]  ;;  %v1853_v33 = vld [vmem:[%s10210_s15 + $0x1210] sm:$0xff] }
  0xa7   : > { %v1855_v34 = vld [vmem:[%s10210_s15 + $0x1220] sm:$0xff]  ;;  %1852 = vst [vmem:[%s10215_s16 + $0x900] sm:$0xff] %v1851_v32  ;;  %1854 = vst [vmem:[%s10215_s16 + $0x908] sm:$0xff] %v1853_v33  ;;  %v1857_v35 = vld [vmem:[%s10210_s15 + $0x1230] sm:$0xff] }
  0xa8   : > { %1856 = vst [vmem:[%s10215_s16 + $0x910] sm:$0xff] %v1855_v34  ;;  %v1859_v36 = vld [vmem:[%s10210_s15 + $0x1240] sm:$0xff]  ;;  %v1861_v37 = vld [vmem:[%s10210_s15 + $0x1250] sm:$0xff]  ;;  %1858 = vst [vmem:[%s10215_s16 + $0x918] sm:$0xff] %v1857_v35 }
  0xa9   : > { %1860 = vst [vmem:[%s10215_s16 + $0x920] sm:$0xff] %v1859_v36  ;;  %1862 = vst [vmem:[%s10215_s16 + $0x928] sm:$0xff] %v1861_v37  ;;  %v1863_v38 = vld [vmem:[%s10210_s15 + $0x1260] sm:$0xff]  ;;  %v1865_v39 = vld [vmem:[%s10210_s15 + $0x1270] sm:$0xff] }
  0xaa   : > { %v1867_v40 = vld [vmem:[%s10210_s15 + $0x1280] sm:$0xff]  ;;  %1864 = vst [vmem:[%s10215_s16 + $0x930] sm:$0xff] %v1863_v38  ;;  %1866 = vst [vmem:[%s10215_s16 + $0x938] sm:$0xff] %v1865_v39  ;;  %v1869_v41 = vld [vmem:[%s10210_s15 + $0x1290] sm:$0xff] }
  0xab   : > { %1868 = vst [vmem:[%s10215_s16 + $0x940] sm:$0xff] %v1867_v40  ;;  %v1871_v42 = vld [vmem:[%s10210_s15 + $0x12a0] sm:$0xff]  ;;  %v1873_v43 = vld [vmem:[%s10210_s15 + $0x12b0] sm:$0xff]  ;;  %1870 = vst [vmem:[%s10215_s16 + $0x948] sm:$0xff] %v1869_v41 }
  0xac   : > { %1872 = vst [vmem:[%s10215_s16 + $0x950] sm:$0xff] %v1871_v42  ;;  %1874 = vst [vmem:[%s10215_s16 + $0x958] sm:$0xff] %v1873_v43  ;;  %v1875_v44 = vld [vmem:[%s10210_s15 + $0x12c0] sm:$0xff]  ;;  %v1877_v45 = vld [vmem:[%s10210_s15 + $0x12d0] sm:$0xff] }
  0xad   : > { %v1879_v46 = vld [vmem:[%s10210_s15 + $0x12e0] sm:$0xff]  ;;  %1876 = vst [vmem:[%s10215_s16 + $0x960] sm:$0xff] %v1875_v44  ;;  %1878 = vst [vmem:[%s10215_s16 + $0x968] sm:$0xff] %v1877_v45  ;;  %v1881_v47 = vld [vmem:[%s10210_s15 + $0x12f0] sm:$0xff] }
  0xae   : > { %1880 = vst [vmem:[%s10215_s16 + $0x970] sm:$0xff] %v1879_v46  ;;  %v1883_v48 = vld [vmem:[%s10210_s15 + $0x1300] sm:$0xff]  ;;  %v1885_v49 = vld [vmem:[%s10210_s15 + $0x1310] sm:$0xff]  ;;  %1882 = vst [vmem:[%s10215_s16 + $0x978] sm:$0xff] %v1881_v47 }
  0xaf   : > { %1884 = vst [vmem:[%s10215_s16 + $0x980] sm:$0xff] %v1883_v48  ;;  %1886 = vst [vmem:[%s10215_s16 + $0x988] sm:$0xff] %v1885_v49  ;;  %v1887_v50 = vld [vmem:[%s10210_s15 + $0x1320] sm:$0xff]  ;;  %v1889_v51 = vld [vmem:[%s10210_s15 + $0x1330] sm:$0xff] }
  0xb0   : > { %v1891_v52 = vld [vmem:[%s10210_s15 + $0x1340] sm:$0xff]  ;;  %1888 = vst [vmem:[%s10215_s16 + $0x990] sm:$0xff] %v1887_v50  ;;  %1890 = vst [vmem:[%s10215_s16 + $0x998] sm:$0xff] %v1889_v51  ;;  %v1893_v53 = vld [vmem:[%s10210_s15 + $0x1350] sm:$0xff] }
  0xb1   : > { %1892 = vst [vmem:[%s10215_s16 + $0x9a0] sm:$0xff] %v1891_v52  ;;  %v1895_v54 = vld [vmem:[%s10210_s15 + $0x1360] sm:$0xff]  ;;  %v1897_v55 = vld [vmem:[%s10210_s15 + $0x1370] sm:$0xff]  ;;  %1894 = vst [vmem:[%s10215_s16 + $0x9a8] sm:$0xff] %v1893_v53 }
  0xb2   : > { %1896 = vst [vmem:[%s10215_s16 + $0x9b0] sm:$0xff] %v1895_v54  ;;  %1898 = vst [vmem:[%s10215_s16 + $0x9b8] sm:$0xff] %v1897_v55  ;;  %v1899_v56 = vld [vmem:[%s10210_s15 + $0x1380] sm:$0xff]  ;;  %v1901_v57 = vld [vmem:[%s10210_s15 + $0x1390] sm:$0xff] }
  0xb3   : > { %v1903_v58 = vld [vmem:[%s10210_s15 + $0x13a0] sm:$0xff]  ;;  %1900 = vst [vmem:[%s10215_s16 + $0x9c0] sm:$0xff] %v1899_v56  ;;  %1902 = vst [vmem:[%s10215_s16 + $0x9c8] sm:$0xff] %v1901_v57  ;;  %v1905_v59 = vld [vmem:[%s10210_s15 + $0x13b0] sm:$0xff] }
  0xb4   : > { %1904 = vst [vmem:[%s10215_s16 + $0x9d0] sm:$0xff] %v1903_v58  ;;  %v1907_v60 = vld [vmem:[%s10210_s15 + $0x13c0] sm:$0xff]  ;;  %v1909_v61 = vld [vmem:[%s10210_s15 + $0x13d0] sm:$0xff]  ;;  %1906 = vst [vmem:[%s10215_s16 + $0x9d8] sm:$0xff] %v1905_v59 }
  0xb5   : > { %1908 = vst [vmem:[%s10215_s16 + $0x9e0] sm:$0xff] %v1907_v60  ;;  %1910 = vst [vmem:[%s10215_s16 + $0x9e8] sm:$0xff] %v1909_v61  ;;  %v1911_v62 = vld [vmem:[%s10210_s15 + $0x13e0] sm:$0xff]  ;;  %v1913_v63 = vld [vmem:[%s10210_s15 + $0x13f0] sm:$0xff] }
  0xb6   : > { %v1915_v0 = vld [vmem:[%s10210_s15 + $0x1400] sm:$0xff]  ;;  %1912 = vst [vmem:[%s10215_s16 + $0x9f0] sm:$0xff] %v1911_v62  ;;  %1914 = vst [vmem:[%s10215_s16 + $0x9f8] sm:$0xff] %v1913_v63  ;;  %v1917_v1 = vld [vmem:[%s10210_s15 + $0x1410] sm:$0xff] }
  0xb7   : > { %1916 = vst [vmem:[%s10215_s16 + $0xa00] sm:$0xff] %v1915_v0  ;;  %v1919_v2 = vld [vmem:[%s10210_s15 + $0x1420] sm:$0xff]  ;;  %v1921_v3 = vld [vmem:[%s10210_s15 + $0x1430] sm:$0xff]  ;;  %1918 = vst [vmem:[%s10215_s16 + $0xa08] sm:$0xff] %v1917_v1 }
  0xb8   : > { %1920 = vst [vmem:[%s10215_s16 + $0xa10] sm:$0xff] %v1919_v2  ;;  %1922 = vst [vmem:[%s10215_s16 + $0xa18] sm:$0xff] %v1921_v3  ;;  %v1923_v4 = vld [vmem:[%s10210_s15 + $0x1440] sm:$0xff]  ;;  %v1925_v5 = vld [vmem:[%s10210_s15 + $0x1450] sm:$0xff] }
  0xb9   : > { %v1927_v6 = vld [vmem:[%s10210_s15 + $0x1460] sm:$0xff]  ;;  %1924 = vst [vmem:[%s10215_s16 + $0xa20] sm:$0xff] %v1923_v4  ;;  %1926 = vst [vmem:[%s10215_s16 + $0xa28] sm:$0xff] %v1925_v5  ;;  %v1929_v7 = vld [vmem:[%s10210_s15 + $0x1470] sm:$0xff] }
  0xba   : > { %1928 = vst [vmem:[%s10215_s16 + $0xa30] sm:$0xff] %v1927_v6  ;;  %v1931_v8 = vld [vmem:[%s10210_s15 + $0x1480] sm:$0xff]  ;;  %v1933_v9 = vld [vmem:[%s10210_s15 + $0x1490] sm:$0xff]  ;;  %1930 = vst [vmem:[%s10215_s16 + $0xa38] sm:$0xff] %v1929_v7 }
  0xbb   : > { %1932 = vst [vmem:[%s10215_s16 + $0xa40] sm:$0xff] %v1931_v8  ;;  %1934 = vst [vmem:[%s10215_s16 + $0xa48] sm:$0xff] %v1933_v9  ;;  %v1935_v10 = vld [vmem:[%s10210_s15 + $0x14a0] sm:$0xff]  ;;  %v1937_v11 = vld [vmem:[%s10210_s15 + $0x14b0] sm:$0xff] }
  0xbc   : > { %v1939_v12 = vld [vmem:[%s10210_s15 + $0x14c0] sm:$0xff]  ;;  %1936 = vst [vmem:[%s10215_s16 + $0xa50] sm:$0xff] %v1935_v10  ;;  %1938 = vst [vmem:[%s10215_s16 + $0xa58] sm:$0xff] %v1937_v11  ;;  %v1941_v13 = vld [vmem:[%s10210_s15 + $0x14d0] sm:$0xff] }
  0xbd   : > { %1940 = vst [vmem:[%s10215_s16 + $0xa60] sm:$0xff] %v1939_v12  ;;  %v1943_v14 = vld [vmem:[%s10210_s15 + $0x14e0] sm:$0xff]  ;;  %v1945_v15 = vld [vmem:[%s10210_s15 + $0x14f0] sm:$0xff]  ;;  %1942 = vst [vmem:[%s10215_s16 + $0xa68] sm:$0xff] %v1941_v13 }
  0xbe   : > { %1944 = vst [vmem:[%s10215_s16 + $0xa70] sm:$0xff] %v1943_v14  ;;  %1946 = vst [vmem:[%s10215_s16 + $0xa78] sm:$0xff] %v1945_v15  ;;  %v1947_v16 = vld [vmem:[%s10210_s15 + $0x1500] sm:$0xff]  ;;  %v1949_v17 = vld [vmem:[%s10210_s15 + $0x1510] sm:$0xff] }
  0xbf   : > { %v1951_v18 = vld [vmem:[%s10210_s15 + $0x1520] sm:$0xff]  ;;  %1948 = vst [vmem:[%s10215_s16 + $0xa80] sm:$0xff] %v1947_v16  ;;  %1950 = vst [vmem:[%s10215_s16 + $0xa88] sm:$0xff] %v1949_v17  ;;  %v1953_v19 = vld [vmem:[%s10210_s15 + $0x1530] sm:$0xff] }
  0xc0   : > { %1952 = vst [vmem:[%s10215_s16 + $0xa90] sm:$0xff] %v1951_v18  ;;  %v1955_v20 = vld [vmem:[%s10210_s15 + $0x1540] sm:$0xff]  ;;  %v1957_v21 = vld [vmem:[%s10210_s15 + $0x1550] sm:$0xff]  ;;  %1954 = vst [vmem:[%s10215_s16 + $0xa98] sm:$0xff] %v1953_v19 }
  0xc1   : > { %1956 = vst [vmem:[%s10215_s16 + $0xaa0] sm:$0xff] %v1955_v20  ;;  %1958 = vst [vmem:[%s10215_s16 + $0xaa8] sm:$0xff] %v1957_v21  ;;  %v1959_v22 = vld [vmem:[%s10210_s15 + $0x1560] sm:$0xff]  ;;  %v1961_v23 = vld [vmem:[%s10210_s15 + $0x1570] sm:$0xff] }
  0xc2   : > { %v1963_v24 = vld [vmem:[%s10210_s15 + $0x1580] sm:$0xff]  ;;  %1960 = vst [vmem:[%s10215_s16 + $0xab0] sm:$0xff] %v1959_v22  ;;  %1962 = vst [vmem:[%s10215_s16 + $0xab8] sm:$0xff] %v1961_v23  ;;  %v1965_v25 = vld [vmem:[%s10210_s15 + $0x1590] sm:$0xff] }
  0xc3   : > { %1964 = vst [vmem:[%s10215_s16 + $0xac0] sm:$0xff] %v1963_v24  ;;  %v1967_v26 = vld [vmem:[%s10210_s15 + $0x15a0] sm:$0xff]  ;;  %v1969_v27 = vld [vmem:[%s10210_s15 + $0x15b0] sm:$0xff]  ;;  %1966 = vst [vmem:[%s10215_s16 + $0xac8] sm:$0xff] %v1965_v25 }
  0xc4   : > { %1968 = vst [vmem:[%s10215_s16 + $0xad0] sm:$0xff] %v1967_v26  ;;  %1970 = vst [vmem:[%s10215_s16 + $0xad8] sm:$0xff] %v1969_v27  ;;  %v1971_v28 = vld [vmem:[%s10210_s15 + $0x15c0] sm:$0xff]  ;;  %v1973_v29 = vld [vmem:[%s10210_s15 + $0x15d0] sm:$0xff] }
  0xc5   : > { %v1975_v30 = vld [vmem:[%s10210_s15 + $0x15e0] sm:$0xff]  ;;  %1972 = vst [vmem:[%s10215_s16 + $0xae0] sm:$0xff] %v1971_v28  ;;  %1974 = vst [vmem:[%s10215_s16 + $0xae8] sm:$0xff] %v1973_v29  ;;  %v1977_v31 = vld [vmem:[%s10210_s15 + $0x15f0] sm:$0xff] }
  0xc6   : > { %1976 = vst [vmem:[%s10215_s16 + $0xaf0] sm:$0xff] %v1975_v30  ;;  %v1979_v32 = vld [vmem:[%s10210_s15 + $0x1600] sm:$0xff]  ;;  %v1981_v33 = vld [vmem:[%s10210_s15 + $0x1610] sm:$0xff]  ;;  %1978 = vst [vmem:[%s10215_s16 + $0xaf8] sm:$0xff] %v1977_v31 }
  0xc7   : > { %1980 = vst [vmem:[%s10215_s16 + $0xb00] sm:$0xff] %v1979_v32  ;;  %1982 = vst [vmem:[%s10215_s16 + $0xb08] sm:$0xff] %v1981_v33  ;;  %v1983_v34 = vld [vmem:[%s10210_s15 + $0x1620] sm:$0xff]  ;;  %v1985_v35 = vld [vmem:[%s10210_s15 + $0x1630] sm:$0xff] }
  0xc8   : > { %v1987_v36 = vld [vmem:[%s10210_s15 + $0x1640] sm:$0xff]  ;;  %1984 = vst [vmem:[%s10215_s16 + $0xb10] sm:$0xff] %v1983_v34  ;;  %1986 = vst [vmem:[%s10215_s16 + $0xb18] sm:$0xff] %v1985_v35  ;;  %v1989_v37 = vld [vmem:[%s10210_s15 + $0x1650] sm:$0xff] }
  0xc9   : > { %1988 = vst [vmem:[%s10215_s16 + $0xb20] sm:$0xff] %v1987_v36  ;;  %v1991_v38 = vld [vmem:[%s10210_s15 + $0x1660] sm:$0xff]  ;;  %v1993_v39 = vld [vmem:[%s10210_s15 + $0x1670] sm:$0xff]  ;;  %1990 = vst [vmem:[%s10215_s16 + $0xb28] sm:$0xff] %v1989_v37 }
  0xca   : > { %1992 = vst [vmem:[%s10215_s16 + $0xb30] sm:$0xff] %v1991_v38  ;;  %1994 = vst [vmem:[%s10215_s16 + $0xb38] sm:$0xff] %v1993_v39  ;;  %v1995_v40 = vld [vmem:[%s10210_s15 + $0x1680] sm:$0xff]  ;;  %v1997_v41 = vld [vmem:[%s10210_s15 + $0x1690] sm:$0xff] }
  0xcb   : > { %v1999_v42 = vld [vmem:[%s10210_s15 + $0x16a0] sm:$0xff]  ;;  %1996 = vst [vmem:[%s10215_s16 + $0xb40] sm:$0xff] %v1995_v40  ;;  %1998 = vst [vmem:[%s10215_s16 + $0xb48] sm:$0xff] %v1997_v41  ;;  %v2001_v43 = vld [vmem:[%s10210_s15 + $0x16b0] sm:$0xff] }
  0xcc   : > { %2000 = vst [vmem:[%s10215_s16 + $0xb50] sm:$0xff] %v1999_v42  ;;  %v2003_v44 = vld [vmem:[%s10210_s15 + $0x16c0] sm:$0xff]  ;;  %v2005_v45 = vld [vmem:[%s10210_s15 + $0x16d0] sm:$0xff]  ;;  %2002 = vst [vmem:[%s10215_s16 + $0xb58] sm:$0xff] %v2001_v43 }
  0xcd   : > { %2004 = vst [vmem:[%s10215_s16 + $0xb60] sm:$0xff] %v2003_v44  ;;  %2006 = vst [vmem:[%s10215_s16 + $0xb68] sm:$0xff] %v2005_v45  ;;  %v2007_v46 = vld [vmem:[%s10210_s15 + $0x16e0] sm:$0xff]  ;;  %v2009_v47 = vld [vmem:[%s10210_s15 + $0x16f0] sm:$0xff] }
  0xce   : > { %v2011_v48 = vld [vmem:[%s10210_s15 + $0x1700] sm:$0xff]  ;;  %2008 = vst [vmem:[%s10215_s16 + $0xb70] sm:$0xff] %v2007_v46  ;;  %2010 = vst [vmem:[%s10215_s16 + $0xb78] sm:$0xff] %v2009_v47  ;;  %v2013_v49 = vld [vmem:[%s10210_s15 + $0x1710] sm:$0xff] }
  0xcf   : > { %2012 = vst [vmem:[%s10215_s16 + $0xb80] sm:$0xff] %v2011_v48  ;;  %v2015_v50 = vld [vmem:[%s10210_s15 + $0x1720] sm:$0xff]  ;;  %v2017_v51 = vld [vmem:[%s10210_s15 + $0x1730] sm:$0xff]  ;;  %2014 = vst [vmem:[%s10215_s16 + $0xb88] sm:$0xff] %v2013_v49 }
  0xd0   : > { %2016 = vst [vmem:[%s10215_s16 + $0xb90] sm:$0xff] %v2015_v50  ;;  %2018 = vst [vmem:[%s10215_s16 + $0xb98] sm:$0xff] %v2017_v51  ;;  %v2019_v52 = vld [vmem:[%s10210_s15 + $0x1740] sm:$0xff]  ;;  %v2021_v53 = vld [vmem:[%s10210_s15 + $0x1750] sm:$0xff] }
  0xd1   : > { %v2023_v54 = vld [vmem:[%s10210_s15 + $0x1760] sm:$0xff]  ;;  %2020 = vst [vmem:[%s10215_s16 + $0xba0] sm:$0xff] %v2019_v52  ;;  %2022 = vst [vmem:[%s10215_s16 + $0xba8] sm:$0xff] %v2021_v53  ;;  %v2025_v55 = vld [vmem:[%s10210_s15 + $0x1770] sm:$0xff] }
  0xd2   : > { %2024 = vst [vmem:[%s10215_s16 + $0xbb0] sm:$0xff] %v2023_v54  ;;  %v2027_v56 = vld [vmem:[%s10210_s15 + $0x1780] sm:$0xff]  ;;  %v2029_v57 = vld [vmem:[%s10210_s15 + $0x1790] sm:$0xff]  ;;  %2026 = vst [vmem:[%s10215_s16 + $0xbb8] sm:$0xff] %v2025_v55 }
  0xd3   : > { %2028 = vst [vmem:[%s10215_s16 + $0xbc0] sm:$0xff] %v2027_v56  ;;  %2030 = vst [vmem:[%s10215_s16 + $0xbc8] sm:$0xff] %v2029_v57  ;;  %v2031_v58 = vld [vmem:[%s10210_s15 + $0x17a0] sm:$0xff]  ;;  %v2033_v59 = vld [vmem:[%s10210_s15 + $0x17b0] sm:$0xff] }
  0xd4   : > { %v2035_v60 = vld [vmem:[%s10210_s15 + $0x17c0] sm:$0xff]  ;;  %2032 = vst [vmem:[%s10215_s16 + $0xbd0] sm:$0xff] %v2031_v58  ;;  %2034 = vst [vmem:[%s10215_s16 + $0xbd8] sm:$0xff] %v2033_v59  ;;  %v2037_v61 = vld [vmem:[%s10210_s15 + $0x17d0] sm:$0xff] }
  0xd5   : > { %2036 = vst [vmem:[%s10215_s16 + $0xbe0] sm:$0xff] %v2035_v60  ;;  %v2039_v62 = vld [vmem:[%s10210_s15 + $0x17e0] sm:$0xff]  ;;  %v2041_v63 = vld [vmem:[%s10210_s15 + $0x17f0] sm:$0xff]  ;;  %2038 = vst [vmem:[%s10215_s16 + $0xbe8] sm:$0xff] %v2037_v61 }
  0xd6   : > { %2040 = vst [vmem:[%s10215_s16 + $0xbf0] sm:$0xff] %v2039_v62  ;;  %2042 = vst [vmem:[%s10215_s16 + $0xbf8] sm:$0xff] %v2041_v63  ;;  %v2043_v0 = vld [vmem:[%s10210_s15 + $0x1800] sm:$0xff]  ;;  %v2045_v1 = vld [vmem:[%s10210_s15 + $0x1810] sm:$0xff] }
  0xd7   : > { %v2047_v2 = vld [vmem:[%s10210_s15 + $0x1820] sm:$0xff]  ;;  %2044 = vst [vmem:[%s10215_s16 + $0xc00] sm:$0xff] %v2043_v0  ;;  %2046 = vst [vmem:[%s10215_s16 + $0xc08] sm:$0xff] %v2045_v1  ;;  %v2049_v3 = vld [vmem:[%s10210_s15 + $0x1830] sm:$0xff] }
  0xd8   : > { %2048 = vst [vmem:[%s10215_s16 + $0xc10] sm:$0xff] %v2047_v2  ;;  %v2051_v4 = vld [vmem:[%s10210_s15 + $0x1840] sm:$0xff]  ;;  %v2053_v5 = vld [vmem:[%s10210_s15 + $0x1850] sm:$0xff]  ;;  %2050 = vst [vmem:[%s10215_s16 + $0xc18] sm:$0xff] %v2049_v3 }
  0xd9   : > { %2052 = vst [vmem:[%s10215_s16 + $0xc20] sm:$0xff] %v2051_v4  ;;  %2054 = vst [vmem:[%s10215_s16 + $0xc28] sm:$0xff] %v2053_v5  ;;  %v2055_v6 = vld [vmem:[%s10210_s15 + $0x1860] sm:$0xff]  ;;  %v2057_v7 = vld [vmem:[%s10210_s15 + $0x1870] sm:$0xff] }
  0xda   : > { %v2059_v8 = vld [vmem:[%s10210_s15 + $0x1880] sm:$0xff]  ;;  %2056 = vst [vmem:[%s10215_s16 + $0xc30] sm:$0xff] %v2055_v6  ;;  %2058 = vst [vmem:[%s10215_s16 + $0xc38] sm:$0xff] %v2057_v7  ;;  %v2061_v9 = vld [vmem:[%s10210_s15 + $0x1890] sm:$0xff] }
  0xdb   : > { %2060 = vst [vmem:[%s10215_s16 + $0xc40] sm:$0xff] %v2059_v8  ;;  %v2063_v10 = vld [vmem:[%s10210_s15 + $0x18a0] sm:$0xff]  ;;  %v2065_v11 = vld [vmem:[%s10210_s15 + $0x18b0] sm:$0xff]  ;;  %2062 = vst [vmem:[%s10215_s16 + $0xc48] sm:$0xff] %v2061_v9 }
  0xdc   : > { %2064 = vst [vmem:[%s10215_s16 + $0xc50] sm:$0xff] %v2063_v10  ;;  %2066 = vst [vmem:[%s10215_s16 + $0xc58] sm:$0xff] %v2065_v11  ;;  %v2067_v12 = vld [vmem:[%s10210_s15 + $0x18c0] sm:$0xff]  ;;  %v2069_v13 = vld [vmem:[%s10210_s15 + $0x18d0] sm:$0xff] }
  0xdd   : > { %v2071_v14 = vld [vmem:[%s10210_s15 + $0x18e0] sm:$0xff]  ;;  %2068 = vst [vmem:[%s10215_s16 + $0xc60] sm:$0xff] %v2067_v12  ;;  %2070 = vst [vmem:[%s10215_s16 + $0xc68] sm:$0xff] %v2069_v13  ;;  %v2073_v15 = vld [vmem:[%s10210_s15 + $0x18f0] sm:$0xff] }
  0xde   : > { %2072 = vst [vmem:[%s10215_s16 + $0xc70] sm:$0xff] %v2071_v14  ;;  %v2075_v16 = vld [vmem:[%s10210_s15 + $0x1900] sm:$0xff]  ;;  %v2077_v17 = vld [vmem:[%s10210_s15 + $0x1910] sm:$0xff]  ;;  %2074 = vst [vmem:[%s10215_s16 + $0xc78] sm:$0xff] %v2073_v15 }
  0xdf   : > { %2076 = vst [vmem:[%s10215_s16 + $0xc80] sm:$0xff] %v2075_v16  ;;  %2078 = vst [vmem:[%s10215_s16 + $0xc88] sm:$0xff] %v2077_v17  ;;  %v2079_v18 = vld [vmem:[%s10210_s15 + $0x1920] sm:$0xff]  ;;  %v2081_v19 = vld [vmem:[%s10210_s15 + $0x1930] sm:$0xff] }
  0xe0   : > { %v2083_v20 = vld [vmem:[%s10210_s15 + $0x1940] sm:$0xff]  ;;  %2080 = vst [vmem:[%s10215_s16 + $0xc90] sm:$0xff] %v2079_v18  ;;  %2082 = vst [vmem:[%s10215_s16 + $0xc98] sm:$0xff] %v2081_v19  ;;  %v2085_v21 = vld [vmem:[%s10210_s15 + $0x1950] sm:$0xff] }
  0xe1   : > { %2084 = vst [vmem:[%s10215_s16 + $0xca0] sm:$0xff] %v2083_v20  ;;  %v2087_v22 = vld [vmem:[%s10210_s15 + $0x1960] sm:$0xff]  ;;  %v2089_v23 = vld [vmem:[%s10210_s15 + $0x1970] sm:$0xff]  ;;  %2086 = vst [vmem:[%s10215_s16 + $0xca8] sm:$0xff] %v2085_v21 }
  0xe2   : > { %2088 = vst [vmem:[%s10215_s16 + $0xcb0] sm:$0xff] %v2087_v22  ;;  %2090 = vst [vmem:[%s10215_s16 + $0xcb8] sm:$0xff] %v2089_v23  ;;  %v2091_v24 = vld [vmem:[%s10210_s15 + $0x1980] sm:$0xff]  ;;  %v2093_v25 = vld [vmem:[%s10210_s15 + $0x1990] sm:$0xff] }
  0xe3   : > { %v2095_v26 = vld [vmem:[%s10210_s15 + $0x19a0] sm:$0xff]  ;;  %2092 = vst [vmem:[%s10215_s16 + $0xcc0] sm:$0xff] %v2091_v24  ;;  %2094 = vst [vmem:[%s10215_s16 + $0xcc8] sm:$0xff] %v2093_v25  ;;  %v2097_v27 = vld [vmem:[%s10210_s15 + $0x19b0] sm:$0xff] }
  0xe4   : > { %2096 = vst [vmem:[%s10215_s16 + $0xcd0] sm:$0xff] %v2095_v26  ;;  %v2099_v28 = vld [vmem:[%s10210_s15 + $0x19c0] sm:$0xff]  ;;  %v2101_v29 = vld [vmem:[%s10210_s15 + $0x19d0] sm:$0xff]  ;;  %2098 = vst [vmem:[%s10215_s16 + $0xcd8] sm:$0xff] %v2097_v27 }
  0xe5   : > { %2100 = vst [vmem:[%s10215_s16 + $0xce0] sm:$0xff] %v2099_v28  ;;  %2102 = vst [vmem:[%s10215_s16 + $0xce8] sm:$0xff] %v2101_v29  ;;  %v2103_v30 = vld [vmem:[%s10210_s15 + $0x19e0] sm:$0xff]  ;;  %v2105_v31 = vld [vmem:[%s10210_s15 + $0x19f0] sm:$0xff] }
  0xe6   : > { %v2107_v32 = vld [vmem:[%s10210_s15 + $0x1a00] sm:$0xff]  ;;  %2104 = vst [vmem:[%s10215_s16 + $0xcf0] sm:$0xff] %v2103_v30  ;;  %2106 = vst [vmem:[%s10215_s16 + $0xcf8] sm:$0xff] %v2105_v31  ;;  %v2109_v33 = vld [vmem:[%s10210_s15 + $0x1a10] sm:$0xff] }
  0xe7   : > { %2108 = vst [vmem:[%s10215_s16 + $0xd00] sm:$0xff] %v2107_v32  ;;  %v2111_v34 = vld [vmem:[%s10210_s15 + $0x1a20] sm:$0xff]  ;;  %v2113_v35 = vld [vmem:[%s10210_s15 + $0x1a30] sm:$0xff]  ;;  %2110 = vst [vmem:[%s10215_s16 + $0xd08] sm:$0xff] %v2109_v33 }
  0xe8   : > { %2112 = vst [vmem:[%s10215_s16 + $0xd10] sm:$0xff] %v2111_v34  ;;  %2114 = vst [vmem:[%s10215_s16 + $0xd18] sm:$0xff] %v2113_v35  ;;  %v2115_v36 = vld [vmem:[%s10210_s15 + $0x1a40] sm:$0xff]  ;;  %v2117_v37 = vld [vmem:[%s10210_s15 + $0x1a50] sm:$0xff] }
  0xe9   : > { %v2119_v38 = vld [vmem:[%s10210_s15 + $0x1a60] sm:$0xff]  ;;  %2116 = vst [vmem:[%s10215_s16 + $0xd20] sm:$0xff] %v2115_v36  ;;  %2118 = vst [vmem:[%s10215_s16 + $0xd28] sm:$0xff] %v2117_v37  ;;  %v2121_v39 = vld [vmem:[%s10210_s15 + $0x1a70] sm:$0xff] }
  0xea   : > { %2120 = vst [vmem:[%s10215_s16 + $0xd30] sm:$0xff] %v2119_v38  ;;  %v2123_v40 = vld [vmem:[%s10210_s15 + $0x1a80] sm:$0xff]  ;;  %v2125_v41 = vld [vmem:[%s10210_s15 + $0x1a90] sm:$0xff]  ;;  %2122 = vst [vmem:[%s10215_s16 + $0xd38] sm:$0xff] %v2121_v39 }
  0xeb   : > { %2124 = vst [vmem:[%s10215_s16 + $0xd40] sm:$0xff] %v2123_v40  ;;  %2126 = vst [vmem:[%s10215_s16 + $0xd48] sm:$0xff] %v2125_v41  ;;  %v2127_v42 = vld [vmem:[%s10210_s15 + $0x1aa0] sm:$0xff]  ;;  %v2129_v43 = vld [vmem:[%s10210_s15 + $0x1ab0] sm:$0xff] }
  0xec   : > { %v2131_v44 = vld [vmem:[%s10210_s15 + $0x1ac0] sm:$0xff]  ;;  %2128 = vst [vmem:[%s10215_s16 + $0xd50] sm:$0xff] %v2127_v42  ;;  %2130 = vst [vmem:[%s10215_s16 + $0xd58] sm:$0xff] %v2129_v43  ;;  %v2133_v45 = vld [vmem:[%s10210_s15 + $0x1ad0] sm:$0xff] }
  0xed   : > { %2132 = vst [vmem:[%s10215_s16 + $0xd60] sm:$0xff] %v2131_v44  ;;  %v2135_v46 = vld [vmem:[%s10210_s15 + $0x1ae0] sm:$0xff]  ;;  %v2137_v47 = vld [vmem:[%s10210_s15 + $0x1af0] sm:$0xff]  ;;  %2134 = vst [vmem:[%s10215_s16 + $0xd68] sm:$0xff] %v2133_v45 }
  0xee   : > { %2136 = vst [vmem:[%s10215_s16 + $0xd70] sm:$0xff] %v2135_v46  ;;  %2138 = vst [vmem:[%s10215_s16 + $0xd78] sm:$0xff] %v2137_v47  ;;  %v2139_v48 = vld [vmem:[%s10210_s15 + $0x1b00] sm:$0xff]  ;;  %v2141_v49 = vld [vmem:[%s10210_s15 + $0x1b10] sm:$0xff] }
  0xef   : > { %v2143_v50 = vld [vmem:[%s10210_s15 + $0x1b20] sm:$0xff]  ;;  %2140 = vst [vmem:[%s10215_s16 + $0xd80] sm:$0xff] %v2139_v48  ;;  %2142 = vst [vmem:[%s10215_s16 + $0xd88] sm:$0xff] %v2141_v49  ;;  %v2145_v51 = vld [vmem:[%s10210_s15 + $0x1b30] sm:$0xff] }
  0xf0   : > { %2144 = vst [vmem:[%s10215_s16 + $0xd90] sm:$0xff] %v2143_v50  ;;  %v2147_v52 = vld [vmem:[%s10210_s15 + $0x1b40] sm:$0xff]  ;;  %v2149_v53 = vld [vmem:[%s10210_s15 + $0x1b50] sm:$0xff]  ;;  %2146 = vst [vmem:[%s10215_s16 + $0xd98] sm:$0xff] %v2145_v51 }
  0xf1   : > { %2148 = vst [vmem:[%s10215_s16 + $0xda0] sm:$0xff] %v2147_v52  ;;  %2150 = vst [vmem:[%s10215_s16 + $0xda8] sm:$0xff] %v2149_v53  ;;  %v2151_v54 = vld [vmem:[%s10210_s15 + $0x1b60] sm:$0xff]  ;;  %v2153_v55 = vld [vmem:[%s10210_s15 + $0x1b70] sm:$0xff] }
  0xf2   : > { %v2155_v56 = vld [vmem:[%s10210_s15 + $0x1b80] sm:$0xff]  ;;  %2152 = vst [vmem:[%s10215_s16 + $0xdb0] sm:$0xff] %v2151_v54  ;;  %2154 = vst [vmem:[%s10215_s16 + $0xdb8] sm:$0xff] %v2153_v55  ;;  %v2157_v57 = vld [vmem:[%s10210_s15 + $0x1b90] sm:$0xff] }
  0xf3   : > { %2156 = vst [vmem:[%s10215_s16 + $0xdc0] sm:$0xff] %v2155_v56  ;;  %v2159_v58 = vld [vmem:[%s10210_s15 + $0x1ba0] sm:$0xff]  ;;  %v2161_v59 = vld [vmem:[%s10210_s15 + $0x1bb0] sm:$0xff]  ;;  %2158 = vst [vmem:[%s10215_s16 + $0xdc8] sm:$0xff] %v2157_v57 }
  0xf4   : > { %2160 = vst [vmem:[%s10215_s16 + $0xdd0] sm:$0xff] %v2159_v58  ;;  %2162 = vst [vmem:[%s10215_s16 + $0xdd8] sm:$0xff] %v2161_v59  ;;  %v2163_v60 = vld [vmem:[%s10210_s15 + $0x1bc0] sm:$0xff]  ;;  %v2165_v61 = vld [vmem:[%s10210_s15 + $0x1bd0] sm:$0xff] }
  0xf5   : > { %v2167_v62 = vld [vmem:[%s10210_s15 + $0x1be0] sm:$0xff]  ;;  %2164 = vst [vmem:[%s10215_s16 + $0xde0] sm:$0xff] %v2163_v60  ;;  %2166 = vst [vmem:[%s10215_s16 + $0xde8] sm:$0xff] %v2165_v61  ;;  %v2169_v63 = vld [vmem:[%s10210_s15 + $0x1bf0] sm:$0xff] }
  0xf6   : > { %2168 = vst [vmem:[%s10215_s16 + $0xdf0] sm:$0xff] %v2167_v62  ;;  %v2171_v0 = vld [vmem:[%s10210_s15 + $0x1c00] sm:$0xff]  ;;  %v2173_v1 = vld [vmem:[%s10210_s15 + $0x1c10] sm:$0xff]  ;;  %2170 = vst [vmem:[%s10215_s16 + $0xdf8] sm:$0xff] %v2169_v63 }
  0xf7   : > { %2172 = vst [vmem:[%s10215_s16 + $0xe00] sm:$0xff] %v2171_v0  ;;  %2174 = vst [vmem:[%s10215_s16 + $0xe08] sm:$0xff] %v2173_v1  ;;  %v2175_v2 = vld [vmem:[%s10210_s15 + $0x1c20] sm:$0xff]  ;;  %v2177_v3 = vld [vmem:[%s10210_s15 + $0x1c30] sm:$0xff] }
  0xf8   : > { %v2179_v4 = vld [vmem:[%s10210_s15 + $0x1c40] sm:$0xff]  ;;  %2176 = vst [vmem:[%s10215_s16 + $0xe10] sm:$0xff] %v2175_v2  ;;  %2178 = vst [vmem:[%s10215_s16 + $0xe18] sm:$0xff] %v2177_v3  ;;  %v2181_v5 = vld [vmem:[%s10210_s15 + $0x1c50] sm:$0xff] }
  0xf9   : > { %2180 = vst [vmem:[%s10215_s16 + $0xe20] sm:$0xff] %v2179_v4  ;;  %v2183_v6 = vld [vmem:[%s10210_s15 + $0x1c60] sm:$0xff]  ;;  %v2185_v7 = vld [vmem:[%s10210_s15 + $0x1c70] sm:$0xff]  ;;  %2182 = vst [vmem:[%s10215_s16 + $0xe28] sm:$0xff] %v2181_v5 }
  0xfa   : > { %2184 = vst [vmem:[%s10215_s16 + $0xe30] sm:$0xff] %v2183_v6  ;;  %2186 = vst [vmem:[%s10215_s16 + $0xe38] sm:$0xff] %v2185_v7  ;;  %v2187_v8 = vld [vmem:[%s10210_s15 + $0x1c80] sm:$0xff]  ;;  %v2189_v9 = vld [vmem:[%s10210_s15 + $0x1c90] sm:$0xff] }
  0xfb   : > { %v2191_v10 = vld [vmem:[%s10210_s15 + $0x1ca0] sm:$0xff]  ;;  %2188 = vst [vmem:[%s10215_s16 + $0xe40] sm:$0xff] %v2187_v8  ;;  %2190 = vst [vmem:[%s10215_s16 + $0xe48] sm:$0xff] %v2189_v9  ;;  %v2193_v11 = vld [vmem:[%s10210_s15 + $0x1cb0] sm:$0xff] }
  0xfc   : > { %2192 = vst [vmem:[%s10215_s16 + $0xe50] sm:$0xff] %v2191_v10  ;;  %v2195_v12 = vld [vmem:[%s10210_s15 + $0x1cc0] sm:$0xff]  ;;  %v2197_v13 = vld [vmem:[%s10210_s15 + $0x1cd0] sm:$0xff]  ;;  %2194 = vst [vmem:[%s10215_s16 + $0xe58] sm:$0xff] %v2193_v11 }
  0xfd   : > { %2196 = vst [vmem:[%s10215_s16 + $0xe60] sm:$0xff] %v2195_v12  ;;  %2198 = vst [vmem:[%s10215_s16 + $0xe68] sm:$0xff] %v2197_v13  ;;  %v2199_v14 = vld [vmem:[%s10210_s15 + $0x1ce0] sm:$0xff]  ;;  %v2201_v15 = vld [vmem:[%s10210_s15 + $0x1cf0] sm:$0xff] }
  0xfe   : > { %v2203_v16 = vld [vmem:[%s10210_s15 + $0x1d00] sm:$0xff]  ;;  %2200 = vst [vmem:[%s10215_s16 + $0xe70] sm:$0xff] %v2199_v14  ;;  %2202 = vst [vmem:[%s10215_s16 + $0xe78] sm:$0xff] %v2201_v15  ;;  %v2205_v17 = vld [vmem:[%s10210_s15 + $0x1d10] sm:$0xff] }
  0xff   : > { %2204 = vst [vmem:[%s10215_s16 + $0xe80] sm:$0xff] %v2203_v16  ;;  %v2207_v18 = vld [vmem:[%s10210_s15 + $0x1d20] sm:$0xff]  ;;  %v2209_v19 = vld [vmem:[%s10210_s15 + $0x1d30] sm:$0xff]  ;;  %2206 = vst [vmem:[%s10215_s16 + $0xe88] sm:$0xff] %v2205_v17 }
 0x100   : > { %2208 = vst [vmem:[%s10215_s16 + $0xe90] sm:$0xff] %v2207_v18  ;;  %2210 = vst [vmem:[%s10215_s16 + $0xe98] sm:$0xff] %v2209_v19  ;;  %v2211_v20 = vld [vmem:[%s10210_s15 + $0x1d40] sm:$0xff]  ;;  %v2213_v21 = vld [vmem:[%s10210_s15 + $0x1d50] sm:$0xff] }
 0x101   : > { %v2215_v22 = vld [vmem:[%s10210_s15 + $0x1d60] sm:$0xff]  ;;  %2212 = vst [vmem:[%s10215_s16 + $0xea0] sm:$0xff] %v2211_v20  ;;  %2214 = vst [vmem:[%s10215_s16 + $0xea8] sm:$0xff] %v2213_v21  ;;  %v2217_v23 = vld [vmem:[%s10210_s15 + $0x1d70] sm:$0xff] }
 0x102   : > { %2216 = vst [vmem:[%s10215_s16 + $0xeb0] sm:$0xff] %v2215_v22  ;;  %v2219_v24 = vld [vmem:[%s10210_s15 + $0x1d80] sm:$0xff]  ;;  %v2221_v25 = vld [vmem:[%s10210_s15 + $0x1d90] sm:$0xff]  ;;  %2218 = vst [vmem:[%s10215_s16 + $0xeb8] sm:$0xff] %v2217_v23 }
 0x103   : > { %2220 = vst [vmem:[%s10215_s16 + $0xec0] sm:$0xff] %v2219_v24  ;;  %2222 = vst [vmem:[%s10215_s16 + $0xec8] sm:$0xff] %v2221_v25  ;;  %v2223_v26 = vld [vmem:[%s10210_s15 + $0x1da0] sm:$0xff]  ;;  %v2225_v27 = vld [vmem:[%s10210_s15 + $0x1db0] sm:$0xff] }
 0x104   : > { %v2227_v28 = vld [vmem:[%s10210_s15 + $0x1dc0] sm:$0xff]  ;;  %2224 = vst [vmem:[%s10215_s16 + $0xed0] sm:$0xff] %v2223_v26  ;;  %2226 = vst [vmem:[%s10215_s16 + $0xed8] sm:$0xff] %v2225_v27  ;;  %v2229_v29 = vld [vmem:[%s10210_s15 + $0x1dd0] sm:$0xff] }
 0x105   : > { %2228 = vst [vmem:[%s10215_s16 + $0xee0] sm:$0xff] %v2227_v28  ;;  %v2231_v30 = vld [vmem:[%s10210_s15 + $0x1de0] sm:$0xff]  ;;  %v2233_v31 = vld [vmem:[%s10210_s15 + $0x1df0] sm:$0xff]  ;;  %2230 = vst [vmem:[%s10215_s16 + $0xee8] sm:$0xff] %v2229_v29 }
 0x106   : > { %2232 = vst [vmem:[%s10215_s16 + $0xef0] sm:$0xff] %v2231_v30  ;;  %2234 = vst [vmem:[%s10215_s16 + $0xef8] sm:$0xff] %v2233_v31  ;;  %v2235_v32 = vld [vmem:[%s10210_s15 + $0x1e00] sm:$0xff]  ;;  %v2237_v33 = vld [vmem:[%s10210_s15 + $0x1e10] sm:$0xff] }
 0x107   : > { %v2239_v34 = vld [vmem:[%s10210_s15 + $0x1e20] sm:$0xff]  ;;  %2236 = vst [vmem:[%s10215_s16 + $0xf00] sm:$0xff] %v2235_v32  ;;  %2238 = vst [vmem:[%s10215_s16 + $0xf08] sm:$0xff] %v2237_v33  ;;  %v2241_v35 = vld [vmem:[%s10210_s15 + $0x1e30] sm:$0xff] }
 0x108   : > { %2240 = vst [vmem:[%s10215_s16 + $0xf10] sm:$0xff] %v2239_v34  ;;  %v2243_v36 = vld [vmem:[%s10210_s15 + $0x1e40] sm:$0xff]  ;;  %v2245_v37 = vld [vmem:[%s10210_s15 + $0x1e50] sm:$0xff]  ;;  %2242 = vst [vmem:[%s10215_s16 + $0xf18] sm:$0xff] %v2241_v35 }
 0x109   : > { %2244 = vst [vmem:[%s10215_s16 + $0xf20] sm:$0xff] %v2243_v36  ;;  %2246 = vst [vmem:[%s10215_s16 + $0xf28] sm:$0xff] %v2245_v37  ;;  %v2247_v38 = vld [vmem:[%s10210_s15 + $0x1e60] sm:$0xff]  ;;  %v2249_v39 = vld [vmem:[%s10210_s15 + $0x1e70] sm:$0xff] }
 0x10a   : > { %v2251_v40 = vld [vmem:[%s10210_s15 + $0x1e80] sm:$0xff]  ;;  %2248 = vst [vmem:[%s10215_s16 + $0xf30] sm:$0xff] %v2247_v38  ;;  %2250 = vst [vmem:[%s10215_s16 + $0xf38] sm:$0xff] %v2249_v39  ;;  %v2253_v41 = vld [vmem:[%s10210_s15 + $0x1e90] sm:$0xff] }
 0x10b   : > { %2252 = vst [vmem:[%s10215_s16 + $0xf40] sm:$0xff] %v2251_v40  ;;  %v2255_v42 = vld [vmem:[%s10210_s15 + $0x1ea0] sm:$0xff]  ;;  %v2257_v43 = vld [vmem:[%s10210_s15 + $0x1eb0] sm:$0xff]  ;;  %2254 = vst [vmem:[%s10215_s16 + $0xf48] sm:$0xff] %v2253_v41 }
 0x10c   : > { %2256 = vst [vmem:[%s10215_s16 + $0xf50] sm:$0xff] %v2255_v42  ;;  %2258 = vst [vmem:[%s10215_s16 + $0xf58] sm:$0xff] %v2257_v43  ;;  %v2259_v44 = vld [vmem:[%s10210_s15 + $0x1ec0] sm:$0xff]  ;;  %v2261_v45 = vld [vmem:[%s10210_s15 + $0x1ed0] sm:$0xff] }
 0x10d   : > { %v2263_v46 = vld [vmem:[%s10210_s15 + $0x1ee0] sm:$0xff]  ;;  %2260 = vst [vmem:[%s10215_s16 + $0xf60] sm:$0xff] %v2259_v44  ;;  %2262 = vst [vmem:[%s10215_s16 + $0xf68] sm:$0xff] %v2261_v45  ;;  %v2265_v47 = vld [vmem:[%s10210_s15 + $0x1ef0] sm:$0xff] }
 0x10e   : > { %2264 = vst [vmem:[%s10215_s16 + $0xf70] sm:$0xff] %v2263_v46  ;;  %v2267_v48 = vld [vmem:[%s10210_s15 + $0x1f00] sm:$0xff]  ;;  %v2269_v49 = vld [vmem:[%s10210_s15 + $0x1f10] sm:$0xff]  ;;  %2266 = vst [vmem:[%s10215_s16 + $0xf78] sm:$0xff] %v2265_v47 }
 0x10f   : > { %2268 = vst [vmem:[%s10215_s16 + $0xf80] sm:$0xff] %v2267_v48  ;;  %2270 = vst [vmem:[%s10215_s16 + $0xf88] sm:$0xff] %v2269_v49  ;;  %v2271_v50 = vld [vmem:[%s10210_s15 + $0x1f20] sm:$0xff]  ;;  %v2273_v51 = vld [vmem:[%s10210_s15 + $0x1f30] sm:$0xff] }
 0x110   : > { %v2275_v52 = vld [vmem:[%s10210_s15 + $0x1f40] sm:$0xff]  ;;  %2272 = vst [vmem:[%s10215_s16 + $0xf90] sm:$0xff] %v2271_v50  ;;  %2274 = vst [vmem:[%s10215_s16 + $0xf98] sm:$0xff] %v2273_v51  ;;  %v2277_v53 = vld [vmem:[%s10210_s15 + $0x1f50] sm:$0xff] }
 0x111   : > { %2276 = vst [vmem:[%s10215_s16 + $0xfa0] sm:$0xff] %v2275_v52  ;;  %v2279_v54 = vld [vmem:[%s10210_s15 + $0x1f60] sm:$0xff]  ;;  %v2281_v55 = vld [vmem:[%s10210_s15 + $0x1f70] sm:$0xff]  ;;  %2278 = vst [vmem:[%s10215_s16 + $0xfa8] sm:$0xff] %v2277_v53 }
 0x112   : > { %2280 = vst [vmem:[%s10215_s16 + $0xfb0] sm:$0xff] %v2279_v54  ;;  %2282 = vst [vmem:[%s10215_s16 + $0xfb8] sm:$0xff] %v2281_v55  ;;  %v2283_v56 = vld [vmem:[%s10210_s15 + $0x1f80] sm:$0xff]  ;;  %v2285_v57 = vld [vmem:[%s10210_s15 + $0x1f90] sm:$0xff] }
 0x113   : > { %v2287_v58 = vld [vmem:[%s10210_s15 + $0x1fa0] sm:$0xff]  ;;  %2284 = vst [vmem:[%s10215_s16 + $0xfc0] sm:$0xff] %v2283_v56  ;;  %2286 = vst [vmem:[%s10215_s16 + $0xfc8] sm:$0xff] %v2285_v57  ;;  %v2289_v59 = vld [vmem:[%s10210_s15 + $0x1fb0] sm:$0xff] }
 0x114   : > { %2288 = vst [vmem:[%s10215_s16 + $0xfd0] sm:$0xff] %v2287_v58  ;;  %v2291_v60 = vld [vmem:[%s10210_s15 + $0x1fc0] sm:$0xff]  ;;  %v2293_v61 = vld [vmem:[%s10210_s15 + $0x1fd0] sm:$0xff]  ;;  %2290 = vst [vmem:[%s10215_s16 + $0xfd8] sm:$0xff] %v2289_v59 }
 0x115   : > { %2292 = vst [vmem:[%s10215_s16 + $0xfe0] sm:$0xff] %v2291_v60  ;;  %2294 = vst [vmem:[%s10215_s16 + $0xfe8] sm:$0xff] %v2293_v61  ;;  %v2295_v62 = vld [vmem:[%s10210_s15 + $0x1fe0] sm:$0xff]  ;;  %v2297_v63 = vld [vmem:[%s10210_s15 + $0x1ff0] sm:$0xff] }
 0x116   : > { %2296 = vst [vmem:[%s10215_s16 + $0xff0] sm:$0xff] %v2295_v62  ;;  %2298 = vst [vmem:[%s10215_s16 + $0xff8] sm:$0xff] %v2297_v63 }
 0x117 PF: > { %p8640_p7 = scmp.ge.s32.totalorder %s10116_s24, 1  ;;  %p4412_p8 = scmp.lt.s32.totalorder %s10116_s24, 9 }
 0x119   : > { %p4413_p9 = pnand %p8640_p7, %p4412_p8 }
 0x11a   : > { %s4419_s17 = sand.u32 (!%p4413_p9), 1, %s10092_s18   ;;  %s8642_s27 = sshll.u32 (!%p4413_p9), %s10100_s20, 5 }
 0x11b   : > { %4416 = sbr.rel (%p4413_p9) target bundleno = 1105 (0x451), region = 88  ;;  %s8641_s28 = sshll.u32 (!%p4413_p9), %s4419_s17, 12 }
 0x11c   : > { %p4464_p10 = scmp.lt.s32.totalorder (!%p4413_p9), %s8642_s27, 127  ;;  %s8644_s29 = sshll.u32 (!%p4413_p9), %s10104_s21, 1 }
 0x11d   : > { %p4472_p11 = scmp.lt.s32.totalorder (!%p4413_p9), %s8644_s29, 3  ;;  %s11268_s8 = scalar_lea.vmem (!%p4413_p9), [#allocation3], %s8641_s28 }
 0x11e   : > { %p8649_p12 = scmp.ne.s32.totalorder (!%p4413_p9), %s10100_s20, 0 }
 0x120   : > { %s11978_s27 = smov (!%p4464_p10, %s8642_s27), 127  ;;  %s11980_s29 = smov (!%p4472_p11, %s8644_s29), 3 }
 0x121   : > { %s8643_s30 = sshll.u32 %s11978_s27, 2  ;;  %s4474_s18 = scalar_lea.vmem %s11961_s2, %s11980_s29 }
 0x122   : > { %s11246_s9 = scalar_lea.vmem %s11959_s0, %s8643_s30  ;;  %s4479_s13 = scalar_lea.vmem %s11962_s3, %s11980_s29 }
 0x123   : > { %s4484_s16 = scalar_lea.vmem %s11963_s4, %s11980_s29  ;;  %s8648_s17 = sshll.u32 %s11980_s29, 2 }
 0x124   : > { %s11266_s7 = scalar_lea.vmem %s11964_s5, %s8648_s17  ;;  %4495 = sbr.rel (%p8649_p12) target bundleno = 299 (0x12b), region = 96 }
 0x129   : > { %v10118_v0 = vmov 0.0  }
 0x12a   : > { %4496 = vst [vmem:[#allocation2] sm:$0xff] %v10118_v0  ;;  %4497 = vst [vmem:[#allocation2 + $0x8] sm:$0xff] %v10118_v0 }
 0x12b PF: > { %v9258_v1 = vld [vmem:[%s11268_s8 + $0x74] ss:$8 sps:$4 sm:$0xff]   ;;  %v9262_v3 = vld [vmem:[%s11268_s8 + $0x70] ss:$8 sps:$4 sm:$0xff]   ;;  %v9264_v5 = vld [vmem:[%s11268_s8 + $0x64] ss:$8 sps:$4 sm:$0xff]  }
 0x12c   : > { %v9260_v2 = vld [vmem:[%s11268_s8 + $0x174] ss:$8 sps:$4 sm:$0xff]   ;;  %7700 = vmatprep.subr.bf16.mxu0 %v9258_v1  ;;  %v9263_v4 = vld [vmem:[%s11268_s8 + $0x170] ss:$8 sps:$4 sm:$0xff]   ;;  %v9266_v6 = vld [vmem:[%s11268_s8 + $0x164] ss:$8 sps:$4 sm:$0xff]  }
 0x12d   : > { %7741 = vmatprep.subr.bf16.mxu1 %v9260_v2  ;;  %7701 = vmatpush1.bf16.msra.mxu0 %v9262_v3  ;;  %v9268_v7 = vld [vmem:[%s11268_s8 + $0x60] ss:$8 sps:$4 sm:$0xff]   ;;  %v9270_v9 = vld [vmem:[%s11268_s8 + $0x54] ss:$8 sps:$4 sm:$0xff]   ;;  %v9274_v11 = vld [vmem:[%s11268_s8 + $0x50] ss:$8 sps:$4 sm:$0xff]  }
 0x12e   : > { %7742 = vmatpush1.bf16.msra.mxu1 %v9263_v4  ;;  %7702 = vmatprep.subr.bf16.mxu0 %v9264_v5  ;;  %v9269_v8 = vld [vmem:[%s11268_s8 + $0x160] ss:$8 sps:$4 sm:$0xff]   ;;  %v9272_v10 = vld [vmem:[%s11268_s8 + $0x154] ss:$8 sps:$4 sm:$0xff]   ;;  %v9275_v12 = vld [vmem:[%s11268_s8 + $0x150] ss:$8 sps:$4 sm:$0xff]  }
 0x12f   : > { %7743 = vmatprep.subr.bf16.mxu1 %v9266_v6  ;;  %v9276_v13 = vld [vmem:[%s11268_s8 + $0x44] ss:$8 sps:$4 sm:$0xff]   ;;  %v9280_v15 = vld [vmem:[%s11268_s8 + $0x40] ss:$8 sps:$4 sm:$0xff]   ;;  %v9282_v17 = vld [vmem:[%s11268_s8 + $0x34] ss:$8 sps:$4 sm:$0xff]  }
 0x130   : > { %v9278_v14 = vld [vmem:[%s11268_s8 + $0x144] ss:$8 sps:$4 sm:$0xff]   ;;  %v9281_v16 = vld [vmem:[%s11268_s8 + $0x140] ss:$8 sps:$4 sm:$0xff]   ;;  %v9284_v18 = vld [vmem:[%s11268_s8 + $0x134] ss:$8 sps:$4 sm:$0xff]  }
 0x131   : > { %7703 = vmatpush1.bf16.msra.mxu0 %v9268_v7  ;;  %v9286_v19 = vld [vmem:[%s11268_s8 + $0x30] ss:$8 sps:$4 sm:$0xff]   ;;  %v9288_v21 = vld [vmem:[%s11268_s8 + $0x24] ss:$8 sps:$4 sm:$0xff]   ;;  %v9292_v23 = vld [vmem:[%s11268_s8 + $0x20] ss:$8 sps:$4 sm:$0xff]  }
 0x132   : > { %7744 = vmatpush1.bf16.msra.mxu1 %v9269_v8  ;;  %7704 = vmatprep.subr.bf16.mxu0 %v9270_v9  ;;  %v9287_v20 = vld [vmem:[%s11268_s8 + $0x130] ss:$8 sps:$4 sm:$0xff]   ;;  %v9290_v22 = vld [vmem:[%s11268_s8 + $0x124] ss:$8 sps:$4 sm:$0xff]   ;;  %v9293_v24 = vld [vmem:[%s11268_s8 + $0x120] ss:$8 sps:$4 sm:$0xff]  }
 0x133   : > { %7745 = vmatprep.subr.bf16.mxu1 %v9272_v10  ;;  %v9294_v25 = vld [vmem:[%s11268_s8 + $0x14] ss:$8 sps:$4 sm:$0xff]   ;;  %v9298_v27 = vld [vmem:[%s11268_s8 + $0x10] ss:$8 sps:$4 sm:$0xff]   ;;  %v9300_v29 = vld [vmem:[%s11268_s8 + $0x4] ss:$8 sps:$4 sm:$0xff]  }
 0x134   : > { %v9296_v26 = vld [vmem:[%s11268_s8 + $0x114] ss:$8 sps:$4 sm:$0xff]   ;;  %v9299_v28 = vld [vmem:[%s11268_s8 + $0x110] ss:$8 sps:$4 sm:$0xff]   ;;  %v9302_v30 = vld [vmem:[%s11268_s8 + $0x104] ss:$8 sps:$4 sm:$0xff]  }
 0x135   : > { %7705 = vmatpush1.bf16.msra.mxu0 %v9274_v11  ;;  %v9304_v31 = vld [vmem:[%s11268_s8] ss:$8 sps:$4 sm:$0xff]   ;;  %v9306_v33 = vld [vmem:[%s11268_s8 + $0xf4] ss:$8 sps:$4 sm:$0xff]   ;;  %v9310_v35 = vld [vmem:[%s11268_s8 + $0xf0] ss:$8 sps:$4 sm:$0xff]  }
 0x136   : > { %7746 = vmatpush1.bf16.msra.mxu1 %v9275_v12  ;;  %7706 = vmatprep.subr.bf16.mxu0 %v9276_v13  ;;  %v9305_v32 = vld [vmem:[%s11268_s8 + $0x100] ss:$8 sps:$4 sm:$0xff]   ;;  %v9308_v34 = vld [vmem:[%s11268_s8 + $0x1f4] ss:$8 sps:$4 sm:$0xff]   ;;  %v9311_v36 = vld [vmem:[%s11268_s8 + $0x1f0] ss:$8 sps:$4 sm:$0xff]  }
 0x137   : > { %7747 = vmatprep.subr.bf16.mxu1 %v9278_v14  ;;  %v9312_v37 = vld [vmem:[%s11268_s8 + $0xe4] ss:$8 sps:$4 sm:$0xff]   ;;  %v9316_v39 = vld [vmem:[%s11268_s8 + $0xe0] ss:$8 sps:$4 sm:$0xff]   ;;  %v9318_v41 = vld [vmem:[%s11268_s8 + $0xd4] ss:$8 sps:$4 sm:$0xff]  }
 0x138   : > { %v9314_v38 = vld [vmem:[%s11268_s8 + $0x1e4] ss:$8 sps:$4 sm:$0xff]   ;;  %v9317_v40 = vld [vmem:[%s11268_s8 + $0x1e0] ss:$8 sps:$4 sm:$0xff]   ;;  %v9320_v42 = vld [vmem:[%s11268_s8 + $0x1d4] ss:$8 sps:$4 sm:$0xff]  }
 0x139   : > { %7707 = vmatpush1.bf16.msra.mxu0 %v9280_v15  ;;  %v9322_v43 = vld [vmem:[%s11268_s8 + $0xd0] ss:$8 sps:$4 sm:$0xff]   ;;  %v9324_v45 = vld [vmem:[%s11268_s8 + $0xc4] ss:$8 sps:$4 sm:$0xff]   ;;  %v9328_v50 = vld [vmem:[%s11268_s8 + $0xc0] ss:$8 sps:$4 sm:$0xff]  }
 0x13a   : > { %7748 = vmatpush1.bf16.msra.mxu1 %v9281_v16  ;;  %7708 = vmatprep.subr.bf16.mxu0 %v9282_v17  ;;  %v9323_v44 = vld [vmem:[%s11268_s8 + $0x1d0] ss:$8 sps:$4 sm:$0xff]   ;;  %v9326_v46 = vld [vmem:[%s11268_s8 + $0x1c4] ss:$8 sps:$4 sm:$0xff]   ;;  %v9329_v51 = vld [vmem:[%s11268_s8 + $0x1c0] ss:$8 sps:$4 sm:$0xff]  }
 0x13b   : > { %7749 = vmatprep.subr.bf16.mxu1 %v9284_v18  ;;  %v4500_v47 = vld [vmem:[%s11246_s9] sm:$0xff]  ;;  %v4501_v49 = vld [vmem:[%s11246_s9 + $0x8] sm:$0xff]  ;;  %v9336_v57 = vld [vmem:[%s11268_s8 + $0xa4] ss:$8 sps:$4 sm:$0xff]   ;;  %p9194_p13 = scmp.ne.s32.totalorder %s10100_s20, 3 }
 0x13c   : > { %v8651_v48 = vcombine.high %v4500_v47, %v4500_v47  ;;  %v8653_v52 = vcombine.high %v4501_v49, %v4501_v49  ;;  %v9330_v53 = vld [vmem:[%s11268_s8 + $0xb4] ss:$8 sps:$4 sm:$0xff]   ;;  %v9334_v55 = vld [vmem:[%s11268_s8 + $0xb0] ss:$8 sps:$4 sm:$0xff]   ;;  %v9338_v58 = vld [vmem:[%s11268_s8 + $0x1a4] ss:$8 sps:$4 sm:$0xff]   ;;  %v8650_v7 = vcombine.low %v4500_v47, %v4500_v47  ;;  %v8652_v8 = vcombine.low %v4501_v49, %v4501_v49 }
 0x13d   : > { %7709 = vmatpush1.bf16.msra.mxu0 %v9286_v19  ;;  %v9332_v54 = vld [vmem:[%s11268_s8 + $0x1b4] ss:$8 sps:$4 sm:$0xff]   ;;  %v9335_v56 = vld [vmem:[%s11268_s8 + $0x1b0] ss:$8 sps:$4 sm:$0xff]   ;;  %v9340_v59 = vld [vmem:[%s11268_s8 + $0xa0] ss:$8 sps:$4 sm:$0xff]  }
 0x13e   : > { %7750 = vmatpush1.bf16.msra.mxu1 %v9287_v20  ;;  %7710 = vmatprep.subr.bf16.mxu0 %v9288_v21  ;;  %v9341_v60 = vld [vmem:[%s11268_s8 + $0x1a0] ss:$8 sps:$4 sm:$0xff]   ;;  %v9342_v61 = vld [vmem:[%s11268_s8 + $0x94] ss:$8 sps:$4 sm:$0xff]   ;;  %v9346_v63 = vld [vmem:[%s11268_s8 + $0x90] ss:$8 sps:$4 sm:$0xff]  }
 0x13f   : > { %7751 = vmatprep.subr.bf16.mxu1 %v9290_v22  ;;  %7732 = vmatprep.mubr.bf16.mxu0 %v8651_v48  ;;  %v9344_v62 = vld [vmem:[%s11268_s8 + $0x194] ss:$8 sps:$4 sm:$0xff]   ;;  %v9347_v0 = vld [vmem:[%s11268_s8 + $0x190] ss:$8 sps:$4 sm:$0xff]   ;;  %v9348_v1 = vld [vmem:[%s11268_s8 + $0x84] ss:$8 sps:$4 sm:$0xff]  }
 0x140   : > { %7773 = vmatprep.mubr.bf16.mxu1 %v8653_v52  ;;  %v9350_v2 = vld [vmem:[%s11268_s8 + $0x184] ss:$8 sps:$4 sm:$0xff]   ;;  %v9352_v3 = vld [vmem:[%s11268_s8 + $0x80] ss:$8 sps:$4 sm:$0xff]   ;;  %v9360_v5 = vld [vmem:[%s11268_s8 + $0x274] ss:$8 sps:$4 sm:$0xff]  }
 0x141   : > { %7711 = vmatpush1.bf16.msra.mxu0 %v9292_v23  ;;  %v9353_v4 = vld [vmem:[%s11268_s8 + $0x180] ss:$8 sps:$4 sm:$0xff]   ;;  %v9363_v6 = vld [vmem:[%s11268_s8 + $0x374] ss:$8 sps:$4 sm:$0xff]   ;;  %v9358_v9 = vld [vmem:[%s11268_s8 + $0x270] ss:$8 sps:$4 sm:$0xff]  }
 0x142   : > { %7752 = vmatpush1.bf16.msra.mxu1 %v9293_v24  ;;  %7712 = vmatprep.subr.bf16.mxu0 %v9294_v25  ;;  %v9361_v10 = vld [vmem:[%s11268_s8 + $0x370] ss:$8 sps:$4 sm:$0xff]   ;;  %v9366_v11 = vld [vmem:[%s11268_s8 + $0x264] ss:$8 sps:$4 sm:$0xff]   ;;  %v9364_v13 = vld [vmem:[%s11268_s8 + $0x260] ss:$8 sps:$4 sm:$0xff]  }
 0x143   : > { %7753 = vmatprep.subr.bf16.mxu1 %v9296_v26  ;;  %v9369_v12 = vld [vmem:[%s11268_s8 + $0x364] ss:$8 sps:$4 sm:$0xff]   ;;  %v9367_v14 = vld [vmem:[%s11268_s8 + $0x360] ss:$8 sps:$4 sm:$0xff]   ;;  %v9372_v15 = vld [vmem:[%s11268_s8 + $0x254] ss:$8 sps:$4 sm:$0xff]  }
 0x144   : > { %v9375_v16 = vld [vmem:[%s11268_s8 + $0x354] ss:$8 sps:$4 sm:$0xff]   ;;  %v9370_v17 = vld [vmem:[%s11268_s8 + $0x250] ss:$8 sps:$4 sm:$0xff]   ;;  %v9378_v19 = vld [vmem:[%s11268_s8 + $0x244] ss:$8 sps:$4 sm:$0xff]  }
 0x145   : > { %7713 = vmatpush1.bf16.msra.mxu0 %v9298_v27  ;;  %v9373_v18 = vld [vmem:[%s11268_s8 + $0x350] ss:$8 sps:$4 sm:$0xff]   ;;  %v9381_v20 = vld [vmem:[%s11268_s8 + $0x344] ss:$8 sps:$4 sm:$0xff]   ;;  %v9376_v21 = vld [vmem:[%s11268_s8 + $0x240] ss:$8 sps:$4 sm:$0xff]  }
 0x146   : > { %7754 = vmatpush1.bf16.msra.mxu1 %v9299_v28  ;;  %7714 = vmatprep.subr.bf16.mxu0 %v9300_v29  ;;  %v9379_v22 = vld [vmem:[%s11268_s8 + $0x340] ss:$8 sps:$4 sm:$0xff]   ;;  %v9384_v23 = vld [vmem:[%s11268_s8 + $0x234] ss:$8 sps:$4 sm:$0xff]   ;;  %v9382_v25 = vld [vmem:[%s11268_s8 + $0x230] ss:$8 sps:$4 sm:$0xff]  }
 0x147   : > { %7755 = vmatprep.subr.bf16.mxu1 %v9302_v30  ;;  %v9387_v24 = vld [vmem:[%s11268_s8 + $0x334] ss:$8 sps:$4 sm:$0xff]   ;;  %v9385_v26 = vld [vmem:[%s11268_s8 + $0x330] ss:$8 sps:$4 sm:$0xff]   ;;  %v9390_v27 = vld [vmem:[%s11268_s8 + $0x224] ss:$8 sps:$4 sm:$0xff]  }
 0x148   : > { %v9393_v28 = vld [vmem:[%s11268_s8 + $0x324] ss:$8 sps:$4 sm:$0xff]   ;;  %v9388_v29 = vld [vmem:[%s11268_s8 + $0x220] ss:$8 sps:$4 sm:$0xff]   ;;  %v9423_v52 = vld [vmem:[%s11268_s8 + $0x3d4] ss:$8 sps:$4 sm:$0xff]  }
 0x149   : > { %7715 = vmatpush1.bf16.msra.mxu0 %v9304_v31  ;;  %v9391_v30 = vld [vmem:[%s11268_s8 + $0x320] ss:$8 sps:$4 sm:$0xff]   ;;  %v9396_v31 = vld [vmem:[%s11268_s8 + $0x214] ss:$8 sps:$4 sm:$0xff]   ;;  %v9414_v47 = vld [vmem:[%s11268_s8 + $0x2e4] ss:$8 sps:$4 sm:$0xff]  }
 0x14a   : > { %7756 = vmatpush1.bf16.msra.mxu1 %v9305_v32  ;;  %7716 = vmatprep.subr.bf16.mxu0 %v9306_v33  ;;  %v9399_v32 = vld [vmem:[%s11268_s8 + $0x314] ss:$8 sps:$4 sm:$0xff]   ;;  %v11364_v33 = vld [vmem:[%s11246_s9 + $0x10] sm:$0xff] }
 0x14b   : > { %7757 = vmatprep.subr.bf16.mxu1 %v9308_v34  ;;  %v11367_v34 = vld [vmem:[%s11246_s9 + $0x18] sm:$0xff] }
 0x14c   : > { %v9417_v48 = vld [vmem:[%s11268_s8 + $0x3e4] ss:$8 sps:$4 sm:$0xff]   ;;  %v9412_v49 = vld [vmem:[%s11268_s8 + $0x2e0] ss:$8 sps:$4 sm:$0xff]  }
 0x14d   : > { %7717 = vmatpush2.bf16.msra.mxu0 %v9310_v35  ;;  %v9394_v35 = vld [vmem:[%s11268_s8 + $0x210] ss:$8 sps:$4 sm:$0xff]  }
 0x14e   : > { %7758 = vmatpush2.bf16.msra.mxu1 %v9311_v36  ;;  %7718 = vmatprep.subr.bf16.mxu0 %v9312_v37  ;;  %v9397_v36 = vld [vmem:[%s11268_s8 + $0x310] ss:$8 sps:$4 sm:$0xff]   ;;  %v8655_v37 = vcombine.high %v11364_v33, %v11364_v33 }
 0x14f   : > { %7759 = vmatprep.subr.bf16.mxu1 %v9314_v38  ;;  %v8657_v38 = vcombine.high %v11367_v34, %v11367_v34 }
 0x151   : > { %7719 = vmatpush2.bf16.msra.mxu0 %v9316_v39  ;;  %v9402_v39 = vld [vmem:[%s11268_s8 + $0x204] ss:$8 sps:$4 sm:$0xff]  }
 0x152   : > { %7760 = vmatpush2.bf16.msra.mxu1 %v9317_v40  ;;  %7720 = vmatprep.subr.bf16.mxu0 %v9318_v41  ;;  %v9405_v40 = vld [vmem:[%s11268_s8 + $0x304] ss:$8 sps:$4 sm:$0xff]   ;;  %v9400_v41 = vld [vmem:[%s11268_s8 + $0x200] ss:$8 sps:$4 sm:$0xff]  }
 0x153   : > { %7761 = vmatprep.subr.bf16.mxu1 %v9320_v42  ;;  %v9403_v42 = vld [vmem:[%s11268_s8 + $0x300] ss:$8 sps:$4 sm:$0xff]  }
 0x155   : > { %7721 = vmatpush2.bf16.msra.mxu0 %v9322_v43  ;;  %v9408_v43 = vld [vmem:[%s11268_s8 + $0x2f4] ss:$8 sps:$4 sm:$0xff]  }
 0x156   : > { %7762 = vmatpush2.bf16.msra.mxu1 %v9323_v44  ;;  %7722 = vmatprep.subr.bf16.mxu0 %v9324_v45  ;;  %v9411_v44 = vld [vmem:[%s11268_s8 + $0x3f4] ss:$8 sps:$4 sm:$0xff]   ;;  %v9406_v45 = vld [vmem:[%s11268_s8 + $0x2f0] ss:$8 sps:$4 sm:$0xff]  }
 0x157   : > { %7763 = vmatprep.subr.bf16.mxu1 %v9326_v46  ;;  %v9409_v46 = vld [vmem:[%s11268_s8 + $0x3f0] ss:$8 sps:$4 sm:$0xff]  }
 0x159   : > { %7723 = vmatpush2.bf16.msra.mxu0 %v9328_v50  ;;  %v9415_v50 = vld [vmem:[%s11268_s8 + $0x3e0] ss:$8 sps:$4 sm:$0xff]  }
 0x15a   : > { %7764 = vmatpush2.bf16.msra.mxu1 %v9329_v51  ;;  %7724 = vmatprep.subr.bf16.mxu0 %v9330_v53  ;;  %v9420_v51 = vld [vmem:[%s11268_s8 + $0x2d4] ss:$8 sps:$4 sm:$0xff]   ;;  %v9418_v53 = vld [vmem:[%s11268_s8 + $0x2d0] ss:$8 sps:$4 sm:$0xff]  }
 0x15b   : > { %7765 = vmatprep.subr.bf16.mxu1 %v9332_v54  ;;  %v9421_v54 = vld [vmem:[%s11268_s8 + $0x3d0] ss:$8 sps:$4 sm:$0xff]  }
 0x15d   : > { %7725 = vmatpush2.bf16.msra.mxu0 %v9334_v55  ;;  %v9426_v55 = vld [vmem:[%s11268_s8 + $0x2c4] ss:$8 sps:$4 sm:$0xff]  }
 0x15e   : > { %7766 = vmatpush2.bf16.msra.mxu1 %v9335_v56  ;;  %7726 = vmatprep.subr.bf16.mxu0 %v9336_v57  ;;  %v9429_v56 = vld [vmem:[%s11268_s8 + $0x3c4] ss:$8 sps:$4 sm:$0xff]   ;;  %v9424_v57 = vld [vmem:[%s11268_s8 + $0x2c0] ss:$8 sps:$4 sm:$0xff]  }
 0x15f   : > { %7767 = vmatprep.subr.bf16.mxu1 %v9338_v58  ;;  %v9427_v58 = vld [vmem:[%s11268_s8 + $0x3c0] ss:$8 sps:$4 sm:$0xff]  }
 0x161   : > { %7727 = vmatpush2.bf16.msra.mxu0 %v9340_v59  ;;  %v9432_v59 = vld [vmem:[%s11268_s8 + $0x2b4] ss:$8 sps:$4 sm:$0xff]  }
 0x162   : > { %7768 = vmatpush2.bf16.msra.mxu1 %v9341_v60  ;;  %7728 = vmatprep.subr.bf16.mxu0 %v9342_v61  ;;  %v9435_v60 = vld [vmem:[%s11268_s8 + $0x3b4] ss:$8 sps:$4 sm:$0xff]   ;;  %v9430_v61 = vld [vmem:[%s11268_s8 + $0x2b0] ss:$8 sps:$4 sm:$0xff]  }
 0x163   : > { %7769 = vmatprep.subr.bf16.mxu1 %v9344_v62  ;;  %v9433_v62 = vld [vmem:[%s11268_s8 + $0x3b0] ss:$8 sps:$4 sm:$0xff]  }
 0x165   : > { %7729 = vmatpush2.bf16.msra.mxu0 %v9346_v63  ;;  %v9438_v63 = vld [vmem:[%s11268_s8 + $0x2a4] ss:$8 sps:$4 sm:$0xff]  }
 0x166   : > { %7770 = vmatpush2.bf16.msra.mxu1 %v9347_v0  ;;  %7730 = vmatprep.subr.bf16.mxu0 %v9348_v1  ;;  %v9441_v0 = vld [vmem:[%s11268_s8 + $0x3a4] ss:$8 sps:$4 sm:$0xff]   ;;  %v9436_v1 = vld [vmem:[%s11268_s8 + $0x2a0] ss:$8 sps:$4 sm:$0xff]  }
 0x167   : > { %7771 = vmatprep.subr.bf16.mxu1 %v9350_v2  ;;  %v9439_v2 = vld [vmem:[%s11268_s8 + $0x3a0] ss:$8 sps:$4 sm:$0xff]  }
 0x169   : > { %7731 = vmatpush2.bf16.msra.mxu0 %v9352_v3  ;;  %v9444_v3 = vld [vmem:[%s11268_s8 + $0x294] ss:$8 sps:$4 sm:$0xff]  }
 0x16a   : > { %7772 = vmatpush2.bf16.msra.mxu1 %v9353_v4  ;;  %7782 = vmatprep.subr.bf16.mxu0 %v9360_v5  ;;  %v9447_v4 = vld [vmem:[%s11268_s8 + $0x394] ss:$8 sps:$4 sm:$0xff]   ;;  %v9442_v5 = vld [vmem:[%s11268_s8 + $0x290] ss:$8 sps:$4 sm:$0xff]  }
 0x16b   : > { %7823 = vmatprep.subr.bf16.mxu1 %v9363_v6  ;;  %v9445_v6 = vld [vmem:[%s11268_s8 + $0x390] ss:$8 sps:$4 sm:$0xff]  }
 0x16c   : > { %7733 = vmatmul.mubr.bf16.vlgmr.msra.gmra.mxu0 %v8650_v7  ;;  %v9450_v7 = vld [vmem:[%s11268_s8 + $0x284] ss:$8 sps:$4 sm:$0xff]  }
 0x16d   : > { %7774 = vmatmul.mubr.bf16.vlgmr.msra.gmra.mxu1 %v8652_v8  ;;  %7783 = vmatpush1.bf16.msra.mxu0 %v9358_v9  ;;  %v9453_v8 = vld [vmem:[%s11268_s8 + $0x384] ss:$8 sps:$4 sm:$0xff]   ;;  %v9448_v9 = vld [vmem:[%s11268_s8 + $0x280] ss:$8 sps:$4 sm:$0xff]  }
 0x16e   : > { %7824 = vmatpush1.bf16.msra.mxu1 %v9361_v10  ;;  %7784 = vmatprep.subr.bf16.mxu0 %v9366_v11  ;;  %v9451_v10 = vld [vmem:[%s11268_s8 + $0x380] ss:$8 sps:$4 sm:$0xff]   ;;  %v9460_v11 = vld [vmem:[%s11268_s8 + $0x474] ss:$8 sps:$4 sm:$0xff]  }
 0x16f   : > { %7825 = vmatprep.subr.bf16.mxu1 %v9369_v12  ;;  %7814 = vmatprep.mubr.bf16.mxu0 %v8655_v37  ;;  %v9463_v12 = vld [vmem:[%s11268_s8 + $0x574] ss:$8 sps:$4 sm:$0xff]   ;;  %v9490_v37 = vld [vmem:[%s11268_s8 + $0x424] ss:$8 sps:$4 sm:$0xff]  }
 0x170   : > { %7855 = vmatprep.mubr.bf16.mxu1 %v8657_v38  ;;  %v9493_v38 = vld [vmem:[%s11268_s8 + $0x524] ss:$8 sps:$4 sm:$0xff]  }
 0x171   : > { %7785 = vmatpush1.bf16.msra.mxu0 %v9364_v13  ;;  %v8654_v13 = vcombine.low %v11364_v33, %v11364_v33  ;;  %v9484_v33 = vld [vmem:[%s11268_s8 + $0x434] ss:$8 sps:$4 sm:$0xff]  }
 0x172   : > { %7826 = vmatpush1.bf16.msra.mxu1 %v9367_v14  ;;  %7786 = vmatprep.subr.bf16.mxu0 %v9372_v15  ;;  %v8656_v14 = vcombine.low %v11367_v34, %v11367_v34  ;;  %v9458_v15 = vld [vmem:[%s11268_s8 + $0x470] ss:$8 sps:$4 sm:$0xff]   ;;  %v9487_v34 = vld [vmem:[%s11268_s8 + $0x534] ss:$8 sps:$4 sm:$0xff]  }
 0x173   : > { %7827 = vmatprep.subr.bf16.mxu1 %v9375_v16  ;;  %v9461_v16 = vld [vmem:[%s11268_s8 + $0x570] ss:$8 sps:$4 sm:$0xff]  }
 0x175   : > { %7787 = vmatpush1.bf16.msra.mxu0 %v9370_v17  ;;  %v9466_v17 = vld [vmem:[%s11268_s8 + $0x464] ss:$8 sps:$4 sm:$0xff]  }
 0x176   : > { %7828 = vmatpush1.bf16.msra.mxu1 %v9373_v18  ;;  %7788 = vmatprep.subr.bf16.mxu0 %v9378_v19  ;;  %v9469_v18 = vld [vmem:[%s11268_s8 + $0x564] ss:$8 sps:$4 sm:$0xff]   ;;  %v11422_v19 = vld [vmem:[%s11246_s9 + $0x20] sm:$0xff] }
 0x177   : > { %7829 = vmatprep.subr.bf16.mxu1 %v9381_v20  ;;  %v11425_v20 = vld [vmem:[%s11246_s9 + $0x28] sm:$0xff] }
 0x179   : > { %7789 = vmatpush1.bf16.msra.mxu0 %v9376_v21  ;;  %v8659_v21 = vcombine.high %v11422_v19, %v11422_v19 }
 0x17a   : > { %7830 = vmatpush1.bf16.msra.mxu1 %v9379_v22  ;;  %7790 = vmatprep.subr.bf16.mxu0 %v9384_v23  ;;  %v8661_v22 = vcombine.high %v11425_v20, %v11425_v20  ;;  %v9464_v23 = vld [vmem:[%s11268_s8 + $0x460] ss:$8 sps:$4 sm:$0xff]  }
 0x17b   : > { %7831 = vmatprep.subr.bf16.mxu1 %v9387_v24  ;;  %v9467_v24 = vld [vmem:[%s11268_s8 + $0x560] ss:$8 sps:$4 sm:$0xff]  }
 0x17d   : > { %7791 = vmatpush1.bf16.msra.mxu0 %v9382_v25  ;;  %v9472_v25 = vld [vmem:[%s11268_s8 + $0x454] ss:$8 sps:$4 sm:$0xff]  }
 0x17e   : > { %7832 = vmatpush1.bf16.msra.mxu1 %v9385_v26  ;;  %7792 = vmatprep.subr.bf16.mxu0 %v9390_v27  ;;  %v9475_v26 = vld [vmem:[%s11268_s8 + $0x554] ss:$8 sps:$4 sm:$0xff]   ;;  %v9470_v27 = vld [vmem:[%s11268_s8 + $0x450] ss:$8 sps:$4 sm:$0xff]  }
 0x17f   : > { %7833 = vmatprep.subr.bf16.mxu1 %v9393_v28  ;;  %v9473_v28 = vld [vmem:[%s11268_s8 + $0x550] ss:$8 sps:$4 sm:$0xff]  }
 0x181   : > { %7793 = vmatpush1.bf16.msra.mxu0 %v9388_v29  ;;  %v9478_v29 = vld [vmem:[%s11268_s8 + $0x444] ss:$8 sps:$4 sm:$0xff]  }
 0x182   : > { %7834 = vmatpush1.bf16.msra.mxu1 %v9391_v30  ;;  %7794 = vmatprep.subr.bf16.mxu0 %v9396_v31  ;;  %v9481_v30 = vld [vmem:[%s11268_s8 + $0x544] ss:$8 sps:$4 sm:$0xff]   ;;  %v9476_v31 = vld [vmem:[%s11268_s8 + $0x440] ss:$8 sps:$4 sm:$0xff]  }
 0x183   : > { %7835 = vmatprep.subr.bf16.mxu1 %v9399_v32  ;;  %v9479_v32 = vld [vmem:[%s11268_s8 + $0x540] ss:$8 sps:$4 sm:$0xff]  }
 0x185   : > { %7795 = vmatpush1.bf16.msra.mxu0 %v9394_v35  ;;  %v9482_v35 = vld [vmem:[%s11268_s8 + $0x430] ss:$8 sps:$4 sm:$0xff]  }
 0x186   : > { %7836 = vmatpush1.bf16.msra.mxu1 %v9397_v36  ;;  %7796 = vmatprep.subr.bf16.mxu0 %v9402_v39  ;;  %v9485_v36 = vld [vmem:[%s11268_s8 + $0x530] ss:$8 sps:$4 sm:$0xff]   ;;  %v9488_v39 = vld [vmem:[%s11268_s8 + $0x420] ss:$8 sps:$4 sm:$0xff]  }
 0x187   : > { %7837 = vmatprep.subr.bf16.mxu1 %v9405_v40  ;;  %v9491_v40 = vld [vmem:[%s11268_s8 + $0x520] ss:$8 sps:$4 sm:$0xff]  }
 0x189   : > { %7797 = vmatpush1.bf16.msra.mxu0 %v9400_v41  ;;  %v9496_v41 = vld [vmem:[%s11268_s8 + $0x414] ss:$8 sps:$4 sm:$0xff]  }
 0x18a   : > { %7838 = vmatpush1.bf16.msra.mxu1 %v9403_v42  ;;  %7798 = vmatprep.subr.bf16.mxu0 %v9408_v43  ;;  %v9499_v42 = vld [vmem:[%s11268_s8 + $0x514] ss:$8 sps:$4 sm:$0xff]   ;;  %v9494_v43 = vld [vmem:[%s11268_s8 + $0x410] ss:$8 sps:$4 sm:$0xff]  }
 0x18b   : > { %7839 = vmatprep.subr.bf16.mxu1 %v9411_v44  ;;  %v9497_v44 = vld [vmem:[%s11268_s8 + $0x510] ss:$8 sps:$4 sm:$0xff]  }
 0x18d   : > { %7799 = vmatpush2.bf16.msra.mxu0 %v9406_v45  ;;  %v9502_v45 = vld [vmem:[%s11268_s8 + $0x404] ss:$8 sps:$4 sm:$0xff]  }
 0x18e   : > { %7840 = vmatpush2.bf16.msra.mxu1 %v9409_v46  ;;  %7800 = vmatprep.subr.bf16.mxu0 %v9414_v47  ;;  %v9505_v46 = vld [vmem:[%s11268_s8 + $0x504] ss:$8 sps:$4 sm:$0xff]   ;;  %v9500_v47 = vld [vmem:[%s11268_s8 + $0x400] ss:$8 sps:$4 sm:$0xff]  }
 0x18f   : > { %7841 = vmatprep.subr.bf16.mxu1 %v9417_v48  ;;  %v9503_v48 = vld [vmem:[%s11268_s8 + $0x500] ss:$8 sps:$4 sm:$0xff]  }
 0x191   : > { %7801 = vmatpush2.bf16.msra.mxu0 %v9412_v49  ;;  %v9508_v49 = vld [vmem:[%s11268_s8 + $0x4f4] ss:$8 sps:$4 sm:$0xff]  }
 0x192   : > { %7842 = vmatpush2.bf16.msra.mxu1 %v9415_v50  ;;  %7802 = vmatprep.subr.bf16.mxu0 %v9420_v51  ;;  %v9511_v50 = vld [vmem:[%s11268_s8 + $0x5f4] ss:$8 sps:$4 sm:$0xff]   ;;  %v9506_v51 = vld [vmem:[%s11268_s8 + $0x4f0] ss:$8 sps:$4 sm:$0xff]  }
 0x193   : > { %7843 = vmatprep.subr.bf16.mxu1 %v9423_v52  ;;  %v9509_v52 = vld [vmem:[%s11268_s8 + $0x5f0] ss:$8 sps:$4 sm:$0xff]  }
 0x195   : > { %7803 = vmatpush2.bf16.msra.mxu0 %v9418_v53  ;;  %v9514_v53 = vld [vmem:[%s11268_s8 + $0x4e4] ss:$8 sps:$4 sm:$0xff]  }
 0x196   : > { %7844 = vmatpush2.bf16.msra.mxu1 %v9421_v54  ;;  %7804 = vmatprep.subr.bf16.mxu0 %v9426_v55  ;;  %v9517_v54 = vld [vmem:[%s11268_s8 + $0x5e4] ss:$8 sps:$4 sm:$0xff]   ;;  %v9512_v55 = vld [vmem:[%s11268_s8 + $0x4e0] ss:$8 sps:$4 sm:$0xff]  }
 0x197   : > { %7845 = vmatprep.subr.bf16.mxu1 %v9429_v56  ;;  %v9515_v56 = vld [vmem:[%s11268_s8 + $0x5e0] ss:$8 sps:$4 sm:$0xff]  }
 0x199   : > { %7805 = vmatpush2.bf16.msra.mxu0 %v9424_v57  ;;  %v9520_v57 = vld [vmem:[%s11268_s8 + $0x4d4] ss:$8 sps:$4 sm:$0xff]  }
 0x19a   : > { %7846 = vmatpush2.bf16.msra.mxu1 %v9427_v58  ;;  %7806 = vmatprep.subr.bf16.mxu0 %v9432_v59  ;;  %v9523_v58 = vld [vmem:[%s11268_s8 + $0x5d4] ss:$8 sps:$4 sm:$0xff]   ;;  %v9518_v59 = vld [vmem:[%s11268_s8 + $0x4d0] ss:$8 sps:$4 sm:$0xff]  }
 0x19b   : > { %7847 = vmatprep.subr.bf16.mxu1 %v9435_v60  ;;  %v9521_v60 = vld [vmem:[%s11268_s8 + $0x5d0] ss:$8 sps:$4 sm:$0xff]  }
 0x19d   : > { %7807 = vmatpush2.bf16.msra.mxu0 %v9430_v61  ;;  %v9526_v61 = vld [vmem:[%s11268_s8 + $0x4c4] ss:$8 sps:$4 sm:$0xff]  }
 0x19e   : > { %7848 = vmatpush2.bf16.msra.mxu1 %v9433_v62  ;;  %7808 = vmatprep.subr.bf16.mxu0 %v9438_v63  ;;  %v9529_v62 = vld [vmem:[%s11268_s8 + $0x5c4] ss:$8 sps:$4 sm:$0xff]   ;;  %v9524_v63 = vld [vmem:[%s11268_s8 + $0x4c0] ss:$8 sps:$4 sm:$0xff]  }
 0x19f   : > { %7849 = vmatprep.subr.bf16.mxu1 %v9441_v0  ;;  %v9527_v0 = vld [vmem:[%s11268_s8 + $0x5c0] ss:$8 sps:$4 sm:$0xff]  }
 0x1a1   : > { %7809 = vmatpush2.bf16.msra.mxu0 %v9436_v1  ;;  %v9532_v1 = vld [vmem:[%s11268_s8 + $0x4b4] ss:$8 sps:$4 sm:$0xff]  }
 0x1a2   : > { %7850 = vmatpush2.bf16.msra.mxu1 %v9439_v2  ;;  %7810 = vmatprep.subr.bf16.mxu0 %v9444_v3  ;;  %v9535_v2 = vld [vmem:[%s11268_s8 + $0x5b4] ss:$8 sps:$4 sm:$0xff]   ;;  %v9530_v3 = vld [vmem:[%s11268_s8 + $0x4b0] ss:$8 sps:$4 sm:$0xff]  }
 0x1a3   : > { %7851 = vmatprep.subr.bf16.mxu1 %v9447_v4  ;;  %v9533_v4 = vld [vmem:[%s11268_s8 + $0x5b0] ss:$8 sps:$4 sm:$0xff]  }
 0x1a5   : > { %7811 = vmatpush2.bf16.msra.mxu0 %v9442_v5  ;;  %v9538_v5 = vld [vmem:[%s11268_s8 + $0x4a4] ss:$8 sps:$4 sm:$0xff]  }
 0x1a6   : > { %7852 = vmatpush2.bf16.msra.mxu1 %v9445_v6  ;;  %7812 = vmatprep.subr.bf16.mxu0 %v9450_v7  ;;  %v9541_v6 = vld [vmem:[%s11268_s8 + $0x5a4] ss:$8 sps:$4 sm:$0xff]   ;;  %v9536_v7 = vld [vmem:[%s11268_s8 + $0x4a0] ss:$8 sps:$4 sm:$0xff]  }
 0x1a7   : > { %7853 = vmatprep.subr.bf16.mxu1 %v9453_v8  ;;  %v9539_v8 = vld [vmem:[%s11268_s8 + $0x5a0] ss:$8 sps:$4 sm:$0xff]  }
 0x1a9   : > { %7813 = vmatpush2.bf16.msra.mxu0 %v9448_v9  ;;  %v9544_v9 = vld [vmem:[%s11268_s8 + $0x494] ss:$8 sps:$4 sm:$0xff]  }
 0x1aa   : > { %7854 = vmatpush2.bf16.msra.mxu1 %v9451_v10  ;;  %7864 = vmatprep.subr.bf16.mxu0 %v9460_v11  ;;  %v9547_v10 = vld [vmem:[%s11268_s8 + $0x594] ss:$8 sps:$4 sm:$0xff]   ;;  %v9542_v11 = vld [vmem:[%s11268_s8 + $0x490] ss:$8 sps:$4 sm:$0xff]  }
 0x1ab   : > { %7905 = vmatprep.subr.bf16.mxu1 %v9463_v12  ;;  %v9545_v12 = vld [vmem:[%s11268_s8 + $0x590] ss:$8 sps:$4 sm:$0xff]  }
 0x1ac   : > { %7815 = vmatmul.mubr.bf16.vlgmr.msra.gmra.mxu0 %v8654_v13  ;;  %v9550_v13 = vld [vmem:[%s11268_s8 + $0x484] ss:$8 sps:$4 sm:$0xff]  }
 0x1ad   : > { %7856 = vmatmul.mubr.bf16.vlgmr.msra.gmra.mxu1 %v8656_v14  ;;  %7865 = vmatpush1.bf16.msra.mxu0 %v9458_v15  ;;  %v9553_v14 = vld [vmem:[%s11268_s8 + $0x584] ss:$8 sps:$4 sm:$0xff]   ;;  %v9548_v15 = vld [vmem:[%s11268_s8 + $0x480] ss:$8 sps:$4 sm:$0xff]  }
 0x1ae   : > { %7906 = vmatpush1.bf16.msra.mxu1 %v9461_v16  ;;  %7866 = vmatprep.subr.bf16.mxu0 %v9466_v17  ;;  %v9551_v16 = vld [vmem:[%s11268_s8 + $0x580] ss:$8 sps:$4 sm:$0xff]   ;;  %v9560_v17 = vld [vmem:[%s11268_s8 + $0x674] ss:$8 sps:$4 sm:$0xff]  }
 0x1af   : > { %7907 = vmatprep.subr.bf16.mxu1 %v9469_v18  ;;  %7896 = vmatprep.mubr.bf16.mxu0 %v8659_v21  ;;  %v9563_v18 = vld [vmem:[%s11268_s8 + $0x774] ss:$8 sps:$4 sm:$0xff]   ;;  %v9558_v21 = vld [vmem:[%s11268_s8 + $0x670] ss:$8 sps:$4 sm:$0xff]  }
 0x1b0   : > { %7937 = vmatprep.mubr.bf16.mxu1 %v8661_v22  ;;  %v9561_v22 = vld [vmem:[%s11268_s8 + $0x770] ss:$8 sps:$4 sm:$0xff]  }
 0x1b1   : > { %7867 = vmatpush1.bf16.msra.mxu0 %v9464_v23  ;;  %v8658_v23 = vcombine.low %v11422_v19, %v11422_v19 }
 0x1b2   : > { %7908 = vmatpush1.bf16.msra.mxu1 %v9467_v24  ;;  %7868 = vmatprep.subr.bf16.mxu0 %v9472_v25  ;;  %v8660_v24 = vcombine.low %v11425_v20, %v11425_v20  ;;  %v11498_v25 = vld [vmem:[%s11246_s9 + $0x30] sm:$0xff] }
 0x1b3   : > { %7909 = vmatprep.subr.bf16.mxu1 %v9475_v26  ;;  %v11501_v26 = vld [vmem:[%s11246_s9 + $0x38] sm:$0xff]  ;;  %v8663_v19 = vcombine.high %v11498_v25, %v11498_v25 }
 0x1b4   : > { %v8665_v20 = vcombine.high %v11501_v26, %v11501_v26 }
 0x1b5   : > { %7869 = vmatpush1.bf16.msra.mxu0 %v9470_v27  ;;  %v9566_v27 = vld [vmem:[%s11268_s8 + $0x664] ss:$8 sps:$4 sm:$0xff]  }
 0x1b6   : > { %7910 = vmatpush1.bf16.msra.mxu1 %v9473_v28  ;;  %7870 = vmatprep.subr.bf16.mxu0 %v9478_v29  ;;  %v9569_v28 = vld [vmem:[%s11268_s8 + $0x764] ss:$8 sps:$4 sm:$0xff]   ;;  %v9564_v29 = vld [vmem:[%s11268_s8 + $0x660] ss:$8 sps:$4 sm:$0xff]  }
 0x1b7   : > { %7911 = vmatprep.subr.bf16.mxu1 %v9481_v30  ;;  %v9567_v30 = vld [vmem:[%s11268_s8 + $0x760] ss:$8 sps:$4 sm:$0xff]  }
 0x1b9   : > { %7871 = vmatpush1.bf16.msra.mxu0 %v9476_v31  ;;  %v9572_v31 = vld [vmem:[%s11268_s8 + $0x654] ss:$8 sps:$4 sm:$0xff]  }
 0x1ba   : > { %7912 = vmatpush1.bf16.msra.mxu1 %v9479_v32  ;;  %7872 = vmatprep.subr.bf16.mxu0 %v9484_v33  ;;  %v9575_v32 = vld [vmem:[%s11268_s8 + $0x754] ss:$8 sps:$4 sm:$0xff]   ;;  %v9570_v33 = vld [vmem:[%s11268_s8 + $0x650] ss:$8 sps:$4 sm:$0xff]  }
 0x1bb   : > { %7913 = vmatprep.subr.bf16.mxu1 %v9487_v34  ;;  %v9573_v34 = vld [vmem:[%s11268_s8 + $0x750] ss:$8 sps:$4 sm:$0xff]  }
 0x1bd   : > { %7873 = vmatpush1.bf16.msra.mxu0 %v9482_v35  ;;  %v9578_v35 = vld [vmem:[%s11268_s8 + $0x644] ss:$8 sps:$4 sm:$0xff]  }
 0x1be   : > { %7914 = vmatpush1.bf16.msra.mxu1 %v9485_v36  ;;  %7874 = vmatprep.subr.bf16.mxu0 %v9490_v37  ;;  %v9581_v36 = vld [vmem:[%s11268_s8 + $0x744] ss:$8 sps:$4 sm:$0xff]   ;;  %v9576_v37 = vld [vmem:[%s11268_s8 + $0x640] ss:$8 sps:$4 sm:$0xff]  }
 0x1bf   : > { %7915 = vmatprep.subr.bf16.mxu1 %v9493_v38  ;;  %v9579_v38 = vld [vmem:[%s11268_s8 + $0x740] ss:$8 sps:$4 sm:$0xff]  }
 0x1c1   : > { %7875 = vmatpush1.bf16.msra.mxu0 %v9488_v39  ;;  %v9584_v39 = vld [vmem:[%s11268_s8 + $0x634] ss:$8 sps:$4 sm:$0xff]  }
 0x1c2   : > { %7916 = vmatpush1.bf16.msra.mxu1 %v9491_v40  ;;  %7876 = vmatprep.subr.bf16.mxu0 %v9496_v41  ;;  %v9587_v40 = vld [vmem:[%s11268_s8 + $0x734] ss:$8 sps:$4 sm:$0xff]   ;;  %v9582_v41 = vld [vmem:[%s11268_s8 + $0x630] ss:$8 sps:$4 sm:$0xff]  }
 0x1c3   : > { %7917 = vmatprep.subr.bf16.mxu1 %v9499_v42  ;;  %v9585_v42 = vld [vmem:[%s11268_s8 + $0x730] ss:$8 sps:$4 sm:$0xff]  }
 0x1c5   : > { %7877 = vmatpush1.bf16.msra.mxu0 %v9494_v43  ;;  %v9590_v43 = vld [vmem:[%s11268_s8 + $0x624] ss:$8 sps:$4 sm:$0xff]  }
 0x1c6   : > { %7918 = vmatpush1.bf16.msra.mxu1 %v9497_v44  ;;  %7878 = vmatprep.subr.bf16.mxu0 %v9502_v45  ;;  %v9593_v44 = vld [vmem:[%s11268_s8 + $0x724] ss:$8 sps:$4 sm:$0xff]   ;;  %v9588_v45 = vld [vmem:[%s11268_s8 + $0x620] ss:$8 sps:$4 sm:$0xff]  }
 0x1c7   : > { %7919 = vmatprep.subr.bf16.mxu1 %v9505_v46  ;;  %v9591_v46 = vld [vmem:[%s11268_s8 + $0x720] ss:$8 sps:$4 sm:$0xff]  }
 0x1c9   : > { %7879 = vmatpush1.bf16.msra.mxu0 %v9500_v47  ;;  %v9596_v47 = vld [vmem:[%s11268_s8 + $0x614] ss:$8 sps:$4 sm:$0xff]  }
 0x1ca   : > { %7920 = vmatpush1.bf16.msra.mxu1 %v9503_v48  ;;  %7880 = vmatprep.subr.bf16.mxu0 %v9508_v49  ;;  %v9599_v48 = vld [vmem:[%s11268_s8 + $0x714] ss:$8 sps:$4 sm:$0xff]   ;;  %v9594_v49 = vld [vmem:[%s11268_s8 + $0x610] ss:$8 sps:$4 sm:$0xff]  }
 0x1cb   : > { %7921 = vmatprep.subr.bf16.mxu1 %v9511_v50  ;;  %v9597_v50 = vld [vmem:[%s11268_s8 + $0x710] ss:$8 sps:$4 sm:$0xff]  }
 0x1cd   : > { %7881 = vmatpush2.bf16.msra.mxu0 %v9506_v51  ;;  %v9602_v51 = vld [vmem:[%s11268_s8 + $0x604] ss:$8 sps:$4 sm:$0xff]  }
 0x1ce   : > { %7922 = vmatpush2.bf16.msra.mxu1 %v9509_v52  ;;  %7882 = vmatprep.subr.bf16.mxu0 %v9514_v53  ;;  %v9605_v52 = vld [vmem:[%s11268_s8 + $0x704] ss:$8 sps:$4 sm:$0xff]   ;;  %v9600_v53 = vld [vmem:[%s11268_s8 + $0x600] ss:$8 sps:$4 sm:$0xff]  }
 0x1cf   : > { %7923 = vmatprep.subr.bf16.mxu1 %v9517_v54  ;;  %v9603_v54 = vld [vmem:[%s11268_s8 + $0x700] ss:$8 sps:$4 sm:$0xff]  }
 0x1d1   : > { %7883 = vmatpush2.bf16.msra.mxu0 %v9512_v55  ;;  %v9608_v55 = vld [vmem:[%s11268_s8 + $0x6f4] ss:$8 sps:$4 sm:$0xff]  }
 0x1d2   : > { %7924 = vmatpush2.bf16.msra.mxu1 %v9515_v56  ;;  %7884 = vmatprep.subr.bf16.mxu0 %v9520_v57  ;;  %v9611_v56 = vld [vmem:[%s11268_s8 + $0x7f4] ss:$8 sps:$4 sm:$0xff]   ;;  %v9606_v57 = vld [vmem:[%s11268_s8 + $0x6f0] ss:$8 sps:$4 sm:$0xff]  }
 0x1d3   : > { %7925 = vmatprep.subr.bf16.mxu1 %v9523_v58  ;;  %v9609_v58 = vld [vmem:[%s11268_s8 + $0x7f0] ss:$8 sps:$4 sm:$0xff]  }
 0x1d5   : > { %7885 = vmatpush2.bf16.msra.mxu0 %v9518_v59  ;;  %v9614_v59 = vld [vmem:[%s11268_s8 + $0x6e4] ss:$8 sps:$4 sm:$0xff]  }
 0x1d6   : > { %7926 = vmatpush2.bf16.msra.mxu1 %v9521_v60  ;;  %7886 = vmatprep.subr.bf16.mxu0 %v9526_v61  ;;  %v9617_v60 = vld [vmem:[%s11268_s8 + $0x7e4] ss:$8 sps:$4 sm:$0xff]   ;;  %v9612_v61 = vld [vmem:[%s11268_s8 + $0x6e0] ss:$8 sps:$4 sm:$0xff]  }
 0x1d7   : > { %7927 = vmatprep.subr.bf16.mxu1 %v9529_v62  ;;  %v9615_v62 = vld [vmem:[%s11268_s8 + $0x7e0] ss:$8 sps:$4 sm:$0xff]  }
 0x1d9   : > { %7887 = vmatpush2.bf16.msra.mxu0 %v9524_v63  ;;  %v9620_v63 = vld [vmem:[%s11268_s8 + $0x6d4] ss:$8 sps:$4 sm:$0xff]  }
 0x1da   : > { %7928 = vmatpush2.bf16.msra.mxu1 %v9527_v0  ;;  %7888 = vmatprep.subr.bf16.mxu0 %v9532_v1  ;;  %v9623_v0 = vld [vmem:[%s11268_s8 + $0x7d4] ss:$8 sps:$4 sm:$0xff]   ;;  %v9618_v1 = vld [vmem:[%s11268_s8 + $0x6d0] ss:$8 sps:$4 sm:$0xff]  }
 0x1db   : > { %7929 = vmatprep.subr.bf16.mxu1 %v9535_v2  ;;  %v9621_v2 = vld [vmem:[%s11268_s8 + $0x7d0] ss:$8 sps:$4 sm:$0xff]  }
 0x1dd   : > { %7889 = vmatpush2.bf16.msra.mxu0 %v9530_v3  ;;  %v9626_v3 = vld [vmem:[%s11268_s8 + $0x6c4] ss:$8 sps:$4 sm:$0xff]  }
 0x1de   : > { %7930 = vmatpush2.bf16.msra.mxu1 %v9533_v4  ;;  %7890 = vmatprep.subr.bf16.mxu0 %v9538_v5  ;;  %v9629_v4 = vld [vmem:[%s11268_s8 + $0x7c4] ss:$8 sps:$4 sm:$0xff]   ;;  %v9624_v5 = vld [vmem:[%s11268_s8 + $0x6c0] ss:$8 sps:$4 sm:$0xff]  }
 0x1df   : > { %7931 = vmatprep.subr.bf16.mxu1 %v9541_v6  ;;  %v9627_v6 = vld [vmem:[%s11268_s8 + $0x7c0] ss:$8 sps:$4 sm:$0xff]  }
 0x1e1   : > { %7891 = vmatpush2.bf16.msra.mxu0 %v9536_v7  ;;  %v9632_v7 = vld [vmem:[%s11268_s8 + $0x6b4] ss:$8 sps:$4 sm:$0xff]  }
 0x1e2   : > { %7932 = vmatpush2.bf16.msra.mxu1 %v9539_v8  ;;  %7892 = vmatprep.subr.bf16.mxu0 %v9544_v9  ;;  %v9635_v8 = vld [vmem:[%s11268_s8 + $0x7b4] ss:$8 sps:$4 sm:$0xff]   ;;  %v9630_v9 = vld [vmem:[%s11268_s8 + $0x6b0] ss:$8 sps:$4 sm:$0xff]  }
 0x1e3   : > { %7933 = vmatprep.subr.bf16.mxu1 %v9547_v10  ;;  %v9633_v10 = vld [vmem:[%s11268_s8 + $0x7b0] ss:$8 sps:$4 sm:$0xff]  }
 0x1e5   : > { %7893 = vmatpush2.bf16.msra.mxu0 %v9542_v11  ;;  %v9638_v11 = vld [vmem:[%s11268_s8 + $0x6a4] ss:$8 sps:$4 sm:$0xff]  }
 0x1e6   : > { %7934 = vmatpush2.bf16.msra.mxu1 %v9545_v12  ;;  %7894 = vmatprep.subr.bf16.mxu0 %v9550_v13  ;;  %v9641_v12 = vld [vmem:[%s11268_s8 + $0x7a4] ss:$8 sps:$4 sm:$0xff]   ;;  %v9636_v13 = vld [vmem:[%s11268_s8 + $0x6a0] ss:$8 sps:$4 sm:$0xff]  }
 0x1e7   : > { %7935 = vmatprep.subr.bf16.mxu1 %v9553_v14  ;;  %v9639_v14 = vld [vmem:[%s11268_s8 + $0x7a0] ss:$8 sps:$4 sm:$0xff]  }
 0x1e9   : > { %7895 = vmatpush2.bf16.msra.mxu0 %v9548_v15  ;;  %v9644_v15 = vld [vmem:[%s11268_s8 + $0x694] ss:$8 sps:$4 sm:$0xff]  }
 0x1ea   : > { %7936 = vmatpush2.bf16.msra.mxu1 %v9551_v16  ;;  %7946 = vmatprep.subr.bf16.mxu0 %v9560_v17  ;;  %v9647_v16 = vld [vmem:[%s11268_s8 + $0x794] ss:$8 sps:$4 sm:$0xff]   ;;  %v9642_v17 = vld [vmem:[%s11268_s8 + $0x690] ss:$8 sps:$4 sm:$0xff]  }
 0x1eb   : > { %7987 = vmatprep.subr.bf16.mxu1 %v9563_v18  ;;  %v9645_v18 = vld [vmem:[%s11268_s8 + $0x790] ss:$8 sps:$4 sm:$0xff]  }
 0x1ec   : > { %7897 = vmatmul.mubr.bf16.vlgmr.msra.gmra.mxu0 %v8658_v23  ;;  %v9648_v23 = vld [vmem:[%s11268_s8 + $0x680] ss:$8 sps:$4 sm:$0xff]  }
 0x1ed   : > { %7938 = vmatmul.mubr.bf16.vlgmr.msra.gmra.mxu1 %v8660_v24  ;;  %7947 = vmatpush1.bf16.msra.mxu0 %v9558_v21  ;;  %v9650_v21 = vld [vmem:[%s11268_s8 + $0x684] ss:$8 sps:$4 sm:$0xff]   ;;  %v9651_v24 = vld [vmem:[%s11268_s8 + $0x780] ss:$8 sps:$4 sm:$0xff]  }
 0x1ee   : > { %7988 = vmatpush1.bf16.msra.mxu1 %v9561_v22  ;;  %7948 = vmatprep.subr.bf16.mxu0 %v9566_v27  ;;  %v9653_v22 = vld [vmem:[%s11268_s8 + $0x784] ss:$8 sps:$4 sm:$0xff]   ;;  %v9660_v27 = vld [vmem:[%s11268_s8 + $0x874] ss:$8 sps:$4 sm:$0xff]  }
 0x1ef   : > { %7989 = vmatprep.subr.bf16.mxu1 %v9569_v28  ;;  %7978 = vmatprep.mubr.bf16.mxu0 %v8663_v19  ;;  %v9663_v28 = vld [vmem:[%s11268_s8 + $0x974] ss:$8 sps:$4 sm:$0xff]  }
 0x1f0   : > { %8019 = vmatprep.mubr.bf16.mxu1 %v8665_v20  ;;  %v11570_v19 = vld [vmem:[%s11246_s9 + $0x40] sm:$0xff]  ;;  %v8662_v20 = vcombine.low %v11498_v25, %v11498_v25 }
 0x1f1   : > { %7949 = vmatpush1.bf16.msra.mxu0 %v9564_v29  ;;  %v8664_v29 = vcombine.low %v11501_v26, %v11501_v26 }
 0x1f2   : > { %7990 = vmatpush1.bf16.msra.mxu1 %v9567_v30  ;;  %7950 = vmatprep.subr.bf16.mxu0 %v9572_v31  ;;  %v11577_v30 = vld [vmem:[%s11246_s9 + $0x48] sm:$0xff] }
 0x1f3   : > { %7991 = vmatprep.subr.bf16.mxu1 %v9575_v32  ;;  %v9658_v31 = vld [vmem:[%s11268_s8 + $0x870] ss:$8 sps:$4 sm:$0xff]   ;;  %v8669_v25 = vcombine.high %v11577_v30, %v11577_v30 }
 0x1f4   : > { %v9661_v32 = vld [vmem:[%s11268_s8 + $0x970] ss:$8 sps:$4 sm:$0xff]  }
 0x1f5   : > { %7951 = vmatpush1.bf16.msra.mxu0 %v9570_v33  ;;  %v9666_v33 = vld [vmem:[%s11268_s8 + $0x864] ss:$8 sps:$4 sm:$0xff]  }
 0x1f6   : > { %7992 = vmatpush1.bf16.msra.mxu1 %v9573_v34  ;;  %7952 = vmatprep.subr.bf16.mxu0 %v9578_v35  ;;  %v9669_v34 = vld [vmem:[%s11268_s8 + $0x964] ss:$8 sps:$4 sm:$0xff]   ;;  %v8667_v35 = vcombine.high %v11570_v19, %v11570_v19 }
 0x1f7   : > { %7993 = vmatprep.subr.bf16.mxu1 %v9581_v36 }
 0x1f9   : > { %7953 = vmatpush1.bf16.msra.mxu0 %v9576_v37  ;;  %v9664_v37 = vld [vmem:[%s11268_s8 + $0x860] ss:$8 sps:$4 sm:$0xff]  }
 0x1fa   : > { %7994 = vmatpush1.bf16.msra.mxu1 %v9579_v38  ;;  %7954 = vmatprep.subr.bf16.mxu0 %v9584_v39  ;;  %v9667_v38 = vld [vmem:[%s11268_s8 + $0x960] ss:$8 sps:$4 sm:$0xff]  }
 0x1fb   : > { %7995 = vmatprep.subr.bf16.mxu1 %v9587_v40  ;;  %v9672_v40 = vld [vmem:[%s11268_s8 + $0x854] ss:$8 sps:$4 sm:$0xff]  }
 0x1fd   : > { %7955 = vmatpush1.bf16.msra.mxu0 %v9582_v41 }
 0x1fe   : > { %7996 = vmatpush1.bf16.msra.mxu1 %v9585_v42  ;;  %7956 = vmatprep.subr.bf16.mxu0 %v9590_v43  ;;  %v9675_v43 = vld [vmem:[%s11268_s8 + $0x954] ss:$8 sps:$4 sm:$0xff]  }
 0x1ff   : > { %7997 = vmatprep.subr.bf16.mxu1 %v9593_v44 }
 0x201   : > { %7957 = vmatpush1.bf16.msra.mxu0 %v9588_v45 }
 0x202   : > { %7998 = vmatpush1.bf16.msra.mxu1 %v9591_v46  ;;  %7958 = vmatprep.subr.bf16.mxu0 %v9596_v47  ;;  %v9670_v47 = vld [vmem:[%s11268_s8 + $0x850] ss:$8 sps:$4 sm:$0xff]  }
 0x203   : > { %7999 = vmatprep.subr.bf16.mxu1 %v9599_v48  ;;  %v9673_v48 = vld [vmem:[%s11268_s8 + $0x950] ss:$8 sps:$4 sm:$0xff]  }
 0x205   : > { %7959 = vmatpush1.bf16.msra.mxu0 %v9594_v49  ;;  %v9678_v49 = vld [vmem:[%s11268_s8 + $0x844] ss:$8 sps:$4 sm:$0xff]  }
 0x206   : > { %8000 = vmatpush1.bf16.msra.mxu1 %v9597_v50  ;;  %7960 = vmatprep.subr.bf16.mxu0 %v9602_v51 }
 0x207   : > { %8001 = vmatprep.subr.bf16.mxu1 %v9605_v52  ;;  %v9681_v52 = vld [vmem:[%s11268_s8 + $0x944] ss:$8 sps:$4 sm:$0xff]  }
 0x209   : > { %7961 = vmatpush1.bf16.msra.mxu0 %v9600_v53  ;;  %v9676_v53 = vld [vmem:[%s11268_s8 + $0x840] ss:$8 sps:$4 sm:$0xff]  }
 0x20a   : > { %8002 = vmatpush1.bf16.msra.mxu1 %v9603_v54  ;;  %7962 = vmatprep.subr.bf16.mxu0 %v9608_v55  ;;  %v9679_v54 = vld [vmem:[%s11268_s8 + $0x940] ss:$8 sps:$4 sm:$0xff]   ;;  %v9684_v55 = vld [vmem:[%s11268_s8 + $0x834] ss:$8 sps:$4 sm:$0xff]  }
 0x20b   : > { %8003 = vmatprep.subr.bf16.mxu1 %v9611_v56  ;;  %v9687_v56 = vld [vmem:[%s11268_s8 + $0x934] ss:$8 sps:$4 sm:$0xff]  }
 0x20d   : > { %7963 = vmatpush2.bf16.msra.mxu0 %v9606_v57  ;;  %v9682_v57 = vld [vmem:[%s11268_s8 + $0x830] ss:$8 sps:$4 sm:$0xff]  }
 0x20e   : > { %8004 = vmatpush2.bf16.msra.mxu1 %v9609_v58  ;;  %7964 = vmatprep.subr.bf16.mxu0 %v9614_v59  ;;  %v9685_v58 = vld [vmem:[%s11268_s8 + $0x930] ss:$8 sps:$4 sm:$0xff]   ;;  %v9690_v59 = vld [vmem:[%s11268_s8 + $0x824] ss:$8 sps:$4 sm:$0xff]  }
 0x20f   : > { %8005 = vmatprep.subr.bf16.mxu1 %v9617_v60  ;;  %v9693_v60 = vld [vmem:[%s11268_s8 + $0x924] ss:$8 sps:$4 sm:$0xff]  }
 0x211   : > { %7965 = vmatpush2.bf16.msra.mxu0 %v9612_v61  ;;  %v9688_v61 = vld [vmem:[%s11268_s8 + $0x820] ss:$8 sps:$4 sm:$0xff]  }
 0x212   : > { %8006 = vmatpush2.bf16.msra.mxu1 %v9615_v62  ;;  %7966 = vmatprep.subr.bf16.mxu0 %v9620_v63  ;;  %v9691_v62 = vld [vmem:[%s11268_s8 + $0x920] ss:$8 sps:$4 sm:$0xff]   ;;  %v9696_v63 = vld [vmem:[%s11268_s8 + $0x814] ss:$8 sps:$4 sm:$0xff]  }
 0x213   : > { %8007 = vmatprep.subr.bf16.mxu1 %v9623_v0  ;;  %v9699_v0 = vld [vmem:[%s11268_s8 + $0x914] ss:$8 sps:$4 sm:$0xff]  }
 0x215   : > { %7967 = vmatpush2.bf16.msra.mxu0 %v9618_v1  ;;  %v9694_v1 = vld [vmem:[%s11268_s8 + $0x810] ss:$8 sps:$4 sm:$0xff]  }
 0x216   : > { %8008 = vmatpush2.bf16.msra.mxu1 %v9621_v2  ;;  %7968 = vmatprep.subr.bf16.mxu0 %v9626_v3  ;;  %v9697_v2 = vld [vmem:[%s11268_s8 + $0x910] ss:$8 sps:$4 sm:$0xff]   ;;  %v9702_v3 = vld [vmem:[%s11268_s8 + $0x804] ss:$8 sps:$4 sm:$0xff]  }
 0x217   : > { %8009 = vmatprep.subr.bf16.mxu1 %v9629_v4  ;;  %v9705_v4 = vld [vmem:[%s11268_s8 + $0x904] ss:$8 sps:$4 sm:$0xff]  }
 0x219   : > { %7969 = vmatpush2.bf16.msra.mxu0 %v9624_v5  ;;  %v9700_v5 = vld [vmem:[%s11268_s8 + $0x800] ss:$8 sps:$4 sm:$0xff]  }
 0x21a   : > { %8010 = vmatpush2.bf16.msra.mxu1 %v9627_v6  ;;  %7970 = vmatprep.subr.bf16.mxu0 %v9632_v7  ;;  %v9703_v6 = vld [vmem:[%s11268_s8 + $0x900] ss:$8 sps:$4 sm:$0xff]   ;;  %v9708_v7 = vld [vmem:[%s11268_s8 + $0x8f4] ss:$8 sps:$4 sm:$0xff]  }
 0x21b   : > { %8011 = vmatprep.subr.bf16.mxu1 %v9635_v8  ;;  %v9711_v8 = vld [vmem:[%s11268_s8 + $0x9f4] ss:$8 sps:$4 sm:$0xff]  }
 0x21d   : > { %7971 = vmatpush2.bf16.msra.mxu0 %v9630_v9  ;;  %v9706_v9 = vld [vmem:[%s11268_s8 + $0x8f0] ss:$8 sps:$4 sm:$0xff]  }
 0x21e   : > { %8012 = vmatpush2.bf16.msra.mxu1 %v9633_v10  ;;  %7972 = vmatprep.subr.bf16.mxu0 %v9638_v11  ;;  %v9709_v10 = vld [vmem:[%s11268_s8 + $0x9f0] ss:$8 sps:$4 sm:$0xff]   ;;  %v9714_v11 = vld [vmem:[%s11268_s8 + $0x8e4] ss:$8 sps:$4 sm:$0xff]  }
 0x21f   : > { %8013 = vmatprep.subr.bf16.mxu1 %v9641_v12  ;;  %v9717_v12 = vld [vmem:[%s11268_s8 + $0x9e4] ss:$8 sps:$4 sm:$0xff]  }
 0x221   : > { %7973 = vmatpush2.bf16.msra.mxu0 %v9636_v13  ;;  %v9712_v13 = vld [vmem:[%s11268_s8 + $0x8e0] ss:$8 sps:$4 sm:$0xff]  }
 0x222   : > { %8014 = vmatpush2.bf16.msra.mxu1 %v9639_v14  ;;  %7974 = vmatprep.subr.bf16.mxu0 %v9644_v15  ;;  %v9715_v14 = vld [vmem:[%s11268_s8 + $0x9e0] ss:$8 sps:$4 sm:$0xff]   ;;  %v9720_v15 = vld [vmem:[%s11268_s8 + $0x8d4] ss:$8 sps:$4 sm:$0xff]  }
 0x223   : > { %8015 = vmatprep.subr.bf16.mxu1 %v9647_v16  ;;  %v9723_v16 = vld [vmem:[%s11268_s8 + $0x9d4] ss:$8 sps:$4 sm:$0xff]  }
 0x225   : > { %7975 = vmatpush2.bf16.msra.mxu0 %v9642_v17  ;;  %v9718_v17 = vld [vmem:[%s11268_s8 + $0x8d0] ss:$8 sps:$4 sm:$0xff]  }
 0x226   : > { %8016 = vmatpush2.bf16.msra.mxu1 %v9645_v18  ;;  %7976 = vmatprep.subr.bf16.mxu0 %v9650_v21  ;;  %v9721_v18 = vld [vmem:[%s11268_s8 + $0x9d0] ss:$8 sps:$4 sm:$0xff]   ;;  %v9726_v21 = vld [vmem:[%s11268_s8 + $0x8c4] ss:$8 sps:$4 sm:$0xff]  }
 0x227   : > { %8017 = vmatprep.subr.bf16.mxu1 %v9653_v22  ;;  %v9729_v22 = vld [vmem:[%s11268_s8 + $0x9c4] ss:$8 sps:$4 sm:$0xff]  }
 0x229   : > { %7977 = vmatpush2.bf16.msra.mxu0 %v9648_v23  ;;  %v9724_v23 = vld [vmem:[%s11268_s8 + $0x8c0] ss:$8 sps:$4 sm:$0xff]  }
 0x22a   : > { %8018 = vmatpush2.bf16.msra.mxu1 %v9651_v24  ;;  %8028 = vmatprep.subr.bf16.mxu0 %v9660_v27  ;;  %v9727_v24 = vld [vmem:[%s11268_s8 + $0x9c0] ss:$8 sps:$4 sm:$0xff]   ;;  %v9732_v27 = vld [vmem:[%s11268_s8 + $0x8b4] ss:$8 sps:$4 sm:$0xff]  }
 0x22b   : > { %8069 = vmatprep.subr.bf16.mxu1 %v9663_v28  ;;  %v9735_v28 = vld [vmem:[%s11268_s8 + $0x9b4] ss:$8 sps:$4 sm:$0xff]  }
 0x22c   : > { %v7734_v26 = vpop.f32.mrf.mxu0  ;;  %7979 = vmatmul.mubr.bf16.vlgmr.msra.gmra.mxu0 %v8662_v20  ;;  %v9730_v20 = vld [vmem:[%s11268_s8 + $0x8b0] ss:$8 sps:$4 sm:$0xff]  }
 0x22d   : > { %v7775_v36 = vpop.f32.mrf.mxu1  ;;  %8020 = vmatmul.mubr.bf16.vlgmr.msra.gmra.mxu1 %v8664_v29  ;;  %8029 = vmatpush1.bf16.msra.mxu0 %v9658_v31  ;;  %v9733_v29 = vld [vmem:[%s11268_s8 + $0x9b0] ss:$8 sps:$4 sm:$0xff]   ;;  %v9738_v31 = vld [vmem:[%s11268_s8 + $0x8a4] ss:$8 sps:$4 sm:$0xff]  }
 0x22e   : > { %v11589_v39 = vadd.f32 %v7775_v36, %v7734_v26  ;;  %8070 = vmatpush1.bf16.msra.mxu1 %v9661_v32  ;;  %v7736_v41 = vpop.f32.mrf.mxu0  ;;  %8030 = vmatprep.subr.bf16.mxu0 %v9666_v33  ;;  %v9741_v32 = vld [vmem:[%s11268_s8 + $0x9a4] ss:$8 sps:$4 sm:$0xff]   ;;  %v9736_v33 = vld [vmem:[%s11268_s8 + $0x8a0] ss:$8 sps:$4 sm:$0xff]   ;;  %v9742_v26 = vld [vmem:[%s11268_s8 + $0x890] ss:$8 sps:$4 sm:$0xff]  }
 0x22f   : > { %v7777_v42 = vpop.f32.mrf.mxu1  ;;  %8071 = vmatprep.subr.bf16.mxu1 %v9669_v34  ;;  %8060 = vmatprep.mubr.bf16.mxu0 %v8667_v35  ;;  %v9739_v34 = vld [vmem:[%s11268_s8 + $0x9a0] ss:$8 sps:$4 sm:$0xff]   ;;  %v9744_v35 = vld [vmem:[%s11268_s8 + $0x894] ss:$8 sps:$4 sm:$0xff]   ;;  %v9745_v36 = vld [vmem:[%s11268_s8 + $0x990] ss:$8 sps:$4 sm:$0xff]  }
 0x230   : > { %v11593_v44 = vadd.f32 %v7777_v42, %v7736_v41  ;;  %8101 = vmatprep.mubr.bf16.mxu1 %v8669_v25  ;;  %v7738_v45 = vpop.f32.mrf.mxu0  ;;  %v9747_v25 = vld [vmem:[%s11268_s8 + $0x994] ss:$8 sps:$4 sm:$0xff]   ;;  %v9751_v41 = vld [vmem:[%s11268_s8 + $0x980] ss:$8 sps:$4 sm:$0xff]  }
 0x231   : > { %v7779_v46 = vpop.f32.mrf.mxu1  ;;  %8031 = vmatpush1.bf16.msra.mxu0 %v9664_v37  ;;  %v9750_v37 = vld [vmem:[%s11268_s8 + $0x884] ss:$8 sps:$4 sm:$0xff]   ;;  %v9760_v42 = vld [vmem:[%s11268_s8 + $0xa74] ss:$8 sps:$4 sm:$0xff]   ;;  %v9758_v45 = vld [vmem:[%s11268_s8 + $0xa70] ss:$8 sps:$4 sm:$0xff]  }
 0x232   : > { %8072 = vmatpush1.bf16.msra.mxu1 %v9667_v38  ;;  %v7739_v50 = vpop.f32.mrf.mxu0  ;;  %8032 = vmatprep.subr.bf16.mxu0 %v9672_v40  ;;  %v9753_v38 = vld [vmem:[%s11268_s8 + $0x984] ss:$8 sps:$4 sm:$0xff]   ;;  %v9748_v40 = vld [vmem:[%s11268_s8 + $0x880] ss:$8 sps:$4 sm:$0xff]   ;;  %v9761_v46 = vld [vmem:[%s11268_s8 + $0xb70] ss:$8 sps:$4 sm:$0xff]  }
 0x233   : > { %v7780_v51 = vpop.f32.mrf.mxu1  ;;  %8073 = vmatprep.subr.bf16.mxu1 %v9675_v43  ;;  %v9763_v43 = vld [vmem:[%s11268_s8 + $0xb74] ss:$8 sps:$4 sm:$0xff]   ;;  %v11661_v50 = vld [vmem:[%s11246_s9 + $0x58] sm:$0xff] }
 0x234   : > { %v9766_v51 = vld [vmem:[%s11268_s8 + $0xa64] ss:$8 sps:$4 sm:$0xff]  }
 0x235   : > { %8033 = vmatpush1.bf16.msra.mxu0 %v9670_v47  ;;  %v8666_v47 = vcombine.low %v11570_v19, %v11570_v19 }
 0x236   : > { %8074 = vmatpush1.bf16.msra.mxu1 %v9673_v48  ;;  %8034 = vmatprep.subr.bf16.mxu0 %v9678_v49  ;;  %v8668_v48 = vcombine.low %v11577_v30, %v11577_v30  ;;  %v11658_v49 = vld [vmem:[%s11246_s9 + $0x50] sm:$0xff]  ;;  %v8673_v30 = vcombine.high %v11661_v50, %v11661_v50 }
 0x237   : > { %8075 = vmatprep.subr.bf16.mxu1 %v9681_v52  ;;  %v9769_v52 = vld [vmem:[%s11268_s8 + $0xb64] ss:$8 sps:$4 sm:$0xff]   ;;  %v8671_v19 = vcombine.high %v11658_v49, %v11658_v49 }
 0x239   : > { %8035 = vmatpush1.bf16.msra.mxu0 %v9676_v53  ;;  %v9764_v53 = vld [vmem:[%s11268_s8 + $0xa60] ss:$8 sps:$4 sm:$0xff]  }
 0x23a   : > { %8076 = vmatpush1.bf16.msra.mxu1 %v9679_v54  ;;  %8036 = vmatprep.subr.bf16.mxu0 %v9684_v55  ;;  %v9767_v54 = vld [vmem:[%s11268_s8 + $0xb60] ss:$8 sps:$4 sm:$0xff]  }
 0x23b   : > { %8077 = vmatprep.subr.bf16.mxu1 %v9687_v56 }
 0x23d   : > { %8037 = vmatpush1.bf16.msra.mxu0 %v9682_v57 }
 0x23e   : > { %8078 = vmatpush1.bf16.msra.mxu1 %v9685_v58  ;;  %8038 = vmatprep.subr.bf16.mxu0 %v9690_v59 }
 0x23f   : > { %8079 = vmatprep.subr.bf16.mxu1 %v9693_v60  ;;  %v9772_v60 = vld [vmem:[%s11268_s8 + $0xa54] ss:$8 sps:$4 sm:$0xff]  }
 0x241   : > { %8039 = vmatpush1.bf16.msra.mxu0 %v9688_v61  ;;  %v9775_v61 = vld [vmem:[%s11268_s8 + $0xb54] ss:$8 sps:$4 sm:$0xff]  }
 0x242   : > { %8080 = vmatpush1.bf16.msra.mxu1 %v9691_v62  ;;  %8040 = vmatprep.subr.bf16.mxu0 %v9696_v63 }
 0x243   : > { %8081 = vmatprep.subr.bf16.mxu1 %v9699_v0 }
 0x245   : > { %8041 = vmatpush1.bf16.msra.mxu0 %v9694_v1 }
 0x246   : > { %8082 = vmatpush1.bf16.msra.mxu1 %v9697_v2  ;;  %8042 = vmatprep.subr.bf16.mxu0 %v9702_v3  ;;  %v9770_v2 = vld [vmem:[%s11268_s8 + $0xa50] ss:$8 sps:$4 sm:$0xff]  }
 0x247   : > { %8083 = vmatprep.subr.bf16.mxu1 %v9705_v4  ;;  %v9773_v3 = vld [vmem:[%s11268_s8 + $0xb50] ss:$8 sps:$4 sm:$0xff]  }
 0x249   : > { %8043 = vmatpush1.bf16.msra.mxu0 %v9700_v5 }
 0x24a   : > { %8084 = vmatpush1.bf16.msra.mxu1 %v9703_v6  ;;  %8044 = vmatprep.subr.bf16.mxu0 %v9708_v7  ;;  %v9781_v6 = vld [vmem:[%s11268_s8 + $0xb44] ss:$8 sps:$4 sm:$0xff]   ;;  %v9776_v7 = vld [vmem:[%s11268_s8 + $0xa40] ss:$8 sps:$4 sm:$0xff]  }
 0x24b   : > { %8085 = vmatprep.subr.bf16.mxu1 %v9711_v8  ;;  %v9779_v8 = vld [vmem:[%s11268_s8 + $0xb40] ss:$8 sps:$4 sm:$0xff]  }
 0x24d   : > { %8045 = vmatpush2.bf16.msra.mxu0 %v9706_v9  ;;  %v9784_v9 = vld [vmem:[%s11268_s8 + $0xa34] ss:$8 sps:$4 sm:$0xff]  }
 0x24e   : > { %8086 = vmatpush2.bf16.msra.mxu1 %v9709_v10  ;;  %8046 = vmatprep.subr.bf16.mxu0 %v9714_v11  ;;  %v9787_v10 = vld [vmem:[%s11268_s8 + $0xb34] ss:$8 sps:$4 sm:$0xff]   ;;  %v9782_v11 = vld [vmem:[%s11268_s8 + $0xa30] ss:$8 sps:$4 sm:$0xff]  }
 0x24f   : > { %8087 = vmatprep.subr.bf16.mxu1 %v9717_v12  ;;  %v9785_v12 = vld [vmem:[%s11268_s8 + $0xb30] ss:$8 sps:$4 sm:$0xff]  }
 0x251   : > { %8047 = vmatpush2.bf16.msra.mxu0 %v9712_v13  ;;  %v9790_v13 = vld [vmem:[%s11268_s8 + $0xa24] ss:$8 sps:$4 sm:$0xff]  }
 0x252   : > { %8088 = vmatpush2.bf16.msra.mxu1 %v9715_v14  ;;  %8048 = vmatprep.subr.bf16.mxu0 %v9720_v15  ;;  %v9793_v14 = vld [vmem:[%s11268_s8 + $0xb24] ss:$8 sps:$4 sm:$0xff]   ;;  %v9788_v15 = vld [vmem:[%s11268_s8 + $0xa20] ss:$8 sps:$4 sm:$0xff]  }
 0x253   : > { %8089 = vmatprep.subr.bf16.mxu1 %v9723_v16  ;;  %v9791_v16 = vld [vmem:[%s11268_s8 + $0xb20] ss:$8 sps:$4 sm:$0xff]  }
 0x255   : > { %8049 = vmatpush2.bf16.msra.mxu0 %v9718_v17  ;;  %v9796_v17 = vld [vmem:[%s11268_s8 + $0xa14] ss:$8 sps:$4 sm:$0xff]  }
 0x256   : > { %8090 = vmatpush2.bf16.msra.mxu1 %v9721_v18  ;;  %8050 = vmatprep.subr.bf16.mxu0 %v9726_v21  ;;  %v9799_v18 = vld [vmem:[%s11268_s8 + $0xb14] ss:$8 sps:$4 sm:$0xff]   ;;  %v9794_v21 = vld [vmem:[%s11268_s8 + $0xa10] ss:$8 sps:$4 sm:$0xff]  }
 0x257   : > { %8091 = vmatprep.subr.bf16.mxu1 %v9729_v22  ;;  %v9797_v22 = vld [vmem:[%s11268_s8 + $0xb10] ss:$8 sps:$4 sm:$0xff]  }
 0x259   : > { %8051 = vmatpush2.bf16.msra.mxu0 %v9724_v23  ;;  %v9802_v23 = vld [vmem:[%s11268_s8 + $0xa04] ss:$8 sps:$4 sm:$0xff]  }
 0x25a   : > { %8092 = vmatpush2.bf16.msra.mxu1 %v9727_v24  ;;  %8052 = vmatprep.subr.bf16.mxu0 %v9732_v27  ;;  %v9805_v24 = vld [vmem:[%s11268_s8 + $0xb04] ss:$8 sps:$4 sm:$0xff]   ;;  %v9800_v27 = vld [vmem:[%s11268_s8 + $0xa00] ss:$8 sps:$4 sm:$0xff]  }
 0x25b   : > { %8093 = vmatprep.subr.bf16.mxu1 %v9735_v28  ;;  %v9803_v28 = vld [vmem:[%s11268_s8 + $0xb00] ss:$8 sps:$4 sm:$0xff]  }
 0x25d   : > { %8053 = vmatpush2.bf16.msra.mxu0 %v9730_v20  ;;  %v9808_v20 = vld [vmem:[%s11268_s8 + $0xaf4] ss:$8 sps:$4 sm:$0xff]  }
 0x25e   : > { %8094 = vmatpush2.bf16.msra.mxu1 %v9733_v29  ;;  %8054 = vmatprep.subr.bf16.mxu0 %v9738_v31  ;;  %v9811_v29 = vld [vmem:[%s11268_s8 + $0xbf4] ss:$8 sps:$4 sm:$0xff]   ;;  %v9806_v31 = vld [vmem:[%s11268_s8 + $0xaf0] ss:$8 sps:$4 sm:$0xff]  }
 0x25f   : > { %8095 = vmatprep.subr.bf16.mxu1 %v9741_v32  ;;  %v9809_v32 = vld [vmem:[%s11268_s8 + $0xbf0] ss:$8 sps:$4 sm:$0xff]  }
 0x261   : > { %8055 = vmatpush2.bf16.msra.mxu0 %v9736_v33  ;;  %v9814_v33 = vld [vmem:[%s11268_s8 + $0xae4] ss:$8 sps:$4 sm:$0xff]  }
 0x262   : > { %8096 = vmatpush2.bf16.msra.mxu1 %v9739_v34  ;;  %8056 = vmatprep.subr.bf16.mxu0 %v9744_v35  ;;  %v9817_v34 = vld [vmem:[%s11268_s8 + $0xbe4] ss:$8 sps:$4 sm:$0xff]   ;;  %v9812_v35 = vld [vmem:[%s11268_s8 + $0xae0] ss:$8 sps:$4 sm:$0xff]  }
 0x263   : > { %8097 = vmatprep.subr.bf16.mxu1 %v9747_v25  ;;  %v9815_v25 = vld [vmem:[%s11268_s8 + $0xbe0] ss:$8 sps:$4 sm:$0xff]  }
 0x265   : > { %8057 = vmatpush2.bf16.msra.mxu0 %v9742_v26  ;;  %v9820_v26 = vld [vmem:[%s11268_s8 + $0xad4] ss:$8 sps:$4 sm:$0xff]  }
 0x266   : > { %8098 = vmatpush2.bf16.msra.mxu1 %v9745_v36  ;;  %8058 = vmatprep.subr.bf16.mxu0 %v9750_v37  ;;  %v9823_v36 = vld [vmem:[%s11268_s8 + $0xbd4] ss:$8 sps:$4 sm:$0xff]   ;;  %v9818_v37 = vld [vmem:[%s11268_s8 + $0xad0] ss:$8 sps:$4 sm:$0xff]  }
 0x267   : > { %8099 = vmatprep.subr.bf16.mxu1 %v9753_v38  ;;  %v9821_v38 = vld [vmem:[%s11268_s8 + $0xbd0] ss:$8 sps:$4 sm:$0xff]  }
 0x269   : > { %8059 = vmatpush2.bf16.msra.mxu0 %v9748_v40  ;;  %v9826_v40 = vld [vmem:[%s11268_s8 + $0xac4] ss:$8 sps:$4 sm:$0xff]  }
 0x26a   : > { %8100 = vmatpush2.bf16.msra.mxu1 %v9751_v41  ;;  %8110 = vmatprep.subr.bf16.mxu0 %v9760_v42  ;;  %v9829_v41 = vld [vmem:[%s11268_s8 + $0xbc4] ss:$8 sps:$4 sm:$0xff]   ;;  %v9824_v42 = vld [vmem:[%s11268_s8 + $0xac0] ss:$8 sps:$4 sm:$0xff]  }
 0x26b   : > { %8151 = vmatprep.subr.bf16.mxu1 %v9763_v43  ;;  %v9827_v43 = vld [vmem:[%s11268_s8 + $0xbc0] ss:$8 sps:$4 sm:$0xff]  }
 0x26c   : > { %v7816_v55 = vpop.f32.mrf.mxu0  ;;  %8061 = vmatmul.mubr.bf16.vlgmr.msra.gmra.mxu0 %v8666_v47  ;;  %v9830_v47 = vld [vmem:[%s11268_s8 + $0xab0] ss:$8 sps:$4 sm:$0xff]  }
 0x26d   : > { %v7857_v56 = vpop.f32.mrf.mxu1  ;;  %8102 = vmatmul.mubr.bf16.vlgmr.msra.gmra.mxu1 %v8668_v48  ;;  %v7817_v57 = vadd.f32 %v7816_v55, %v11589_v39  ;;  %8111 = vmatpush1.bf16.msra.mxu0 %v9758_v45  ;;  %v9832_v45 = vld [vmem:[%s11268_s8 + $0xab4] ss:$8 sps:$4 sm:$0xff]   ;;  %v9833_v48 = vld [vmem:[%s11268_s8 + $0xbb0] ss:$8 sps:$4 sm:$0xff]  }
 0x26e   : > { %8152 = vmatpush1.bf16.msra.mxu1 %v9761_v46  ;;  %v7818_v58 = vpop.f32.mrf.mxu0  ;;  %8112 = vmatprep.subr.bf16.mxu0 %v9766_v51  ;;  %v9835_v46 = vld [vmem:[%s11268_s8 + $0xbb4] ss:$8 sps:$4 sm:$0xff]   ;;  %v9838_v51 = vld [vmem:[%s11268_s8 + $0xaa4] ss:$8 sps:$4 sm:$0xff]   ;;  %v9842_v55 = vld [vmem:[%s11268_s8 + $0xa90] ss:$8 sps:$4 sm:$0xff]  }
 0x26f   : > { %v7859_v59 = vpop.f32.mrf.mxu1  ;;  %8153 = vmatprep.subr.bf16.mxu1 %v9769_v52  ;;  %v11674_v62 = vadd.f32 %v7857_v56, %v7817_v57  ;;  %v7819_v63 = vadd.f32 %v7818_v58, %v11593_v44  ;;  %8142 = vmatprep.mubr.bf16.mxu0 %v8671_v19  ;;  %v9778_v44 = vld [vmem:[%s11268_s8 + $0xa44] ss:$8 sps:$4 sm:$0xff]   ;;  %v9844_v19 = vld [vmem:[%s11268_s8 + $0xa94] ss:$8 sps:$4 sm:$0xff]   ;;  %v9845_v56 = vld [vmem:[%s11268_s8 + $0xb90] ss:$8 sps:$4 sm:$0xff]  }
 0x270   : > { %8183 = vmatprep.mubr.bf16.mxu1 %v8673_v30  ;;  %v7820_v39 = vpop.f32.mrf.mxu0  ;;  %v9841_v52 = vld [vmem:[%s11268_s8 + $0xba4] ss:$8 sps:$4 sm:$0xff]   ;;  %v9847_v30 = vld [vmem:[%s11268_s8 + $0xb94] ss:$8 sps:$4 sm:$0xff]  }
 0x271   : > { %v7861_v0 = vpop.f32.mrf.mxu1  ;;  %v11677_v1 = vadd.f32 %v7859_v59, %v7819_v63  ;;  %8113 = vmatpush1.bf16.msra.mxu0 %v9764_v53  ;;  %v9836_v53 = vld [vmem:[%s11268_s8 + $0xaa0] ss:$8 sps:$4 sm:$0xff]   ;;  %v9850_v57 = vld [vmem:[%s11268_s8 + $0xa84] ss:$8 sps:$4 sm:$0xff]   ;;  %v9863_v63 = vld [vmem:[%s11268_s8 + $0xd74] ss:$8 sps:$4 sm:$0xff]   ;;  %v8670_v39 = vcombine.low %v11658_v49, %v11658_v49 }
 0x272   : > { %8154 = vmatpush1.bf16.msra.mxu1 %v9767_v54  ;;  %v7821_v4 = vpop.f32.mrf.mxu0  ;;  %8114 = vmatprep.subr.bf16.mxu0 %v9772_v60  ;;  %v9839_v54 = vld [vmem:[%s11268_s8 + $0xba0] ss:$8 sps:$4 sm:$0xff]   ;;  %v9853_v58 = vld [vmem:[%s11268_s8 + $0xb84] ss:$8 sps:$4 sm:$0xff]   ;;  %v8672_v0 = vcombine.low %v11661_v50, %v11661_v50 }
 0x273   : > { %v7862_v5 = vpop.f32.mrf.mxu1  ;;  %8155 = vmatprep.subr.bf16.mxu1 %v9775_v61  ;;  %v9848_v59 = vld [vmem:[%s11268_s8 + $0xa80] ss:$8 sps:$4 sm:$0xff]   ;;  %v9860_v61 = vld [vmem:[%s11268_s8 + $0xc74] ss:$8 sps:$4 sm:$0xff]   ;;  %v9858_v4 = vld [vmem:[%s11268_s8 + $0xc70] ss:$8 sps:$4 sm:$0xff]  }
 0x274   : > { %v9851_v60 = vld [vmem:[%s11268_s8 + $0xb80] ss:$8 sps:$4 sm:$0xff]   ;;  %v9861_v5 = vld [vmem:[%s11268_s8 + $0xd70] ss:$8 sps:$4 sm:$0xff]  }
 0x275   : > { %8115 = vmatpush1.bf16.msra.mxu0 %v9770_v2  ;;  %v11740_v2 = vld [vmem:[%s11246_s9 + $0x60] sm:$0xff] }
 0x276   : > { %8156 = vmatpush1.bf16.msra.mxu1 %v9773_v3  ;;  %8116 = vmatprep.subr.bf16.mxu0 %v9778_v44  ;;  %v11743_v3 = vld [vmem:[%s11246_s9 + $0x68] sm:$0xff]  ;;  %v9866_v44 = vld [vmem:[%s11268_s8 + $0xc64] ss:$8 sps:$4 sm:$0xff]   ;;  %v8675_v49 = vcombine.high %v11740_v2, %v11740_v2 }
 0x277   : > { %8157 = vmatprep.subr.bf16.mxu1 %v9781_v6  ;;  %v9869_v6 = vld [vmem:[%s11268_s8 + $0xd64] ss:$8 sps:$4 sm:$0xff]   ;;  %v8677_v50 = vcombine.high %v11743_v3, %v11743_v3 }
 0x279   : > { %8117 = vmatpush1.bf16.msra.mxu0 %v9776_v7 }
 0x27a   : > { %8158 = vmatpush1.bf16.msra.mxu1 %v9779_v8  ;;  %8118 = vmatprep.subr.bf16.mxu0 %v9784_v9 }
 0x27b   : > { %8159 = vmatprep.subr.bf16.mxu1 %v9787_v10  ;;  %v9864_v10 = vld [vmem:[%s11268_s8 + $0xc60] ss:$8 sps:$4 sm:$0xff]  }
 0x27d   : > { %8119 = vmatpush1.bf16.msra.mxu0 %v9782_v11  ;;  %v9867_v11 = vld [vmem:[%s11268_s8 + $0xd60] ss:$8 sps:$4 sm:$0xff]  }
 0x27e   : > { %8160 = vmatpush1.bf16.msra.mxu1 %v9785_v12  ;;  %8120 = vmatprep.subr.bf16.mxu0 %v9790_v13 }
 0x27f   : > { %8161 = vmatprep.subr.bf16.mxu1 %v9793_v14  ;;  %v9872_v14 = vld [vmem:[%s11268_s8 + $0xc54] ss:$8 sps:$4 sm:$0xff]  }
 0x281   : > { %8121 = vmatpush1.bf16.msra.mxu0 %v9788_v15  ;;  %v9875_v15 = vld [vmem:[%s11268_s8 + $0xd54] ss:$8 sps:$4 sm:$0xff]  }
 0x282   : > { %8162 = vmatpush1.bf16.msra.mxu1 %v9791_v16  ;;  %8122 = vmatprep.subr.bf16.mxu0 %v9796_v17 }
 0x283   : > { %8163 = vmatprep.subr.bf16.mxu1 %v9799_v18 }
 0x285   : > { %8123 = vmatpush1.bf16.msra.mxu0 %v9794_v21 }
 0x286   : > { %8164 = vmatpush1.bf16.msra.mxu1 %v9797_v22  ;;  %8124 = vmatprep.subr.bf16.mxu0 %v9802_v23  ;;  %v9870_v22 = vld [vmem:[%s11268_s8 + $0xc50] ss:$8 sps:$4 sm:$0xff]  }
 0x287   : > { %8165 = vmatprep.subr.bf16.mxu1 %v9805_v24  ;;  %v9873_v23 = vld [vmem:[%s11268_s8 + $0xd50] ss:$8 sps:$4 sm:$0xff]  }
 0x289   : > { %8125 = vmatpush1.bf16.msra.mxu0 %v9800_v27 }
 0x28a   : > { %8166 = vmatpush1.bf16.msra.mxu1 %v9803_v28  ;;  %8126 = vmatprep.subr.bf16.mxu0 %v9808_v20  ;;  %v9881_v28 = vld [vmem:[%s11268_s8 + $0xd44] ss:$8 sps:$4 sm:$0xff]   ;;  %v9876_v20 = vld [vmem:[%s11268_s8 + $0xc40] ss:$8 sps:$4 sm:$0xff]  }
 0x28b   : > { %8167 = vmatprep.subr.bf16.mxu1 %v9811_v29  ;;  %v9879_v29 = vld [vmem:[%s11268_s8 + $0xd40] ss:$8 sps:$4 sm:$0xff]  }
 0x28d   : > { %8127 = vmatpush2.bf16.msra.mxu0 %v9806_v31  ;;  %v9884_v31 = vld [vmem:[%s11268_s8 + $0xc34] ss:$8 sps:$4 sm:$0xff]  }
 0x28e   : > { %8168 = vmatpush2.bf16.msra.mxu1 %v9809_v32  ;;  %8128 = vmatprep.subr.bf16.mxu0 %v9814_v33  ;;  %v9887_v32 = vld [vmem:[%s11268_s8 + $0xd34] ss:$8 sps:$4 sm:$0xff]   ;;  %v9882_v33 = vld [vmem:[%s11268_s8 + $0xc30] ss:$8 sps:$4 sm:$0xff]  }
 0x28f   : > { %8169 = vmatprep.subr.bf16.mxu1 %v9817_v34  ;;  %v9885_v34 = vld [vmem:[%s11268_s8 + $0xd30] ss:$8 sps:$4 sm:$0xff]  }
 0x291   : > { %8129 = vmatpush2.bf16.msra.mxu0 %v9812_v35  ;;  %v9890_v35 = vld [vmem:[%s11268_s8 + $0xc24] ss:$8 sps:$4 sm:$0xff]  }
 0x292   : > { %8170 = vmatpush2.bf16.msra.mxu1 %v9815_v25  ;;  %8130 = vmatprep.subr.bf16.mxu0 %v9820_v26  ;;  %v9893_v25 = vld [vmem:[%s11268_s8 + $0xd24] ss:$8 sps:$4 sm:$0xff]   ;;  %v9888_v26 = vld [vmem:[%s11268_s8 + $0xc20] ss:$8 sps:$4 sm:$0xff]  }
 0x293   : > { %8171 = vmatprep.subr.bf16.mxu1 %v9823_v36  ;;  %v9891_v36 = vld [vmem:[%s11268_s8 + $0xd20] ss:$8 sps:$4 sm:$0xff]  }
 0x295   : > { %8131 = vmatpush2.bf16.msra.mxu0 %v9818_v37  ;;  %v9896_v37 = vld [vmem:[%s11268_s8 + $0xc14] ss:$8 sps:$4 sm:$0xff]  }
 0x296   : > { %8172 = vmatpush2.bf16.msra.mxu1 %v9821_v38  ;;  %8132 = vmatprep.subr.bf16.mxu0 %v9826_v40  ;;  %v9899_v38 = vld [vmem:[%s11268_s8 + $0xd14] ss:$8 sps:$4 sm:$0xff]   ;;  %v9894_v40 = vld [vmem:[%s11268_s8 + $0xc10] ss:$8 sps:$4 sm:$0xff]  }
 0x297   : > { %8173 = vmatprep.subr.bf16.mxu1 %v9829_v41  ;;  %v9897_v41 = vld [vmem:[%s11268_s8 + $0xd10] ss:$8 sps:$4 sm:$0xff]  }
 0x299   : > { %8133 = vmatpush2.bf16.msra.mxu0 %v9824_v42  ;;  %v9902_v42 = vld [vmem:[%s11268_s8 + $0xc04] ss:$8 sps:$4 sm:$0xff]  }
 0x29a   : > { %8174 = vmatpush2.bf16.msra.mxu1 %v9827_v43  ;;  %8134 = vmatprep.subr.bf16.mxu0 %v9832_v45  ;;  %v9905_v43 = vld [vmem:[%s11268_s8 + $0xd04] ss:$8 sps:$4 sm:$0xff]   ;;  %v9900_v45 = vld [vmem:[%s11268_s8 + $0xc00] ss:$8 sps:$4 sm:$0xff]  }
 0x29b   : > { %8175 = vmatprep.subr.bf16.mxu1 %v9835_v46  ;;  %v9903_v46 = vld [vmem:[%s11268_s8 + $0xd00] ss:$8 sps:$4 sm:$0xff]  }
 0x29d   : > { %8135 = vmatpush2.bf16.msra.mxu0 %v9830_v47  ;;  %v9908_v47 = vld [vmem:[%s11268_s8 + $0xcf4] ss:$8 sps:$4 sm:$0xff]  }
 0x29e   : > { %8176 = vmatpush2.bf16.msra.mxu1 %v9833_v48  ;;  %8136 = vmatprep.subr.bf16.mxu0 %v9838_v51  ;;  %v9911_v48 = vld [vmem:[%s11268_s8 + $0xdf4] ss:$8 sps:$4 sm:$0xff]   ;;  %v9906_v51 = vld [vmem:[%s11268_s8 + $0xcf0] ss:$8 sps:$4 sm:$0xff]  }
 0x29f   : > { %8177 = vmatprep.subr.bf16.mxu1 %v9841_v52  ;;  %v9909_v52 = vld [vmem:[%s11268_s8 + $0xdf0] ss:$8 sps:$4 sm:$0xff]  }
 0x2a1   : > { %8137 = vmatpush2.bf16.msra.mxu0 %v9836_v53  ;;  %v9914_v53 = vld [vmem:[%s11268_s8 + $0xce4] ss:$8 sps:$4 sm:$0xff]  }
 0x2a2   : > { %8178 = vmatpush2.bf16.msra.mxu1 %v9839_v54  ;;  %8138 = vmatprep.subr.bf16.mxu0 %v9844_v19  ;;  %v9917_v54 = vld [vmem:[%s11268_s8 + $0xde4] ss:$8 sps:$4 sm:$0xff]   ;;  %v9912_v19 = vld [vmem:[%s11268_s8 + $0xce0] ss:$8 sps:$4 sm:$0xff]  }
 0x2a3   : > { %8179 = vmatprep.subr.bf16.mxu1 %v9847_v30  ;;  %v9915_v30 = vld [vmem:[%s11268_s8 + $0xde0] ss:$8 sps:$4 sm:$0xff]  }
 0x2a5   : > { %8139 = vmatpush2.bf16.msra.mxu0 %v9842_v55  ;;  %v9920_v55 = vld [vmem:[%s11268_s8 + $0xcd4] ss:$8 sps:$4 sm:$0xff]  }
 0x2a6   : > { %8180 = vmatpush2.bf16.msra.mxu1 %v9845_v56  ;;  %8140 = vmatprep.subr.bf16.mxu0 %v9850_v57  ;;  %v9923_v56 = vld [vmem:[%s11268_s8 + $0xdd4] ss:$8 sps:$4 sm:$0xff]   ;;  %v9918_v57 = vld [vmem:[%s11268_s8 + $0xcd0] ss:$8 sps:$4 sm:$0xff]  }
 0x2a7   : > { %8181 = vmatprep.subr.bf16.mxu1 %v9853_v58  ;;  %v9921_v58 = vld [vmem:[%s11268_s8 + $0xdd0] ss:$8 sps:$4 sm:$0xff]  }
 0x2a9   : > { %8141 = vmatpush2.bf16.msra.mxu0 %v9848_v59  ;;  %v9926_v59 = vld [vmem:[%s11268_s8 + $0xcc4] ss:$8 sps:$4 sm:$0xff]  }
 0x2aa   : > { %8182 = vmatpush2.bf16.msra.mxu1 %v9851_v60  ;;  %8192 = vmatprep.subr.bf16.mxu0 %v9860_v61  ;;  %v9929_v60 = vld [vmem:[%s11268_s8 + $0xdc4] ss:$8 sps:$4 sm:$0xff]   ;;  %v9924_v61 = vld [vmem:[%s11268_s8 + $0xcc0] ss:$8 sps:$4 sm:$0xff]  }
 0x2ab   : > { %8233 = vmatprep.subr.bf16.mxu1 %v9863_v63  ;;  %v9927_v63 = vld [vmem:[%s11268_s8 + $0xdc0] ss:$8 sps:$4 sm:$0xff]  }
 0x2ac   : > { %v7898_v7 = vpop.f32.mrf.mxu0  ;;  %8143 = vmatmul.mubr.bf16.vlgmr.msra.gmra.mxu0 %v8670_v39  ;;  %v9932_v39 = vld [vmem:[%s11268_s8 + $0xcb4] ss:$8 sps:$4 sm:$0xff]  }
 0x2ad   : > { %v7939_v8 = vpop.f32.mrf.mxu1  ;;  %8184 = vmatmul.mubr.bf16.vlgmr.msra.gmra.mxu1 %v8672_v0  ;;  %v7899_v9 = vadd.f32 %v7898_v7, %v11674_v62  ;;  %8193 = vmatpush1.bf16.msra.mxu0 %v9858_v4  ;;  %v9935_v0 = vld [vmem:[%s11268_s8 + $0xdb4] ss:$8 sps:$4 sm:$0xff]   ;;  %v9930_v4 = vld [vmem:[%s11268_s8 + $0xcb0] ss:$8 sps:$4 sm:$0xff]  }
 0x2ae   : > { %8234 = vmatpush1.bf16.msra.mxu1 %v9861_v5  ;;  %v7900_v12 = vpop.f32.mrf.mxu0  ;;  %8194 = vmatprep.subr.bf16.mxu0 %v9866_v44  ;;  %v9933_v5 = vld [vmem:[%s11268_s8 + $0xdb0] ss:$8 sps:$4 sm:$0xff]   ;;  %v9938_v44 = vld [vmem:[%s11268_s8 + $0xca4] ss:$8 sps:$4 sm:$0xff]   ;;  %v9944_v7 = vld [vmem:[%s11268_s8 + $0xc94] ss:$8 sps:$4 sm:$0xff]  }
 0x2af   : > { %v7941_v13 = vpop.f32.mrf.mxu1  ;;  %8235 = vmatprep.subr.bf16.mxu1 %v9869_v6  ;;  %v11758_v16 = vadd.f32 %v7939_v8, %v7899_v9  ;;  %v7901_v17 = vadd.f32 %v7900_v12, %v11677_v1  ;;  %8224 = vmatprep.mubr.bf16.mxu0 %v8675_v49  ;;  %v9878_v1 = vld [vmem:[%s11268_s8 + $0xc44] ss:$8 sps:$4 sm:$0xff]   ;;  %v9936_v49 = vld [vmem:[%s11268_s8 + $0xca0] ss:$8 sps:$4 sm:$0xff]   ;;  %v9947_v8 = vld [vmem:[%s11268_s8 + $0xd94] ss:$8 sps:$4 sm:$0xff]  }
 0x2b0   : > { %8265 = vmatprep.mubr.bf16.mxu1 %v8677_v50  ;;  %v7902_v62 = vpop.f32.mrf.mxu0  ;;  %v9941_v6 = vld [vmem:[%s11268_s8 + $0xda4] ss:$8 sps:$4 sm:$0xff]   ;;  %v9939_v50 = vld [vmem:[%s11268_s8 + $0xda0] ss:$8 sps:$4 sm:$0xff]   ;;  %v9942_v9 = vld [vmem:[%s11268_s8 + $0xc90] ss:$8 sps:$4 sm:$0xff]  }
 0x2b1   : > { %v7943_v18 = vpop.f32.mrf.mxu1  ;;  %v11761_v21 = vadd.f32 %v7941_v13, %v7901_v17  ;;  %8195 = vmatpush1.bf16.msra.mxu0 %v9864_v10  ;;  %v9945_v10 = vld [vmem:[%s11268_s8 + $0xd90] ss:$8 sps:$4 sm:$0xff]   ;;  %v9953_v12 = vld [vmem:[%s11268_s8 + $0xd84] ss:$8 sps:$4 sm:$0xff]   ;;  %v9948_v13 = vld [vmem:[%s11268_s8 + $0xc80] ss:$8 sps:$4 sm:$0xff]   ;;  %v8674_v62 = vcombine.low %v11740_v2, %v11740_v2 }
 0x2b2   : > { %8236 = vmatpush1.bf16.msra.mxu1 %v9867_v11  ;;  %v7903_v24 = vpop.f32.mrf.mxu0  ;;  %8196 = vmatprep.subr.bf16.mxu0 %v9872_v14  ;;  %v9950_v11 = vld [vmem:[%s11268_s8 + $0xc84] ss:$8 sps:$4 sm:$0xff]   ;;  %v9951_v14 = vld [vmem:[%s11268_s8 + $0xd80] ss:$8 sps:$4 sm:$0xff]   ;;  %v9963_v17 = vld [vmem:[%s11268_s8 + $0xf74] ss:$8 sps:$4 sm:$0xff]   ;;  %v8676_v18 = vcombine.low %v11743_v3, %v11743_v3 }
 0x2b3   : > { %v7944_v27 = vpop.f32.mrf.mxu1  ;;  %8237 = vmatprep.subr.bf16.mxu1 %v9875_v15  ;;  %v9960_v15 = vld [vmem:[%s11268_s8 + $0xe74] ss:$8 sps:$4 sm:$0xff]   ;;  %v9958_v24 = vld [vmem:[%s11268_s8 + $0xe70] ss:$8 sps:$4 sm:$0xff]  }
 0x2b4   : > { %v9961_v27 = vld [vmem:[%s11268_s8 + $0xf70] ss:$8 sps:$4 sm:$0xff]  }
 0x2b5   : > { %8197 = vmatpush1.bf16.msra.mxu0 %v9870_v22  ;;  %v11824_v22 = vld [vmem:[%s11246_s9 + $0x70] sm:$0xff] }
 0x2b6   : > { %8238 = vmatpush1.bf16.msra.mxu1 %v9873_v23  ;;  %8198 = vmatprep.subr.bf16.mxu0 %v9878_v1  ;;  %v11827_v23 = vld [vmem:[%s11246_s9 + $0x78] sm:$0xff]  ;;  %v8679_v2 = vcombine.high %v11824_v22, %v11824_v22 }
 0x2b7   : > { %8239 = vmatprep.subr.bf16.mxu1 %v9881_v28  ;;  %v9966_v1 = vld [vmem:[%s11268_s8 + $0xe64] ss:$8 sps:$4 sm:$0xff]   ;;  %v8681_v3 = vcombine.high %v11827_v23, %v11827_v23 }
 0x2b8   : > { %v9969_v28 = vld [vmem:[%s11268_s8 + $0xf64] ss:$8 sps:$4 sm:$0xff]  }
 0x2b9   : > { %8199 = vmatpush1.bf16.msra.mxu0 %v9876_v20 }
 0x2ba   : > { %8240 = vmatpush1.bf16.msra.mxu1 %v9879_v29  ;;  %8200 = vmatprep.subr.bf16.mxu0 %v9884_v31 }
 0x2bb   : > { %8241 = vmatprep.subr.bf16.mxu1 %v9887_v32  ;;  %v9964_v32 = vld [vmem:[%s11268_s8 + $0xe60] ss:$8 sps:$4 sm:$0xff]  }
 0x2bd   : > { %8201 = vmatpush1.bf16.msra.mxu0 %v9882_v33  ;;  %v9967_v33 = vld [vmem:[%s11268_s8 + $0xf60] ss:$8 sps:$4 sm:$0xff]  }
 0x2be   : > { %8242 = vmatpush1.bf16.msra.mxu1 %v9885_v34  ;;  %8202 = vmatprep.subr.bf16.mxu0 %v9890_v35 }
 0x2bf   : > { %8243 = vmatprep.subr.bf16.mxu1 %v9893_v25  ;;  %v9972_v25 = vld [vmem:[%s11268_s8 + $0xe54] ss:$8 sps:$4 sm:$0xff]  }
 0x2c1   : > { %8203 = vmatpush1.bf16.msra.mxu0 %v9888_v26  ;;  %v9975_v26 = vld [vmem:[%s11268_s8 + $0xf54] ss:$8 sps:$4 sm:$0xff]  }
 0x2c2   : > { %8244 = vmatpush1.bf16.msra.mxu1 %v9891_v36  ;;  %8204 = vmatprep.subr.bf16.mxu0 %v9896_v37 }
 0x2c3   : > { %8245 = vmatprep.subr.bf16.mxu1 %v9899_v38 }
 0x2c5   : > { %8205 = vmatpush1.bf16.msra.mxu0 %v9894_v40 }
 0x2c6   : > { %8246 = vmatpush1.bf16.msra.mxu1 %v9897_v41  ;;  %8206 = vmatprep.subr.bf16.mxu0 %v9902_v42  ;;  %v9970_v41 = vld [vmem:[%s11268_s8 + $0xe50] ss:$8 sps:$4 sm:$0xff]  }
 0x2c7   : > { %8247 = vmatprep.subr.bf16.mxu1 %v9905_v43  ;;  %v9973_v42 = vld [vmem:[%s11268_s8 + $0xf50] ss:$8 sps:$4 sm:$0xff]  }
 0x2c9   : > { %8207 = vmatpush1.bf16.msra.mxu0 %v9900_v45 }
 0x2ca   : > { %8248 = vmatpush1.bf16.msra.mxu1 %v9903_v46  ;;  %8208 = vmatprep.subr.bf16.mxu0 %v9908_v47  ;;  %v9981_v46 = vld [vmem:[%s11268_s8 + $0xf44] ss:$8 sps:$4 sm:$0xff]   ;;  %v9976_v47 = vld [vmem:[%s11268_s8 + $0xe40] ss:$8 sps:$4 sm:$0xff]  }
 0x2cb   : > { %8249 = vmatprep.subr.bf16.mxu1 %v9911_v48  ;;  %v9979_v48 = vld [vmem:[%s11268_s8 + $0xf40] ss:$8 sps:$4 sm:$0xff]  }
 0x2cd   : > { %8209 = vmatpush2.bf16.msra.mxu0 %v9906_v51  ;;  %v9984_v51 = vld [vmem:[%s11268_s8 + $0xe34] ss:$8 sps:$4 sm:$0xff]  }
 0x2ce   : > { %8250 = vmatpush2.bf16.msra.mxu1 %v9909_v52  ;;  %8210 = vmatprep.subr.bf16.mxu0 %v9914_v53  ;;  %v9987_v52 = vld [vmem:[%s11268_s8 + $0xf34] ss:$8 sps:$4 sm:$0xff]   ;;  %v9982_v53 = vld [vmem:[%s11268_s8 + $0xe30] ss:$8 sps:$4 sm:$0xff]  }
 0x2cf   : > { %8251 = vmatprep.subr.bf16.mxu1 %v9917_v54  ;;  %v9985_v54 = vld [vmem:[%s11268_s8 + $0xf30] ss:$8 sps:$4 sm:$0xff]  }
 0x2d1   : > { %8211 = vmatpush2.bf16.msra.mxu0 %v9912_v19  ;;  %v9990_v19 = vld [vmem:[%s11268_s8 + $0xe24] ss:$8 sps:$4 sm:$0xff]  }
 0x2d2   : > { %8252 = vmatpush2.bf16.msra.mxu1 %v9915_v30  ;;  %8212 = vmatprep.subr.bf16.mxu0 %v9920_v55  ;;  %v9993_v30 = vld [vmem:[%s11268_s8 + $0xf24] ss:$8 sps:$4 sm:$0xff]   ;;  %v9988_v55 = vld [vmem:[%s11268_s8 + $0xe20] ss:$8 sps:$4 sm:$0xff]  }
 0x2d3   : > { %8253 = vmatprep.subr.bf16.mxu1 %v9923_v56  ;;  %v9991_v56 = vld [vmem:[%s11268_s8 + $0xf20] ss:$8 sps:$4 sm:$0xff]  }
 0x2d5   : > { %8213 = vmatpush2.bf16.msra.mxu0 %v9918_v57  ;;  %v9996_v57 = vld [vmem:[%s11268_s8 + $0xe14] ss:$8 sps:$4 sm:$0xff]  }
 0x2d6   : > { %8254 = vmatpush2.bf16.msra.mxu1 %v9921_v58  ;;  %8214 = vmatprep.subr.bf16.mxu0 %v9926_v59  ;;  %v9999_v58 = vld [vmem:[%s11268_s8 + $0xf14] ss:$8 sps:$4 sm:$0xff]   ;;  %v9994_v59 = vld [vmem:[%s11268_s8 + $0xe10] ss:$8 sps:$4 sm:$0xff]  }
 0x2d7   : > { %8255 = vmatprep.subr.bf16.mxu1 %v9929_v60  ;;  %v9997_v60 = vld [vmem:[%s11268_s8 + $0xf10] ss:$8 sps:$4 sm:$0xff]  }
 0x2d9   : > { %8215 = vmatpush2.bf16.msra.mxu0 %v9924_v61  ;;  %v10002_v61 = vld [vmem:[%s11268_s8 + $0xe04] ss:$8 sps:$4 sm:$0xff]  }
 0x2da   : > { %8256 = vmatpush2.bf16.msra.mxu1 %v9927_v63  ;;  %8216 = vmatprep.subr.bf16.mxu0 %v9932_v39  ;;  %v10005_v63 = vld [vmem:[%s11268_s8 + $0xf04] ss:$8 sps:$4 sm:$0xff]   ;;  %v10000_v39 = vld [vmem:[%s11268_s8 + $0xe00] ss:$8 sps:$4 sm:$0xff]  }
 0x2db   : > { %8257 = vmatprep.subr.bf16.mxu1 %v9935_v0  ;;  %v10003_v0 = vld [vmem:[%s11268_s8 + $0xf00] ss:$8 sps:$4 sm:$0xff]  }
 0x2dd   : > { %8217 = vmatpush2.bf16.msra.mxu0 %v9930_v4  ;;  %v10008_v4 = vld [vmem:[%s11268_s8 + $0xef4] ss:$8 sps:$4 sm:$0xff]  }
 0x2de   : > { %8258 = vmatpush2.bf16.msra.mxu1 %v9933_v5  ;;  %8218 = vmatprep.subr.bf16.mxu0 %v9938_v44  ;;  %v10011_v5 = vld [vmem:[%s11268_s8 + $0xff4] ss:$8 sps:$4 sm:$0xff]   ;;  %v10006_v44 = vld [vmem:[%s11268_s8 + $0xef0] ss:$8 sps:$4 sm:$0xff]  }
 0x2df   : > { %8259 = vmatprep.subr.bf16.mxu1 %v9941_v6  ;;  %v10009_v6 = vld [vmem:[%s11268_s8 + $0xff0] ss:$8 sps:$4 sm:$0xff]  }
 0x2e1   : > { %8219 = vmatpush2.bf16.msra.mxu0 %v9936_v49  ;;  %v10014_v49 = vld [vmem:[%s11268_s8 + $0xee4] ss:$8 sps:$4 sm:$0xff]  }
 0x2e2   : > { %8260 = vmatpush2.bf16.msra.mxu1 %v9939_v50  ;;  %8220 = vmatprep.subr.bf16.mxu0 %v9944_v7  ;;  %v10017_v50 = vld [vmem:[%s11268_s8 + $0xfe4] ss:$8 sps:$4 sm:$0xff]   ;;  %v10012_v7 = vld [vmem:[%s11268_s8 + $0xee0] ss:$8 sps:$4 sm:$0xff]  }
 0x2e3   : > { %8261 = vmatprep.subr.bf16.mxu1 %v9947_v8  ;;  %v10015_v8 = vld [vmem:[%s11268_s8 + $0xfe0] ss:$8 sps:$4 sm:$0xff]  }
 0x2e5   : > { %8221 = vmatpush2.bf16.msra.mxu0 %v9942_v9  ;;  %v10020_v9 = vld [vmem:[%s11268_s8 + $0xed4] ss:$8 sps:$4 sm:$0xff]  }
 0x2e6   : > { %8262 = vmatpush2.bf16.msra.mxu1 %v9945_v10  ;;  %8222 = vmatprep.subr.bf16.mxu0 %v9950_v11  ;;  %v10023_v10 = vld [vmem:[%s11268_s8 + $0xfd4] ss:$8 sps:$4 sm:$0xff]   ;;  %v10018_v11 = vld [vmem:[%s11268_s8 + $0xed0] ss:$8 sps:$4 sm:$0xff]  }
 0x2e7   : > { %8263 = vmatprep.subr.bf16.mxu1 %v9953_v12  ;;  %v10021_v12 = vld [vmem:[%s11268_s8 + $0xfd0] ss:$8 sps:$4 sm:$0xff]  }
 0x2e9   : > { %8223 = vmatpush2.bf16.msra.mxu0 %v9948_v13  ;;  %v10026_v13 = vld [vmem:[%s11268_s8 + $0xec4] ss:$8 sps:$4 sm:$0xff]  }
 0x2ea   : > { %8264 = vmatpush2.bf16.msra.mxu1 %v9951_v14  ;;  %8274 = vmatprep.subr.bf16.mxu0 %v9960_v15  ;;  %v10029_v14 = vld [vmem:[%s11268_s8 + $0xfc4] ss:$8 sps:$4 sm:$0xff]   ;;  %v10024_v15 = vld [vmem:[%s11268_s8 + $0xec0] ss:$8 sps:$4 sm:$0xff]  }
 0x2eb   : > { %8315 = vmatprep.subr.bf16.mxu1 %v9963_v17  ;;  %v10027_v17 = vld [vmem:[%s11268_s8 + $0xfc0] ss:$8 sps:$4 sm:$0xff]  }
 0x2ec   : > { %v7980_v20 = vpop.f32.mrf.mxu0  ;;  %8225 = vmatmul.mubr.bf16.vlgmr.msra.gmra.mxu0 %v8674_v62  ;;  %v10032_v62 = vld [vmem:[%s11268_s8 + $0xeb4] ss:$8 sps:$4 sm:$0xff]  }
 0x2ed   : > { %v8021_v29 = vpop.f32.mrf.mxu1  ;;  %8266 = vmatmul.mubr.bf16.vlgmr.msra.gmra.mxu1 %v8676_v18  ;;  %v7981_v31 = vadd.f32 %v7980_v20, %v11758_v16  ;;  %8275 = vmatpush1.bf16.msra.mxu0 %v9958_v24  ;;  %v10035_v18 = vld [vmem:[%s11268_s8 + $0xfb4] ss:$8 sps:$4 sm:$0xff]   ;;  %v10030_v24 = vld [vmem:[%s11268_s8 + $0xeb0] ss:$8 sps:$4 sm:$0xff]  }
 0x2ee   : > { %8316 = vmatpush1.bf16.msra.mxu1 %v9961_v27  ;;  %v7982_v34 = vpop.f32.mrf.mxu0  ;;  %8276 = vmatprep.subr.bf16.mxu0 %v9966_v1  ;;  %v10033_v27 = vld [vmem:[%s11268_s8 + $0xfb0] ss:$8 sps:$4 sm:$0xff]   ;;  %v10038_v1 = vld [vmem:[%s11268_s8 + $0xea4] ss:$8 sps:$4 sm:$0xff]   ;;  %v10044_v20 = vld [vmem:[%s11268_s8 + $0xe94] ss:$8 sps:$4 sm:$0xff]  }
 0x2ef   : > { %v8023_v35 = vpop.f32.mrf.mxu1  ;;  %8317 = vmatprep.subr.bf16.mxu1 %v9969_v28  ;;  %v11842_v36 = vadd.f32 %v8021_v29, %v7981_v31  ;;  %v7983_v37 = vadd.f32 %v7982_v34, %v11761_v21  ;;  %8306 = vmatprep.mubr.bf16.mxu0 %v8679_v2  ;;  %v9978_v21 = vld [vmem:[%s11268_s8 + $0xe44] ss:$8 sps:$4 sm:$0xff]   ;;  %v10036_v2 = vld [vmem:[%s11268_s8 + $0xea0] ss:$8 sps:$4 sm:$0xff]   ;;  %v10047_v29 = vld [vmem:[%s11268_s8 + $0xf94] ss:$8 sps:$4 sm:$0xff]  }
 0x2f0   : > { %8347 = vmatprep.mubr.bf16.mxu1 %v8681_v3  ;;  %v7984_v16 = vpop.f32.mrf.mxu0  ;;  %v10041_v28 = vld [vmem:[%s11268_s8 + $0xfa4] ss:$8 sps:$4 sm:$0xff]   ;;  %v10039_v3 = vld [vmem:[%s11268_s8 + $0xfa0] ss:$8 sps:$4 sm:$0xff]   ;;  %v10042_v31 = vld [vmem:[%s11268_s8 + $0xe90] ss:$8 sps:$4 sm:$0xff]  }
 0x2f1   : > { %v8025_v38 = vpop.f32.mrf.mxu1  ;;  %v11845_v40 = vadd.f32 %v8023_v35, %v7983_v37  ;;  %8277 = vmatpush1.bf16.msra.mxu0 %v9964_v32  ;;  %v10045_v32 = vld [vmem:[%s11268_s8 + $0xf90] ss:$8 sps:$4 sm:$0xff]   ;;  %v10053_v34 = vld [vmem:[%s11268_s8 + $0xf84] ss:$8 sps:$4 sm:$0xff]   ;;  %v10048_v35 = vld [vmem:[%s11268_s8 + $0xe80] ss:$8 sps:$4 sm:$0xff]   ;;  %v8680_v37 = vcombine.low %v11827_v23, %v11827_v23 }
 0x2f2   : > { %8318 = vmatpush1.bf16.msra.mxu1 %v9967_v33  ;;  %v7985_v43 = vpop.f32.mrf.mxu0  ;;  %8278 = vmatprep.subr.bf16.mxu0 %v9972_v25  ;;  %v10050_v33 = vld [vmem:[%s11268_s8 + $0xe84] ss:$8 sps:$4 sm:$0xff]   ;;  %v10051_v25 = vld [vmem:[%s11268_s8 + $0xf80] ss:$8 sps:$4 sm:$0xff]  }
 0x2f3   : > { %v8026_v45 = vpop.f32.mrf.mxu1  ;;  %8319 = vmatprep.subr.bf16.mxu1 %v9975_v26  ;;  %v8678_v26 = vcombine.low %v11824_v22, %v11824_v22 }
 0x2f5   : > { %8279 = vmatpush1.bf16.msra.mxu0 %v9970_v41 }
 0x2f6   : > { %8320 = vmatpush1.bf16.msra.mxu1 %v9973_v42  ;;  %8280 = vmatprep.subr.bf16.mxu0 %v9978_v21 }
 0x2f7   : > { %8321 = vmatprep.subr.bf16.mxu1 %v9981_v46 }
 0x2f9   : > { %8281 = vmatpush1.bf16.msra.mxu0 %v9976_v47 }
 0x2fa   : > { %8322 = vmatpush1.bf16.msra.mxu1 %v9979_v48  ;;  %8282 = vmatprep.subr.bf16.mxu0 %v9984_v51 }
 0x2fb   : > { %8323 = vmatprep.subr.bf16.mxu1 %v9987_v52 }
 0x2fd   : > { %8283 = vmatpush1.bf16.msra.mxu0 %v9982_v53 }
 0x2fe   : > { %8324 = vmatpush1.bf16.msra.mxu1 %v9985_v54  ;;  %8284 = vmatprep.subr.bf16.mxu0 %v9990_v19 }
 0x2ff   : > { %8325 = vmatprep.subr.bf16.mxu1 %v9993_v30 }
 0x301   : > { %8285 = vmatpush1.bf16.msra.mxu0 %v9988_v55 }
 0x302   : > { %8326 = vmatpush1.bf16.msra.mxu1 %v9991_v56  ;;  %8286 = vmatprep.subr.bf16.mxu0 %v9996_v57 }
 0x303   : > { %8327 = vmatprep.subr.bf16.mxu1 %v9999_v58 }
 0x305   : > { %8287 = vmatpush1.bf16.msra.mxu0 %v9994_v59 }
 0x306   : > { %8328 = vmatpush1.bf16.msra.mxu1 %v9997_v60  ;;  %8288 = vmatprep.subr.bf16.mxu0 %v10002_v61 }
 0x307   : > { %8329 = vmatprep.subr.bf16.mxu1 %v10005_v63 }
 0x309   : > { %8289 = vmatpush1.bf16.msra.mxu0 %v10000_v39 }
 0x30a   : > { %8330 = vmatpush1.bf16.msra.mxu1 %v10003_v0  ;;  %8290 = vmatprep.subr.bf16.mxu0 %v10008_v4 }
 0x30b   : > { %8331 = vmatprep.subr.bf16.mxu1 %v10011_v5 }
 0x30d   : > { %8291 = vmatpush2.bf16.msra.mxu0 %v10006_v44 }
 0x30e   : > { %8332 = vmatpush2.bf16.msra.mxu1 %v10009_v6  ;;  %8292 = vmatprep.subr.bf16.mxu0 %v10014_v49 }
 0x30f   : > { %8333 = vmatprep.subr.bf16.mxu1 %v10017_v50 }
 0x311   : > { %8293 = vmatpush2.bf16.msra.mxu0 %v10012_v7 }
 0x312   : > { %8334 = vmatpush2.bf16.msra.mxu1 %v10015_v8  ;;  %8294 = vmatprep.subr.bf16.mxu0 %v10020_v9 }
 0x313   : > { %8335 = vmatprep.subr.bf16.mxu1 %v10023_v10  ;;  %v4498_v10 = vld [vmem:[#allocation2] sm:$0xff] }
 0x315   : > { %8295 = vmatpush2.bf16.msra.mxu0 %v10018_v11 }
 0x316   : > { %8336 = vmatpush2.bf16.msra.mxu1 %v10021_v12  ;;  %8296 = vmatprep.subr.bf16.mxu0 %v10026_v13 }
 0x317   : > { %8337 = vmatprep.subr.bf16.mxu1 %v10029_v14 }
 0x319   : > { %8297 = vmatpush2.bf16.msra.mxu0 %v10024_v15  ;;  %v4499_v15 = vld [vmem:[#allocation2 + $0x8] sm:$0xff] }
 0x31a   : > { %8338 = vmatpush2.bf16.msra.mxu1 %v10027_v17  ;;  %8298 = vmatprep.subr.bf16.mxu0 %v10032_v62 }
 0x31b   : > { %8339 = vmatprep.subr.bf16.mxu1 %v10035_v18 }
 0x31d   : > { %8299 = vmatpush2.bf16.msra.mxu0 %v10030_v24 }
 0x31e   : > { %8340 = vmatpush2.bf16.msra.mxu1 %v10033_v27  ;;  %8300 = vmatprep.subr.bf16.mxu0 %v10038_v1 }
 0x31f   : > { %8341 = vmatprep.subr.bf16.mxu1 %v10041_v28 }
 0x321   : > { %8301 = vmatpush2.bf16.msra.mxu0 %v10036_v2 }
 0x322   : > { %8342 = vmatpush2.bf16.msra.mxu1 %v10039_v3  ;;  %8302 = vmatprep.subr.bf16.mxu0 %v10044_v20 }
 0x323   : > { %8343 = vmatprep.subr.bf16.mxu1 %v10047_v29 }
 0x325   : > { %8303 = vmatpush2.bf16.msra.mxu0 %v10042_v31 }
 0x326   : > { %8344 = vmatpush2.bf16.msra.mxu1 %v10045_v32  ;;  %8304 = vmatprep.subr.bf16.mxu0 %v10050_v33 }
 0x327   : > { %8345 = vmatprep.subr.bf16.mxu1 %v10053_v34 }
 0x329   : > { %8305 = vmatpush2.bf16.msra.mxu0 %v10048_v35 }
 0x32a   : > { %8346 = vmatpush2.bf16.msra.mxu1 %v10051_v25 }
 0x32c   : > { %v8062_v16 = vpop.f32.mrf.mxu0  ;;  %8307 = vmatmul.mubr.bf16.vlgmr.msra.gmra.mxu0 %v8678_v26 }
 0x32d   : > { %v8103_v38 = vpop.f32.mrf.mxu1  ;;  %8348 = vmatmul.mubr.bf16.vlgmr.msra.gmra.mxu1 %v8680_v37  ;;  %v8063_v41 = vadd.f32 %v8062_v16, %v11842_v36 }
 0x32e   : > { %v8064_v42 = vpop.f32.mrf.mxu0 }
 0x32f   : > { %v8105_v43 = vpop.f32.mrf.mxu1  ;;  %v8104_v45 = vadd.f32 %v8103_v38, %v8063_v41  ;;  %v8065_v21 = vadd.f32 %v8064_v42, %v11845_v40 }
 0x330   : > { %v8066_v46 = vpop.f32.mrf.mxu0 }
 0x331   : > { %v8107_v47 = vpop.f32.mrf.mxu1  ;;  %v8106_v48 = vadd.f32 %v8105_v43, %v8065_v21 }
 0x332   : > { %v8067_v22 = vpop.f32.mrf.mxu0 }
 0x333   : > { %v8108_v51 = vpop.f32.mrf.mxu1 }
 0x36c   : > { %v8144_v52 = vpop.f32.mrf.mxu0 }
 0x36d   : > { %v8185_v23 = vpop.f32.mrf.mxu1  ;;  %v8145_v53 = vadd.f32 %v8144_v52, %v8104_v45 }
 0x36e   : > { %v8146_v54 = vpop.f32.mrf.mxu0 }
 0x36f   : > { %v8187_v19 = vpop.f32.mrf.mxu1  ;;  %v8186_v30 = vadd.f32 %v8185_v23, %v8145_v53  ;;  %v8147_v55 = vadd.f32 %v8146_v54, %v8106_v48 }
 0x370   : > { %v8148_v56 = vpop.f32.mrf.mxu0 }
 0x371   : > { %v8189_v57 = vpop.f32.mrf.mxu1  ;;  %v8188_v36 = vadd.f32 %v8187_v19, %v8147_v55 }
 0x372   : > { %v8149_v58 = vpop.f32.mrf.mxu0 }
 0x373   : > { %v8190_v59 = vpop.f32.mrf.mxu1 }
 0x3ac   : > { %v8226_v60 = vpop.f32.mrf.mxu0 }
 0x3ad   : > { %v8267_v61 = vpop.f32.mrf.mxu1  ;;  %v8227_v44 = vadd.f32 %v8226_v60, %v8186_v30 }
 0x3ae   : > { %v8228_v40 = vpop.f32.mrf.mxu0 }
 0x3af   : > { %v8269_v63 = vpop.f32.mrf.mxu1  ;;  %v8229_v6 = vadd.f32 %v8228_v40, %v8188_v36  ;;  %v8268_v49 = vadd.f32 %v8267_v61, %v8227_v44 }
 0x3b0   : > { %v8230_v39 = vpop.f32.mrf.mxu0 }
 0x3b1   : > { %v8271_v0 = vpop.f32.mrf.mxu1  ;;  %v8270_v8 = vadd.f32 %v8269_v63, %v8229_v6 }
 0x3b2   : > { %v8231_v4 = vpop.f32.mrf.mxu0 }
 0x3b3   : > { %v8272_v5 = vpop.f32.mrf.mxu1 }
 0x3ec   : > { %v8308_v50 = vpop.f32.mrf.mxu0 }
 0x3ed   : > { %v8349_v7 = vpop.f32.mrf.mxu1  ;;  %v8309_v9 = vadd.f32 %v8308_v50, %v8268_v49 }
 0x3ee   : > { %v8310_v11 = vpop.f32.mrf.mxu0 }
 0x3ef   : > { %v8351_v12 = vpop.f32.mrf.mxu1  ;;  %v8350_v13 = vadd.f32 %v8349_v7, %v8309_v9  ;;  %v8311_v14 = vadd.f32 %v8310_v11, %v8270_v8 }
 0x3f0   : > { %v8312_v17 = vpop.f32.mrf.mxu0 }
 0x3f1   : > { %v8353_v62 = vpop.f32.mrf.mxu1  ;;  %v8356_v18 = vadd.f32 %v8350_v13, %v4498_v10  ;;  %v8352_v24 = vadd.f32 %v8351_v12, %v8311_v14  ;;  %8363 = sbr.rel (%p9194_p13) target bundleno = 1105 (0x451), region = 100 }
 0x3f2   : > { %v8313_v27 = vpop.f32.mrf.mxu0 }
 0x3f3   : > { %v8354_v1 = vpop.f32.mrf.mxu1  ;;  %8358 = vst [vmem:[#allocation2] sm:$0xff] %v8356_v18  ;;  %v8357_v28 = vadd.f32 %v8352_v24, %v4499_v15 }
 0x3f5   : > { %8359 = vst [vmem:[#allocation2 + $0x8] sm:$0xff] %v8357_v28 }
 0x3f6   : > { %v8368_v2 = vlaneseq  ;;  %v8366_v20 = vld [vmem:[%s4474_s18] sm:$0x3]  ;;  %v10119_v8 = vmov 1966171168  }
 0x3f7   : > { %v8428_v9 = vunpack.c.l.s4 %v10119_v8  ;;  %v8419_v17 = vld [vmem:[%s4479_s13] sm:$0x3] }
 0x3f8   : > { %v8369_v3 = vshrl.u32 %v8368_v2, 7 }
 0x3f9   : > { %v8429_v10 = vunpack.c.0.s8 %v8428_v9 }
 0x3fa   : > { %v11913_v29 = vsub.s32 0, %v8369_v3  ;;  %v11915_v31 = vsub.s32 1, %v8369_v3  ;;  %v8364_v32 = vld [vmem:[#allocation2] sm:$0xff]  ;;  %vm8382_vm0 = vcmp.lt.s32.totalorder %v8369_v3, 2 }
 0x3fb   : > { %v8432_v12 = vsub.s32 %v8429_v10, %v8369_v3  ;;  %v8443_v3 = vld [vmem:[%s4484_s16] sm:$0x3] }
 0x3fc   : > { %v8365_v33 = vld [vmem:[#allocation2 + $0x8] sm:$0xff]  ;;  %v8371_v34 = vrot.slane %v8366_v20, %v11913_v29  ;;  %v8375_v35 = vrot.slane %v8366_v20, %v11915_v31 }
 0x3fe   : > { %v8378_v25 = vadd.f32 %v8371_v34, %v8364_v32  ;;  %v8379_v26 = vadd.f32 %v8375_v35, %v8365_v33 }
 0x400   : > { %v8383_v37 = vsel %vm8382_vm0, %v8378_v25, 0.0  ;;  %v8384_v16 = vsel %vm8382_vm0, %v8379_v26, 0.0 }
 0x401   : > { %v8385_v38 = vrot.slane %v8383_v37, 4  ;;  %v8391_v41 = vrot.slane %v8384_v16, 4 }
 0x403   : > { %v8386_v42 = vadd.f32 %v8385_v38, %v8383_v37  ;;  %v8392_v43 = vadd.f32 %v8391_v41, %v8384_v16 }
 0x405   : > { %v8387_v45 = vrot.slane %v8386_v42, 2  ;;  %v8393_v21 = vrot.slane %v8392_v43, 2 }
 0x407   : > { %v8388_v46 = vadd.f32 %v8387_v45, %v8386_v42  ;;  %v8394_v47 = vadd.f32 %v8393_v21, %v8392_v43 }
 0x409   : > { %v8389_v48 = vrot.slane %v8388_v46, 1  ;;  %v8395_v22 = vrot.slane %v8394_v47, 1 }
 0x40b   : > { %v8390_v51 = vadd.f32 %v8389_v48, %v8388_v46  ;;  %v8396_v52 = vadd.f32 %v8395_v22, %v8394_v47 }
 0x40d   : > { %v8397_v23 = vmul.f32 0.5, %v8390_v51  ;;  %v8398_v53 = vmul.f32 0.5, %v8396_v52 }
 0x40f   : > { %v8399_v54 = vsub.f32 %v8378_v25, %v8397_v23  ;;  %v8400_v19 = vsub.f32 %v8379_v26, %v8398_v53 }
 0x411   : > { %v8401_v30 = vsel %vm8382_vm0, %v8399_v54, 0.0  ;;  %v8402_v55 = vsel %vm8382_vm0, %v8400_v19, 0.0 }
 0x412   : > { %v8403_v56 = vmul.f32 %v8401_v30, %v8401_v30  ;;  %v8404_v57 = vmul.f32 %v8402_v55, %v8402_v55 }
 0x414   : > { %v8405_v36 = vrot.slane %v8403_v56, 4  ;;  %v8411_v58 = vrot.slane %v8404_v57, 4 }
 0x416   : > { %v8406_v59 = vadd.f32 %v8405_v36, %v8403_v56  ;;  %v8412_v60 = vadd.f32 %v8411_v58, %v8404_v57 }
 0x418   : > { %v8407_v61 = vrot.slane %v8406_v59, 2  ;;  %v8413_v40 = vrot.slane %v8412_v60, 2 }
 0x41a   : > { %v8408_v63 = vadd.f32 %v8407_v61, %v8406_v59  ;;  %v8414_v39 = vadd.f32 %v8413_v40, %v8412_v60 }
 0x41c   : > { %v8409_v0 = vrot.slane %v8408_v63, 1  ;;  %v8415_v4 = vrot.slane %v8414_v39, 1 }
 0x41e   : > { %v8410_v5 = vadd.f32 %v8409_v0, %v8408_v63  ;;  %v8416_v44 = vadd.f32 %v8415_v4, %v8414_v39 }
 0x420   : > { %v8417_v6 = vmul.f32 0.5, %v8410_v5  ;;  %v8418_v49 = vmul.f32 0.5, %v8416_v44 }
 0x422   : > { %v8420_v50 = vadd.f32 1e-05, %v8417_v6  ;;  %v8421_v7 = vadd.f32 1e-05, %v8418_v49 }
 0x424   : > { %10058 = vrsqrt.f32 %v8420_v50 }
 0x425   : > { %10060 = vrsqrt.f32 %v8421_v7 }
 0x431   : > { %v10059_v11 = vpop.eup %10058 }
 0x432   : > { %v10061_v13 = vpop.eup %10060 }
 0x433   : > { %v8426_v14 = vcombine.low %v10059_v11, %v10061_v13 }
 0x435   : > { %v8433_v15 = vrot.slane %v8426_v14, %v8432_v12 }
 0x437   : > { %v8440_v62 = vrot.slane %v8433_v15, %v8432_v12 }
 0x439   : > { %v8442_v18 = vmul.f32 %v8440_v62, %v8419_v17 }
 0x43b   : > { %v8448_v24 = vrot.slane %v8442_v18, %v11913_v29  ;;  %v8452_v27 = vrot.slane %v8442_v18, %v11915_v31 }
 0x43d   : > { %v8455_v1 = vmul.f32 %v8448_v24, %v8397_v23  ;;  %v8456_v28 = vmul.f32 %v8452_v27, %v8398_v53  ;;  %v8476_v34 = vmul.f32 %v8448_v24, %v8378_v25  ;;  %v8477_v35 = vmul.f32 %v8452_v27, %v8379_v26 }
 0x43f   : > { %v8459_v2 = vcombine.low %v8455_v1, %v8456_v28 }
 0x441   : > { %v8466_v20 = vrot.slane %v8459_v2, %v8432_v12 }
 0x443   : > { %v8473_v32 = vrot.slane %v8466_v20, %v8432_v12 }
 0x445   : > { %v8475_v33 = vsub.f32 %v8443_v3, %v8473_v32 }
 0x447   : > { %v8482_v37 = vrot.slane %v8475_v33, %v11913_v29  ;;  %v8486_v16 = vrot.slane %v8475_v33, %v11915_v31 }
 0x449   : > { %v8489_v38 = vadd.f32 %v8482_v37, %v8476_v34  ;;  %v8490_v41 = vadd.f32 %v8486_v16, %v8477_v35 }
 0x44b   : > { %vm8491_vm1 = vcmp.gt.f32.partialorder %v8489_v38, 0.0  ;;  %vm8492_vm2 = vcmp.gt.f32.partialorder %v8490_v41, 0.0  ;;  %v8493_v42 = vmul.f32 0.2, %v8489_v38  ;;  %v8494_v43 = vmul.f32 0.2, %v8490_v41 }
 0x44d   : > { %v8495_v45 = vsel %vm8491_vm1, %v8489_v38, %v8493_v42  ;;  %v8496_v21 = vsel %vm8492_vm2, %v8490_v41, %v8494_v43 }
 0x44e   : > { %v9199_v46 = vpack.c.bf16 %v8496_v21, %v8495_v45 }
 0x450   : > { %8505 = vst [vmem:[%s11266_s7] sm:$0xff] %v9199_v46 }
 0x451 PF: > { %s15_s24 = sadd.s32 1, %s10116_s24   ;;  %s11965_s18 = smov %s10096_s19 }
 0x452   : > { %p12_p0 = scmp.ge.s32.totalorder %s15_s24, 10   ;;  %s11966_s19 = smov %s10201_s6 }
 0x453   : > { %s11967_s20 = smov %s10108_s22  ;;  %s11968_s21 = smov %s10112_s23 }
 0x454   : > { %s11969_s22 = smov %s11972_s25  ;;  %s11970_s23 = smov %s11976_s26 }
 0x455   :  { %14 = sbr.rel (!%p12_p0) target bundleno = 4 (0x4), region = 153 }

</bundles_post_ra>
